<compile_context>
chip_gen: v7x
topology: tpu7x:2x2x1
jax: 0.10.0
libtpu: 0.0.40
codegen_flags: <defaults>
</compile_context>

<pallas_src>
import functools
import math

import jax
import jax.numpy as jnp
from jax import lax
from jax.experimental import pallas as pl
from jax.experimental.pallas import tpu as pltpu


def _round_up(x, m):
    return (x + m - 1) // m * m


# ----------------------------------------------------------------------------
# Fused kernel: stem conv + BN + SiLU -> depthwise conv + BN + SiLU ->
#               pointwise conv + BN -> sigmoid.  One grid step == B_blk images.
# ----------------------------------------------------------------------------
def _fused_backbone_kernel(
    x_ref,            # (B, hp, wp, 4*cin) bf16 : stride-2 phases merged into lanes
    w_stem_ref,       # (9*cin, c1)        bf16 : stem conv as ONE K=27 operand
    ss_ref, sb_ref,   # (1, c1)            f32  : folded stem BN
    w_dw_ref,         # (9, 1, c1, 1)      f32  : depthwise weight per tap
    ds_ref, db_ref,   # (1, c1, 1)         f32  : folded depthwise BN
    w_pw_ref,         # (c1, c_out)        bf16 : pointwise projection (no lane pad)
    ps_ref, pb_ref,   # (1, c_out)         f32  : folded pointwise BN
    out_ref,          # (B, ho*wo//pack, pack*c_out) f32 : packed output
    col_ref,          # scratch (B, ho, wo, 9*cin) bf16  : stem im2col operand
    pad_ref,          # scratch (B, ho+2, c1, wo+2) f32  : depthwise halo, lanes=wo
    *, ho, wo, cin, c1, c_out, pack,
):
    f32 = jnp.float32
    B = x_ref.shape[0]
    hw = ho * wo
    wchunk = wo // pack

    # ---------------- stage 1: stem 3x3 stride-2 conv -> ONE K=27 MXU matmul -----
    # Tap (dy, dx): spatial offset (dy//2, dx//2) in the phase grid, lane offset
    # (2*(dy%2) + dx%2)*cin in the phase-merged channel axis.  All slices are
    # contiguous; the 9 taps are packed side by side into the im2col scratch so a
    # single jnp.dot replaces 9 K=3 matmuls + 9 f32 full-array adds.
    t = 0
    for dy in range(3):
        for dx in range(3):
            off = (2 * (dy % 2) + (dx % 2)) * cin
            col_ref[:, :, :, t * cin:(t + 1) * cin] = x_ref[
                :, dy // 2:dy // 2 + ho, dx // 2:dx // 2 + wo, off:off + cin]
            t += 1
    a = col_ref[...].reshape(B * hw, 9 * cin)
    y = jnp.dot(a, w_stem_ref[...], preferred_element_type=f32)      # (B*hw, c1)
    y = y * ss_ref[...] + sb_ref[...]
    y = y * jax.nn.sigmoid(y)                                         # SiLU (f32)

    # ------------- stage 1 -> 2 handoff: lane-dense (B, ho, c1, wo) halo ---------
    # Zero only the 1-pixel border strips (not the whole scratch); per step, so the
    # grid stays "parallel"-safe on megacore.  Interior is fully overwritten below.
    pad_ref[:, 0:1, :, :] = jnp.zeros((B, 1, c1, wo + 2), f32)
    pad_ref[:, ho + 1:ho + 2, :, :] = jnp.zeros((B, 1, c1, wo + 2), f32)
    pad_ref[:, 1:ho + 1, :, 0:1] = jnp.zeros((B, ho, c1, 1), f32)
    pad_ref[:, 1:ho + 1, :, wo + 1:wo + 2] = jnp.zeros((B, ho, c1, 1), f32)
    pad_ref[:, 1:ho + 1, :, 1:wo + 1] = jnp.transpose(
        y.reshape(B, ho, wo, c1), (0, 1, 3, 2))                       # (B,ho,c1,wo)

    # --------------- stage 2: depthwise 3x3 conv (VPU, lanes carry wo) -----------
    dw = pad_ref[:, 0:ho, :, 0:wo] * w_dw_ref[0]          # (1,c1,1) lane-broadcast
    for k in range(1, 9):
        dy, dx = k // 3, k % 3
        dw = dw + pad_ref[:, dy:dy + ho, :, dx:dx + wo] * w_dw_ref[k]
    z = dw * ds_ref[...] + db_ref[...]
    z = z * jax.nn.sigmoid(z)                                         # SiLU

    # ---- stage 3: pointwise 1x1 conv (MXU) + BN + sigmoid on REAL channels only --
    z2 = jnp.transpose(z, (0, 1, 3, 2)).reshape(B * hw, c1)           # pixel-major
    o = jnp.dot(z2.astype(jnp.bfloat16), w_pw_ref[...],
                preferred_element_type=f32)                           # (B*hw, c_out)
    o = o * ps_ref[...] + pb_ref[...]
    o = jax.nn.sigmoid(o)                                 # module's sigmoid head
    # Pack `pack` contiguous width-chunks of each output row side by side on the
    # lane axis: out[b, i*wchunk+s, k*c_out+c] = o[b, i, k*wchunk+s, c].  The output
    # block (and HBM writeback) is `pack`x smaller than a 128-padded channel store,
    # built from contiguous slices + masked lane-strip stores only.
    o4 = o.reshape(B, ho, wo, c_out)
    for k in range(pack):
        out_ref[:, :, k * c_out:(k + 1) * c_out] = o4[
            :, :, k * wchunk:(k + 1) * wchunk, :].reshape(B, ho * wchunk, c_out)


# ----------------------------------------------------------------------------
# Parameter init (deterministic, eval-mode BN folded into scale/bias)
# ----------------------------------------------------------------------------
def _bn_fold(keys, c, eps=1e-5):
    kg, kb, km, kv = keys
    gamma = 0.8 + 0.4 * jax.random.uniform(kg, (c,), jnp.float32)
    beta = 0.1 * jax.random.normal(kb, (c,), jnp.float32)
    mean = 0.1 * jax.random.normal(km, (c,), jnp.float32)
    var = 0.5 + jax.random.uniform(kv, (c,), jnp.float32)
    scale = gamma / jnp.sqrt(var + eps)
    bias = beta - mean * scale
    return scale.reshape(1, c), bias.reshape(1, c)


def init_params(key, c_in=3, c_stem=32, c_out=16):
    ks = jax.random.split(key, 15)
    p = {}
    p["w_stem"] = jax.random.normal(ks[0], (3, 3, c_in, c_stem), jnp.float32) / jnp.sqrt(
        9.0 * c_in)
    p["stem_scale"], p["stem_bias"] = _bn_fold(ks[1:5], c_stem)
    p["w_dw"] = jax.random.normal(ks[5], (3, 3, c_stem), jnp.float32) / 3.0
    p["dw_scale"], p["dw_bias"] = _bn_fold(ks[6:10], c_stem)
    p["w_pw"] = jax.random.normal(ks[10], (c_stem, c_out), jnp.float32) / jnp.sqrt(
        float(c_stem))
    p["pw_scale"], p["pw_bias"] = _bn_fold(ks[11:15], c_out)
    return p


def _pick_batch_block(n, hp, wp, ho, wo, c1, c_out, pack):
    """Largest divisor of n (<= 8) whose per-step VMEM estimate fits a small budget."""
    in_b = hp * _round_up(wp, 16) * 128 * 2 * 2                 # bf16 input, 2 bufs
    col_b = ho * _round_up(wo, 16) * 128 * 2                    # bf16 im2col scratch
    pad_b = (ho + 2) * c1 * _round_up(wo + 2, 128) * 4          # f32 halo scratch
    out_b = (ho * wo // pack) * _round_up(pack * c_out, 128) * 4 * 2
    per_img = in_b + col_b + pad_b + out_b
    b = int(max(1, min(8, (8 * 1024 * 1024) // max(per_img, 1))))
    while n % b:
        b -= 1
    return b


# ----------------------------------------------------------------------------
# Forward pass (== EfficientNetBackbone.forward: features(x) -> sigmoid)
# ----------------------------------------------------------------------------
def efficientnet_backbone_forward(x_nchw, params):
    n, c_in, h, w = x_nchw.shape
    assert h % 2 == 0 and w % 2 == 0
    ho, wo = h // 2, w // 2
    hp, wp = ho + 1, wo + 1
    hw = ho * wo
    c1 = params["w_stem"].shape[-1]
    c_out = params["w_pw"].shape[-1]
    pack = math.gcd(wo, max(1, 128 // c_out))     # pixels packed per output lane-row

    # bf16 FIRST (halves the un-hidden prologue HBM traffic), then NCHW -> NHWC,
    # pad 1, and merge the 4 stride-2 phases with the channels into the lane axis:
    #   x12[b, i, j, (2*(r%2)+(s%2))*cin + c] == x_padded[b, 2i + r%2, 2j + s%2, c]
    x = jnp.transpose(x_nchw.astype(jnp.bfloat16), (0, 2, 3, 1))
    xp = jnp.pad(x, ((0, 0), (1, 1), (1, 1), (0, 0)))
    x12 = xp.reshape(n, hp, 2, wp, 2, c_in).transpose(0, 1, 3, 2, 4, 5)
    x12 = x12.reshape(n, hp, wp, 4 * c_in)

    # MXU weights in bf16; stem weight reshaped to a single K=9*cin operand;
    # depthwise weights / BN pre-shaped for (B, ho, c1, wo) lane-broadcasts;
    # pointwise kept at its real c_out (no 128-lane padding).
    w_stem = params["w_stem"].reshape(9 * c_in, c1).astype(jnp.bfloat16)
    w_dw = params["w_dw"].reshape(9, 1, c1, 1)
    ds = params["dw_scale"].reshape(1, c1, 1)
    db = params["dw_bias"].reshape(1, c1, 1)
    w_pw = params["w_pw"].astype(jnp.bfloat16)

    b_blk = _pick_batch_block(n, hp, wp, ho, wo, c1, c_out, pack)
    rows = hw // pack

    kernel = functools.partial(_fused_backbone_kernel, ho=ho, wo=wo, cin=c_in,
                               c1=c1, c_out=c_out, pack=pack)

    # advisory cost estimate (real c_out, not a padded channel count)
    flops = n * hw * (2 * 9 * c_in * c1 + 2 * 9 * c1 + 2 * c1 * c_out)
    transcendentals = n * hw * (2 * c1 + c_out)
    bytes_accessed = (x12.size * 2 + n * hw * c_out * 4
                      + w_stem.size * 2 + w_pw.size * 2 + w_dw.size * 4
                      + 4 * c1 * 4 + 2 * c_out * 4)

    def full(arr):
        return pl.BlockSpec(arr.shape, lambda i, _nd=arr.ndim: (0,) * _nd)

    out = pl.pallas_call(
        kernel,
        out_shape=jax.ShapeDtypeStruct((n, rows, pack * c_out), jnp.float32),
        grid=(n // b_blk,),
        in_specs=[
            pl.BlockSpec((b_blk, hp, wp, 4 * c_in), lambda i: (i, 0, 0, 0)),
            full(w_stem), full(params["stem_scale"]), full(params["stem_bias"]),
            full(w_dw), full(ds), full(db),
            full(w_pw), full(params["pw_scale"]), full(params["pw_bias"]),
        ],
        out_specs=pl.BlockSpec((b_blk, rows, pack * c_out), lambda i: (i, 0, 0)),
        scratch_shapes=[
            pltpu.VMEM((b_blk, ho, wo, 9 * c_in), jnp.bfloat16),   # stem im2col
            pltpu.VMEM((b_blk, ho + 2, c1, wo + 2), jnp.float32),  # depthwise halo
        ],
        compiler_params=pltpu.CompilerParams(
            dimension_semantics=("parallel",),       # megacore split on v7x
            # packed output + lane-dense scratch keep per-image blocks small;
            # 48 MB stays within v7x's 64 MiB physical VMEM and gives headroom
            # for the staged f32 temporaries on v5e/v6e.
            vmem_limit_bytes=48 * 1024 * 1024,
        ),
        cost_estimate=pl.CostEstimate(
            flops=flops, transcendentals=transcendentals,
            bytes_accessed=bytes_accessed),
    )(x12, w_stem, params["stem_scale"], params["stem_bias"],
      w_dw, ds, db, w_pw, params["pw_scale"], params["pw_bias"])

    # un-pack: (n, hw//pack, pack*c_out) -> (n, ho, wo, c_out) -> NCHW
    wchunk = wo // pack
    out = out.reshape(n, ho, wchunk, pack, c_out).transpose(0, 1, 3, 2, 4)
    out = out.reshape(n, ho, wo, c_out)
    return jnp.transpose(out, (0, 3, 1, 2))


# ----------------------------------------------------------------------------
# Pure-JAX f32 reference (for tolerance-testing the intentional bf16 deviations)
# ----------------------------------------------------------------------------
def _reference_forward(x_nchw, params):
    x = jnp.transpose(x_nchw, (0, 2, 3, 1)).astype(jnp.float32)
    y = lax.conv_general_dilated(
        x, params["w_stem"], window_strides=(2, 2), padding=((1, 1), (1, 1)),
        dimension_numbers=("NHWC", "HWIO", "NHWC"))
    y = y * params["stem_scale"][0] + params["stem_bias"][0]
    y = y * jax.nn.sigmoid(y)
    c1 = y.shape[-1]
    z = lax.conv_general_dilated(
        y, params["w_dw"].reshape(3, 3, 1, c1), window_strides=(1, 1),
        padding=((1, 1), (1, 1)), dimension_numbers=("NHWC", "HWIO", "NHWC"),
        feature_group_count=c1)
    z = z * params["dw_scale"][0] + params["dw_bias"][0]
    z = z * jax.nn.sigmoid(z)
    o = jnp.einsum("nhwc,cd->nhwd", z, params["w_pw"])
    o = o * params["pw_scale"][0] + params["pw_bias"][0]
    o = jax.nn.sigmoid(o)
    return jnp.transpose(o, (0, 3, 1, 2))


if __name__ == "__main__":
    key = jax.random.PRNGKey(0)
    kx, kp = jax.random.split(key)
    x = jax.random.normal(kx, (2, 3, 16, 16), jnp.float32)   # NCHW, like PyTorch
    params = init_params(kp)

    fwd = jax.jit(efficientnet_backbone_forward)
    out = jax.block_until_ready(fwd(x, params))

    assert out.shape == (2, 16, 8, 8), out.shape
    assert out.dtype == jnp.float32
    assert bool(jnp.all(jnp.isfinite(out)))
    assert bool(jnp.all((out >= 0.0) & (out <= 1.0)))        # sigmoid range check

    ref = _reference_forward(x, params)                      # bf16 tolerance check
    assert bool(jnp.allclose(out, ref, atol=5e-2)), float(jnp.max(jnp.abs(out - ref)))
    print("KERNEL_OK")
</pallas_src>

<mosaic_0001>
module attributes {stable_mosaic.version = 11 : i64} {
  func.func @_fused_backbone_kernel(%arg0: i32, %arg1: memref<2x9x9x12xbf16, #tpu.memory_space<vmem>>, %arg2: memref<27x32xbf16, #tpu.memory_space<vmem>>, %arg3: memref<1x32xf32, #tpu.memory_space<vmem>>, %arg4: memref<1x32xf32, #tpu.memory_space<vmem>>, %arg5: memref<9x1x32x1xf32, #tpu.memory_space<vmem>>, %arg6: memref<1x32x1xf32, #tpu.memory_space<vmem>>, %arg7: memref<1x32x1xf32, #tpu.memory_space<vmem>>, %arg8: memref<32x16xbf16, #tpu.memory_space<vmem>>, %arg9: memref<1x16xf32, #tpu.memory_space<vmem>>, %arg10: memref<1x16xf32, #tpu.memory_space<vmem>>, %arg11: memref<2x8x128xf32, #tpu.memory_space<vmem>>, %arg12: memref<2x8x8x27xbf16, #tpu.memory_space<vmem>>, %arg13: memref<2x10x32x10xf32, #tpu.memory_space<vmem>>) attributes {dimension_semantics = [#tpu.dimension_semantics<parallel>], iteration_bounds = array<i64: 1>, scalar_prefetch = 0 : i64, scratch_operands = 2 : i64, tpu.core_type = #tpu.core_type<tc>, window_params = [{transform_indices = @transform_0, window_bounds = array<i64: 2, 9, 9, 12>}, {pipeline_mode = #tpu.pipeline_mode<synchronous>, transform_indices = @transform_1, window_bounds = array<i64: 27, 32>}, {pipeline_mode = #tpu.pipeline_mode<synchronous>, transform_indices = @transform_2, window_bounds = array<i64: 1, 32>}, {pipeline_mode = #tpu.pipeline_mode<synchronous>, transform_indices = @transform_3, window_bounds = array<i64: 1, 32>}, {pipeline_mode = #tpu.pipeline_mode<synchronous>, transform_indices = @transform_4, window_bounds = array<i64: 9, 1, 32, 1>}, {pipeline_mode = #tpu.pipeline_mode<synchronous>, transform_indices = @transform_5, window_bounds = array<i64: 1, 32, 1>}, {pipeline_mode = #tpu.pipeline_mode<synchronous>, transform_indices = @transform_6, window_bounds = array<i64: 1, 32, 1>}, {pipeline_mode = #tpu.pipeline_mode<synchronous>, transform_indices = @transform_7, window_bounds = array<i64: 32, 16>}, {pipeline_mode = #tpu.pipeline_mode<synchronous>, transform_indices = @transform_8, window_bounds = array<i64: 1, 16>}, {pipeline_mode = #tpu.pipeline_mode<synchronous>, transform_indices = @transform_9, window_bounds = array<i64: 1, 16>}, {transform_indices = @transform_10, window_bounds = array<i64: 2, 8, 128>}]} {
    %c0 = arith.constant 0 : index
    %c0_0 = arith.constant 0 : index
    %c0_1 = arith.constant 0 : index
    %c0_2 = arith.constant 0 : index
    %0 = vector.load %arg1[%c0, %c0_0, %c0_1, %c0_2] : memref<2x9x9x12xbf16, #tpu.memory_space<vmem>>, vector<2x8x8x3xbf16>
    %c0_3 = arith.constant 0 : index
    %c0_4 = arith.constant 0 : index
    %c0_5 = arith.constant 0 : index
    %c0_6 = arith.constant 0 : index
    %1 = vector.load %arg12[%c0_3, %c0_4, %c0_5, %c0_6] : memref<2x8x8x27xbf16, #tpu.memory_space<vmem>>, vector<2x8x8x3xbf16>
    tpu.vector_store %arg12[%c0_3, %c0_4, %c0_5, %c0_6], %0 {strides = array<i32>} : memref<2x8x8x27xbf16, #tpu.memory_space<vmem>>, vector<2x8x8x3xbf16>,
    %c0_7 = arith.constant 0 : index
    %c0_8 = arith.constant 0 : index
    %c0_9 = arith.constant 0 : index
    %c3 = arith.constant 3 : index
    %2 = vector.load %arg1[%c0_7, %c0_8, %c0_9, %c3] : memref<2x9x9x12xbf16, #tpu.memory_space<vmem>>, vector<2x8x8x3xbf16>
    %c0_10 = arith.constant 0 : index
    %c0_11 = arith.constant 0 : index
    %c0_12 = arith.constant 0 : index
    %c3_13 = arith.constant 3 : index
    %3 = vector.load %arg12[%c0_10, %c0_11, %c0_12, %c3_13] : memref<2x8x8x27xbf16, #tpu.memory_space<vmem>>, vector<2x8x8x3xbf16>
    tpu.vector_store %arg12[%c0_10, %c0_11, %c0_12, %c3_13], %2 {strides = array<i32>} : memref<2x8x8x27xbf16, #tpu.memory_space<vmem>>, vector<2x8x8x3xbf16>,
    %c0_14 = arith.constant 0 : index
    %c0_15 = arith.constant 0 : index
    %c1 = arith.constant 1 : index
    %c0_16 = arith.constant 0 : index
    %4 = vector.load %arg1[%c0_14, %c0_15, %c1, %c0_16] : memref<2x9x9x12xbf16, #tpu.memory_space<vmem>>, vector<2x8x8x3xbf16>
    %c0_17 = arith.constant 0 : index
    %c0_18 = arith.constant 0 : index
    %c0_19 = arith.constant 0 : index
    %c6 = arith.constant 6 : index
    %5 = vector.load %arg12[%c0_17, %c0_18, %c0_19, %c6] : memref<2x8x8x27xbf16, #tpu.memory_space<vmem>>, vector<2x8x8x3xbf16>
    tpu.vector_store %arg12[%c0_17, %c0_18, %c0_19, %c6], %4 {strides = array<i32>} : memref<2x8x8x27xbf16, #tpu.memory_space<vmem>>, vector<2x8x8x3xbf16>,
    %c0_20 = arith.constant 0 : index
    %c0_21 = arith.constant 0 : index
    %c0_22 = arith.constant 0 : index
    %c6_23 = arith.constant 6 : index
    %6 = vector.load %arg1[%c0_20, %c0_21, %c0_22, %c6_23] : memref<2x9x9x12xbf16, #tpu.memory_space<vmem>>, vector<2x8x8x3xbf16>
    %c0_24 = arith.constant 0 : index
    %c0_25 = arith.constant 0 : index
    %c0_26 = arith.constant 0 : index
    %c9 = arith.constant 9 : index
    %7 = vector.load %arg12[%c0_24, %c0_25, %c0_26, %c9] : memref<2x8x8x27xbf16, #tpu.memory_space<vmem>>, vector<2x8x8x3xbf16>
    tpu.vector_store %arg12[%c0_24, %c0_25, %c0_26, %c9], %6 {strides = array<i32>} : memref<2x8x8x27xbf16, #tpu.memory_space<vmem>>, vector<2x8x8x3xbf16>,
    %c0_27 = arith.constant 0 : index
    %c0_28 = arith.constant 0 : index
    %c0_29 = arith.constant 0 : index
    %c9_30 = arith.constant 9 : index
    %8 = vector.load %arg1[%c0_27, %c0_28, %c0_29, %c9_30] : memref<2x9x9x12xbf16, #tpu.memory_space<vmem>>, vector<2x8x8x3xbf16>
    %c0_31 = arith.constant 0 : index
    %c0_32 = arith.constant 0 : index
    %c0_33 = arith.constant 0 : index
    %c12 = arith.constant 12 : index
    %9 = vector.load %arg12[%c0_31, %c0_32, %c0_33, %c12] : memref<2x8x8x27xbf16, #tpu.memory_space<vmem>>, vector<2x8x8x3xbf16>
    tpu.vector_store %arg12[%c0_31, %c0_32, %c0_33, %c12], %8 {strides = array<i32>} : memref<2x8x8x27xbf16, #tpu.memory_space<vmem>>, vector<2x8x8x3xbf16>,
    %c0_34 = arith.constant 0 : index
    %c0_35 = arith.constant 0 : index
    %c1_36 = arith.constant 1 : index
    %c6_37 = arith.constant 6 : index
    %10 = vector.load %arg1[%c0_34, %c0_35, %c1_36, %c6_37] : memref<2x9x9x12xbf16, #tpu.memory_space<vmem>>, vector<2x8x8x3xbf16>
    %c0_38 = arith.constant 0 : index
    %c0_39 = arith.constant 0 : index
    %c0_40 = arith.constant 0 : index
    %c15 = arith.constant 15 : index
    %11 = vector.load %arg12[%c0_38, %c0_39, %c0_40, %c15] : memref<2x8x8x27xbf16, #tpu.memory_space<vmem>>, vector<2x8x8x3xbf16>
    tpu.vector_store %arg12[%c0_38, %c0_39, %c0_40, %c15], %10 {strides = array<i32>} : memref<2x8x8x27xbf16, #tpu.memory_space<vmem>>, vector<2x8x8x3xbf16>,
    %c0_41 = arith.constant 0 : index
    %c1_42 = arith.constant 1 : index
    %c0_43 = arith.constant 0 : index
    %c0_44 = arith.constant 0 : index
    %12 = vector.load %arg1[%c0_41, %c1_42, %c0_43, %c0_44] : memref<2x9x9x12xbf16, #tpu.memory_space<vmem>>, vector<2x8x8x3xbf16>
    %c0_45 = arith.constant 0 : index
    %c0_46 = arith.constant 0 : index
    %c0_47 = arith.constant 0 : index
    %c18 = arith.constant 18 : index
    %13 = vector.load %arg12[%c0_45, %c0_46, %c0_47, %c18] : memref<2x8x8x27xbf16, #tpu.memory_space<vmem>>, vector<2x8x8x3xbf16>
    tpu.vector_store %arg12[%c0_45, %c0_46, %c0_47, %c18], %12 {strides = array<i32>} : memref<2x8x8x27xbf16, #tpu.memory_space<vmem>>, vector<2x8x8x3xbf16>,
    %c0_48 = arith.constant 0 : index
    %c1_49 = arith.constant 1 : index
    %c0_50 = arith.constant 0 : index
    %c3_51 = arith.constant 3 : index
    %14 = vector.load %arg1[%c0_48, %c1_49, %c0_50, %c3_51] : memref<2x9x9x12xbf16, #tpu.memory_space<vmem>>, vector<2x8x8x3xbf16>
    %c0_52 = arith.constant 0 : index
    %c0_53 = arith.constant 0 : index
    %c0_54 = arith.constant 0 : index
    %c21 = arith.constant 21 : index
    %15 = vector.load %arg12[%c0_52, %c0_53, %c0_54, %c21] : memref<2x8x8x27xbf16, #tpu.memory_space<vmem>>, vector<2x8x8x3xbf16>
    tpu.vector_store %arg12[%c0_52, %c0_53, %c0_54, %c21], %14 {strides = array<i32>} : memref<2x8x8x27xbf16, #tpu.memory_space<vmem>>, vector<2x8x8x3xbf16>,
    %c0_55 = arith.constant 0 : index
    %c1_56 = arith.constant 1 : index
    %c1_57 = arith.constant 1 : index
    %c0_58 = arith.constant 0 : index
    %16 = vector.load %arg1[%c0_55, %c1_56, %c1_57, %c0_58] : memref<2x9x9x12xbf16, #tpu.memory_space<vmem>>, vector<2x8x8x3xbf16>
    %c0_59 = arith.constant 0 : index
    %c0_60 = arith.constant 0 : index
    %c0_61 = arith.constant 0 : index
    %c24 = arith.constant 24 : index
    %17 = vector.load %arg12[%c0_59, %c0_60, %c0_61, %c24] : memref<2x8x8x27xbf16, #tpu.memory_space<vmem>>, vector<2x8x8x3xbf16>
    tpu.vector_store %arg12[%c0_59, %c0_60, %c0_61, %c24], %16 {strides = array<i32>} : memref<2x8x8x27xbf16, #tpu.memory_space<vmem>>, vector<2x8x8x3xbf16>,
    %c0_62 = arith.constant 0 : index
    %c0_63 = arith.constant 0 : index
    %c0_64 = arith.constant 0 : index
    %c0_65 = arith.constant 0 : index
    %18 = vector.load %arg12[%c0_62, %c0_63, %c0_64, %c0_65] : memref<2x8x8x27xbf16, #tpu.memory_space<vmem>>, vector<2x8x8x27xbf16>
    %19 = vector.shape_cast %18 : vector<2x8x8x27xbf16> to vector<128x27xbf16>
    %c0_66 = arith.constant 0 : index
    %c0_67 = arith.constant 0 : index
    %20 = vector.load %arg2[%c0_66, %c0_67] : memref<27x32xbf16, #tpu.memory_space<vmem>>, vector<27x32xbf16>
    %cst = arith.constant dense<0.000000e+00> : vector<128x32xf32>
    %21 = tpu.matmul %19, %20, %cst {dimension_numbers = #tpu.dot_dimension_numbers<[1], [0], [0], [1], [0, 0, 1, 1], [], []>} : vector<128x27xbf16>, vector<27x32xbf16>, vector<128x32xf32> -> vector<128x32xf32>
    %c0_68 = arith.constant 0 : index
    %c0_69 = arith.constant 0 : index
    %22 = vector.load %arg3[%c0_68, %c0_69] : memref<1x32xf32, #tpu.memory_space<vmem>>, vector<1x32xf32>
    %23 = vector.broadcast %22 : vector<1x32xf32> to vector<128x32xf32>
    %24 = arith.mulf %21, %23 : vector<128x32xf32>
    %c0_70 = arith.constant 0 : index
    %c0_71 = arith.constant 0 : index
    %25 = vector.load %arg4[%c0_70, %c0_71] : memref<1x32xf32, #tpu.memory_space<vmem>>, vector<1x32xf32>
    %26 = vector.broadcast %25 : vector<1x32xf32> to vector<128x32xf32>
    %27 = arith.addf %24, %26 : vector<128x32xf32>
    %28 = arith.negf %27 : vector<128x32xf32>
    %29 = math.exp %28 : vector<128x32xf32>
    %cst_72 = arith.constant 1.000000e+00 : f32
    %30 = vector.broadcast %cst_72 : f32 to vector<128x32xf32>
    %31 = arith.addf %30, %29 : vector<128x32xf32>
    %32 = arith.divf %30, %31 : vector<128x32xf32>
    %33 = arith.mulf %27, %32 : vector<128x32xf32>
    %cst_73 = arith.constant 0.000000e+00 : f32
    %34 = vector.broadcast %cst_73 : f32 to vector<2x1x32x10xf32>
    %c0_74 = arith.constant 0 : index
    %c0_75 = arith.constant 0 : index
    %c0_76 = arith.constant 0 : index
    %c0_77 = arith.constant 0 : index
    %35 = vector.load %arg13[%c0_74, %c0_75, %c0_76, %c0_77] : memref<2x10x32x10xf32, #tpu.memory_space<vmem>>, vector<2x1x32x10xf32>
    tpu.vector_store %arg13[%c0_74, %c0_75, %c0_76, %c0_77], %34 {strides = array<i32>} : memref<2x10x32x10xf32, #tpu.memory_space<vmem>>, vector<2x1x32x10xf32>,
    %cst_78 = arith.constant 0.000000e+00 : f32
    %36 = vector.broadcast %cst_78 : f32 to vector<2x1x32x10xf32>
    %c0_79 = arith.constant 0 : index
    %c9_80 = arith.constant 9 : index
    %c0_81 = arith.constant 0 : index
    %c0_82 = arith.constant 0 : index
    %37 = vector.load %arg13[%c0_79, %c9_80, %c0_81, %c0_82] : memref<2x10x32x10xf32, #tpu.memory_space<vmem>>, vector<2x1x32x10xf32>
    tpu.vector_store %arg13[%c0_79, %c9_80, %c0_81, %c0_82], %36 {strides = array<i32>} : memref<2x10x32x10xf32, #tpu.memory_space<vmem>>, vector<2x1x32x10xf32>,
    %cst_83 = arith.constant 0.000000e+00 : f32
    %38 = vector.broadcast %cst_83 : f32 to vector<2x8x32x1xf32>
    %c0_84 = arith.constant 0 : index
    %c1_85 = arith.constant 1 : index
    %c0_86 = arith.constant 0 : index
    %c0_87 = arith.constant 0 : index
    %39 = vector.load %arg13[%c0_84, %c1_85, %c0_86, %c0_87] : memref<2x10x32x10xf32, #tpu.memory_space<vmem>>, vector<2x8x32x1xf32>
    tpu.vector_store %arg13[%c0_84, %c1_85, %c0_86, %c0_87], %38 {strides = array<i32>} : memref<2x10x32x10xf32, #tpu.memory_space<vmem>>, vector<2x8x32x1xf32>,
    %cst_88 = arith.constant 0.000000e+00 : f32
    %40 = vector.broadcast %cst_88 : f32 to vector<2x8x32x1xf32>
    %c0_89 = arith.constant 0 : index
    %c1_90 = arith.constant 1 : index
    %c0_91 = arith.constant 0 : index
    %c9_92 = arith.constant 9 : index
    %41 = vector.load %arg13[%c0_89, %c1_90, %c0_91, %c9_92] : memref<2x10x32x10xf32, #tpu.memory_space<vmem>>, vector<2x8x32x1xf32>
    tpu.vector_store %arg13[%c0_89, %c1_90, %c0_91, %c9_92], %40 {strides = array<i32>} : memref<2x10x32x10xf32, #tpu.memory_space<vmem>>, vector<2x8x32x1xf32>,
    %42 = vector.shape_cast %33 : vector<128x32xf32> to vector<2x8x8x32xf32>
    %43 = tpu.transpose %42, [0, 1, 3, 2] : vector<2x8x8x32xf32> -> vector<2x8x32x8xf32>
    %c0_93 = arith.constant 0 : index
    %c1_94 = arith.constant 1 : index
    %c0_95 = arith.constant 0 : index
    %c1_96 = arith.constant 1 : index
    %44 = vector.load %arg13[%c0_93, %c1_94, %c0_95, %c1_96] : memref<2x10x32x10xf32, #tpu.memory_space<vmem>>, vector<2x8x32x8xf32>
    tpu.vector_store %arg13[%c0_93, %c1_94, %c0_95, %c1_96], %43 {strides = array<i32>} : memref<2x10x32x10xf32, #tpu.memory_space<vmem>>, vector<2x8x32x8xf32>,
    %c0_97 = arith.constant 0 : index
    %c0_98 = arith.constant 0 : index
    %c0_99 = arith.constant 0 : index
    %c0_100 = arith.constant 0 : index
    %45 = vector.load %arg13[%c0_97, %c0_98, %c0_99, %c0_100] : memref<2x10x32x10xf32, #tpu.memory_space<vmem>>, vector<2x8x32x8xf32>
    %c0_101 = arith.constant 0 : index
    %c0_102 = arith.constant 0 : index
    %c0_103 = arith.constant 0 : index
    %c0_104 = arith.constant 0 : index
    %46 = vector.load %arg5[%c0_101, %c0_102, %c0_103, %c0_104] : memref<9x1x32x1xf32, #tpu.memory_space<vmem>>, vector<1x1x32x1xf32>
    %47 = vector.shape_cast %46 : vector<1x1x32x1xf32> to vector<1x32x1xf32>
    %48 = vector.shape_cast %47 : vector<1x32x1xf32> to vector<1x1x32x1xf32>
    %49 = vector.broadcast %48 : vector<1x1x32x1xf32> to vector<2x8x32x8xf32>
    %50 = arith.mulf %45, %49 : vector<2x8x32x8xf32>
    %c0_105 = arith.constant 0 : index
    %c0_106 = arith.constant 0 : index
    %c0_107 = arith.constant 0 : index
    %c1_108 = arith.constant 1 : index
    %51 = vector.load %arg13[%c0_105, %c0_106, %c0_107, %c1_108] : memref<2x10x32x10xf32, #tpu.memory_space<vmem>>, vector<2x8x32x8xf32>
    %c1_109 = arith.constant 1 : index
    %c0_110 = arith.constant 0 : index
    %c0_111 = arith.constant 0 : index
    %c0_112 = arith.constant 0 : index
    %52 = vector.load %arg5[%c1_109, %c0_110, %c0_111, %c0_112] : memref<9x1x32x1xf32, #tpu.memory_space<vmem>>, vector<1x1x32x1xf32>
    %53 = vector.shape_cast %52 : vector<1x1x32x1xf32> to vector<1x32x1xf32>
    %54 = vector.shape_cast %53 : vector<1x32x1xf32> to vector<1x1x32x1xf32>
    %55 = vector.broadcast %54 : vector<1x1x32x1xf32> to vector<2x8x32x8xf32>
    %56 = arith.mulf %51, %55 : vector<2x8x32x8xf32>
    %57 = arith.addf %50, %56 : vector<2x8x32x8xf32>
    %c0_113 = arith.constant 0 : index
    %c0_114 = arith.constant 0 : index
    %c0_115 = arith.constant 0 : index
    %c2 = arith.constant 2 : index
    %58 = vector.load %arg13[%c0_113, %c0_114, %c0_115, %c2] : memref<2x10x32x10xf32, #tpu.memory_space<vmem>>, vector<2x8x32x8xf32>
    %c2_116 = arith.constant 2 : index
    %c0_117 = arith.constant 0 : index
    %c0_118 = arith.constant 0 : index
    %c0_119 = arith.constant 0 : index
    %59 = vector.load %arg5[%c2_116, %c0_117, %c0_118, %c0_119] : memref<9x1x32x1xf32, #tpu.memory_space<vmem>>, vector<1x1x32x1xf32>
    %60 = vector.shape_cast %59 : vector<1x1x32x1xf32> to vector<1x32x1xf32>
    %61 = vector.shape_cast %60 : vector<1x32x1xf32> to vector<1x1x32x1xf32>
    %62 = vector.broadcast %61 : vector<1x1x32x1xf32> to vector<2x8x32x8xf32>
    %63 = arith.mulf %58, %62 : vector<2x8x32x8xf32>
    %64 = arith.addf %57, %63 : vector<2x8x32x8xf32>
    %c0_120 = arith.constant 0 : index
    %c1_121 = arith.constant 1 : index
    %c0_122 = arith.constant 0 : index
    %c0_123 = arith.constant 0 : index
    %65 = vector.load %arg13[%c0_120, %c1_121, %c0_122, %c0_123] : memref<2x10x32x10xf32, #tpu.memory_space<vmem>>, vector<2x8x32x8xf32>
    %c3_124 = arith.constant 3 : index
    %c0_125 = arith.constant 0 : index
    %c0_126 = arith.constant 0 : index
    %c0_127 = arith.constant 0 : index
    %66 = vector.load %arg5[%c3_124, %c0_125, %c0_126, %c0_127] : memref<9x1x32x1xf32, #tpu.memory_space<vmem>>, vector<1x1x32x1xf32>
    %67 = vector.shape_cast %66 : vector<1x1x32x1xf32> to vector<1x32x1xf32>
    %68 = vector.shape_cast %67 : vector<1x32x1xf32> to vector<1x1x32x1xf32>
    %69 = vector.broadcast %68 : vector<1x1x32x1xf32> to vector<2x8x32x8xf32>
    %70 = arith.mulf %65, %69 : vector<2x8x32x8xf32>
    %71 = arith.addf %64, %70 : vector<2x8x32x8xf32>
    %c0_128 = arith.constant 0 : index
    %c1_129 = arith.constant 1 : index
    %c0_130 = arith.constant 0 : index
    %c1_131 = arith.constant 1 : index
    %72 = vector.load %arg13[%c0_128, %c1_129, %c0_130, %c1_131] : memref<2x10x32x10xf32, #tpu.memory_space<vmem>>, vector<2x8x32x8xf32>
    %c4 = arith.constant 4 : index
    %c0_132 = arith.constant 0 : index
    %c0_133 = arith.constant 0 : index
    %c0_134 = arith.constant 0 : index
    %73 = vector.load %arg5[%c4, %c0_132, %c0_133, %c0_134] : memref<9x1x32x1xf32, #tpu.memory_space<vmem>>, vector<1x1x32x1xf32>
    %74 = vector.shape_cast %73 : vector<1x1x32x1xf32> to vector<1x32x1xf32>
    %75 = vector.shape_cast %74 : vector<1x32x1xf32> to vector<1x1x32x1xf32>
    %76 = vector.broadcast %75 : vector<1x1x32x1xf32> to vector<2x8x32x8xf32>
    %77 = arith.mulf %72, %76 : vector<2x8x32x8xf32>
    %78 = arith.addf %71, %77 : vector<2x8x32x8xf32>
    %c0_135 = arith.constant 0 : index
    %c1_136 = arith.constant 1 : index
    %c0_137 = arith.constant 0 : index
    %c2_138 = arith.constant 2 : index
    %79 = vector.load %arg13[%c0_135, %c1_136, %c0_137, %c2_138] : memref<2x10x32x10xf32, #tpu.memory_space<vmem>>, vector<2x8x32x8xf32>
    %c5 = arith.constant 5 : index
    %c0_139 = arith.constant 0 : index
    %c0_140 = arith.constant 0 : index
    %c0_141 = arith.constant 0 : index
    %80 = vector.load %arg5[%c5, %c0_139, %c0_140, %c0_141] : memref<9x1x32x1xf32, #tpu.memory_space<vmem>>, vector<1x1x32x1xf32>
    %81 = vector.shape_cast %80 : vector<1x1x32x1xf32> to vector<1x32x1xf32>
    %82 = vector.shape_cast %81 : vector<1x32x1xf32> to vector<1x1x32x1xf32>
    %83 = vector.broadcast %82 : vector<1x1x32x1xf32> to vector<2x8x32x8xf32>
    %84 = arith.mulf %79, %83 : vector<2x8x32x8xf32>
    %85 = arith.addf %78, %84 : vector<2x8x32x8xf32>
    %c0_142 = arith.constant 0 : index
    %c2_143 = arith.constant 2 : index
    %c0_144 = arith.constant 0 : index
    %c0_145 = arith.constant 0 : index
    %86 = vector.load %arg13[%c0_142, %c2_143, %c0_144, %c0_145] : memref<2x10x32x10xf32, #tpu.memory_space<vmem>>, vector<2x8x32x8xf32>
    %c6_146 = arith.constant 6 : index
    %c0_147 = arith.constant 0 : index
    %c0_148 = arith.constant 0 : index
    %c0_149 = arith.constant 0 : index
    %87 = vector.load %arg5[%c6_146, %c0_147, %c0_148, %c0_149] : memref<9x1x32x1xf32, #tpu.memory_space<vmem>>, vector<1x1x32x1xf32>
    %88 = vector.shape_cast %87 : vector<1x1x32x1xf32> to vector<1x32x1xf32>
    %89 = vector.shape_cast %88 : vector<1x32x1xf32> to vector<1x1x32x1xf32>
    %90 = vector.broadcast %89 : vector<1x1x32x1xf32> to vector<2x8x32x8xf32>
    %91 = arith.mulf %86, %90 : vector<2x8x32x8xf32>
    %92 = arith.addf %85, %91 : vector<2x8x32x8xf32>
    %c0_150 = arith.constant 0 : index
    %c2_151 = arith.constant 2 : index
    %c0_152 = arith.constant 0 : index
    %c1_153 = arith.constant 1 : index
    %93 = vector.load %arg13[%c0_150, %c2_151, %c0_152, %c1_153] : memref<2x10x32x10xf32, #tpu.memory_space<vmem>>, vector<2x8x32x8xf32>
    %c7 = arith.constant 7 : index
    %c0_154 = arith.constant 0 : index
    %c0_155 = arith.constant 0 : index
    %c0_156 = arith.constant 0 : index
    %94 = vector.load %arg5[%c7, %c0_154, %c0_155, %c0_156] : memref<9x1x32x1xf32, #tpu.memory_space<vmem>>, vector<1x1x32x1xf32>
    %95 = vector.shape_cast %94 : vector<1x1x32x1xf32> to vector<1x32x1xf32>
    %96 = vector.shape_cast %95 : vector<1x32x1xf32> to vector<1x1x32x1xf32>
    %97 = vector.broadcast %96 : vector<1x1x32x1xf32> to vector<2x8x32x8xf32>
    %98 = arith.mulf %93, %97 : vector<2x8x32x8xf32>
    %99 = arith.addf %92, %98 : vector<2x8x32x8xf32>
    %c0_157 = arith.constant 0 : index
    %c2_158 = arith.constant 2 : index
    %c0_159 = arith.constant 0 : index
    %c2_160 = arith.constant 2 : index
    %100 = vector.load %arg13[%c0_157, %c2_158, %c0_159, %c2_160] : memref<2x10x32x10xf32, #tpu.memory_space<vmem>>, vector<2x8x32x8xf32>
    %c8 = arith.constant 8 : index
    %c0_161 = arith.constant 0 : index
    %c0_162 = arith.constant 0 : index
    %c0_163 = arith.constant 0 : index
    %101 = vector.load %arg5[%c8, %c0_161, %c0_162, %c0_163] : memref<9x1x32x1xf32, #tpu.memory_space<vmem>>, vector<1x1x32x1xf32>
    %102 = vector.shape_cast %101 : vector<1x1x32x1xf32> to vector<1x32x1xf32>
    %103 = vector.shape_cast %102 : vector<1x32x1xf32> to vector<1x1x32x1xf32>
    %104 = vector.broadcast %103 : vector<1x1x32x1xf32> to vector<2x8x32x8xf32>
    %105 = arith.mulf %100, %104 : vector<2x8x32x8xf32>
    %106 = arith.addf %99, %105 : vector<2x8x32x8xf32>
    %c0_164 = arith.constant 0 : index
    %c0_165 = arith.constant 0 : index
    %c0_166 = arith.constant 0 : index
    %107 = vector.load %arg6[%c0_164, %c0_165, %c0_166] : memref<1x32x1xf32, #tpu.memory_space<vmem>>, vector<1x32x1xf32>
    %108 = vector.shape_cast %107 : vector<1x32x1xf32> to vector<1x1x32x1xf32>
    %109 = vector.broadcast %108 : vector<1x1x32x1xf32> to vector<2x8x32x8xf32>
    %110 = arith.mulf %106, %109 : vector<2x8x32x8xf32>
    %c0_167 = arith.constant 0 : index
    %c0_168 = arith.constant 0 : index
    %c0_169 = arith.constant 0 : index
    %111 = vector.load %arg7[%c0_167, %c0_168, %c0_169] : memref<1x32x1xf32, #tpu.memory_space<vmem>>, vector<1x32x1xf32>
    %112 = vector.shape_cast %111 : vector<1x32x1xf32> to vector<1x1x32x1xf32>
    %113 = vector.broadcast %112 : vector<1x1x32x1xf32> to vector<2x8x32x8xf32>
    %114 = arith.addf %110, %113 : vector<2x8x32x8xf32>
    %115 = arith.negf %114 : vector<2x8x32x8xf32>
    %116 = math.exp %115 : vector<2x8x32x8xf32>
    %cst_170 = arith.constant 1.000000e+00 : f32
    %117 = vector.broadcast %cst_170 : f32 to vector<2x8x32x8xf32>
    %118 = arith.addf %117, %116 : vector<2x8x32x8xf32>
    %119 = arith.divf %117, %118 : vector<2x8x32x8xf32>
    %120 = arith.mulf %114, %119 : vector<2x8x32x8xf32>
    %121 = tpu.transpose %120, [0, 1, 3, 2] : vector<2x8x32x8xf32> -> vector<2x8x8x32xf32>
    %122 = vector.shape_cast %121 : vector<2x8x8x32xf32> to vector<128x32xf32>
    %123 = arith.truncf %122 : vector<128x32xf32> to vector<128x32xbf16>
    %c0_171 = arith.constant 0 : index
    %c0_172 = arith.constant 0 : index
    %124 = vector.load %arg8[%c0_171, %c0_172] : memref<32x16xbf16, #tpu.memory_space<vmem>>, vector<32x16xbf16>
    %cst_173 = arith.constant dense<0.000000e+00> : vector<128x16xf32>
    %125 = tpu.matmul %123, %124, %cst_173 {dimension_numbers = #tpu.dot_dimension_numbers<[1], [0], [0], [1], [0, 0, 1, 1], [], []>} : vector<128x32xbf16>, vector<32x16xbf16>, vector<128x16xf32> -> vector<128x16xf32>
    %c0_174 = arith.constant 0 : index
    %c0_175 = arith.constant 0 : index
    %126 = vector.load %arg9[%c0_174, %c0_175] : memref<1x16xf32, #tpu.memory_space<vmem>>, vector<1x16xf32>
    %127 = vector.broadcast %126 : vector<1x16xf32> to vector<128x16xf32>
    %128 = arith.mulf %125, %127 : vector<128x16xf32>
    %c0_176 = arith.constant 0 : index
    %c0_177 = arith.constant 0 : index
    %129 = vector.load %arg10[%c0_176, %c0_177] : memref<1x16xf32, #tpu.memory_space<vmem>>, vector<1x16xf32>
    %130 = vector.broadcast %129 : vector<1x16xf32> to vector<128x16xf32>
    %131 = arith.addf %128, %130 : vector<128x16xf32>
    %132 = arith.negf %131 : vector<128x16xf32>
    %133 = math.exp %132 : vector<128x16xf32>
    %cst_178 = arith.constant 1.000000e+00 : f32
    %134 = vector.broadcast %cst_178 : f32 to vector<128x16xf32>
    %135 = arith.addf %134, %133 : vector<128x16xf32>
    %136 = arith.divf %134, %135 : vector<128x16xf32>
    %137 = vector.shape_cast %136 : vector<128x16xf32> to vector<2x8x8x16xf32>
    %138 = vector.extract_strided_slice %137 {offsets = [0, 0, 0, 0], sizes = [2, 8, 1, 16], strides = [1, 1, 1, 1]} : vector<2x8x8x16xf32> to vector<2x8x1x16xf32>
    %139 = vector.shape_cast %138 : vector<2x8x1x16xf32> to vector<2x8x16xf32>
    %c0_179 = arith.constant 0 : index
    %c0_180 = arith.constant 0 : index
    %c0_181 = arith.constant 0 : index
    %140 = vector.load %arg11[%c0_179, %c0_180, %c0_181] : memref<2x8x128xf32, #tpu.memory_space<vmem>>, vector<2x8x16xf32>
    tpu.vector_store %arg11[%c0_179, %c0_180, %c0_181], %139 {strides = array<i32>} : memref<2x8x128xf32, #tpu.memory_space<vmem>>, vector<2x8x16xf32>,
    %141 = vector.extract_strided_slice %137 {offsets = [0, 0, 1, 0], sizes = [2, 8, 1, 16], strides = [1, 1, 1, 1]} : vector<2x8x8x16xf32> to vector<2x8x1x16xf32>
    %142 = vector.shape_cast %141 : vector<2x8x1x16xf32> to vector<2x8x16xf32>
    %c0_182 = arith.constant 0 : index
    %c0_183 = arith.constant 0 : index
    %c16 = arith.constant 16 : index
    %143 = vector.load %arg11[%c0_182, %c0_183, %c16] : memref<2x8x128xf32, #tpu.memory_space<vmem>>, vector<2x8x16xf32>
    tpu.vector_store %arg11[%c0_182, %c0_183, %c16], %142 {strides = array<i32>} : memref<2x8x128xf32, #tpu.memory_space<vmem>>, vector<2x8x16xf32>,
    %144 = vector.extract_strided_slice %137 {offsets = [0, 0, 2, 0], sizes = [2, 8, 1, 16], strides = [1, 1, 1, 1]} : vector<2x8x8x16xf32> to vector<2x8x1x16xf32>
    %145 = vector.shape_cast %144 : vector<2x8x1x16xf32> to vector<2x8x16xf32>
    %c0_184 = arith.constant 0 : index
    %c0_185 = arith.constant 0 : index
    %c32 = arith.constant 32 : index
    %146 = vector.load %arg11[%c0_184, %c0_185, %c32] : memref<2x8x128xf32, #tpu.memory_space<vmem>>, vector<2x8x16xf32>
    tpu.vector_store %arg11[%c0_184, %c0_185, %c32], %145 {strides = array<i32>} : memref<2x8x128xf32, #tpu.memory_space<vmem>>, vector<2x8x16xf32>,
    %147 = vector.extract_strided_slice %137 {offsets = [0, 0, 3, 0], sizes = [2, 8, 1, 16], strides = [1, 1, 1, 1]} : vector<2x8x8x16xf32> to vector<2x8x1x16xf32>
    %148 = vector.shape_cast %147 : vector<2x8x1x16xf32> to vector<2x8x16xf32>
    %c0_186 = arith.constant 0 : index
    %c0_187 = arith.constant 0 : index
    %c48 = arith.constant 48 : index
    %149 = vector.load %arg11[%c0_186, %c0_187, %c48] : memref<2x8x128xf32, #tpu.memory_space<vmem>>, vector<2x8x16xf32>
    tpu.vector_store %arg11[%c0_186, %c0_187, %c48], %148 {strides = array<i32>} : memref<2x8x128xf32, #tpu.memory_space<vmem>>, vector<2x8x16xf32>,
    %150 = vector.extract_strided_slice %137 {offsets = [0, 0, 4, 0], sizes = [2, 8, 1, 16], strides = [1, 1, 1, 1]} : vector<2x8x8x16xf32> to vector<2x8x1x16xf32>
    %151 = vector.shape_cast %150 : vector<2x8x1x16xf32> to vector<2x8x16xf32>
    %c0_188 = arith.constant 0 : index
    %c0_189 = arith.constant 0 : index
    %c64 = arith.constant 64 : index
    %152 = vector.load %arg11[%c0_188, %c0_189, %c64] : memref<2x8x128xf32, #tpu.memory_space<vmem>>, vector<2x8x16xf32>
    tpu.vector_store %arg11[%c0_188, %c0_189, %c64], %151 {strides = array<i32>} : memref<2x8x128xf32, #tpu.memory_space<vmem>>, vector<2x8x16xf32>,
    %153 = vector.extract_strided_slice %137 {offsets = [0, 0, 5, 0], sizes = [2, 8, 1, 16], strides = [1, 1, 1, 1]} : vector<2x8x8x16xf32> to vector<2x8x1x16xf32>
    %154 = vector.shape_cast %153 : vector<2x8x1x16xf32> to vector<2x8x16xf32>
    %c0_190 = arith.constant 0 : index
    %c0_191 = arith.constant 0 : index
    %c80 = arith.constant 80 : index
    %155 = vector.load %arg11[%c0_190, %c0_191, %c80] : memref<2x8x128xf32, #tpu.memory_space<vmem>>, vector<2x8x16xf32>
    tpu.vector_store %arg11[%c0_190, %c0_191, %c80], %154 {strides = array<i32>} : memref<2x8x128xf32, #tpu.memory_space<vmem>>, vector<2x8x16xf32>,
    %156 = vector.extract_strided_slice %137 {offsets = [0, 0, 6, 0], sizes = [2, 8, 1, 16], strides = [1, 1, 1, 1]} : vector<2x8x8x16xf32> to vector<2x8x1x16xf32>
    %157 = vector.shape_cast %156 : vector<2x8x1x16xf32> to vector<2x8x16xf32>
    %c0_192 = arith.constant 0 : index
    %c0_193 = arith.constant 0 : index
    %c96 = arith.constant 96 : index
    %158 = vector.load %arg11[%c0_192, %c0_193, %c96] : memref<2x8x128xf32, #tpu.memory_space<vmem>>, vector<2x8x16xf32>
    tpu.vector_store %arg11[%c0_192, %c0_193, %c96], %157 {strides = array<i32>} : memref<2x8x128xf32, #tpu.memory_space<vmem>>, vector<2x8x16xf32>,
    %159 = vector.extract_strided_slice %137 {offsets = [0, 0, 7, 0], sizes = [2, 8, 1, 16], strides = [1, 1, 1, 1]} : vector<2x8x8x16xf32> to vector<2x8x1x16xf32>
    %160 = vector.shape_cast %159 : vector<2x8x1x16xf32> to vector<2x8x16xf32>
    %c0_194 = arith.constant 0 : index
    %c0_195 = arith.constant 0 : index
    %c112 = arith.constant 112 : index
    %161 = vector.load %arg11[%c0_194, %c0_195, %c112] : memref<2x8x128xf32, #tpu.memory_space<vmem>>, vector<2x8x16xf32>
    tpu.vector_store %arg11[%c0_194, %c0_195, %c112], %160 {strides = array<i32>} : memref<2x8x128xf32, #tpu.memory_space<vmem>>, vector<2x8x16xf32>,
    return
  }
  func.func @transform_0(%arg0: i32) -> (i32, i32, i32, i32) {
    %c0_i32 = arith.constant 0 : i32
    %c0_i32_0 = arith.constant 0 : i32
    %c0_i32_1 = arith.constant 0 : i32
    %c0_i32_2 = arith.constant 0 : i32
    return %arg0, %c0_i32, %c0_i32_0, %c0_i32_1 : i32, i32, i32, i32
  }
  func.func @transform_1(%arg0: i32) -> (i32, i32) {
    %c0_i32 = arith.constant 0 : i32
    %c0_i32_0 = arith.constant 0 : i32
    %c0_i32_1 = arith.constant 0 : i32
    return %c0_i32, %c0_i32_0 : i32, i32
  }
  func.func @transform_2(%arg0: i32) -> (i32, i32) {
    %c0_i32 = arith.constant 0 : i32
    %c0_i32_0 = arith.constant 0 : i32
    %c0_i32_1 = arith.constant 0 : i32
    return %c0_i32, %c0_i32_0 : i32, i32
  }
  func.func @transform_3(%arg0: i32) -> (i32, i32) {
    %c0_i32 = arith.constant 0 : i32
    %c0_i32_0 = arith.constant 0 : i32
    %c0_i32_1 = arith.constant 0 : i32
    return %c0_i32, %c0_i32_0 : i32, i32
  }
  func.func @transform_4(%arg0: i32) -> (i32, i32, i32, i32) {
    %c0_i32 = arith.constant 0 : i32
    %c0_i32_0 = arith.constant 0 : i32
    %c0_i32_1 = arith.constant 0 : i32
    %c0_i32_2 = arith.constant 0 : i32
    %c0_i32_3 = arith.constant 0 : i32
    return %c0_i32, %c0_i32_0, %c0_i32_1, %c0_i32_2 : i32, i32, i32, i32
  }
  func.func @transform_5(%arg0: i32) -> (i32, i32, i32) {
    %c0_i32 = arith.constant 0 : i32
    %c0_i32_0 = arith.constant 0 : i32
    %c0_i32_1 = arith.constant 0 : i32
    %c0_i32_2 = arith.constant 0 : i32
    return %c0_i32, %c0_i32_0, %c0_i32_1 : i32, i32, i32
  }
  func.func @transform_6(%arg0: i32) -> (i32, i32, i32) {
    %c0_i32 = arith.constant 0 : i32
    %c0_i32_0 = arith.constant 0 : i32
    %c0_i32_1 = arith.constant 0 : i32
    %c0_i32_2 = arith.constant 0 : i32
    return %c0_i32, %c0_i32_0, %c0_i32_1 : i32, i32, i32
  }
  func.func @transform_7(%arg0: i32) -> (i32, i32) {
    %c0_i32 = arith.constant 0 : i32
    %c0_i32_0 = arith.constant 0 : i32
    %c0_i32_1 = arith.constant 0 : i32
    return %c0_i32, %c0_i32_0 : i32, i32
  }
  func.func @transform_8(%arg0: i32) -> (i32, i32) {
    %c0_i32 = arith.constant 0 : i32
    %c0_i32_0 = arith.constant 0 : i32
    %c0_i32_1 = arith.constant 0 : i32
    return %c0_i32, %c0_i32_0 : i32, i32
  }
  func.func @transform_9(%arg0: i32) -> (i32, i32) {
    %c0_i32 = arith.constant 0 : i32
    %c0_i32_0 = arith.constant 0 : i32
    %c0_i32_1 = arith.constant 0 : i32
    return %c0_i32, %c0_i32_0 : i32, i32
  }
  func.func @transform_10(%arg0: i32) -> (i32, i32, i32) {
    %c0_i32 = arith.constant 0 : i32
    %c0_i32_0 = arith.constant 0 : i32
    %c0_i32_1 = arith.constant 0 : i32
    return %arg0, %c0_i32, %c0_i32_0 : i32, i32, i32
  }
}

</mosaic_0001>

<bundles_post_ra>
// kernel: efficientnet_backbone_forward.1
= control target key start
LH: loop header
LB: loop body
LE: loop exit
PB: predicated region body
PF: predicated region fallthrough
CT: control target
= control target key end

     0   :  { %vm134_vm0 = vsmask.f32 3328  ;;  %vm135_vm1 = vsmask.f32 7440  ;;  %s8522_s17 = smov 6   ;;  %s8523_s22 = smov 3   ;;  %s14606_s0 = inlined_call_operand.vmem [shape: bf16[2,9,9,12], index: 0, kind: input, shape index: {}]   ;;  %s14607_s1 = inlined_call_operand.vmem [shape: bf16[27,32], index: 1, kind: input, shape index: {}]   ;;  %s14608_s2 = inlined_call_operand.vmem [shape: f32[1,32], index: 2, kind: input, shape index: {}]   ;;  %s14609_s3 = inlined_call_operand.vmem [shape: f32[1,32], index: 3, kind: input, shape index: {}]   ;;  %s14610_s4 = inlined_call_operand.vmem [shape: f32[9,1,32,1], index: 4, kind: input, shape index: {}]   ;;  %s14611_s5 = inlined_call_operand.vmem [shape: f32[1,32,1], index: 5, kind: input, shape index: {}]   ;;  %s14612_s6 = inlined_call_operand.vmem [shape: f32[1,32,1], index: 6, kind: input, shape index: {}]   ;;  %s14613_s7 = inlined_call_operand.vmem [shape: bf16[32,16], index: 7, kind: input, shape index: {}]   ;;  %s14614_s8 = inlined_call_operand.vmem [shape: f32[1,16], index: 8, kind: input, shape index: {}]   ;;  %s14615_s9 = inlined_call_operand.vmem [shape: f32[1,16], index: 9, kind: input, shape index: {}]   ;;  %s14616_s10 = inlined_call_operand.vmem [shape: f32[2,8,128], index: 10, kind: output, shape index: {}]  }
   0x1   :  { %v106_v0 = vld [vmem:[%s14606_s0 + $0x10] sm:$0xf]  ;;  %v107_v1 = vld [vmem:[%s14606_s0 + $0x14] sm:$0x1]  ;;  %v102_v5 = vld [vmem:[%s14606_s0] sm:$0xf] }
   0x2   :  { %v166_v2 = vshrl.u32 %v106_v0, 16  ;;  %v169_v3 = vshll.u32 %v106_v0, 16  ;;  %v175_v4 = vshll.u32 %v107_v1, 16  ;;  %v103_v6 = vld [vmem:[%s14606_s0 + $0x4] sm:$0x1]  ;;  %v138_v7 = vshrl.u32 %v102_v5, 16  ;;  %vm8621_vm2 = vmor %vm134_vm0, %vm135_vm1 }
   0x3   :  { %v141_v8 = vshll.u32 %v102_v5, 16  ;;  %v108_v9 = vld [vmem:[%s14606_s0 + $0x18] sm:$0xf]  ;;  %v147_v13 = vshll.u32 %v103_v6, 16  ;;  %v109_v14 = vld [vmem:[%s14606_s0 + $0x1c] sm:$0x1] }
   0x4   :  { %v168_v10 = vrot.slane %v166_v2, 4  ;;  %v171_v11 = vrot.slane %v169_v3, 5  ;;  %v177_v12 = vrot.slane %v175_v4, 5  ;;  %v140_v15 = vrot.slane %v138_v7, 4  ;;  %v104_v19 = vld [vmem:[%s14606_s0 + $0x8] sm:$0xf] }
   0x5   :  { %v143_v16 = vrot.slane %v141_v8, 5  ;;  %v180_v17 = vshrl.u32 %v108_v9, 16  ;;  %v183_v18 = vshll.u32 %v108_v9, 16  ;;  %v149_v21 = vrot.slane %v147_v13, 5  ;;  %v105_v23 = vld [vmem:[%s14606_s0 + $0xc] sm:$0x1] }
   0x6   :  { %v172_v20 = vor.u32 %v171_v11, %v168_v10  ;;  %v189_v22 = vshll.u32 %v109_v14, 16  ;;  %v152_v24 = vshrl.u32 %v104_v19, 16  ;;  %v155_v29 = vshll.u32 %v104_v19, 16  ;;  %v112_v30 = vld [vmem:[%s14606_s0 + $0x28] sm:$0xf]  ;;  %s8524_s16 = smov 9  }
   0x7   :  { %v144_v26 = vor.u32 %v143_v16, %v140_v15  ;;  %v182_v27 = vrot.slane %v180_v17, 4  ;;  %v185_v28 = vrot.slane %v183_v18, 5  ;;  %v161_v34 = vshll.u32 %v105_v23, 16  ;;  %v113_v35 = vld [vmem:[%s14606_s0 + $0x2c] sm:$0x1]  ;;  %s8525_s25 = smov 18  }
   0x8   :  { %v173_v31 = vrot.slane %v172_v20, 4  ;;  %v191_v32 = vrot.slane %v189_v22, 5  ;;  %v154_v33 = vrot.slane %v152_v24, 4  ;;  %v157_v38 = vrot.slane %v155_v29, 5  ;;  %v110_v40 = vld [vmem:[%s14606_s0 + $0x20] sm:$0xf] }
   0x9   :  { %v145_v36 = vrot.slane %v144_v26, 4  ;;  %v186_v37 = vor.u32 %v185_v28, %v182_v27  ;;  %v208_v39 = vshrl.u32 %v112_v30, 16  ;;  %v163_v42 = vrot.slane %v161_v34, 5  ;;  %v111_v45 = vld [vmem:[%s14606_s0 + $0x24] sm:$0x1]  ;;  %s8527_s14 = smov 24  }
   0xa   :  { %v178_v41 = vsel %vm8621_vm2, %v173_v31, %v177_v12  ;;  %v211_v43 = vshll.u32 %v112_v30, 16  ;;  %v217_v44 = vshll.u32 %v113_v35, 16  ;;  %v158_v48 = vor.u32 %v157_v38, %v154_v33  ;;  %v116_v50 = vld [vmem:[%s14606_s0 + $0x38] sm:$0xf]  ;;  %v117_v51 = vld [vmem:[%s14606_s0 + $0x3c] sm:$0x1] }
   0xb   :  { %365 = vrot.lane.b32.xlu1 %v178_v41, %s8522_s17  ;;  %v150_v46 = vsel %vm8621_vm2, %v145_v36, %v149_v21  ;;  %v187_v47 = vrot.slane %v186_v37, 4  ;;  %v210_v49 = vrot.slane %v208_v39, 4  ;;  %v194_v54 = vshrl.u32 %v110_v40, 16  ;;  %v114_v56 = vld [vmem:[%s14606_s0 + $0x30] sm:$0xf]  ;;  %s8531_s15 = smov 127  }
   0xc   :  { %361 = vrot.lane.b32.xlu0 %v150_v46, %s8522_s17  ;;  %v213_v52 = vrot.slane %v211_v43, 5  ;;  %v219_v53 = vrot.slane %v217_v44, 5  ;;  %v197_v55 = vshll.u32 %v110_v40, 16  ;;  %v159_v58 = vrot.slane %v158_v48, 4  ;;  %v115_v61 = vld [vmem:[%s14606_s0 + $0x34] sm:$0x1] }
   0xd   :  { %v192_v57 = vsel %vm8621_vm2, %v187_v47, %v191_v32  ;;  %v203_v59 = vshll.u32 %v111_v45, 16  ;;  %v236_v60 = vshrl.u32 %v116_v50, 16  ;;  %v196_v63 = vrot.slane %v194_v54, 4  ;;  %v120_v2 = vld [vmem:[%s14606_s0 + $0x50] sm:$0xf]  ;;  %s8532_s21 = smov 126  }
   0xe   :  { %v214_v62 = vor.u32 %v213_v52, %v210_v49  ;;  %v199_v0 = vrot.slane %v197_v55, 5  ;;  %v239_v1 = vshll.u32 %v116_v50, 16  ;;  %v164_v3 = vsel %vm8621_vm2, %v159_v58, %v163_v42  ;;  %v121_v11 = vld [vmem:[%s14606_s0 + $0x54] sm:$0x1]  ;;  %v118_v16 = vld [vmem:[%s14606_s0 + $0x48] sm:$0xf] }
   0xf   :  { %367 = vrot.lane.b32.xlu1 %v192_v57, %s8522_s17  ;;  %v205_v4 = vrot.slane %v203_v59, 5  ;;  %v238_v5 = vrot.slane %v236_v60, 4  ;;  %v245_v6 = vshll.u32 %v117_v51, 16  ;;  %v222_v10 = vshrl.u32 %v114_v56, 16  ;;  %v119_v21 = vld [vmem:[%s14606_s0 + $0x4c] sm:$0x1] }
  0x10   :  { %363 = vrot.lane.b32.xlu0 %v164_v3, %s8522_s17  ;;  %v215_v7 = vrot.slane %v214_v62, 4  ;;  %v200_v8 = vor.u32 %v199_v0, %v196_v63  ;;  %v241_v9 = vrot.slane %v239_v1, 5  ;;  %v225_v13 = vshll.u32 %v114_v56, 16  ;;  %v124_v27 = vld [vmem:[%s14606_s0 + $0x60] sm:$0xf]  ;;  %s8534_s24 = smov 32  }
  0x11   :  { %v247_v12 = vrot.slane %v245_v6, 5  ;;  %v231_v14 = vshll.u32 %v115_v61, 16  ;;  %v264_v15 = vshrl.u32 %v120_v2, 16  ;;  %v224_v20 = vrot.slane %v222_v10, 4  ;;  %v125_v32 = vld [vmem:[%s14606_s0 + $0x64] sm:$0x1] }
  0x12   :  { %v220_v17 = vsel %vm8621_vm2, %v215_v7, %v219_v53  ;;  %v201_v18 = vrot.slane %v200_v8, 4  ;;  %v242_v19 = vor.u32 %v241_v9, %v238_v5  ;;  %v227_v22 = vrot.slane %v225_v13, 5  ;;  %v122_v37 = vld [vmem:[%s14606_s0 + $0x58] sm:$0xf]  ;;  %v123_v46 = vld [vmem:[%s14606_s0 + $0x5c] sm:$0x1] }
  0x13   :  { %371 = vrot.lane.b32.xlu1 %v220_v17, %s8522_s17  ;;  %v233_v23 = vrot.slane %v231_v14, 5  ;;  %v266_v24 = vrot.slane %v264_v15, 4  ;;  %v267_v26 = vshll.u32 %v120_v2, 16  ;;  %v273_v30 = vshll.u32 %v121_v11, 16  ;;  %v128_v51 = vld [vmem:[%s14606_s0 + $0x70] sm:$0xf] }
  0x14   :  { %v206_v28 = vsel %vm8621_vm2, %v201_v18, %v205_v4  ;;  %v243_v29 = vrot.slane %v242_v19, 4  ;;  %v250_v31 = vshrl.u32 %v118_v16, 16  ;;  %v228_v33 = vor.u32 %v227_v22, %v224_v20  ;;  %v129_v56 = vld [vmem:[%s14606_s0 + $0x74] sm:$0x1]  ;;  %v126_v61 = vld [vmem:[%s14606_s0 + $0x68] sm:$0xf] }
  0x15   :  { %369 = vrot.lane.b32.xlu0 %v206_v28, %s8522_s17  ;;  %v269_v34 = vrot.slane %v267_v26, 5  ;;  %v253_v35 = vshll.u32 %v118_v16, 16  ;;  %v259_v36 = vshll.u32 %v119_v21, 16  ;;  %v275_v39 = vrot.slane %v273_v30, 5  ;;  %v127_v2 = vld [vmem:[%s14606_s0 + $0x6c] sm:$0x1] }
  0x16   :  { %v248_v38 = vsel %vm8621_vm2, %v243_v29, %v247_v12  ;;  %v252_v40 = vrot.slane %v250_v31, 4  ;;  %v292_v41 = vshrl.u32 %v124_v27, 16  ;;  %v229_v42 = vrot.slane %v228_v33, 4  ;;  %v132_v7 = vld [vmem:[%s14606_s0 + $0x80] sm:$0xf]  ;;  %s8537_s11 = smov 80  }
  0x17   :  { %375 = vrot.lane.b32.xlu1 %v248_v38, %s8522_s17  ;;  %v270_v43 = vor.u32 %v269_v34, %v266_v24  ;;  %v255_v44 = vrot.slane %v253_v35, 5  ;;  %v261_v45 = vrot.slane %v259_v36, 5  ;;  %v295_v48 = vshll.u32 %v124_v27, 16  ;;  %v133_v16 = vld [vmem:[%s14606_s0 + $0x84] sm:$0x1]  ;;  %s8538_s12 = smov 96  }
  0x18   :  { %v294_v47 = vrot.slane %v292_v41, 4  ;;  %v301_v49 = vshll.u32 %v125_v32, 16  ;;  %v278_v50 = vshrl.u32 %v122_v37, 16  ;;  %v234_v52 = vsel %vm8621_vm2, %v229_v42, %v233_v23  ;;  %v130_v21 = vld [vmem:[%s14606_s0 + $0x78] sm:$0xf] }
  0x19   :  { %v271_v53 = vrot.slane %v270_v43, 4  ;;  %v256_v54 = vor.u32 %v255_v44, %v252_v40  ;;  %v281_v55 = vshll.u32 %v122_v37, 16  ;;  %373 = vrot.lane.b32.xlu0 %v234_v52, %s8522_s17  ;;  %v297_v57 = vrot.slane %v295_v48, 5  ;;  %v131_v27 = vld [vmem:[%s14606_s0 + $0x7c] sm:$0x1] }
  0x1a   :  { %v303_v58 = vrot.slane %v301_v49, 5  ;;  %v280_v59 = vrot.slane %v278_v50, 4  ;;  %v287_v60 = vshll.u32 %v123_v46, 16  ;;  %v320_v1 = vshrl.u32 %v128_v51, 16  ;;  %v427_v50 = vld [vmem:[%s14606_s0 + $0x8] sm:$0xf] }
  0x1b   :  { %v276_v62 = vsel %vm8621_vm2, %v271_v53, %v275_v39  ;;  %v257_v63 = vrot.slane %v256_v54, 4  ;;  %v283_v0 = vrot.slane %v281_v55, 5  ;;  %v298_v3 = vor.u32 %v297_v57, %v294_v47  ;;  %v426_v52 = vld [vmem:[%s14606_s0] sm:$0xf]  ;;  %v429_v53 = vld [vmem:[%s14606_s0 + $0x18] sm:$0xf] }
  0x1c   :  { %379 = vrot.lane.b32.xlu1 %v276_v62, %s8522_s17  ;;  %v289_v4 = vrot.slane %v287_v60, 5  ;;  %v323_v5 = vshll.u32 %v128_v51, 16  ;;  %v329_v6 = vshll.u32 %v129_v56, 16  ;;  %v322_v10 = vrot.slane %v320_v1, 4  ;;  %v428_v54 = vld [vmem:[%s14606_s0 + $0x10] sm:$0xf] }
  0x1d   :  { %v262_v8 = vsel %vm8621_vm2, %v257_v63, %v261_v45  ;;  %v284_v9 = vor.u32 %v283_v0, %v280_v59  ;;  %v306_v11 = vshrl.u32 %v126_v61, 16  ;;  %v299_v12 = vrot.slane %v298_v3, 4  ;;  %v431_v55 = vld [vmem:[%s14606_s0 + $0x28] sm:$0xf]  ;;  %v430_v56 = vld [vmem:[%s14606_s0 + $0x20] sm:$0xf] }
  0x1e   :  { %377 = vrot.lane.b32.xlu0 %v262_v8, %s8522_s17  ;;  %v325_v13 = vrot.slane %v323_v5, 5  ;;  %v331_v14 = vrot.slane %v329_v6, 5  ;;  %v309_v15 = vshll.u32 %v126_v61, 16  ;;  %v315_v19 = vshll.u32 %v127_v2, 16  ;;  %v433_v57 = vld [vmem:[%s14606_s0 + $0x38] sm:$0xf] }
  0x1f   :  { %v285_v17 = vrot.slane %v284_v9, 4  ;;  %v308_v18 = vrot.slane %v306_v11, 4  ;;  %v348_v20 = vshrl.u32 %v132_v7, 16  ;;  %v304_v22 = vsel %vm8621_vm2, %v299_v12, %v303_v58  ;;  %v432_v58 = vld [vmem:[%s14606_s0 + $0x30] sm:$0xf] }
  0x20   :  { %v326_v23 = vor.u32 %v325_v13, %v322_v10  ;;  %v311_v24 = vrot.slane %v309_v15, 5  ;;  %v351_v26 = vshll.u32 %v132_v7, 16  ;;  %383 = vrot.lane.b32.xlu1 %v304_v22, %s8522_s17  ;;  %v317_v29 = vrot.slane %v315_v19, 5  ;;  %v435_v59 = vld [vmem:[%s14606_s0 + $0x50] sm:$0xf] }
  0x21   :  { %v290_v28 = vsel %vm8621_vm2, %v285_v17, %v289_v4  ;;  %v350_v30 = vrot.slane %v348_v20, 4  ;;  %v357_v31 = vshll.u32 %v133_v16, 16  ;;  %v334_v35 = vshrl.u32 %v130_v21, 16  ;;  %v38_v60 = vld [vmem:[%s14606_s0 + $0x10] sm:$0xf] }
  0x22   :  { %381 = vrot.lane.b32.xlu0 %v290_v28, %s8522_s17  ;;  %v327_v32 = vrot.slane %v326_v23, 4  ;;  %v312_v33 = vor.u32 %v311_v24, %v308_v18  ;;  %v353_v34 = vrot.slane %v351_v26, 5  ;;  %v337_v37 = vshll.u32 %v130_v21, 16  ;;  %v434_v61 = vld [vmem:[%s14606_s0 + $0x48] sm:$0xf] }
  0x23   :  { %v359_v36 = vrot.slane %v357_v31, 5  ;;  %v343_v38 = vshll.u32 %v131_v27, 16  ;;  %v336_v42 = vrot.slane %v334_v35, 4  ;;  %vm52_vm3 = vcmask 19456   ;;  %v71_v62 = vld [vmem:[%s14606_s0 + $0x10] sm:$0xf] }
  0x24   :  { %v332_v39 = vsel %vm8621_vm2, %v327_v32, %v331_v14  ;;  %v313_v40 = vrot.slane %v312_v33, 4  ;;  %v354_v41 = vor.u32 %v353_v34, %v350_v30  ;;  %v339_v43 = vrot.slane %v337_v37, 5  ;;  %55 = vst.msk [vmem:[#allocation2 + $0x8] sm:$0xf] %vm52_vm3, %v38_v60  ;;  %v437_v63 = vld [vmem:[%s14606_s0 + $0x60] sm:$0xf] }
  0x25   :  { %387 = vrot.lane.b32.xlu1 %v332_v39, %s8522_s17  ;;  %v345_v47 = vrot.slane %v343_v38, 5  ;;  %vm85_vm4 = vcmask 44056   ;;  %v36_v0 = vld [vmem:[%s14606_s0] sm:$0xf]  ;;  %v436_v2 = vld [vmem:[%s14606_s0 + $0x58] sm:$0xf] }
  0x26   :  { %v318_v44 = vsel %vm8621_vm2, %v313_v40, %v317_v29  ;;  %v355_v45 = vrot.slane %v354_v41, 4  ;;  %v340_v46 = vor.u32 %v339_v43, %v336_v42  ;;  %88 = vst.msk [vmem:[#allocation2 + $0x8] sm:$0xf] %vm85_vm4, %v71_v62  ;;  %v69_v1 = vld [vmem:[%s14606_s0] sm:$0xf]  ;;  %vm409_vm5 = vcmask 68656  }
  0x27   :  { %385 = vrot.lane.b32.xlu0 %v318_v44, %s8522_s17  ;;  %53 = vst.msk [vmem:[#allocation2] sm:$0xf] %vm52_vm3, %v36_v0  ;;  %v439_v3 = vld [vmem:[%s14606_s0 + $0x70] sm:$0xf]  ;;  %v39_v4 = vld [vmem:[%s14606_s0 + $0x18] sm:$0xf] }
  0x28   :  { %v360_v48 = vsel %vm8621_vm2, %v355_v45, %v359_v36  ;;  %v341_v49 = vrot.slane %v340_v46, 4  ;;  %86 = vst.msk [vmem:[#allocation2] sm:$0xf] %vm85_vm4, %v69_v1  ;;  %v72_v5 = vld [vmem:[%s14606_s0 + $0x18] sm:$0xf]  ;;  %vm506_vm6 = vcmask 93256  }
  0x29   :  { %391 = vrot.lane.b32.xlu1 %v360_v48, %s8522_s17  ;;  %v438_v6 = vld [vmem:[%s14606_s0 + $0x68] sm:$0xf]  ;;  %56 = vst.msk [vmem:[#allocation2 + $0xc] sm:$0xf] %vm52_vm3, %v39_v4  ;;  %v441_v8 = vld [vmem:[%s14606_s0 + $0x80] sm:$0xf] }
  0x2a   :  { %v346_v51 = vsel %vm8621_vm2, %v341_v49, %v345_v47  ;;  %v37_v7 = vld [vmem:[%s14606_s0 + $0x8] sm:$0xf]  ;;  %89 = vst.msk [vmem:[#allocation2 + $0xc] sm:$0xf] %vm85_vm4, %v72_v5  ;;  %v440_v10 = vld [vmem:[%s14606_s0 + $0x78] sm:$0xf] }
  0x2b   :  { %389 = vrot.lane.b32.xlu0 %v346_v51, %s8522_s17  ;;  %54 = vst.msk [vmem:[#allocation2 + $0x4] sm:$0xf] %vm52_vm3, %v37_v7  ;;  %v70_v9 = vld [vmem:[%s14606_s0 + $0x8] sm:$0xf]  ;;  %v40_v14 = vld [vmem:[%s14606_s0 + $0x20] sm:$0xf] }
  0x2c   :  { %87 = vst.msk [vmem:[#allocation2 + $0x4] sm:$0xf] %vm85_vm4, %v70_v9  ;;  %v41_v11 = vld [vmem:[%s14606_s0 + $0x28] sm:$0xf]  ;;  %v73_v15 = vld [vmem:[%s14606_s0 + $0x20] sm:$0xf] }
  0x2d   :  { %460 = vrot.lane.b32.xlu1 %v427_v50, %s8523_s22  ;;  %v524_v12 = vld [vmem:[%s14606_s0 + $0x8] sm:$0xf]  ;;  %58 = vst.msk [vmem:[#allocation2 + $0x14] sm:$0xf] %vm52_vm3, %v41_v11  ;;  %57 = vst.msk [vmem:[#allocation2 + $0x10] sm:$0xf] %vm52_vm3, %v40_v14 }
  0x2e   :  { %v74_v13 = vld [vmem:[%s14606_s0 + $0x28] sm:$0xf]  ;;  %v523_v16 = vld [vmem:[%s14606_s0] sm:$0xf]  ;;  %90 = vst.msk [vmem:[#allocation2 + $0x10] sm:$0xf] %vm85_vm4, %v73_v15 }
  0x2f   :  { %458 = vrot.lane.b32.xlu0 %v426_v52, %s8523_s22  ;;  %91 = vst.msk [vmem:[#allocation2 + $0x14] sm:$0xf] %vm85_vm4, %v74_v13  ;;  %v526_v17 = vld [vmem:[%s14606_s0 + $0x18] sm:$0xf]  ;;  %v525_v20 = vld [vmem:[%s14606_s0 + $0x10] sm:$0xf] }
  0x30   :  { %v43_v18 = vld [vmem:[%s14606_s0 + $0x38] sm:$0xf]  ;;  %v42_v21 = vld [vmem:[%s14606_s0 + $0x30] sm:$0xf]  ;;  %v528_v23 = vld [vmem:[%s14606_s0 + $0x28] sm:$0xf] }
  0x31   :  { %464 = vrot.lane.b32.xlu1 %v429_v53, %s8523_s22  ;;  %60 = vst.msk [vmem:[#allocation2 + $0x1c] sm:$0xf] %vm52_vm3, %v43_v18  ;;  %v76_v19 = vld [vmem:[%s14606_s0 + $0x38] sm:$0xf]  ;;  %v75_v22 = vld [vmem:[%s14606_s0 + $0x30] sm:$0xf] }
  0x32   :  { %93 = vst.msk [vmem:[#allocation2 + $0x1c] sm:$0xf] %vm85_vm4, %v76_v19  ;;  %v45_v24 = vld [vmem:[%s14606_s0 + $0x50] sm:$0xf]  ;;  %v622_v26 = vld [vmem:[%s14606_s0 + $0x8] sm:$0xf] }
  0x33   :  { %462 = vrot.lane.b32.xlu0 %v428_v54, %s8523_s22  ;;  %59 = vst.msk [vmem:[#allocation2 + $0x18] sm:$0xf] %vm52_vm3, %v42_v21  ;;  %62 = vst.msk [vmem:[#allocation2 + $0x24] sm:$0xf] %vm52_vm3, %v45_v24  ;;  %v78_v27 = vld [vmem:[%s14606_s0 + $0x50] sm:$0xf] }
  0x34   :  { %92 = vst.msk [vmem:[#allocation2 + $0x18] sm:$0xf] %vm85_vm4, %v75_v22  ;;  %v44_v28 = vld [vmem:[%s14606_s0 + $0x48] sm:$0xf]  ;;  %v527_v29 = vld [vmem:[%s14606_s0 + $0x20] sm:$0xf] }
  0x35   :  { %468 = vrot.lane.b32.xlu1 %v431_v55, %s8523_s22  ;;  %v620_v30 = vld [vmem:[%s14606_s0] sm:$0xf]  ;;  %95 = vst.msk [vmem:[#allocation2 + $0x24] sm:$0xf] %vm85_vm4, %v78_v27  ;;  %v77_v31 = vld [vmem:[%s14606_s0 + $0x48] sm:$0xf] }
  0x36   :  { %61 = vst.msk [vmem:[#allocation2 + $0x20] sm:$0xf] %vm52_vm3, %v44_v28  ;;  %v530_v32 = vld [vmem:[%s14606_s0 + $0x38] sm:$0xf]  ;;  %v47_v33 = vld [vmem:[%s14606_s0 + $0x60] sm:$0xf] }
  0x37   :  { %466 = vrot.lane.b32.xlu0 %v430_v56, %s8523_s22  ;;  %94 = vst.msk [vmem:[#allocation2 + $0x20] sm:$0xf] %vm85_vm4, %v77_v31  ;;  %v80_v34 = vld [vmem:[%s14606_s0 + $0x60] sm:$0xf]  ;;  %v667_v35 = vshrl.u32 %v622_v26, 16  ;;  %v670_v36 = vshll.u32 %v622_v26, 16 }
  0x38   :  { %64 = vst.msk [vmem:[#allocation2 + $0x2c] sm:$0xf] %vm52_vm3, %v47_v33  ;;  %v46_v37 = vld [vmem:[%s14606_s0 + $0x58] sm:$0xf]  ;;  %v653_v39 = vshrl.u32 %v620_v30, 16  ;;  %v656_v40 = vshll.u32 %v620_v30, 16 }
  0x39   :  { %472 = vrot.lane.b32.xlu1 %v433_v57, %s8523_s22  ;;  %v79_v38 = vld [vmem:[%s14606_s0 + $0x58] sm:$0xf]  ;;  %97 = vst.msk [vmem:[#allocation2 + $0x2c] sm:$0xf] %vm85_vm4, %v80_v34  ;;  %v49_v41 = vld [vmem:[%s14606_s0 + $0x70] sm:$0xf] }
  0x3a   :  { %63 = vst.msk [vmem:[#allocation2 + $0x28] sm:$0xf] %vm52_vm3, %v46_v37  ;;  %v82_v42 = vld [vmem:[%s14606_s0 + $0x70] sm:$0xf]  ;;  %66 = vst.msk [vmem:[#allocation2 + $0x34] sm:$0xf] %vm52_vm3, %v49_v41 }
  0x3b   :  { %470 = vrot.lane.b32.xlu0 %v432_v58, %s8523_s22  ;;  %v529_v43 = vld [vmem:[%s14606_s0 + $0x30] sm:$0xf]  ;;  %96 = vst.msk [vmem:[#allocation2 + $0x28] sm:$0xf] %vm85_vm4, %v79_v38  ;;  %v48_v44 = vld [vmem:[%s14606_s0 + $0x68] sm:$0xf] }
  0x3c   :  { %v81_v45 = vld [vmem:[%s14606_s0 + $0x68] sm:$0xf]  ;;  %v626_v46 = vld [vmem:[%s14606_s0 + $0x18] sm:$0xf]  ;;  %99 = vst.msk [vmem:[#allocation2 + $0x34] sm:$0xf] %vm85_vm4, %v82_v42 }
  0x3d   :  { %476 = vrot.lane.b32.xlu1 %v435_v59, %s8523_s22  ;;  %65 = vst.msk [vmem:[#allocation2 + $0x30] sm:$0xf] %vm52_vm3, %v48_v44  ;;  %v51_v47 = vld [vmem:[%s14606_s0 + $0x80] sm:$0xf]  ;;  %v532_v49 = vld [vmem:[%s14606_s0 + $0x50] sm:$0xf] }
  0x3e   :  { %v84_v48 = vld [vmem:[%s14606_s0 + $0x80] sm:$0xf]  ;;  %98 = vst.msk [vmem:[#allocation2 + $0x30] sm:$0xf] %vm85_vm4, %v81_v45  ;;  %v50_v50 = vld [vmem:[%s14606_s0 + $0x78] sm:$0xf] }
  0x3f   :  { %474 = vrot.lane.b32.xlu0 %v434_v61, %s8523_s22  ;;  %68 = vst.msk [vmem:[#allocation2 + $0x3c] sm:$0xf] %vm52_vm3, %v51_v47  ;;  %v83_v51 = vld [vmem:[%s14606_s0 + $0x78] sm:$0xf]  ;;  %v669_v52 = vrot.slane %v667_v35, 4  ;;  %v672_v53 = vrot.slane %v670_v36, 5 }
  0x40   :  { %v655_v54 = vrot.slane %v653_v39, 4  ;;  %v658_v55 = vrot.slane %v656_v40, 5  ;;  %v624_v56 = vld [vmem:[%s14606_s0 + $0x10] sm:$0xf]  ;;  %101 = vst.msk [vmem:[#allocation2 + $0x3c] sm:$0xf] %vm85_vm4, %v84_v48 }
  0x41   :  { %480 = vrot.lane.b32.xlu1 %v437_v63, %s8523_s22  ;;  %67 = vst.msk [vmem:[#allocation2 + $0x38] sm:$0xf] %vm52_vm3, %v50_v50  ;;  %v623_v57 = vld [vmem:[%s14606_s0 + $0xc] sm:$0x1]  ;;  %v621_v58 = vld [vmem:[%s14606_s0 + $0x4] sm:$0x1] }
  0x42   :  { %v695_v59 = vshrl.u32 %v626_v46, 16  ;;  %v698_v60 = vshll.u32 %v626_v46, 16  ;;  %100 = vst.msk [vmem:[#allocation2 + $0x38] sm:$0xf] %vm85_vm4, %v83_v51  ;;  %v531_v61 = vld [vmem:[%s14606_s0 + $0x48] sm:$0xf]  ;;  %v659_v5 = vor.u32 %v658_v55, %v655_v54 }
  0x43   :  { %478 = vrot.lane.b32.xlu0 %v436_v2, %s8523_s22  ;;  %v630_v62 = vld [vmem:[%s14606_s0 + $0x28] sm:$0xf]  ;;  %v534_v63 = vld [vmem:[%s14606_s0 + $0x60] sm:$0xf]  ;;  %v627_v0 = vld [vmem:[%s14606_s0 + $0x1c] sm:$0x1] }
  0x44   :  { %v681_v1 = vshrl.u32 %v624_v56, 16  ;;  %v684_v2 = vshll.u32 %v624_v56, 16  ;;  %v676_v4 = vshll.u32 %v623_v57, 16  ;;  %v697_v7 = vrot.slane %v695_v59, 4  ;;  %v625_v9 = vld [vmem:[%s14606_s0 + $0x14] sm:$0x1] }
  0x45   :  { %484 = vrot.lane.b32.xlu1 %v439_v3, %s8523_s22  ;;  %v673_v3 = vor.u32 %v672_v53, %v669_v52  ;;  %v726_v11 = vshll.u32 %v630_v62, 16  ;;  %v536_v13 = vld [vmem:[%s14606_s0 + $0x70] sm:$0xf]  ;;  %v704_v14 = vshll.u32 %v627_v0, 16  ;;  %v634_v18 = vld [vmem:[%s14606_s0 + $0x38] sm:$0xf] }
  0x46   :  { %v683_v15 = vrot.slane %v681_v1, 4  ;;  %v535_v19 = vld [vmem:[%s14606_s0 + $0x68] sm:$0xf]  ;;  %v678_v21 = vrot.slane %v676_v4, 5  ;;  %v632_v24 = vld [vmem:[%s14606_s0 + $0x30] sm:$0xf] }
  0x47   :  { %482 = vrot.lane.b32.xlu0 %v438_v6, %s8523_s22  ;;  %v662_v6 = vshll.u32 %v621_v58, 16  ;;  %v9029_v26 = vrot.slane %v659_v5, 4  ;;  %v638_v30 = vld [vmem:[%s14606_s0 + $0x50] sm:$0xf]  ;;  %v631_v31 = vld [vmem:[%s14606_s0 + $0x2c] sm:$0x1] }
  0x48   :  { %v751_v34 = vshrl.u32 %v634_v18, 16  ;;  %v754_v35 = vshll.u32 %v634_v18, 16  ;;  %v538_v36 = vld [vmem:[%s14606_s0 + $0x80] sm:$0xf]  ;;  %v706_v37 = vrot.slane %v704_v14, 5  ;;  %v737_v39 = vshrl.u32 %v632_v24, 16 }
  0x49   :  { %488 = vrot.lane.b32.xlu1 %v441_v8, %s8523_s22  ;;  %v700_v8 = vrot.slane %v698_v60, 5  ;;  %v9023_v22 = vrot.slane %v662_v6, 5  ;;  %v740_v40 = vshll.u32 %v632_v24, 16  ;;  %v537_v41 = vld [vmem:[%s14606_s0 + $0x78] sm:$0xf]  ;;  %v779_v45 = vshrl.u32 %v638_v30, 16 }
  0x4a   :  { %v629_v44 = vld [vmem:[%s14606_s0 + $0x24] sm:$0x1]  ;;  %v782_v46 = vshll.u32 %v638_v30, 16  ;;  %v732_v50 = vshll.u32 %v631_v31, 16  ;;  %v635_v51 = vld [vmem:[%s14606_s0 + $0x3c] sm:$0x1] }
  0x4b   :  { %486 = vrot.lane.b32.xlu0 %v440_v10, %s8523_s22  ;;  %v723_v10 = vshrl.u32 %v630_v62, 16  ;;  %v701_v27 = vor.u32 %v700_v8, %v697_v7  ;;  %v665_v47 = vsel %vm8621_vm2, %v9029_v26, %v9023_v22  ;;  %v636_v52 = vld [vmem:[%s14606_s0 + $0x48] sm:$0xf]  ;;  %v753_v55 = vrot.slane %v751_v34, 4  ;;  %v642_v57 = vld [vmem:[%s14606_s0 + $0x60] sm:$0xf] }
  0x4c   :  { %v756_v56 = vrot.slane %v754_v35, 5  ;;  %v718_v59 = vshll.u32 %v629_v44, 16  ;;  %v633_v60 = vld [vmem:[%s14606_s0 + $0x34] sm:$0x1]  ;;  %v742_v62 = vrot.slane %v740_v40, 5  ;;  %v781_v0 = vrot.slane %v779_v45, 4 }
  0x4d   :  { %557 = vrot.lane.b32.xlu1 %v524_v12, %s8523_s22  ;;  %v533_v12 = vld [vmem:[%s14606_s0 + $0x58] sm:$0xf]  ;;  %v725_v28 = vrot.slane %v723_v10, 4  ;;  %v702_v48 = vrot.slane %v701_v27, 4  ;;  %v784_v1 = vrot.slane %v782_v46, 5  ;;  %v734_v5 = vrot.slane %v732_v50, 5 }
  0x4e   :  { %v807_v6 = vshrl.u32 %v642_v57, 16  ;;  %v810_v7 = vshll.u32 %v642_v57, 16  ;;  %v757_v10 = vor.u32 %v756_v56, %v753_v55  ;;  %v720_v14 = vrot.slane %v718_v59, 5  ;;  %v646_v22 = vld [vmem:[%s14606_s0 + $0x70] sm:$0xf] }
  0x4f   :  { %555 = vrot.lane.b32.xlu0 %v523_v16, %s8523_s22  ;;  %v686_v16 = vrot.slane %v684_v2, 5  ;;  %v765_v2 = vshrl.u32 %v636_v52, 16  ;;  %v707_v4 = vsel %vm8621_vm2, %v702_v48, %v706_v37  ;;  %v785_v18 = vor.u32 %v784_v1, %v781_v0  ;;  %v644_v37 = vld [vmem:[%s14606_s0 + $0x68] sm:$0xf]  ;;  %v641_v45 = vld [vmem:[%s14606_s0 + $0x5c] sm:$0x1] }
  0x50   :  { %v809_v24 = vrot.slane %v807_v6, 4  ;;  %v812_v26 = vrot.slane %v810_v7, 5  ;;  %v758_v31 = vrot.slane %v757_v10, 4  ;;  %v835_v35 = vshrl.u32 %v646_v22, 16  ;;  %v648_v56 = vld [vmem:[%s14606_s0 + $0x78] sm:$0xf] }
  0x51   :  { %561 = vrot.lane.b32.xlu1 %v526_v17, %s8523_s22  ;;  %v628_v17 = vld [vmem:[%s14606_s0 + $0x20] sm:$0xf]  ;;  %v687_v38 = vor.u32 %v686_v16, %v683_v15  ;;  %v746_v15 = vshll.u32 %v633_v60, 16  ;;  %v821_v50 = vshrl.u32 %v644_v37, 16  ;;  %v802_v60 = vshll.u32 %v641_v45, 16 }
  0x52   :  { %v712_v33 = vshll.u32 %v628_v17, 16  ;;  %v813_v44 = vor.u32 %v812_v26, %v809_v24  ;;  %v852_v6 = vshll.u32 %v648_v56, 16  ;;  %vm603_vm7 = vcmask 117856  }
  0x53   :  { %559 = vrot.lane.b32.xlu0 %v525_v20, %s8523_s22  ;;  %v674_v20 = vrot.slane %v673_v3, 4  ;;  %v688_v58 = vrot.slane %v687_v38, 4  ;;  %v768_v3 = vshll.u32 %v636_v52, 16  ;;  %v837_v52 = vrot.slane %v835_v35, 4 }
  0x54   :  { %v714_v54 = vrot.slane %v712_v33, 5  ;;  %v748_v33 = vrot.slane %v746_v15, 5  ;;  %v814_v0 = vrot.slane %v813_v44, 4  ;;  %vm1553_vm8 = vcmask 1044480  }
  0x55   :  { %565 = vrot.lane.b32.xlu1 %v528_v23, %s8523_s22  ;;  %v690_v23 = vshll.u32 %v625_v9, 16  ;;  %v679_v42 = vsel %vm8621_vm2, %v674_v20, %v678_v21  ;;  %v767_v20 = vrot.slane %v765_v2, 4  ;;  %v770_v21 = vrot.slane %v768_v3, 5  ;;  %v645_v2 = vld [vmem:[%s14606_s0 + $0x6c] sm:$0x1] }
  0x56   :  { %v823_v3 = vrot.slane %v821_v50, 4  ;;  %v830_v15 = vshll.u32 %v645_v2, 16  ;;  %v7535_v50 = vld [vmem:[%s14606_s0 + $0x20] sm:$0xf]  ;;  %vm1554_vm9 = vcmask 1045504   ;;  %vm924_vm10 = vcmask 142456  }
  0x57   :  { %563 = vrot.lane.b32.xlu0 %v527_v29, %s8523_s22  ;;  %v728_v29 = vrot.slane %v726_v11, 5  ;;  %v760_v11 = vshll.u32 %v635_v51, 16  ;;  %v771_v40 = vor.u32 %v770_v21, %v767_v20  ;;  %v824_v51 = vshll.u32 %v644_v37, 16 }
  0x58   :  { %v854_v20 = vrot.slane %v852_v6, 5  ;;  %vm1022_vm11 = vcmask 167056   ;;  %vm1119_vm12 = vcmask 191656   ;;  %vm1440_vm13 = vcmask 216256  }
  0x59   :  { %569 = vrot.lane.b32.xlu1 %v530_v32, %s8523_s22  ;;  %v709_v32 = vshrl.u32 %v628_v17, 16  ;;  %vm1528_vm14 = vcmask 220160   ;;  %vm1834_vm15 = vcmask 7168   ;;  %vm1899_vm0 = vcmask 80968  }
  0x5a   :  { %vm2732_vm1 = vcmask 72712   ;;  %vm6998_vm3 = vcmask 261120   ;;  %vm7282_vm4 = vcmask 1042434  }
  0x5b   :  { %567 = vrot.lane.b32.xlu0 %v529_v43, %s8523_s22  ;;  %v9046_v43 = vrot.slane %v690_v23, 5  ;;  %v711_v53 = vrot.slane %v709_v32, 4  ;;  %v643_v23 = vld [vmem:[%s14606_s0 + $0x64] sm:$0x1]  ;;  %v762_v32 = vrot.slane %v760_v11, 5 }
  0x5c   :  { %v651_v11 = vld [vmem:[%s14606_s0 + $0x84] sm:$0x1] }
  0x5d   :  { %573 = vrot.lane.b32.xlu1 %v532_v49, %s8523_s22  ;;  %v729_v49 = vor.u32 %v728_v29, %v725_v28  ;;  %v715_v9 = vor.u32 %v714_v54, %v711_v53  ;;  %v872_v26 = vshll.u32 %v651_v11, 16  ;;  %v7546_v11 = vld [vmem:[%s14606_s0 + $0x80] sm:$0xf] }
  0x5f   :  { %571 = vrot.lane.b32.xlu0 %v531_v61, %s8523_s22  ;;  %v739_v61 = vrot.slane %v737_v39, 4  ;;  %v730_v8 = vrot.slane %v729_v49, 4  ;;  %v716_v30 = vrot.slane %v715_v9, 4  ;;  %v763_v49 = vsel %vm8621_vm2, %v758_v31, %v762_v32 }
  0x60   :  { %v832_v31 = vrot.slane %v830_v15, 5  ;;  %v874_v37 = vrot.slane %v872_v26, 5  ;;  %v7548_v15 = vld [vmem:[%s14606_s0 + $0x8] sm:$0xf]  ;;  %v7570_v26 = vld [vmem:[%s14606_s0 + $0x20] sm:$0xf] }
  0x61   :  { %577 = vrot.lane.b32.xlu1 %v534_v63, %s8523_s22  ;;  %v639_v63 = vld [vmem:[%s14606_s0 + $0x54] sm:$0x1]  ;;  %v743_v17 = vor.u32 %v742_v62, %v739_v61  ;;  %v735_v29 = vsel %vm8621_vm2, %v730_v8, %v734_v5  ;;  %v721_v48 = vsel %vm8621_vm2, %v716_v30, %v720_v14  ;;  %v849_v5 = vshrl.u32 %v648_v56, 16  ;;  %v7536_v56 = vld [vmem:[%s14606_s0 + $0x28] sm:$0xf] }
  0x62   :  { %v788_v16 = vshll.u32 %v639_v63, 16  ;;  %v647_v61 = vld [vmem:[%s14606_s0 + $0x74] sm:$0x1]  ;;  %v772_v63 = vrot.slane %v771_v40, 4  ;;  %v804_v14 = vrot.slane %v802_v60, 5 }
  0x63   :  { %575 = vrot.lane.b32.xlu0 %v533_v12, %s8523_s22  ;;  %v640_v12 = vld [vmem:[%s14606_s0 + $0x58] sm:$0xf]  ;;  %v744_v38 = vrot.slane %v743_v17, 4  ;;  %v844_v8 = vshll.u32 %v647_v61, 16 }
  0x64   :  { %v793_v27 = vshrl.u32 %v640_v12, 16  ;;  %v796_v28 = vshll.u32 %v640_v12, 16  ;;  %v790_v39 = vrot.slane %v788_v16, 5  ;;  %v7538_v60 = vld [vmem:[%s14606_s0 + $0x38] sm:$0xf] }
  0x65   :  { %581 = vrot.lane.b32.xlu1 %v536_v13, %s8523_s22  ;;  %v693_v13 = vsel %vm8621_vm2, %v688_v58, %v9046_v43  ;;  %v786_v43 = vrot.slane %v785_v18, 4  ;;  %v749_v57 = vsel %vm8621_vm2, %v744_v38, %v748_v33  ;;  %v7541_v61 = vld [vmem:[%s14606_s0 + $0x58] sm:$0xf] }
  0x66   :  { %v795_v46 = vrot.slane %v793_v27, 4  ;;  %v649_v27 = vld [vmem:[%s14606_s0 + $0x7c] sm:$0x1] }
  0x67   :  { %579 = vrot.lane.b32.xlu0 %v535_v19, %s8523_s22  ;;  %v637_v19 = vld [vmem:[%s14606_s0 + $0x4c] sm:$0x1]  ;;  %v791_v62 = vsel %vm8621_vm2, %v786_v43, %v790_v39  ;;  %v858_v33 = vshll.u32 %v649_v27, 16  ;;  %v7552_v27 = vld [vmem:[%s14606_s0 + $0x28] sm:$0xf] }
  0x68   :  { %v774_v34 = vshll.u32 %v637_v19, 16  ;;  %v851_v19 = vrot.slane %v849_v5, 4  ;;  %v7545_v5 = vld [vmem:[%s14606_s0 + $0x78] sm:$0xf] }
  0x69   :  { %585 = vrot.lane.b32.xlu1 %v538_v36, %s8523_s22  ;;  %v838_v36 = vshll.u32 %v646_v22, 16 }
  0x6a   :  { %v776_v58 = vrot.slane %v774_v34, 5  ;;  %v855_v32 = vor.u32 %v854_v20, %v851_v19  ;;  %v7550_v19 = vld [vmem:[%s14606_s0 + $0x18] sm:$0xf] }
  0x6b   :  { %583 = vrot.lane.b32.xlu0 %v537_v41, %s8523_s22  ;;  %v816_v41 = vshll.u32 %v643_v23, 16  ;;  %v840_v53 = vrot.slane %v838_v36, 5  ;;  %v846_v23 = vrot.slane %v844_v8, 5 }
  0x6c   :  { %v777_v12 = vsel %vm8621_vm2, %v772_v63, %v776_v58  ;;  %v856_v40 = vrot.slane %v855_v32, 4  ;;  %v7540_v63 = vld [vmem:[%s14606_s0 + $0x50] sm:$0xf]  ;;  %v7555_v32 = vld [vmem:[%s14606_s0 + $0x40] sm:$0xf] }
  0x6d   :  { %878 = vrot.lane.b32.xlu1 %v679_v42, %s8524_s16  ;;  %v650_v42 = vld [vmem:[%s14606_s0 + $0x80] sm:$0xf]  ;;  %v818_v59 = vrot.slane %v816_v41, 5  ;;  %v841_v7 = vor.u32 %v840_v53, %v837_v52  ;;  %v860_v41 = vrot.slane %v858_v33, 5  ;;  %v7534_v52 = vld [vmem:[%s14606_s0 + $0x18] sm:$0xf] }
  0x6e   :  { %v863_v54 = vshrl.u32 %v650_v42, 16  ;;  %v866_v55 = vshll.u32 %v650_v42, 16  ;;  %v7537_v53 = vld [vmem:[%s14606_s0 + $0x30] sm:$0xf] }
  0x6f   :  { %876 = vrot.lane.b32.xlu0 %v665_v47, %s8524_s16  ;;  %v798_v47 = vrot.slane %v796_v28, 5  ;;  %v819_v17 = vsel %vm8621_vm2, %v814_v0, %v818_v59  ;;  %v842_v22 = vrot.slane %v841_v7, 4  ;;  %v861_v44 = vsel %vm8621_vm2, %v856_v40, %v860_v41  ;;  %v7544_v7 = vld [vmem:[%s14606_s0 + $0x70] sm:$0xf]  ;;  %v7557_v41 = vld [vmem:[%s14606_s0 + $0x58] sm:$0xf] }
  0x70   :  { %v865_v9 = vrot.slane %v863_v54, 4  ;;  %v868_v10 = vrot.slane %v866_v55, 5 }
  0x71   :  { %882 = vrot.lane.b32.xlu1 %v707_v4, %s8524_s16  ;;  %v799_v1 = vor.u32 %v798_v47, %v795_v46  ;;  %v826_v4 = vrot.slane %v824_v51, 5  ;;  %v847_v35 = vsel %vm8621_vm2, %v842_v22, %v846_v23  ;;  %v7533_v46 = vld [vmem:[%s14606_s0 + $0x10] sm:$0xf] }
  0x72   :  { %v869_v24 = vor.u32 %v868_v10, %v865_v9  ;;  %v7547_v9 = vld [vmem:[%s14606_s0 + $0x88] sm:$0xf]  ;;  %v7566_v22 = vld [vmem:[%s14606_s0 + $0x10] sm:$0xf] }
  0x73   :  { %880 = vrot.lane.b32.xlu0 %v693_v13, %s8524_s16  ;;  %v800_v13 = vrot.slane %v799_v1, 4  ;;  %v827_v18 = vor.u32 %v826_v4, %v823_v3  ;;  %v7543_v1 = vld [vmem:[%s14606_s0 + $0x68] sm:$0xf]  ;;  %v7542_v3 = vld [vmem:[%s14606_s0 + $0x60] sm:$0xf] }
  0x74   :  { %v870_v36 = vrot.slane %v869_v24, 4  ;;  %v7564_v24 = vld [vmem:[%s14606_s0 + $0x8] sm:$0xf] }
  0x75   :  { %886 = vrot.lane.b32.xlu1 %v735_v29, %s8524_s16  ;;  %v805_v28 = vsel %vm8621_vm2, %v800_v13, %v804_v14  ;;  %v828_v30 = vrot.slane %v827_v18, 4  ;;  %v7549_v13 = vld [vmem:[%s14606_s0 + $0x10] sm:$0xf]  ;;  %v1169_v33 = vshrl.u32 %v7564_v24, 16 }
  0x76   :  { %v875_v42 = vsel %vm8621_vm2, %v870_v36, %v874_v37  ;;  %v1211_v36 = vshrl.u32 %v7570_v26, 16  ;;  %v1214_v37 = vshll.u32 %v7570_v26, 16 }
  0x77   :  { %884 = vrot.lane.b32.xlu0 %v721_v48, %s8524_s16  ;;  %v833_v38 = vsel %vm8621_vm2, %v828_v30, %v832_v31  ;;  %v7532_v48 = vld [vmem:[%s14606_s0 + $0x8] sm:$0xf]  ;;  %v7568_v30 = vld [vmem:[%s14606_s0 + $0x18] sm:$0xf] }
  0x78   :  { %v1200_v40 = vshll.u32 %v7568_v30, 16 }
  0x79   :  { %890 = vrot.lane.b32.xlu1 %v763_v49, %s8524_s16 }
  0x7b   :  { %888 = vrot.lane.b32.xlu0 %v749_v57, %s8524_s16  ;;  %v7539_v57 = vld [vmem:[%s14606_s0 + $0x40] sm:$0xf] }
  0x7d   :  { %894 = vrot.lane.b32.xlu1 %v791_v62, %s8524_s16  ;;  %v366_v16 = vpop.permute.xlu1 %365 }
  0x7e   :  { %412 = vst.msk [vmem:[#allocation2 + $0x8] sm:$0xf] %vm409_vm5, %v366_v16  ;;  %v362_v21 = vpop.permute.xlu0 %361 }
  0x7f   :  { %410 = vst.msk [vmem:[#allocation2] sm:$0xf] %vm409_vm5, %v362_v21  ;;  %892 = vrot.lane.b32.xlu0 %v777_v12, %s8524_s16  ;;  %v7553_v21 = vld [vmem:[%s14606_s0 + $0x30] sm:$0xf] }
  0x81   :  { %898 = vrot.lane.b32.xlu1 %v819_v17, %s8524_s16  ;;  %v368_v29 = vpop.permute.xlu1 %367  ;;  %v7551_v17 = vld [vmem:[%s14606_s0 + $0x20] sm:$0xf] }
  0x82   :  { %413 = vst.msk [vmem:[#allocation2 + $0xc] sm:$0xf] %vm409_vm5, %v368_v29  ;;  %v364_v34 = vpop.permute.xlu0 %363  ;;  %v1186_v29 = vshll.u32 %v7566_v22, 16 }
  0x83   :  { %411 = vst.msk [vmem:[#allocation2 + $0x4] sm:$0xf] %vm409_vm5, %v364_v34  ;;  %896 = vrot.lane.b32.xlu0 %v805_v28, %s8524_s16  ;;  %v1183_v28 = vshrl.u32 %v7566_v22, 16  ;;  %v1172_v34 = vshll.u32 %v7564_v24, 16 }
  0x85   :  { %902 = vrot.lane.b32.xlu1 %v847_v35, %s8524_s16  ;;  %v372_v39 = vpop.permute.xlu1 %371 }
  0x86   :  { %415 = vst.msk [vmem:[#allocation2 + $0x14] sm:$0xf] %vm409_vm5, %v372_v39  ;;  %v1197_v39 = vshrl.u32 %v7568_v30, 16 }
  0x87   :  { %v370_v43 = vpop.permute.xlu0 %369  ;;  %900 = vrot.lane.b32.xlu0 %v833_v38, %s8524_s16  ;;  %v7554_v38 = vld [vmem:[%s14606_s0 + $0x38] sm:$0xf] }
  0x88   :  { %414 = vst.msk [vmem:[#allocation2 + $0x10] sm:$0xf] %vm409_vm5, %v370_v43  ;;  %v1185_v43 = vrot.slane %v1183_v28, 4 }
  0x89   :  { %906 = vrot.lane.b32.xlu1 %v875_v42, %s8524_s16  ;;  %v376_v45 = vpop.permute.xlu1 %375  ;;  %v7567_v42 = vld [vmem:[%s14606_s0 + $0x14] sm:$0x1] }
  0x8a   :  { %417 = vst.msk [vmem:[#allocation2 + $0x1c] sm:$0xf] %vm409_vm5, %v376_v45 }
  0x8b   :  { %904 = vrot.lane.b32.xlu0 %v861_v44, %s8524_s16  ;;  %v374_v47 = vpop.permute.xlu0 %373  ;;  %v1188_v44 = vrot.slane %v1186_v29, 5  ;;  %v7563_v29 = vld [vmem:[%s14606_s0 + $0x88] sm:$0xf]  ;;  %s8536_s16 = smov 64  }
  0x8c   :  { %416 = vst.msk [vmem:[#allocation2 + $0x18] sm:$0xf] %vm409_vm5, %v374_v47  ;;  %v1171_v47 = vrot.slane %v1169_v33, 4 }
  0x8d   :  { %976 = vrot.lane.b32.xlu1 %v7533_v46, %s8525_s25  ;;  %v7565_v46 = vld [vmem:[%s14606_s0 + $0xc] sm:$0x1] }
  0x8e   :  { %v380_v49 = vpop.permute.xlu1 %379 }
  0x8f   :  { %419 = vst.msk [vmem:[#allocation2 + $0x24] sm:$0xf] %vm409_vm5, %v380_v49  ;;  %974 = vrot.lane.b32.xlu0 %v7532_v48, %s8525_s25  ;;  %v1174_v48 = vrot.slane %v1172_v34, 5  ;;  %v7571_v49 = vld [vmem:[%s14606_s0 + $0x24] sm:$0x1] }
  0x90   :  { %v378_v51 = vpop.permute.xlu0 %377  ;;  %v9385_v34 = vld [vmem:[%s14606_s0 + $0x2c] sm:$0x1] }
  0x91   :  { %418 = vst.msk [vmem:[#allocation2 + $0x20] sm:$0xf] %vm409_vm5, %v378_v51  ;;  %980 = vrot.lane.b32.xlu1 %v7535_v50, %s8525_s25  ;;  %v1213_v51 = vrot.slane %v1211_v36, 4 }
  0x92   :  { %v384_v54 = vpop.permute.xlu1 %383 }
  0x93   :  { %978 = vrot.lane.b32.xlu0 %v7534_v52, %s8525_s25  ;;  %421 = vst.msk [vmem:[#allocation2 + $0x2c] sm:$0xf] %vm409_vm5, %v384_v54  ;;  %v1216_v52 = vrot.slane %v1214_v37, 5  ;;  %v7556_v54 = vld [vmem:[%s14606_s0 + $0x50] sm:$0xf] }
  0x94   :  { %v382_v55 = vpop.permute.xlu0 %381 }
  0x95   :  { %420 = vst.msk [vmem:[#allocation2 + $0x28] sm:$0xf] %vm409_vm5, %v382_v55  ;;  %984 = vrot.lane.b32.xlu1 %v7537_v53, %s8525_s25  ;;  %v7569_v53 = vld [vmem:[%s14606_s0 + $0x1c] sm:$0x1]  ;;  %v1199_v55 = vrot.slane %v1197_v39, 4 }
  0x97   :  { %v388_v58 = vpop.permute.xlu1 %387  ;;  %982 = vrot.lane.b32.xlu0 %v7536_v56, %s8525_s25  ;;  %v1202_v56 = vrot.slane %v1200_v40, 5 }
  0x98   :  { %423 = vst.msk [vmem:[#allocation2 + $0x34] sm:$0xf] %vm409_vm5, %v388_v58  ;;  %v1189_v58 = vor.u32 %v1188_v44, %v1185_v43  ;;  %v7562_v43 = vld [vmem:[%s14606_s0 + $0x80] sm:$0xf] }
  0x99   :  { %v386_v59 = vpop.permute.xlu0 %385  ;;  %988 = vrot.lane.b32.xlu1 %v7539_v57, %s8525_s25  ;;  %v7574_v57 = vld [vmem:[%s14606_s0 + $0x30] sm:$0xf] }
  0x9a   :  { %422 = vst.msk [vmem:[#allocation2 + $0x30] sm:$0xf] %vm409_vm5, %v386_v59  ;;  %v1192_v59 = vshll.u32 %v7567_v42, 16 }
  0x9b   :  { %v392_v62 = vpop.permute.xlu1 %391  ;;  %986 = vrot.lane.b32.xlu0 %v7538_v60, %s8525_s25  ;;  %v1178_v60 = vshll.u32 %v7565_v46, 16 }
  0x9c   :  { %425 = vst.msk [vmem:[#allocation2 + $0x3c] sm:$0xf] %vm409_vm5, %v392_v62  ;;  %v9318_v62 = vld [vmem:[%s14606_s0 + $0x28] sm:$0xf] }
  0x9d   :  { %992 = vrot.lane.b32.xlu1 %v7541_v61, %s8525_s25  ;;  %v390_v0 = vpop.permute.xlu0 %389  ;;  %v1220_v61 = vshll.u32 %v7571_v49, 16  ;;  %v7941_v49 = vld [vmem:[%s14607_s1 + $0x8] sm:$0x3f]  }
  0x9e   :  { %424 = vst.msk [vmem:[#allocation2 + $0x38] sm:$0xf] %vm409_vm5, %v390_v0  ;;  %v7559_v0 = vld [vmem:[%s14606_s0 + $0x68] sm:$0xf]  ;;  %vm7285_vm5 = vcmask 1043459  }
  0x9f   :  { %v461_v2 = vpop.permute.xlu1 %460  ;;  %990 = vrot.lane.b32.xlu0 %v7540_v63, %s8525_s25 }
  0xa0   :  { %508 = vst.msk [vmem:[#allocation2 + $0x4] sm:$0xf] %vm506_vm6, %v461_v2  ;;  %v1206_v2 = vshll.u32 %v7569_v53, 16 }
  0xa1   :  { %996 = vrot.lane.b32.xlu1 %v7543_v1, %s8525_s25  ;;  %v459_v4 = vpop.permute.xlu0 %458  ;;  %v1175_v1 = vor.u32 %v1174_v48, %v1171_v47  ;;  %v9409_v47 = vld [vmem:[%s14606_s0 + $0x44] sm:$0x1]  ;;  %v7580_v48 = vld [vmem:[%s14606_s0 + $0x50] sm:$0xf] }
  0xa2   :  { %507 = vst.msk [vmem:[#allocation2] sm:$0xf] %vm506_vm6, %v459_v4  ;;  %v7558_v4 = vld [vmem:[%s14606_s0 + $0x60] sm:$0xf] }
  0xa3   :  { %v465_v6 = vpop.permute.xlu1 %464  ;;  %994 = vrot.lane.b32.xlu0 %v7542_v3, %s8525_s25 }
  0xa4   :  { %510 = vst.msk [vmem:[#allocation2 + $0xc] sm:$0xf] %vm506_vm6, %v465_v6  ;;  %v1239_v6 = vshrl.u32 %v7574_v57, 16 }
  0xa5   :  { %1000 = vrot.lane.b32.xlu1 %v7545_v5, %s8525_s25  ;;  %v463_v8 = vpop.permute.xlu0 %462  ;;  %v1217_v5 = vor.u32 %v1216_v52, %v1213_v51 }
  0xa6   :  { %509 = vst.msk [vmem:[#allocation2 + $0x8] sm:$0xf] %vm506_vm6, %v463_v8  ;;  %v7561_v8 = vld [vmem:[%s14606_s0 + $0x78] sm:$0xf]  ;;  %v9366_v26 = vrot.slane %v1239_v6, 4 }
  0xa7   :  { %v469_v10 = vpop.permute.xlu1 %468  ;;  %998 = vrot.lane.b32.xlu0 %v7544_v7, %s8525_s25  ;;  %v1242_v7 = vshll.u32 %v7574_v57, 16  ;;  %v9364_v24 = vrot.slane %v1217_v5, 4 }
  0xa8   :  { %512 = vst.msk [vmem:[#allocation2 + $0x14] sm:$0xf] %vm506_vm6, %v469_v10  ;;  %v9335_v10 = vld [vmem:[%s14606_s0 + $0x34] sm:$0x1] }
  0xa9   :  { %1004 = vrot.lane.b32.xlu1 %v7547_v9, %s8525_s25  ;;  %v467_v12 = vpop.permute.xlu0 %466  ;;  %v1203_v9 = vor.u32 %v1202_v56, %v1199_v55  ;;  %v1248_v28 = vshll.u32 %v9335_v10, 16  ;;  %v7586_v55 = vld [vmem:[%s14606_s0 + $0x68] sm:$0xf] }
  0xaa   :  { %511 = vst.msk [vmem:[#allocation2 + $0x10] sm:$0xf] %vm506_vm6, %v467_v12  ;;  %v9339_v12 = vrot.slane %v1189_v58, 4  ;;  %v1234_v58 = vshll.u32 %v9385_v34, 16 }
  0xab   :  { %v473_v14 = vpop.permute.xlu1 %472  ;;  %1002 = vrot.lane.b32.xlu0 %v7546_v11, %s8525_s25  ;;  %v1225_v11 = vshrl.u32 %v9318_v62, 16  ;;  %v9376_v30 = vrot.slane %v1203_v9, 4  ;;  %v1250_v6 = vrot.slane %v1248_v28, 5 }
  0xac   :  { %514 = vst.msk [vmem:[#allocation2 + $0x1c] sm:$0xf] %vm506_vm6, %v473_v14  ;;  %v9343_v14 = vrot.slane %v1178_v60, 5 }
  0xad   :  { %1073 = vrot.lane.b32.xlu1 %v7549_v13, %s8525_s25  ;;  %v471_v16 = vpop.permute.xlu0 %470  ;;  %v9341_v13 = vrot.slane %v1192_v59, 5  ;;  %v7577_v59 = vld [vmem:[%s14606_s0 + $0x3c] sm:$0x1] }
  0xae   :  { %513 = vst.msk [vmem:[#allocation2 + $0x18] sm:$0xf] %vm506_vm6, %v471_v16  ;;  %v7578_v16 = vld [vmem:[%s14606_s0 + $0x40] sm:$0xf] }
  0xaf   :  { %v477_v18 = vpop.permute.xlu1 %476  ;;  %1071 = vrot.lane.b32.xlu0 %v7548_v15, %s8525_s25  ;;  %v9345_v15 = vrot.slane %v1220_v61, 5  ;;  %v1267_v33 = vshrl.u32 %v7578_v16, 16  ;;  %v1195_v44 = vsel %vm8621_vm2, %v9339_v12, %v9341_v13  ;;  %v1276_v12 = vshll.u32 %v9409_v47, 16  ;;  %v7584_v13 = vld [vmem:[%s14606_s0 + $0x60] sm:$0xf] }
  0xb0   :  { %516 = vst.msk [vmem:[#allocation2 + $0x24] sm:$0xf] %vm506_vm6, %v477_v18  ;;  %v9350_v18 = vrot.slane %v1175_v1, 4  ;;  %v7594_v47 = vld [vmem:[%s14606_s0 + $0x88] sm:$0xf] }
  0xb1   :  { %1077 = vrot.lane.b32.xlu1 %v7551_v17, %s8525_s25  ;;  %v475_v20 = vpop.permute.xlu0 %474  ;;  %v1269_v53 = vrot.slane %v1267_v33, 4  ;;  %v1223_v5 = vsel %vm8621_vm2, %v9364_v24, %v9345_v15 }
  0xb2   :  { %515 = vst.msk [vmem:[#allocation2 + $0x20] sm:$0xf] %vm506_vm6, %v475_v20  ;;  %v7576_v20 = vld [vmem:[%s14606_s0 + $0x38] sm:$0xf] }
  0xb3   :  { %v481_v23 = vpop.permute.xlu1 %480  ;;  %1075 = vrot.lane.b32.xlu0 %v7550_v19, %s8525_s25  ;;  %v9352_v19 = vrot.slane %v1206_v2, 5  ;;  %v1253_v36 = vshrl.u32 %v7576_v20, 16  ;;  %v1256_v37 = vshll.u32 %v7576_v20, 16 }
  0xb4   :  { %518 = vst.msk [vmem:[#allocation2 + $0x2c] sm:$0xf] %vm506_vm6, %v481_v23  ;;  %v7560_v23 = vld [vmem:[%s14606_s0 + $0x70] sm:$0xf] }
  0xb5   :  { %1081 = vrot.lane.b32.xlu1 %v7553_v21, %s8525_s25  ;;  %v479_v31 = vpop.permute.xlu0 %478  ;;  %v7582_v21 = vld [vmem:[%s14606_s0 + $0x58] sm:$0xf]  ;;  %v1255_v60 = vrot.slane %v1253_v36, 4  ;;  %v1258_v61 = vrot.slane %v1256_v37, 5  ;;  %v1209_v15 = vsel %vm8621_vm2, %v9376_v30, %v9352_v19  ;;  %v7587_v19 = vld [vmem:[%s14606_s0 + $0x6c] sm:$0x1] }
  0xb6   :  { %517 = vst.msk [vmem:[#allocation2 + $0x28] sm:$0xf] %vm506_vm6, %v479_v31  ;;  %v9378_v31 = vrot.slane %v1225_v11, 4  ;;  %v1298_v40 = vshll.u32 %v7582_v21, 16  ;;  %v1309_v30 = vshrl.u32 %v7584_v13, 16 }
  0xb7   :  { %v485_v35 = vpop.permute.xlu1 %484  ;;  %1079 = vrot.lane.b32.xlu0 %v7552_v27, %s8525_s25  ;;  %v9368_v27 = vrot.slane %v1242_v7, 5  ;;  %v1323_v7 = vshrl.u32 %v7586_v55, 16 }
  0xb8   :  { %520 = vst.msk [vmem:[#allocation2 + $0x34] sm:$0xf] %vm506_vm6, %v485_v35  ;;  %v1270_v35 = vshll.u32 %v7578_v16, 16  ;;  %v1300_v2 = vrot.slane %v1298_v40, 5  ;;  %v1236_v16 = vrot.slane %v1234_v58, 5 }
  0xb9   :  { %1085 = vrot.lane.b32.xlu1 %v7555_v32, %s8525_s25  ;;  %v483_v45 = vpop.permute.xlu0 %482  ;;  %v1228_v32 = vshll.u32 %v9318_v62, 16  ;;  %v1245_v46 = vor.u32 %v9368_v27, %v9366_v26  ;;  %v7590_v27 = vld [vmem:[%s14606_s0 + $0x78] sm:$0xf]  ;;  %v1325_v28 = vrot.slane %v1323_v7, 4 }
  0xba   :  { %519 = vst.msk [vmem:[#allocation2 + $0x30] sm:$0xf] %vm506_vm6, %v483_v45  ;;  %v1181_v45 = vsel %vm8621_vm2, %v9350_v18, %v9343_v14  ;;  %v1354_v40 = vshll.u32 %v7590_v27, 16 }
  0xbb   :  { %v489_v50 = vpop.permute.xlu1 %488  ;;  %1083 = vrot.lane.b32.xlu0 %v7554_v38, %s8525_s25  ;;  %v1295_v38 = vshrl.u32 %v7582_v21, 16  ;;  %v1230_v52 = vrot.slane %v1228_v32, 5  ;;  %v1246_v9 = vrot.slane %v1245_v46, 4  ;;  %v1259_v21 = vor.u32 %v1258_v61, %v1255_v60 }
  0xbc   :  { %522 = vst.msk [vmem:[#allocation2 + $0x3c] sm:$0xf] %vm506_vm6, %v489_v50  ;;  %v8526_v50 = vmov 65535   ;;  %v1332_v46 = vshll.u32 %v7587_v19, 16  ;;  %v1379_v60 = vshrl.u32 %v7594_v47, 16  ;;  %v1382_v61 = vshll.u32 %v7594_v47, 16 }
  0xbd   :  { %1089 = vrot.lane.b32.xlu1 %v7557_v41, %s8525_s25  ;;  %v487_v63 = vpop.permute.xlu0 %486  ;;  %v7940_v41 = vld [vmem:[%s14607_s1] sm:$0xff]   ;;  %v1555_v51 = vsel %vm1553_vm8, 4294967295, %v8526_v50  ;;  %v1297_v1 = vrot.slane %v1295_v38, 4  ;;  %v1231_v10 = vor.u32 %v1230_v52, %v9378_v31  ;;  %v1312_v31 = vshll.u32 %v7584_v13, 16  ;;  %s8539_s1 = smov 112  }
  0xbe   :  { %521 = vst.msk [vmem:[#allocation2 + $0x38] sm:$0xf] %vm506_vm6, %v487_v63  ;;  %7776 = vmatprep.subr.bf16.mxu0 %v7940_v41  ;;  %v1556_v56 = vsel %vm1554_vm9, %v1555_v51, 0  ;;  %v1251_v32 = vsel %vm8621_vm2, %v1246_v9, %v1250_v6  ;;  %v7585_v50 = vld [vmem:[%s14606_s0 + $0x64] sm:$0x1]  ;;  %v1311_v51 = vrot.slane %v1309_v30, 4 }
  0xbf   :  { %v558_v3 = vpop.permute.xlu1 %557  ;;  %1087 = vrot.lane.b32.xlu0 %v7556_v54, %s8525_s25  ;;  %v1272_v54 = vrot.slane %v1270_v35, 5  ;;  %7777 = vmatpush3.bf16.msra.mxu0 %v7940_v41  ;;  %v1558_v62 = vand.u32 %v7941_v49, %v1556_v56  ;;  %v1232_v33 = vrot.slane %v1231_v10, 4  ;;  %v1278_v35 = vrot.slane %v1276_v12, 5  ;;  %v7588_v41 = vld [vmem:[%s14606_s0 + $0x70] sm:$0xf] }
  0xc0   :  { %605 = vst.msk [vmem:[#allocation2 + $0x4] sm:$0xf] %vm603_vm7, %v558_v3  ;;  %v1281_v3 = vshrl.u32 %v7580_v48, 16  ;;  %v1314_v52 = vrot.slane %v1312_v31, 5  ;;  %v1340_v56 = vshll.u32 %v7588_v41, 16  ;;  %vm7288_vm6 = vcmask 1044484  }
  0xc1   :  { %1093 = vrot.lane.b32.xlu1 %v7559_v0, %s8525_s25  ;;  %v556_v17 = vpop.permute.xlu0 %555  ;;  %v7583_v0 = vld [vmem:[%s14606_s0 + $0x5c] sm:$0x1]  ;;  %7778 = vmatprep.subr.bf16.mxu0 %v1558_v62  ;;  %v1273_v11 = vor.u32 %v1272_v54, %v1269_v53  ;;  %v1237_v53 = vsel %vm8621_vm2, %v1232_v33, %v1236_v16  ;;  %v7589_v16 = vld [vmem:[%s14606_s0 + $0x74] sm:$0x1]  ;;  %vm7294_vm8 = vcmask 1046534   ;;  %vm7297_vm9 = vcmask 1047559  }
  0xc2   :  { %604 = vst.msk [vmem:[#allocation2] sm:$0xf] %vm603_vm7, %v556_v17  ;;  %v1262_v17 = vshll.u32 %v7577_v59, 16  ;;  %v1304_v18 = vshll.u32 %v7583_v0, 16  ;;  %v1283_v24 = vrot.slane %v1281_v3, 4  ;;  %v1356_v59 = vrot.slane %v1354_v40, 5 }
  0xc3   :  { %v562_v22 = vpop.permute.xlu1 %561  ;;  %1091 = vrot.lane.b32.xlu0 %v7558_v4, %s8525_s25  ;;  %v1284_v4 = vshll.u32 %v7580_v48, 16  ;;  %7779 = vmatpush3.bf16.msra.mxu0 %v1558_v62  ;;  %v1274_v34 = vrot.slane %v1273_v11, 4  ;;  %v7592_v62 = vld [vmem:[%s14606_s0 + $0x80] sm:$0xf]  ;;  %v1318_v3 = vshll.u32 %v7585_v50, 16  ;;  %v1342_v10 = vrot.slane %v1340_v56, 5 }
  0xc4   :  { %607 = vst.msk [vmem:[#allocation2 + $0xc] sm:$0xf] %vm603_vm7, %v562_v22  ;;  %v1301_v22 = vor.u32 %v1300_v2, %v1297_v1  ;;  %v1264_v37 = vrot.slane %v1262_v17, 5  ;;  %v1334_v2 = vrot.slane %v1332_v46, 5  ;;  %v1365_v11 = vshrl.u32 %v7592_v62, 16 }
  0xc5   :  { %1097 = vrot.lane.b32.xlu1 %v7561_v8, %s8525_s25  ;;  %v560_v39 = vpop.permute.xlu0 %559  ;;  %v1326_v8 = vshll.u32 %v7586_v55, 16  ;;  %v1286_v26 = vrot.slane %v1284_v4, 5  ;;  %v1279_v54 = vsel %vm8621_vm2, %v1274_v34, %v1278_v35  ;;  %v1337_v55 = vshrl.u32 %v7588_v41, 16  ;;  %v7591_v4 = vld [vmem:[%s14606_s0 + $0x7c] sm:$0x1] }
  0xc6   :  { %606 = vst.msk [vmem:[#allocation2 + $0x8] sm:$0xf] %vm603_vm7, %v560_v39  ;;  %v1351_v39 = vshrl.u32 %v7590_v27, 16  ;;  %v1302_v48 = vrot.slane %v1301_v22, 4  ;;  %v1368_v12 = vshll.u32 %v7592_v62, 16  ;;  %v1381_v17 = vrot.slane %v1379_v60, 4 }
  0xc7   :  { %v566_v42 = vpop.permute.xlu1 %565  ;;  %1095 = vrot.lane.b32.xlu0 %v7560_v23, %s8525_s25  ;;  %v7581_v23 = vld [vmem:[%s14606_s0 + $0x54] sm:$0x1]  ;;  %v1339_v9 = vrot.slane %v1337_v55, 4  ;;  %v1346_v19 = vshll.u32 %v7589_v16, 16  ;;  %v7593_v35 = vld [vmem:[%s14606_s0 + $0x84] sm:$0x1] }
  0xc8   :  { %609 = vst.msk [vmem:[#allocation2 + $0x14] sm:$0xf] %vm603_vm7, %v566_v42  ;;  %v1290_v38 = vshll.u32 %v7581_v23, 16  ;;  %v1353_v58 = vrot.slane %v1351_v39, 4  ;;  %v1374_v41 = vshll.u32 %v7593_v35, 16 }
  0xc9   :  { %1101 = vrot.lane.b32.xlu1 %v7563_v29, %s8525_s25  ;;  %v564_v57 = vpop.permute.xlu0 %563  ;;  %v1328_v29 = vrot.slane %v1326_v8, 5  ;;  %v1315_v8 = vor.u32 %v1314_v52, %v1311_v51  ;;  %v1343_v27 = vor.u32 %v1342_v10, %v1339_v9  ;;  %v1348_v39 = vrot.slane %v1346_v19, 5 }
  0xca   :  { %608 = vst.msk [vmem:[#allocation2 + $0x10] sm:$0xf] %vm603_vm7, %v564_v57  ;;  %v1292_v1 = vrot.slane %v1290_v38, 5 }
  0xcb   :  { %v570_v63 = vpop.permute.xlu1 %569  ;;  %1099 = vrot.lane.b32.xlu0 %v7562_v43, %s8525_s25  ;;  %v1260_v43 = vrot.slane %v1259_v21, 4  ;;  %v1329_v49 = vor.u32 %v1328_v29, %v1325_v28  ;;  %v7595_v21 = vld [vmem:[%s14606_s0 + $0x8c] sm:$0x1]  ;;  %v1367_v28 = vrot.slane %v1365_v11, 4  ;;  %v1370_v29 = vrot.slane %v1368_v12, 5 }
  0xcc   :  { %611 = vst.msk [vmem:[#allocation2 + $0x1c] sm:$0xf] %vm603_vm7, %v570_v63  ;;  %v1388_v34 = vshll.u32 %v7595_v21, 16  ;;  %v1344_v38 = vrot.slane %v1343_v27, 4 }
  0xcd   :  { %1394 = vrot.lane.b32.xlu1 %v1195_v44, %s8527_s14  ;;  %v568_v14 = vpop.permute.xlu0 %567  ;;  %v1306_v44 = vrot.slane %v1304_v18, 5  ;;  %v1265_v0 = vsel %vm8621_vm2, %v1260_v43, %v1264_v37  ;;  %v1330_v7 = vrot.slane %v1329_v49, 4  ;;  %v1384_v18 = vrot.slane %v1382_v61, 5 }
  0xce   :  { %610 = vst.msk [vmem:[#allocation2 + $0x18] sm:$0xf] %vm603_vm7, %v568_v14  ;;  %v1357_v14 = vor.u32 %v1356_v59, %v1353_v58  ;;  %v1371_v40 = vor.u32 %v1370_v29, %v1367_v28  ;;  %v1349_v47 = vsel %vm8621_vm2, %v1344_v38, %v1348_v39  ;;  %v1376_v49 = vrot.slane %v1374_v41, 5 }
  0xcf   :  { %v574_v20 = vpop.permute.xlu1 %573  ;;  %1392 = vrot.lane.b32.xlu0 %v1181_v45, %s8527_s14  ;;  %v1287_v45 = vor.u32 %v1286_v26, %v1283_v24  ;;  %v1335_v23 = vsel %vm8621_vm2, %v1330_v7, %v1334_v2  ;;  %v1316_v24 = vrot.slane %v1315_v8, 4  ;;  %v1320_v26 = vrot.slane %v1318_v3, 5 }
  0xd0   :  { %613 = vst.msk [vmem:[#allocation2 + $0x24] sm:$0xf] %vm603_vm7, %v574_v20  ;;  %v1358_v31 = vrot.slane %v1357_v14, 4  ;;  %v1385_v33 = vor.u32 %v1384_v18, %v1381_v17 }
  0xd1   :  { %1398 = vrot.lane.b32.xlu1 %v1223_v5, %s8527_s14  ;;  %v572_v36 = vpop.permute.xlu0 %571  ;;  %v1307_v5 = vsel %vm8621_vm2, %v1302_v48, %v1306_v44  ;;  %v1288_v6 = vrot.slane %v1287_v45, 4  ;;  %v1321_v37 = vsel %vm8621_vm2, %v1316_v24, %v1320_v26  ;;  %v1390_v45 = vrot.slane %v1388_v34, 5 }
  0xd2   :  { %612 = vst.msk [vmem:[#allocation2 + $0x20] sm:$0xf] %vm603_vm7, %v572_v36  ;;  %v1386_v44 = vrot.slane %v1385_v33, 4  ;;  %v1372_v48 = vrot.slane %v1371_v40, 4 }
  0xd3   :  { %v578_v42 = vpop.permute.xlu1 %577  ;;  %1396 = vrot.lane.b32.xlu0 %v1209_v15, %s8527_s14  ;;  %v1360_v15 = vshll.u32 %v7591_v4, 16  ;;  %v1293_v22 = vsel %vm8621_vm2, %v1288_v6, %v1292_v1 }
  0xd4   :  { %615 = vst.msk [vmem:[#allocation2 + $0x2c] sm:$0xf] %vm603_vm7, %v578_v42  ;;  %v1391_v51 = vsel %vm8621_vm2, %v1386_v44, %v1390_v45 }
  0xd5   :  { %1402 = vrot.lane.b32.xlu1 %v1251_v32, %s8527_s14  ;;  %v576_v57 = vpop.permute.xlu0 %575  ;;  %v1362_v32 = vrot.slane %v1360_v15, 5 }
  0xd6   :  { %614 = vst.msk [vmem:[#allocation2 + $0x28] sm:$0xf] %vm603_vm7, %v576_v57 }
  0xd7   :  { %v582_v63 = vpop.permute.xlu1 %581  ;;  %1400 = vrot.lane.b32.xlu0 %v1237_v53, %s8527_s14  ;;  %v1363_v43 = vsel %vm8621_vm2, %v1358_v31, %v1362_v32  ;;  %v1377_v53 = vsel %vm8621_vm2, %v1372_v48, %v1376_v49  ;;  %vm1815_vm2 = vcmask 80896  }
  0xd8   :  { %617 = vst.msk [vmem:[#allocation2 + $0x34] sm:$0xf] %vm603_vm7, %v582_v63 }
  0xd9   :  { %1406 = vrot.lane.b32.xlu1 %v1279_v54, %s8527_s14  ;;  %v580_v13 = vpop.permute.xlu0 %579 }
  0xda   :  { %616 = vst.msk [vmem:[#allocation2 + $0x30] sm:$0xf] %vm603_vm7, %v580_v13 }
  0xdb   :  { %v586_v20 = vpop.permute.xlu1 %585  ;;  %1404 = vrot.lane.b32.xlu0 %v1265_v0, %s8527_s14 }
  0xdc   :  { %619 = vst.msk [vmem:[#allocation2 + $0x3c] sm:$0xf] %vm603_vm7, %v586_v20 }
  0xdd   :  { %1410 = vrot.lane.b32.xlu1 %v1307_v5, %s8527_s14  ;;  %v584_v30 = vpop.permute.xlu0 %583 }
  0xde   :  { %618 = vst.msk [vmem:[#allocation2 + $0x38] sm:$0xf] %vm603_vm7, %v584_v30  ;;  %vm7291_vm7 = vcmask 1045509  }
  0xdf   :  { %v879_v36 = vpop.permute.xlu1 %878  ;;  %1408 = vrot.lane.b32.xlu0 %v1293_v22, %s8527_s14 }
  0xe0   :  { %926 = vst.msk [vmem:[#allocation2 + $0x4] sm:$0xf] %vm924_vm10, %v879_v36 }
  0xe1   :  { %1414 = vrot.lane.b32.xlu1 %v1335_v23, %s8527_s14  ;;  %v877_v42 = vpop.permute.xlu0 %876 }
  0xe2   :  { %925 = vst.msk [vmem:[#allocation2] sm:$0xf] %vm924_vm10, %v877_v42 }
  0xe3   :  { %v883_v46 = vpop.permute.xlu1 %882  ;;  %1412 = vrot.lane.b32.xlu0 %v1321_v37, %s8527_s14 }
  0xe4   :  { %928 = vst.msk [vmem:[#allocation2 + $0xc] sm:$0xf] %vm924_vm10, %v883_v46 }
  0xe5   :  { %1418 = vrot.lane.b32.xlu1 %v1363_v43, %s8527_s14  ;;  %v881_v50 = vpop.permute.xlu0 %880 }
  0xe6   :  { %927 = vst.msk [vmem:[#allocation2 + $0x8] sm:$0xf] %vm924_vm10, %v881_v50 }
  0xe7   :  { %v887_v52 = vpop.permute.xlu1 %886  ;;  %1416 = vrot.lane.b32.xlu0 %v1349_v47, %s8527_s14 }
  0xe8   :  { %930 = vst.msk [vmem:[#allocation2 + $0x14] sm:$0xf] %vm924_vm10, %v887_v52 }
  0xe9   :  { %1422 = vrot.lane.b32.xlu1 %v1391_v51, %s8527_s14  ;;  %v885_v54 = vpop.permute.xlu0 %884 }
  0xea   :  { %929 = vst.msk [vmem:[#allocation2 + $0x10] sm:$0xf] %vm924_vm10, %v885_v54 }
  0xeb   :  { %v891_v55 = vpop.permute.xlu1 %890  ;;  %1420 = vrot.lane.b32.xlu0 %v1377_v53, %s8527_s14 }
  0xec   :  { %932 = vst.msk [vmem:[#allocation2 + $0x1c] sm:$0xf] %vm924_vm10, %v891_v55 }
  0xed   :  { %v889_v56 = vpop.permute.xlu0 %888 }
  0xee   :  { %931 = vst.msk [vmem:[#allocation2 + $0x18] sm:$0xf] %vm924_vm10, %v889_v56 }
  0xef   :  { %v895_v57 = vpop.permute.xlu1 %894 }
  0xf0   :  { %934 = vst.msk [vmem:[#allocation2 + $0x24] sm:$0xf] %vm924_vm10, %v895_v57  ;;  %v9601_v57 = vld [vmem:[%s14608_s2] ss:$0 sm:$0xff]  ;;  %s8529_s2 = smov 1  }
  0xf1   :  { %v893_v58 = vpop.permute.xlu0 %892 }
  0xf2   :  { %933 = vst.msk [vmem:[#allocation2 + $0x20] sm:$0xf] %vm924_vm10, %v893_v58 }
  0xf3   :  { %v899_v59 = vpop.permute.xlu1 %898 }
  0xf4   :  { %936 = vst.msk [vmem:[#allocation2 + $0x2c] sm:$0xf] %vm924_vm10, %v899_v59  ;;  %v9606_v59 = vld [vmem:[%s14609_s3] ss:$0 sm:$0xff] }
  0xf5   :  { %v897_v25 = vpop.permute.xlu0 %896 }
  0xf6   :  { %935 = vst.msk [vmem:[#allocation2 + $0x28] sm:$0xf] %vm924_vm10, %v897_v25 }
  0xf7   :  { %v903_v60 = vpop.permute.xlu1 %902 }
  0xf8   :  { %938 = vst.msk [vmem:[#allocation2 + $0x34] sm:$0xf] %vm924_vm10, %v903_v60 }
  0xf9   :  { %v901_v61 = vpop.permute.xlu0 %900 }
  0xfa   :  { %937 = vst.msk [vmem:[#allocation2 + $0x30] sm:$0xf] %vm924_vm10, %v901_v61 }
  0xfb   :  { %v907_v62 = vpop.permute.xlu1 %906 }
  0xfc   :  { %940 = vst.msk [vmem:[#allocation2 + $0x3c] sm:$0xf] %vm924_vm10, %v907_v62 }
  0xfd   :  { %v905_v63 = vpop.permute.xlu0 %904 }
  0xfe   :  { %939 = vst.msk [vmem:[#allocation2 + $0x38] sm:$0xf] %vm924_vm10, %v905_v63  ;;  %vm7279_vm10 = vcmask 1041409  }
  0xff   :  { %v977_v0 = vpop.permute.xlu1 %976 }
 0x100   :  { %1024 = vst.msk [vmem:[#allocation2 + $0x4] sm:$0xf] %vm1022_vm11, %v977_v0 }
 0x101   :  { %v975_v1 = vpop.permute.xlu0 %974 }
 0x102   :  { %1023 = vst.msk [vmem:[#allocation2] sm:$0xf] %vm1022_vm11, %v975_v1 }
 0x103   :  { %v981_v2 = vpop.permute.xlu1 %980 }
 0x104   :  { %1026 = vst.msk [vmem:[#allocation2 + $0xc] sm:$0xf] %vm1022_vm11, %v981_v2 }
 0x105   :  { %v979_v3 = vpop.permute.xlu0 %978 }
 0x106   :  { %1025 = vst.msk [vmem:[#allocation2 + $0x8] sm:$0xf] %vm1022_vm11, %v979_v3 }
 0x107   :  { %v985_v4 = vpop.permute.xlu1 %984 }
 0x108   :  { %1028 = vst.msk [vmem:[#allocation2 + $0x14] sm:$0xf] %vm1022_vm11, %v985_v4 }
 0x109   :  { %v983_v5 = vpop.permute.xlu0 %982 }
 0x10a   :  { %1027 = vst.msk [vmem:[#allocation2 + $0x10] sm:$0xf] %vm1022_vm11, %v983_v5 }
 0x10b   :  { %v989_v6 = vpop.permute.xlu1 %988 }
 0x10c   :  { %1030 = vst.msk [vmem:[#allocation2 + $0x1c] sm:$0xf] %vm1022_vm11, %v989_v6 }
 0x10d   :  { %v987_v7 = vpop.permute.xlu0 %986 }
 0x10e   :  { %1029 = vst.msk [vmem:[#allocation2 + $0x18] sm:$0xf] %vm1022_vm11, %v987_v7 }
 0x10f   :  { %v993_v8 = vpop.permute.xlu1 %992 }
 0x110   :  { %1032 = vst.msk [vmem:[#allocation2 + $0x24] sm:$0xf] %vm1022_vm11, %v993_v8 }
 0x111   :  { %v991_v9 = vpop.permute.xlu0 %990 }
 0x112   :  { %1031 = vst.msk [vmem:[#allocation2 + $0x20] sm:$0xf] %vm1022_vm11, %v991_v9 }
 0x113   :  { %v997_v10 = vpop.permute.xlu1 %996 }
 0x114   :  { %1034 = vst.msk [vmem:[#allocation2 + $0x2c] sm:$0xf] %vm1022_vm11, %v997_v10 }
 0x115   :  { %v995_v11 = vpop.permute.xlu0 %994 }
 0x116   :  { %1033 = vst.msk [vmem:[#allocation2 + $0x28] sm:$0xf] %vm1022_vm11, %v995_v11 }
 0x117   :  { %v1001_v12 = vpop.permute.xlu1 %1000 }
 0x118   :  { %1036 = vst.msk [vmem:[#allocation2 + $0x34] sm:$0xf] %vm1022_vm11, %v1001_v12 }
 0x119   :  { %v999_v13 = vpop.permute.xlu0 %998 }
 0x11a   :  { %1035 = vst.msk [vmem:[#allocation2 + $0x30] sm:$0xf] %vm1022_vm11, %v999_v13 }
 0x11b   :  { %v1005_v14 = vpop.permute.xlu1 %1004 }
 0x11c   :  { %1038 = vst.msk [vmem:[#allocation2 + $0x3c] sm:$0xf] %vm1022_vm11, %v1005_v14 }
 0x11d   :  { %v1003_v15 = vpop.permute.xlu0 %1002 }
 0x11e   :  { %1037 = vst.msk [vmem:[#allocation2 + $0x38] sm:$0xf] %vm1022_vm11, %v1003_v15  ;;  %vm7315_vm11 = vcmask 130048  }
 0x11f   :  { %v1074_v16 = vpop.permute.xlu1 %1073 }
 0x120   :  { %1121 = vst.msk [vmem:[#allocation2 + $0x4] sm:$0xf] %vm1119_vm12, %v1074_v16 }
 0x121   :  { %v1072_v17 = vpop.permute.xlu0 %1071 }
 0x122   :  { %1120 = vst.msk [vmem:[#allocation2] sm:$0xf] %vm1119_vm12, %v1072_v17 }
 0x123   :  { %v1078_v18 = vpop.permute.xlu1 %1077 }
 0x124   :  { %1123 = vst.msk [vmem:[#allocation2 + $0xc] sm:$0xf] %vm1119_vm12, %v1078_v18 }
 0x125   :  { %v1076_v20 = vpop.permute.xlu0 %1075 }
 0x126   :  { %1122 = vst.msk [vmem:[#allocation2 + $0x8] sm:$0xf] %vm1119_vm12, %v1076_v20 }
 0x127   :  { %v1082_v21 = vpop.permute.xlu1 %1081 }
 0x128   :  { %1125 = vst.msk [vmem:[#allocation2 + $0x14] sm:$0xf] %vm1119_vm12, %v1082_v21 }
 0x129   :  { %v1080_v22 = vpop.permute.xlu0 %1079 }
 0x12a   :  { %1124 = vst.msk [vmem:[#allocation2 + $0x10] sm:$0xf] %vm1119_vm12, %v1080_v22 }
 0x12b   :  { %v1086_v23 = vpop.permute.xlu1 %1085 }
 0x12c   :  { %1127 = vst.msk [vmem:[#allocation2 + $0x1c] sm:$0xf] %vm1119_vm12, %v1086_v23 }
 0x12d   :  { %v1084_v24 = vpop.permute.xlu0 %1083 }
 0x12e   :  { %1126 = vst.msk [vmem:[#allocation2 + $0x18] sm:$0xf] %vm1119_vm12, %v1084_v24 }
 0x12f   :  { %v1090_v26 = vpop.permute.xlu1 %1089 }
 0x130   :  { %1129 = vst.msk [vmem:[#allocation2 + $0x24] sm:$0xf] %vm1119_vm12, %v1090_v26 }
 0x131   :  { %v1088_v27 = vpop.permute.xlu0 %1087 }
 0x132   :  { %1128 = vst.msk [vmem:[#allocation2 + $0x20] sm:$0xf] %vm1119_vm12, %v1088_v27 }
 0x133   :  { %v1094_v19 = vpop.permute.xlu1 %1093 }
 0x134   :  { %1131 = vst.msk [vmem:[#allocation2 + $0x2c] sm:$0xf] %vm1119_vm12, %v1094_v19 }
 0x135   :  { %v1092_v28 = vpop.permute.xlu0 %1091 }
 0x136   :  { %1130 = vst.msk [vmem:[#allocation2 + $0x28] sm:$0xf] %vm1119_vm12, %v1092_v28 }
 0x137   :  { %v1098_v29 = vpop.permute.xlu1 %1097 }
 0x138   :  { %1133 = vst.msk [vmem:[#allocation2 + $0x34] sm:$0xf] %vm1119_vm12, %v1098_v29 }
 0x139   :  { %v1096_v30 = vpop.permute.xlu0 %1095 }
 0x13a   :  { %1132 = vst.msk [vmem:[#allocation2 + $0x30] sm:$0xf] %vm1119_vm12, %v1096_v30 }
 0x13b   :  { %v1102_v31 = vpop.permute.xlu1 %1101 }
 0x13c   :  { %1135 = vst.msk [vmem:[#allocation2 + $0x3c] sm:$0xf] %vm1119_vm12, %v1102_v31 }
 0x13d   :  { %v1100_v32 = vpop.permute.xlu0 %1099 }
 0x13e   :  { %1134 = vst.msk [vmem:[#allocation2 + $0x38] sm:$0xf] %vm1119_vm12, %v1100_v32  ;;  %vm7344_vm12 = vcmask 254080  }
 0x13f   :  { %v1395_v33 = vpop.permute.xlu1 %1394 }
 0x140   :  { %1442 = vst.msk [vmem:[#allocation2 + $0x4] sm:$0xf] %vm1440_vm13, %v1395_v33 }
 0x141   :  { %v1393_v34 = vpop.permute.xlu0 %1392 }
 0x142   :  { %1441 = vst.msk [vmem:[#allocation2] sm:$0xf] %vm1440_vm13, %v1393_v34 }
 0x143   :  { %v1399_v35 = vpop.permute.xlu1 %1398 }
 0x144   :  { %1444 = vst.msk [vmem:[#allocation2 + $0xc] sm:$0xf] %vm1440_vm13, %v1399_v35 }
 0x145   :  { %v1397_v36 = vpop.permute.xlu0 %1396 }
 0x146   :  { %1443 = vst.msk [vmem:[#allocation2 + $0x8] sm:$0xf] %vm1440_vm13, %v1397_v36 }
 0x147   :  { %v1403_v37 = vpop.permute.xlu1 %1402 }
 0x148   :  { %1446 = vst.msk [vmem:[#allocation2 + $0x14] sm:$0xf] %vm1440_vm13, %v1403_v37 }
 0x149   :  { %v1401_v38 = vpop.permute.xlu0 %1400  ;;  %v7942_v39 = vld [vmem:[#allocation2] sm:$0xff]  }
 0x14a   :  { %1445 = vst.msk [vmem:[#allocation2 + $0x10] sm:$0xf] %vm1440_vm13, %v1401_v38  ;;  %7780 = vmatprep.mubr.msk.bf16.mxu0 %vm1528_vm14, %v7942_v39 }
 0x14b   :  { %v1407_v40 = vpop.permute.xlu1 %1406 }
 0x14c   :  { %1448 = vst.msk [vmem:[#allocation2 + $0x1c] sm:$0xf] %vm1440_vm13, %v1407_v40 }
 0x14d   :  { %v1405_v41 = vpop.permute.xlu0 %1404  ;;  %v7943_v42 = vld [vmem:[#allocation2 + $0x8] sm:$0xff]  }
 0x14e   :  { %1447 = vst.msk [vmem:[#allocation2 + $0x18] sm:$0xf] %vm1440_vm13, %v1405_v41  ;;  %7781 = vmatmul.mubr.msk.bf16.vlgmr.msra.gmra.mrb[0].mxu0 %vm1528_vm14, %v7943_v42 }
 0x14f   :  { %v1411_v43 = vpop.permute.xlu1 %1410 }
 0x150   :  { %1450 = vst.msk [vmem:[#allocation2 + $0x24] sm:$0xf] %vm1440_vm13, %v1411_v43 }
 0x151   :  { %v7944_v44 = vld [vmem:[#allocation2 + $0x10] sm:$0xff]   ;;  %v1409_v45 = vpop.permute.xlu0 %1408 }
 0x152   :  { %1449 = vst.msk [vmem:[#allocation2 + $0x20] sm:$0xf] %vm1440_vm13, %v1409_v45  ;;  %7784 = vmatprep.mubr.msk.bf16.mxu0 %vm1528_vm14, %v7944_v44 }
 0x153   :  { %v1415_v46 = vpop.permute.xlu1 %1414 }
 0x154   :  { %1452 = vst.msk [vmem:[#allocation2 + $0x2c] sm:$0xf] %vm1440_vm13, %v1415_v46 }
 0x155   :  { %v7945_v47 = vld [vmem:[#allocation2 + $0x18] sm:$0xff]   ;;  %v1413_v48 = vpop.permute.xlu0 %1412 }
 0x156   :  { %1451 = vst.msk [vmem:[#allocation2 + $0x28] sm:$0xf] %vm1440_vm13, %v1413_v48  ;;  %7785 = vmatmul.mubr.msk.bf16.gmra.mrb[4].mxu0 %vm1528_vm14, %v7945_v47 }
 0x157   :  { %v1419_v49 = vpop.permute.xlu1 %1418 }
 0x158   :  { %1454 = vst.msk [vmem:[#allocation2 + $0x34] sm:$0xf] %vm1440_vm13, %v1419_v49 }
 0x159   :  { %v7946_v50 = vld [vmem:[#allocation2 + $0x20] sm:$0xff]   ;;  %v1417_v51 = vpop.permute.xlu0 %1416 }
 0x15a   :  { %1453 = vst.msk [vmem:[#allocation2 + $0x30] sm:$0xf] %vm1440_vm13, %v1417_v51  ;;  %7788 = vmatprep.mubr.msk.bf16.mxu0 %vm1528_vm14, %v7946_v50 }
 0x15b   :  { %v1423_v52 = vpop.permute.xlu1 %1422 }
 0x15c   :  { %1456 = vst.msk [vmem:[#allocation2 + $0x3c] sm:$0xf] %vm1440_vm13, %v1423_v52 }
 0x15d   :  { %v7947_v53 = vld [vmem:[#allocation2 + $0x28] sm:$0xff]   ;;  %v1421_v54 = vpop.permute.xlu0 %1420 }
 0x15e   :  { %1455 = vst.msk [vmem:[#allocation2 + $0x38] sm:$0xf] %vm1440_vm13, %v1421_v54  ;;  %7789 = vmatmul.mubr.msk.bf16.gmra.mrb[8].mxu0 %vm1528_vm14, %v7947_v53  ;;  %vm7342_vm13 = vcmask 261249  }
 0x161   :  { %v7948_v55 = vld [vmem:[#allocation2 + $0x30] sm:$0xff]  }
 0x162   :  { %7792 = vmatprep.mubr.msk.bf16.mxu0 %vm1528_vm14, %v7948_v55 }
 0x165   :  { %v7949_v56 = vld [vmem:[#allocation2 + $0x38] sm:$0xff]  }
 0x166   :  { %7793 = vmatmul.mubr.msk.bf16.gmra.mrb[12].mxu0 %vm1528_vm14, %v7949_v56  ;;  %vm7374_vm14 = vcmask 386304  }
 0x221   :  { %v7782_v58 = vpop.f32.mrb[0].mxu0 }
 0x222   :  { %v1666_v25 = vmul.f32 %v7782_v58, %v9601_v57  ;;  %v1594_v60 = vpop.f32.mrb[1].mxu0 }
 0x223   :  { %v1664_v61 = vmul.f32 %v9601_v57, %v1594_v60  ;;  %v7783_v62 = vpop.f32.mrb[2].mxu0 }
 0x224   :  { %v1689_v63 = vadd.f32 %v9606_v59, %v1666_v25  ;;  %v1667_v0 = vmul.f32 %v7783_v62, %v9601_v57  ;;  %v1597_v1 = vpop.f32.mrb[3].mxu0 }
 0x225   :  { %v1665_v2 = vmul.f32 %v9601_v57, %v1597_v1  ;;  %v9615_v5 = vadd.f32 %v9606_v59, %v1664_v61 }
 0x226   :  { %v7618_v3 = vmul.f32 -1.442695, %v1689_v63  ;;  %v1690_v4 = vadd.f32 %v9606_v59, %v1667_v0 }
 0x227   :  { %v9618_v7 = vadd.f32 %v9606_v59, %v1665_v2  ;;  %v7616_v10 = vmul.f32 -1.442695, %v9615_v5 }
 0x228   :  { %7952 = vpow2.f32 %v7618_v3  ;;  %v7619_v6 = vmul.f32 -1.442695, %v1690_v4 }
 0x229   :  { %v7786_v8 = vpop.f32.mrb[4].mxu0  ;;  %v7617_v13 = vmul.f32 -1.442695, %v9618_v7 }
 0x22a   :  { %7954 = vpow2.f32 %v7619_v6  ;;  %v1610_v9 = vpop.f32.mrb[5].mxu0  ;;  %v1670_v14 = vmul.f32 %v7786_v8, %v9601_v57 }
 0x22b   :  { %v7787_v11 = vpop.f32.mrb[6].mxu0  ;;  %7956 = vpow2.f32 %v7616_v10  ;;  %v1668_v44 = vmul.f32 %v9601_v57, %v1610_v9 }
 0x22c   :  { %v1613_v12 = vpop.f32.mrb[7].mxu0  ;;  %7958 = vpow2.f32 %v7617_v13  ;;  %v1671_v17 = vmul.f32 %v7787_v11, %v9601_v57  ;;  %v9626_v24 = vadd.f32 %v9606_v59, %v1670_v14 }
 0x22d   :  { %v1669_v50 = vmul.f32 %v9601_v57, %v1613_v12  ;;  %v1691_v54 = vadd.f32 %v9606_v59, %v1668_v44 }
 0x22e   :  { %v9633_v29 = vadd.f32 %v9606_v59, %v1671_v17  ;;  %v7622_v31 = vmul.f32 -1.442695, %v9626_v24 }
 0x22f   :  { %v1692_v56 = vadd.f32 %v9606_v59, %v1669_v50  ;;  %v7620_v58 = vmul.f32 -1.442695, %v1691_v54 }
 0x230   :  { %v7623_v34 = vmul.f32 -1.442695, %v9633_v29 }
 0x231   :  { %v7790_v15 = vpop.f32.mrb[8].mxu0  ;;  %v7621_v60 = vmul.f32 -1.442695, %v1692_v56 }
 0x232   :  { %v7953_v16 = vpop.eup %7952  ;;  %v1626_v18 = vpop.f32.mrb[9].mxu0  ;;  %v1674_v1 = vmul.f32 %v7790_v15, %v9601_v57 }
 0x233   :  { %v1753_v20 = vadd.f32 1.0, %v7953_v16  ;;  %v1672_v21 = vmul.f32 %v9601_v57, %v1626_v18  ;;  %v7791_v22 = vpop.f32.mrb[10].mxu0 }
 0x234   :  { %v7955_v23 = vpop.eup %7954  ;;  %v1629_v26 = vpop.f32.mrb[11].mxu0  ;;  %v1675_v3 = vmul.f32 %v7791_v22, %v9601_v57  ;;  %v1697_v6 = vadd.f32 %v9606_v59, %v1674_v1 }
 0x235   :  { %7960 = vrcp.f32 %v1753_v20  ;;  %v1754_v27 = vadd.f32 1.0, %v7955_v23  ;;  %v9629_v19 = vadd.f32 %v9606_v59, %v1672_v21  ;;  %v1673_v28 = vmul.f32 %v9601_v57, %v1629_v26  ;;  %v7957_v32 = vpop.eup %7956 }
 0x236   :  { %v7959_v37 = vpop.eup %7958  ;;  %v1751_v40 = vadd.f32 1.0, %v7957_v32  ;;  %v1698_v9 = vadd.f32 %v9606_v59, %v1675_v3  ;;  %v7626_v10 = vmul.f32 -1.442695, %v1697_v6 }
 0x237   :  { %7962 = vrcp.f32 %v1754_v27  ;;  %v9636_v30 = vadd.f32 %v9606_v59, %v1673_v28  ;;  %v1752_v47 = vadd.f32 1.0, %v7959_v37 }
 0x238   :  { %7964 = vpow2.f32 %v7622_v31  ;;  %v7627_v12 = vmul.f32 -1.442695, %v1698_v9 }
 0x239   :  { %v7794_v33 = vpop.f32.mrb[12].mxu0  ;;  %7966 = vpow2.f32 %v7623_v34  ;;  %v7625_v18 = vmul.f32 -1.442695, %v9636_v30 }
 0x23a   :  { %v1678_v35 = vmul.f32 %v7794_v33, %v9601_v57  ;;  %v1642_v36 = vpop.f32.mrb[13].mxu0  ;;  %7968 = vrcp.f32 %v1751_v40 }
 0x23b   :  { %v1676_v38 = vmul.f32 %v9601_v57, %v1642_v36  ;;  %v7795_v39 = vpop.f32.mrb[14].mxu0  ;;  %7970 = vrcp.f32 %v1752_v47 }
 0x23c   :  { %v9643_v41 = vadd.f32 %v9606_v59, %v1678_v35  ;;  %v1679_v42 = vmul.f32 %v7795_v39, %v9601_v57  ;;  %v1645_v43 = vpop.f32.mrb[15].mxu0  ;;  %7972 = vpow2.f32 %v7620_v58 }
 0x23d   :  { %v9648_v45 = vadd.f32 %v9606_v59, %v1676_v38  ;;  %v1677_v46 = vmul.f32 %v9601_v57, %v1645_v43  ;;  %7974 = vpow2.f32 %v7621_v60 }
 0x23e   :  { %v9652_v48 = vadd.f32 %v9606_v59, %v1679_v42  ;;  %v7630_v28 = vmul.f32 -1.442695, %v9643_v41 }
 0x23f   :  { %v7961_v49 = vpop.eup %7960  ;;  %v9656_v51 = vadd.f32 %v9606_v59, %v1677_v46  ;;  %v7624_v59 = vmul.f32 -1.442695, %v9629_v19  ;;  %v7628_v39 = vmul.f32 -1.442695, %v9648_v45 }
 0x240   :  { %v1801_v52 = vmul.f32 %v7961_v49, %v1689_v63  ;;  %v7631_v31 = vmul.f32 -1.442695, %v9652_v48 }
 0x241   :  { %v7963_v53 = vpop.eup %7962  ;;  %v7629_v42 = vmul.f32 -1.442695, %v9656_v51 }
 0x242   :  { %2028 = vxpose.xlu0.b32.start.end [1/1] (short) (narrow) %v1801_v52, 32  ;;  %v1802_v55 = vmul.f32 %v7963_v53, %v1690_v4  ;;  %v7965_v25 = vpop.eup %7964 }
 0x243   :  { %v7967_v61 = vpop.eup %7966  ;;  %v1757_v62 = vadd.f32 1.0, %v7965_v25 }
 0x244   :  { %2060 = vxpose.xlu1.b32.start.end [1/1] (short) (narrow) %v1802_v55, 32  ;;  %v7969_v0 = vpop.eup %7968  ;;  %v1758_v2 = vadd.f32 1.0, %v7967_v61 }
 0x245   :  { %v7971_v63 = vpop.eup %7970  ;;  %7976 = vrcp.f32 %v1757_v62  ;;  %v1799_v4 = vmul.f32 %v7969_v0, %v9615_v5 }
 0x246   :  { %7978 = vrcp.f32 %v1758_v2  ;;  %v1800_v8 = vmul.f32 %v7971_v63, %v9618_v7  ;;  %v7973_v11 = vpop.eup %7972  ;;  %v8528_v2 = vmov 0.0  }
 0x247   :  { %v7975_v13 = vpop.eup %7974  ;;  %v1755_v14 = vadd.f32 1.0, %v7973_v11  ;;  %7980 = vpow2.f32 %v7626_v10  ;;  %1843 = vst.msk [vmem:[#allocation3 + $0x60] sm:$0xff] %vm1834_vm15, %v8528_v2  ;;  %1835 = vst.msk [vmem:[#allocation3 + $0x20] sm:$0xff] %vm1834_vm15, %v8528_v2  ;;  %v8530_v10 = vmov 0  }
 0x248   :  { %v1756_v57 = vadd.f32 1.0, %v7975_v13  ;;  %7982 = vpow2.f32 %v7627_v12  ;;  %1836 = vst.msk [vmem:[#allocation3 + $0x28] sm:$0xff] %vm1834_vm15, %v8528_v2  ;;  %1837 = vst.msk [vmem:[#allocation3 + $0x30] sm:$0xff] %vm1834_vm15, %v8528_v2 }
 0x249   :  { %7984 = vrcp.f32 %v1755_v14  ;;  %1838 = vst.msk [vmem:[#allocation3 + $0x38] sm:$0xff] %vm1834_vm15, %v8528_v2  ;;  %1839 = vst.msk [vmem:[#allocation3 + $0x40] sm:$0xff] %vm1834_vm15, %v8528_v2 }
 0x24a   :  { %7986 = vrcp.f32 %v1756_v57  ;;  %1840 = vst.msk [vmem:[#allocation3 + $0x48] sm:$0xff] %vm1834_vm15, %v8528_v2  ;;  %1841 = vst.msk [vmem:[#allocation3 + $0x50] sm:$0xff] %vm1834_vm15, %v8528_v2 }
 0x24b   :  { %7988 = vpow2.f32 %v7624_v59  ;;  %1842 = vst.msk [vmem:[#allocation3 + $0x58] sm:$0xff] %vm1834_vm15, %v8528_v2  ;;  %1844 = vst.msk [vmem:[#allocation3 + $0x68] sm:$0xff] %vm1834_vm15, %v8528_v2 }
 0x24c   :  { %7990 = vpow2.f32 %v7625_v18  ;;  %1845 = vst.msk [vmem:[#allocation3 + $0x70] sm:$0xff] %vm1834_vm15, %v8528_v2  ;;  %1846 = vst.msk [vmem:[#allocation3 + $0x78] sm:$0xff] %vm1834_vm15, %v8528_v2 }
 0x24d   :  { %1847 = vst.msk [vmem:[#allocation3 + $0x80] sm:$0xff] %vm1834_vm15, %v8528_v2  ;;  %1848 = vst.msk [vmem:[#allocation3 + $0x88] sm:$0xff] %vm1834_vm15, %v8528_v2 }
 0x24e   :  { %1849 = vst.msk [vmem:[#allocation3 + $0x90] sm:$0xff] %vm1834_vm15, %v8528_v2  ;;  %1850 = vst.msk [vmem:[#allocation3 + $0x98] sm:$0xff] %vm1834_vm15, %v8528_v2 }
 0x24f   :  { %1964 = vxpose.xlu0.b32.start.end [1/1] (short) (narrow) %v1799_v4, 32  ;;  %v7977_v15 = vpop.eup %7976  ;;  %1851 = vst.msk [vmem:[#allocation3 + $0xa0] sm:$0xff] %vm1834_vm15, %v8528_v2  ;;  %1852 = vst.msk [vmem:[#allocation3 + $0xa8] sm:$0xff] %vm1834_vm15, %v8528_v2 }
 0x250   :  { %v7979_v16 = vpop.eup %7978  ;;  %v1805_v5 = vmul.f32 %v7977_v15, %v9626_v24  ;;  %1853 = vst.msk [vmem:[#allocation3 + $0xb0] sm:$0xff] %vm1834_vm15, %v8528_v2  ;;  %1854 = vst.msk [vmem:[#allocation3 + $0xb8] sm:$0xff] %vm1834_vm15, %v8528_v2 }
 0x251   :  { %1996 = vxpose.xlu1.b32.start.end [1/1] (short) (narrow) %v1800_v8, 32  ;;  %v1806_v7 = vmul.f32 %v7979_v16, %v9633_v29  ;;  %v7981_v17 = vpop.eup %7980  ;;  %1855 = vst.msk [vmem:[#allocation3 + $0xc0] sm:$0xff] %vm1834_vm15, %v8528_v2  ;;  %1856 = vst.msk [vmem:[#allocation3 + $0xc8] sm:$0xff] %vm1834_vm15, %v8528_v2 }
 0x252   :  { %v7983_v20 = vpop.eup %7982  ;;  %v1761_v21 = vadd.f32 1.0, %v7981_v17  ;;  %1857 = vst.msk [vmem:[#allocation3 + $0xd0] sm:$0xff] %vm1834_vm15, %v8528_v2  ;;  %1858 = vst.msk [vmem:[#allocation3 + $0xd8] sm:$0xff] %vm1834_vm15, %v8528_v2 }
 0x253   :  { %v7985_v22 = vpop.eup %7984  ;;  %v1762_v23 = vadd.f32 1.0, %v7983_v20  ;;  %1859 = vst.msk [vmem:[#allocation3 + $0xe0] sm:$0xff] %vm1834_vm15, %v8528_v2  ;;  %1860 = vst.msk [vmem:[#allocation3 + $0xe8] sm:$0xff] %vm1834_vm15, %v8528_v2 }
 0x254   :  { %v7987_v26 = vpop.eup %7986  ;;  %7992 = vrcp.f32 %v1761_v21  ;;  %v1803_v27 = vmul.f32 %v7985_v22, %v1691_v54  ;;  %1861 = vst.msk [vmem:[#allocation3 + $0xf0] sm:$0xff] %vm1834_vm15, %v8528_v2  ;;  %1862 = vst.msk [vmem:[#allocation3 + $0xf8] sm:$0xff] %vm1834_vm15, %v8528_v2 }
 0x255   :  { %7994 = vrcp.f32 %v1762_v23  ;;  %v1804_v24 = vmul.f32 %v7987_v26, %v1692_v56  ;;  %v7989_v29 = vpop.eup %7988  ;;  %1863 = vst.msk [vmem:[#allocation3 + $0x100] sm:$0xff] %vm1834_vm15, %v8528_v2  ;;  %1864 = vst.msk [vmem:[#allocation3 + $0x108] sm:$0xff] %vm1834_vm15, %v8528_v2 }
 0x256   :  { %v7991_v32 = vpop.eup %7990  ;;  %v1759_v33 = vadd.f32 1.0, %v7989_v29  ;;  %7996 = vpow2.f32 %v7630_v28  ;;  %1865 = vst.msk [vmem:[#allocation3 + $0x110] sm:$0xff] %vm1834_vm15, %v8528_v2  ;;  %1866 = vst.msk [vmem:[#allocation3 + $0x118] sm:$0xff] %vm1834_vm15, %v8528_v2 }
 0x257   :  { %v1760_v35 = vadd.f32 1.0, %v7991_v32  ;;  %7998 = vpow2.f32 %v7631_v31  ;;  %1867 = vst.msk [vmem:[#allocation3 + $0x160] sm:$0xff] %vm1834_vm15, %v8528_v2  ;;  %1868 = vst.msk [vmem:[#allocation3 + $0x168] sm:$0xff] %vm1834_vm15, %v8528_v2 }
 0x258   :  { %8000 = vrcp.f32 %v1759_v33  ;;  %1869 = vst.msk [vmem:[#allocation3 + $0x170] sm:$0xff] %vm1834_vm15, %v8528_v2  ;;  %1870 = vst.msk [vmem:[#allocation3 + $0x178] sm:$0xff] %vm1834_vm15, %v8528_v2 }
 0x259   :  { %8002 = vrcp.f32 %v1760_v35  ;;  %1871 = vst.msk [vmem:[#allocation3 + $0x180] sm:$0xff] %vm1834_vm15, %v8528_v2  ;;  %1872 = vst.msk [vmem:[#allocation3 + $0x188] sm:$0xff] %vm1834_vm15, %v8528_v2 }
 0x25a   :  { %8004 = vpow2.f32 %v7628_v39  ;;  %1873 = vst.msk [vmem:[#allocation3 + $0x190] sm:$0xff] %vm1834_vm15, %v8528_v2  ;;  %1874 = vst.msk [vmem:[#allocation3 + $0x198] sm:$0xff] %vm1834_vm15, %v8528_v2 }
 0x25b   :  { %8006 = vpow2.f32 %v7629_v42  ;;  %1875 = vst.msk [vmem:[#allocation3 + $0x1a0] sm:$0xff] %vm1834_vm15, %v8528_v2  ;;  %1876 = vst.msk [vmem:[#allocation3 + $0x1a8] sm:$0xff] %vm1834_vm15, %v8528_v2 }
 0x25c   :  { %2156 = vxpose.xlu0.b32.start.end [1/1] (short) (narrow) %v1805_v5, 32  ;;  %1877 = vst.msk [vmem:[#allocation3 + $0x1b0] sm:$0xff] %vm1834_vm15, %v8528_v2  ;;  %1878 = vst.msk [vmem:[#allocation3 + $0x1b8] sm:$0xff] %vm1834_vm15, %v8528_v2 }
 0x25d   :  { %1879 = vst.msk [vmem:[#allocation3 + $0x1c0] sm:$0xff] %vm1834_vm15, %v8528_v2  ;;  %1880 = vst.msk [vmem:[#allocation3 + $0x1c8] sm:$0xff] %vm1834_vm15, %v8528_v2 }
 0x25e   :  { %2188 = vxpose.xlu1.b32.start.end [1/1] (short) (narrow) %v1806_v7, 32  ;;  %v7993_v34 = vpop.eup %7992  ;;  %1881 = vst.msk [vmem:[#allocation3 + $0x1d0] sm:$0xff] %vm1834_vm15, %v8528_v2  ;;  %1882 = vst.msk [vmem:[#allocation3 + $0x1d8] sm:$0xff] %vm1834_vm15, %v8528_v2 }
 0x25f   :  { %v7995_v36 = vpop.eup %7994  ;;  %v1809_v37 = vmul.f32 %v7993_v34, %v1697_v6  ;;  %1883 = vst.msk [vmem:[#allocation3 + $0x1e0] sm:$0xff] %vm1834_vm15, %v8528_v2  ;;  %1884 = vst.msk [vmem:[#allocation3 + $0x1e8] sm:$0xff] %vm1834_vm15, %v8528_v2 }
 0x260   :  { %v1810_v38 = vmul.f32 %v7995_v36, %v1698_v9  ;;  %v7997_v40 = vpop.eup %7996  ;;  %1885 = vst.msk [vmem:[#allocation3 + $0x1f0] sm:$0xff] %vm1834_vm15, %v8528_v2  ;;  %1886 = vst.msk [vmem:[#allocation3 + $0x1f8] sm:$0xff] %vm1834_vm15, %v8528_v2 }
 0x261   :  { %v7999_v43 = vpop.eup %7998  ;;  %v1765_v44 = vadd.f32 1.0, %v7997_v40  ;;  %1887 = vst.msk [vmem:[#allocation3 + $0x200] sm:$0xff] %vm1834_vm15, %v8528_v2  ;;  %1888 = vst.msk [vmem:[#allocation3 + $0x208] sm:$0xff] %vm1834_vm15, %v8528_v2 }
 0x262   :  { %v8001_v46 = vpop.eup %8000  ;;  %v1766_v47 = vadd.f32 1.0, %v7999_v43  ;;  %1889 = vst.msk [vmem:[#allocation3 + $0x210] sm:$0xff] %vm1834_vm15, %v8528_v2  ;;  %1890 = vst.msk [vmem:[#allocation3 + $0x218] sm:$0xff] %vm1834_vm15, %v8528_v2 }
 0x263   :  { %v8003_v49 = vpop.eup %8002  ;;  %8008 = vrcp.f32 %v1765_v44  ;;  %v1807_v50 = vmul.f32 %v8001_v46, %v9629_v19  ;;  %1891 = vst.msk [vmem:[#allocation3 + $0x220] sm:$0xff] %vm1834_vm15, %v8528_v2  ;;  %1892 = vst.msk [vmem:[#allocation3 + $0x228] sm:$0xff] %vm1834_vm15, %v8528_v2 }
 0x264   :  { %8010 = vrcp.f32 %v1766_v47  ;;  %v1808_v52 = vmul.f32 %v8003_v49, %v9636_v30  ;;  %v8005_v53 = vpop.eup %8004  ;;  %1893 = vst.msk [vmem:[#allocation3 + $0x230] sm:$0xff] %vm1834_vm15, %v8528_v2  ;;  %1894 = vst.msk [vmem:[#allocation3 + $0x238] sm:$0xff] %vm1834_vm15, %v8528_v2 }
 0x265   :  { %v8007_v54 = vpop.eup %8006  ;;  %v1763_v55 = vadd.f32 1.0, %v8005_v53  ;;  %1895 = vst.msk [vmem:[#allocation3 + $0x240] sm:$0xff] %vm1834_vm15, %v8528_v2  ;;  %1896 = vst.msk [vmem:[#allocation3 + $0x248] sm:$0xff] %vm1834_vm15, %v8528_v2 }
 0x266   :  { %v1764_v58 = vadd.f32 1.0, %v8007_v54  ;;  %1897 = vst.msk [vmem:[#allocation3 + $0x250] sm:$0xff] %vm1834_vm15, %v8528_v2  ;;  %1898 = vst.msk [vmem:[#allocation3 + $0x258] sm:$0xff] %vm1834_vm15, %v8528_v2  ;;  %vm7372_vm15 = vcmask 392450  }
 0x267   :  { %8012 = vrcp.f32 %v1763_v55  ;;  %1908 = vst.msk [vmem:[#allocation3 + $0x60] sm:$0xff] %vm1899_vm0, %v8528_v2  ;;  %1909 = vst.msk [vmem:[#allocation3 + $0x68] sm:$0xff] %vm1899_vm0, %v8528_v2 }
 0x268   :  { %8014 = vrcp.f32 %v1764_v58  ;;  %1900 = vst.msk [vmem:[#allocation3 + $0x20] sm:$0xff] %vm1899_vm0, %v8528_v2  ;;  %1901 = vst.msk [vmem:[#allocation3 + $0x28] sm:$0xff] %vm1899_vm0, %v8528_v2 }
 0x269   :  { %2092 = vxpose.xlu0.b32.start.end [1/1] (short) (narrow) %v1803_v27, 32  ;;  %1902 = vst.msk [vmem:[#allocation3 + $0x30] sm:$0xff] %vm1899_vm0, %v8528_v2  ;;  %1903 = vst.msk [vmem:[#allocation3 + $0x38] sm:$0xff] %vm1899_vm0, %v8528_v2 }
 0x26a   :  { %1904 = vst.msk [vmem:[#allocation3 + $0x40] sm:$0xff] %vm1899_vm0, %v8528_v2  ;;  %1905 = vst.msk [vmem:[#allocation3 + $0x48] sm:$0xff] %vm1899_vm0, %v8528_v2 }
 0x26b   :  { %2124 = vxpose.xlu1.b32.start.end [1/1] (short) (narrow) %v1804_v24, 32  ;;  %1906 = vst.msk [vmem:[#allocation3 + $0x50] sm:$0xff] %vm1899_vm0, %v8528_v2  ;;  %1907 = vst.msk [vmem:[#allocation3 + $0x58] sm:$0xff] %vm1899_vm0, %v8528_v2 }
 0x26c   :  { %1910 = vst.msk [vmem:[#allocation3 + $0x70] sm:$0xff] %vm1899_vm0, %v8528_v2  ;;  %1911 = vst.msk [vmem:[#allocation3 + $0x78] sm:$0xff] %vm1899_vm0, %v8528_v2 }
 0x26d   :  { %v8009_v56 = vpop.eup %8008  ;;  %1912 = vst.msk [vmem:[#allocation3 + $0x80] sm:$0xff] %vm1899_vm0, %v8528_v2  ;;  %1913 = vst.msk [vmem:[#allocation3 + $0x88] sm:$0xff] %vm1899_vm0, %v8528_v2 }
 0x26e   :  { %v8011_v25 = vpop.eup %8010  ;;  %v1813_v60 = vmul.f32 %v8009_v56, %v9643_v41  ;;  %1914 = vst.msk [vmem:[#allocation3 + $0x90] sm:$0xff] %vm1899_vm0, %v8528_v2  ;;  %1915 = vst.msk [vmem:[#allocation3 + $0x98] sm:$0xff] %vm1899_vm0, %v8528_v2 }
 0x26f   :  { %v1814_v61 = vmul.f32 %v8011_v25, %v9652_v48  ;;  %1916 = vst.msk [vmem:[#allocation3 + $0xa0] sm:$0xff] %vm1899_vm0, %v8528_v2  ;;  %1917 = vst.msk [vmem:[#allocation3 + $0xa8] sm:$0xff] %vm1899_vm0, %v8528_v2 }
 0x270   :  { %1918 = vst.msk [vmem:[#allocation3 + $0xb0] sm:$0xff] %vm1899_vm0, %v8528_v2  ;;  %1919 = vst.msk [vmem:[#allocation3 + $0xb8] sm:$0xff] %vm1899_vm0, %v8528_v2 }
 0x271   :  { %v8013_v19 = vpop.eup %8012  ;;  %1920 = vst.msk [vmem:[#allocation3 + $0xc0] sm:$0xff] %vm1899_vm0, %v8528_v2  ;;  %1921 = vst.msk [vmem:[#allocation3 + $0xc8] sm:$0xff] %vm1899_vm0, %v8528_v2 }
 0x272   :  { %v8015_v62 = vpop.eup %8014  ;;  %v1811_v0 = vmul.f32 %v8013_v19, %v9648_v45  ;;  %1922 = vst.msk [vmem:[#allocation3 + $0xd0] sm:$0xff] %vm1899_vm0, %v8528_v2  ;;  %1923 = vst.msk [vmem:[#allocation3 + $0xd8] sm:$0xff] %vm1899_vm0, %v8528_v2 }
 0x273   :  { %v1812_v30 = vmul.f32 %v8015_v62, %v9656_v51  ;;  %1924 = vst.msk [vmem:[#allocation3 + $0xe0] sm:$0xff] %vm1899_vm0, %v8528_v2  ;;  %1925 = vst.msk [vmem:[#allocation3 + $0xe8] sm:$0xff] %vm1899_vm0, %v8528_v2 }
 0x274   :  { %1926 = vst.msk [vmem:[#allocation3 + $0xf0] sm:$0xff] %vm1899_vm0, %v8528_v2  ;;  %1927 = vst.msk [vmem:[#allocation3 + $0xf8] sm:$0xff] %vm1899_vm0, %v8528_v2 }
 0x275   :  { %1928 = vst.msk [vmem:[#allocation3 + $0x100] sm:$0xff] %vm1899_vm0, %v8528_v2  ;;  %1929 = vst.msk [vmem:[#allocation3 + $0x108] sm:$0xff] %vm1899_vm0, %v8528_v2 }
 0x276   :  { %2284 = vxpose.xlu0.b32.start.end [1/1] (short) (narrow) %v1809_v37, 32  ;;  %1930 = vst.msk [vmem:[#allocation3 + $0x110] sm:$0xff] %vm1899_vm0, %v8528_v2  ;;  %1931 = vst.msk [vmem:[#allocation3 + $0x118] sm:$0xff] %vm1899_vm0, %v8528_v2 }
 0x277   :  { %1932 = vst.msk [vmem:[#allocation3 + $0x160] sm:$0xff] %vm1899_vm0, %v8528_v2  ;;  %1933 = vst.msk [vmem:[#allocation3 + $0x168] sm:$0xff] %vm1899_vm0, %v8528_v2 }
 0x278   :  { %2316 = vxpose.xlu1.b32.start.end [1/1] (short) (narrow) %v1810_v38, 32  ;;  %1934 = vst.msk [vmem:[#allocation3 + $0x170] sm:$0xff] %vm1899_vm0, %v8528_v2  ;;  %1935 = vst.msk [vmem:[#allocation3 + $0x178] sm:$0xff] %vm1899_vm0, %v8528_v2 }
 0x279   :  { %1936 = vst.msk [vmem:[#allocation3 + $0x180] sm:$0xff] %vm1899_vm0, %v8528_v2  ;;  %1937 = vst.msk [vmem:[#allocation3 + $0x188] sm:$0xff] %vm1899_vm0, %v8528_v2 }
 0x27a   :  { %1938 = vst.msk [vmem:[#allocation3 + $0x190] sm:$0xff] %vm1899_vm0, %v8528_v2  ;;  %1939 = vst.msk [vmem:[#allocation3 + $0x198] sm:$0xff] %vm1899_vm0, %v8528_v2 }
 0x27b   :  { %1940 = vst.msk [vmem:[#allocation3 + $0x1a0] sm:$0xff] %vm1899_vm0, %v8528_v2  ;;  %1941 = vst.msk [vmem:[#allocation3 + $0x1a8] sm:$0xff] %vm1899_vm0, %v8528_v2 }
 0x27c   :  { %1942 = vst.msk [vmem:[#allocation3 + $0x1b0] sm:$0xff] %vm1899_vm0, %v8528_v2  ;;  %1943 = vst.msk [vmem:[#allocation3 + $0x1b8] sm:$0xff] %vm1899_vm0, %v8528_v2 }
 0x27d   :  { %1944 = vst.msk [vmem:[#allocation3 + $0x1c0] sm:$0xff] %vm1899_vm0, %v8528_v2  ;;  %1945 = vst.msk [vmem:[#allocation3 + $0x1c8] sm:$0xff] %vm1899_vm0, %v8528_v2 }
 0x27e   :  { %1946 = vst.msk [vmem:[#allocation3 + $0x1d0] sm:$0xff] %vm1899_vm0, %v8528_v2  ;;  %1947 = vst.msk [vmem:[#allocation3 + $0x1d8] sm:$0xff] %vm1899_vm0, %v8528_v2 }
 0x27f   :  { %1948 = vst.msk [vmem:[#allocation3 + $0x1e0] sm:$0xff] %vm1899_vm0, %v8528_v2  ;;  %1949 = vst.msk [vmem:[#allocation3 + $0x1e8] sm:$0xff] %vm1899_vm0, %v8528_v2 }
 0x280   :  { %1950 = vst.msk [vmem:[#allocation3 + $0x1f0] sm:$0xff] %vm1899_vm0, %v8528_v2  ;;  %1951 = vst.msk [vmem:[#allocation3 + $0x1f8] sm:$0xff] %vm1899_vm0, %v8528_v2 }
 0x281   :  { %1952 = vst.msk [vmem:[#allocation3 + $0x200] sm:$0xff] %vm1899_vm0, %v8528_v2  ;;  %1953 = vst.msk [vmem:[#allocation3 + $0x208] sm:$0xff] %vm1899_vm0, %v8528_v2 }
 0x282   :  { %1954 = vst.msk [vmem:[#allocation3 + $0x210] sm:$0xff] %vm1899_vm0, %v8528_v2  ;;  %1955 = vst.msk [vmem:[#allocation3 + $0x218] sm:$0xff] %vm1899_vm0, %v8528_v2 }
 0x283   :  { %2220 = vxpose.xlu0.b32.start.end [1/1] (short) (narrow) %v1807_v50, 32  ;;  %1956 = vst.msk [vmem:[#allocation3 + $0x220] sm:$0xff] %vm1899_vm0, %v8528_v2  ;;  %1957 = vst.msk [vmem:[#allocation3 + $0x228] sm:$0xff] %vm1899_vm0, %v8528_v2 }
 0x284   :  { %1958 = vst.msk [vmem:[#allocation3 + $0x230] sm:$0xff] %vm1899_vm0, %v8528_v2  ;;  %1959 = vst.msk [vmem:[#allocation3 + $0x238] sm:$0xff] %vm1899_vm0, %v8528_v2 }
 0x285   :  { %2252 = vxpose.xlu1.b32.start.end [1/1] (short) (narrow) %v1808_v52, 32  ;;  %1960 = vst.msk [vmem:[#allocation3 + $0x240] sm:$0xff] %vm1899_vm0, %v8528_v2  ;;  %1961 = vst.msk [vmem:[#allocation3 + $0x248] sm:$0xff] %vm1899_vm0, %v8528_v2 }
 0x286   :  { %1962 = vst.msk [vmem:[#allocation3 + $0x250] sm:$0xff] %vm1899_vm0, %v8528_v2  ;;  %1963 = vst.msk [vmem:[#allocation3 + $0x258] sm:$0xff] %vm1899_vm0, %v8528_v2  ;;  %vm7404_vm0 = vcmask 518528  }
 0x287   :  { %1817 = vst.msk [vmem:[#allocation3 + $0x8] sm:$0xff] %vm1815_vm2, %v8528_v2  ;;  %1816 = vst.msk [vmem:[#allocation3] sm:$0xff] %vm1815_vm2, %v8528_v2 }
 0x288   :  { %1818 = vst.msk [vmem:[#allocation3 + $0x10] sm:$0xff] %vm1815_vm2, %v8528_v2  ;;  %1819 = vst.msk [vmem:[#allocation3 + $0x18] sm:$0xff] %vm1815_vm2, %v8528_v2 }
 0x289   :  { %1820 = vst.msk [vmem:[#allocation3 + $0x140] sm:$0xff] %vm1815_vm2, %v8528_v2  ;;  %1821 = vst.msk [vmem:[#allocation3 + $0x148] sm:$0xff] %vm1815_vm2, %v8528_v2 }
 0x28a   :  { %1822 = vst.msk [vmem:[#allocation3 + $0x150] sm:$0xff] %vm1815_vm2, %v8528_v2  ;;  %1823 = vst.msk [vmem:[#allocation3 + $0x158] sm:$0xff] %vm1815_vm2, %v8528_v2 }
 0x28b   :  { %1825 = vst.msk [vmem:[#allocation3 + $0x120] sm:$0xff] %vm1815_vm2, %v8528_v2  ;;  %1826 = vst.msk [vmem:[#allocation3 + $0x128] sm:$0xff] %vm1815_vm2, %v8528_v2 }
 0x28c   :  { %1827 = vst.msk [vmem:[#allocation3 + $0x130] sm:$0xff] %vm1815_vm2, %v8528_v2  ;;  %1828 = vst.msk [vmem:[#allocation3 + $0x138] sm:$0xff] %vm1815_vm2, %v8528_v2 }
 0x28d   :  { %1829 = vst.msk [vmem:[#allocation3 + $0x260] sm:$0xff] %vm1815_vm2, %v8528_v2  ;;  %1830 = vst.msk [vmem:[#allocation3 + $0x268] sm:$0xff] %vm1815_vm2, %v8528_v2 }
 0x28e   :  { %1831 = vst.msk [vmem:[#allocation3 + $0x270] sm:$0xff] %vm1815_vm2, %v8528_v2  ;;  %1832 = vst.msk [vmem:[#allocation3 + $0x278] sm:$0xff] %vm1815_vm2, %v8528_v2  ;;  %v2862_v2 = vld [vmem:[%s14610_s4 + $0x8] sm:$0xff]  ;;  %vm7434_vm2 = vcmask 650752  }
 0x290   :  { %2412 = vxpose.xlu0.b32.start.end [1/1] (short) (narrow) %v1813_v60, 32 }
 0x292   :  { %2444 = vxpose.xlu1.b32.start.end [1/1] (short) (narrow) %v1814_v61, 32 }
 0x29d   :  { %2348 = vxpose.xlu0.b32.start.end [1/1] (short) (narrow) %v1811_v0, 32 }
 0x29f   :  { %2380 = vxpose.xlu1.b32.start.end [1/1] (short) (narrow) %v1812_v30, 32 }
 0x2bd   :  { %7835 = vset.pattern.permute.xlu1 %v8530_v10 }
 0x2c2   :  { %v9680_v1 = vpop.trf.xlu0 }
 0x2c4   :  { %v9810_v41 = vpop.trf.xlu1 }
 0x2c6   :  { %v2045_v45 = vpop.trf.xlu0  ;;  %7834 = vset.pattern.permute.xlu0 %v8530_v10  ;;  %v2861_v10 = vld [vmem:[%s14610_s4] sm:$0xff] }
 0x2c8   :  { %v2077_v48 = vpop.trf.xlu1 }
 0x2c9   :  { %2558 = vrot.lane.b32.xlu1 %v2045_v45, %s8529_s2 }
 0x2ca   :  { %v2046_v51 = vpop.trf.xlu0 }
 0x2cc   :  { %v2078_v63 = vpop.trf.xlu1 }
 0x2ce   :  { %v2047_v3 = vpop.trf.xlu0 }
 0x2d0   :  { %v2079_v4 = vpop.trf.xlu1 }
 0x2d2   :  { %v1980_v6 = vpop.trf.xlu0  ;;  %2556 = vrot.lane.b32.xlu0 %v9680_v1, %s8529_s2 }
 0x2d4   :  { %v2012_v8 = vpop.trf.xlu1 }
 0x2d6   :  { %v1981_v9 = vpop.trf.xlu0  ;;  %2540 = vrot.lane.b32.xlu0 %v1980_v6, %s8529_s2 }
 0x2d7   :  { %2542 = vrot.lane.b32.xlu1 %v1981_v9, %s8529_s2 }
 0x2d8   :  { %v2013_v11 = vpop.trf.xlu1 }
 0x2da   :  { %v1982_v12 = vpop.trf.xlu0  ;;  %2564 = vrot.lane.b32.xlu0 %v9810_v41, %s8529_s2 }
 0x2db   :  { %2566 = vrot.lane.b32.xlu1 %v2077_v48, %s8529_s2 }
 0x2dc   :  { %v2014_v13 = vpop.trf.xlu1 }
 0x2de   :  { %v1983_v14 = vpop.trf.xlu0  ;;  %2548 = vrot.lane.b32.xlu0 %v2012_v8, %s8529_s2 }
 0x2df   :  { %2550 = vrot.lane.b32.xlu1 %v2013_v11, %s8529_s2 }
 0x2e0   :  { %v2015_v15 = vpop.trf.xlu1 }
 0x2e2   :  { %v2172_v57 = vpop.trf.xlu0  ;;  %2560 = vrot.lane.b32.xlu0 %v2046_v51, %s8529_s2 }
 0x2e3   :  { %2562 = vrot.lane.b32.xlu1 %v2047_v3, %s8529_s2 }
 0x2e4   :  { %v2204_v16 = vpop.trf.xlu1 }
 0x2e6   :  { %v2173_v5 = vpop.trf.xlu0  ;;  %2588 = vrot.lane.b32.xlu0 %v2172_v57, %s8529_s2  ;;  %v7633_v57 = vld [vmem:[%s14610_s4 + $0x28] sm:$0xff] }
 0x2e7   :  { %2590 = vrot.lane.b32.xlu1 %v2173_v5, %s8529_s2 }
 0x2e8   :  { %v2205_v7 = vpop.trf.xlu1 }
 0x2ea   :  { %v2174_v59 = vpop.trf.xlu0  ;;  %2544 = vrot.lane.b32.xlu0 %v1982_v12, %s8529_s2 }
 0x2eb   :  { %2546 = vrot.lane.b32.xlu1 %v1983_v14, %s8529_s2 }
 0x2ec   :  { %v2206_v17 = vpop.trf.xlu1 }
 0x2ee   :  { %v2175_v18 = vpop.trf.xlu0 }
 0x2f0   :  { %v2207_v20 = vpop.trf.xlu1 }
 0x2f2   :  { %v2108_v21 = vpop.trf.xlu0 }
 0x2f3   :  { %2572 = vrot.lane.b32.xlu0 %v2108_v21, %s8529_s2 }
 0x2f4   :  { %v2140_v22 = vpop.trf.xlu1 }
 0x2f6   :  { %v2109_v23 = vpop.trf.xlu0 }
 0x2f7   :  { %2568 = vrot.lane.b32.xlu0 %v2078_v63, %s8529_s2  ;;  %2574 = vrot.lane.b32.xlu1 %v2109_v23, %s8529_s2 }
 0x2f8   :  { %v2141_v26 = vpop.trf.xlu1 }
 0x2fa   :  { %v2110_v27 = vpop.trf.xlu0 }
 0x2fb   :  { %2596 = vrot.lane.b32.xlu0 %v2204_v16, %s8529_s2  ;;  %2570 = vrot.lane.b32.xlu1 %v2079_v4, %s8529_s2  ;;  %v2863_v16 = vld [vmem:[%s14610_s4 + $0x10] sm:$0xff] }
 0x2fc   :  { %v2142_v24 = vpop.trf.xlu1 }
 0x2fe   :  { %v2111_v28 = vpop.trf.xlu0 }
 0x2ff   :  { %2552 = vrot.lane.b32.xlu0 %v2014_v13, %s8529_s2  ;;  %2598 = vrot.lane.b32.xlu1 %v2205_v7, %s8529_s2  ;;  %v2864_v13 = vld [vmem:[%s14610_s4 + $0x18] sm:$0xff] }
 0x300   :  { %v2143_v29 = vpop.trf.xlu1  ;;  %v7635_v7 = vld [vmem:[%s14610_s4 + $0x38] sm:$0xff] }
 0x302   :  { %v2300_v31 = vpop.trf.xlu0 }
 0x303   :  { %2580 = vrot.lane.b32.xlu0 %v2140_v22, %s8529_s2  ;;  %2554 = vrot.lane.b32.xlu1 %v2015_v15, %s8529_s2 }
 0x304   :  { %v2332_v32 = vpop.trf.xlu1 }
 0x306   :  { %v2301_v33 = vpop.trf.xlu0 }
 0x307   :  { %2592 = vrot.lane.b32.xlu0 %v2174_v59, %s8529_s2  ;;  %2582 = vrot.lane.b32.xlu1 %v2141_v26, %s8529_s2  ;;  %v7632_v59 = vld [vmem:[%s14610_s4 + $0x20] sm:$0xff] }
 0x308   :  { %v2333_v34 = vpop.trf.xlu1 }
 0x30a   :  { %v2302_v35 = vpop.trf.xlu0 }
 0x30b   :  { %2620 = vrot.lane.b32.xlu0 %v2300_v31, %s8529_s2  ;;  %2594 = vrot.lane.b32.xlu1 %v2175_v18, %s8529_s2 }
 0x30c   :  { %v2334_v36 = vpop.trf.xlu1 }
 0x30e   :  { %v2303_v37 = vpop.trf.xlu0 }
 0x30f   :  { %2576 = vrot.lane.b32.xlu0 %v2110_v27, %s8529_s2  ;;  %2622 = vrot.lane.b32.xlu1 %v2301_v33, %s8529_s2 }
 0x310   :  { %v2335_v38 = vpop.trf.xlu1 }
 0x312   :  { %v2236_v39 = vpop.trf.xlu0 }
 0x313   :  { %2604 = vrot.lane.b32.xlu0 %v2236_v39, %s8529_s2  ;;  %2578 = vrot.lane.b32.xlu1 %v2111_v28, %s8529_s2 }
 0x314   :  { %v2268_v40 = vpop.trf.xlu1 }
 0x316   :  { %v2237_v42 = vpop.trf.xlu0 }
 0x317   :  { %2600 = vrot.lane.b32.xlu0 %v2206_v17, %s8529_s2  ;;  %2606 = vrot.lane.b32.xlu1 %v2237_v42, %s8529_s2  ;;  %v7634_v17 = vld [vmem:[%s14610_s4 + $0x30] sm:$0xff] }
 0x318   :  { %v2269_v43 = vpop.trf.xlu1 }
 0x31a   :  { %v2238_v44 = vpop.trf.xlu0 }
 0x31b   :  { %2628 = vrot.lane.b32.xlu0 %v2332_v32, %s8529_s2  ;;  %2602 = vrot.lane.b32.xlu1 %v2207_v20, %s8529_s2 }
 0x31c   :  { %v2270_v46 = vpop.trf.xlu1 }
 0x31e   :  { %v2239_v47 = vpop.trf.xlu0 }
 0x31f   :  { %2584 = vrot.lane.b32.xlu0 %v2142_v24, %s8529_s2  ;;  %2630 = vrot.lane.b32.xlu1 %v2333_v34, %s8529_s2 }
 0x320   :  { %v2271_v49 = vpop.trf.xlu1 }
 0x322   :  { %v2428_v50 = vpop.trf.xlu0 }
 0x323   :  { %2612 = vrot.lane.b32.xlu0 %v2268_v40, %s8529_s2  ;;  %2586 = vrot.lane.b32.xlu1 %v2143_v29, %s8529_s2 }
 0x324   :  { %v2460_v52 = vpop.trf.xlu1 }
 0x326   :  { %v2429_v53 = vpop.trf.xlu0 }
 0x327   :  { %2624 = vrot.lane.b32.xlu0 %v2302_v35, %s8529_s2  ;;  %2614 = vrot.lane.b32.xlu1 %v2269_v43, %s8529_s2 }
 0x328   :  { %v2461_v54 = vpop.trf.xlu1 }
 0x32a   :  { %v2430_v55 = vpop.trf.xlu0 }
 0x32b   :  { %2608 = vrot.lane.b32.xlu0 %v2238_v44, %s8529_s2  ;;  %2626 = vrot.lane.b32.xlu1 %v2303_v37, %s8529_s2 }
 0x32c   :  { %v2462_v56 = vpop.trf.xlu1 }
 0x32e   :  { %v2431_v58 = vpop.trf.xlu0 }
 0x32f   :  { %2616 = vrot.lane.b32.xlu0 %v2270_v46, %s8529_s2  ;;  %2610 = vrot.lane.b32.xlu1 %v2239_v47, %s8529_s2 }
 0x330   :  { %v9987_v25 = vpop.trf.xlu1 }
 0x332   :  { %v2364_v60 = vpop.trf.xlu0 }
 0x333   :  { %2632 = vrot.lane.b32.xlu0 %v2334_v36, %s8529_s2  ;;  %2634 = vrot.lane.b32.xlu1 %v2335_v38, %s8529_s2 }
 0x334   :  { %v2396_v61 = vpop.trf.xlu1 }
 0x336   :  { %v2365_v19 = vpop.trf.xlu0 }
 0x337   :  { %2636 = vrot.lane.b32.xlu0 %v2364_v60, %s8529_s2  ;;  %2618 = vrot.lane.b32.xlu1 %v2271_v49, %s8529_s2 }
 0x338   :  { %v2397_v62 = vpop.trf.xlu1 }
 0x33a   :  { %v2366_v0 = vpop.trf.xlu0 }
 0x33b   :  { %2640 = vrot.lane.b32.xlu0 %v2366_v0, %s8529_s2  ;;  %2638 = vrot.lane.b32.xlu1 %v2365_v19, %s8529_s2 }
 0x33c   :  { %v2398_v30 = vpop.trf.xlu1 }
 0x33e   :  { %v2367_v1 = vpop.trf.xlu0 }
 0x33f   :  { %2642 = vrot.lane.b32.xlu1 %v2367_v1, %s8529_s2  ;;  %2644 = vrot.lane.b32.xlu0 %v2396_v61, %s8529_s2 }
 0x340   :  { %v2399_v41 = vpop.trf.xlu1 }
 0x343   :  { %2646 = vrot.lane.b32.xlu1 %v2397_v62, %s8529_s2  ;;  %2648 = vrot.lane.b32.xlu0 %v2398_v30, %s8529_s2 }
 0x344   :  { %v2557_v45 = vpop.permute.xlu0 %2556  ;;  %v2559_v48 = vpop.permute.xlu1 %2558 }
 0x345   :  { %2741 = vst.msk [vmem:[#allocation3 + $0x60] sm:$0xff] %vm2732_vm1, %v2557_v45  ;;  %2742 = vst.msk [vmem:[#allocation3 + $0x68] sm:$0xff] %vm2732_vm1, %v2559_v48 }
 0x347   :  { %2652 = vrot.lane.b32.xlu0 %v2428_v50, %s8529_s2  ;;  %2650 = vrot.lane.b32.xlu1 %v2399_v41, %s8529_s2 }
 0x348   :  { %v2541_v51 = vpop.permute.xlu0 %2540 }
 0x349   :  { %2733 = vst.msk [vmem:[#allocation3 + $0x20] sm:$0xff] %vm2732_vm1, %v2541_v51  ;;  %v2543_v63 = vpop.permute.xlu1 %2542 }
 0x34a   :  { %2734 = vst.msk [vmem:[#allocation3 + $0x28] sm:$0xff] %vm2732_vm1, %v2543_v63 }
 0x34b   :  { %2656 = vrot.lane.b32.xlu0 %v2430_v55, %s8529_s2  ;;  %2654 = vrot.lane.b32.xlu1 %v2429_v53, %s8529_s2 }
 0x34c   :  { %v2565_v3 = vpop.permute.xlu0 %2564 }
 0x34d   :  { %2745 = vst.msk [vmem:[#allocation3 + $0x80] sm:$0xff] %vm2732_vm1, %v2565_v3  ;;  %v2567_v4 = vpop.permute.xlu1 %2566 }
 0x34e   :  { %2746 = vst.msk [vmem:[#allocation3 + $0x88] sm:$0xff] %vm2732_vm1, %v2567_v4 }
 0x34f   :  { %2660 = vrot.lane.b32.xlu0 %v2460_v52, %s8529_s2  ;;  %2658 = vrot.lane.b32.xlu1 %v2431_v58, %s8529_s2 }
 0x350   :  { %v2549_v6 = vpop.permute.xlu0 %2548 }
 0x351   :  { %2737 = vst.msk [vmem:[#allocation3 + $0x40] sm:$0xff] %vm2732_vm1, %v2549_v6  ;;  %v2551_v8 = vpop.permute.xlu1 %2550 }
 0x352   :  { %2738 = vst.msk [vmem:[#allocation3 + $0x48] sm:$0xff] %vm2732_vm1, %v2551_v8 }
 0x353   :  { %2664 = vrot.lane.b32.xlu0 %v2462_v56, %s8529_s2  ;;  %2662 = vrot.lane.b32.xlu1 %v2461_v54, %s8529_s2 }
 0x354   :  { %v2561_v9 = vpop.permute.xlu0 %2560 }
 0x355   :  { %2743 = vst.msk [vmem:[#allocation3 + $0x70] sm:$0xff] %vm2732_vm1, %v2561_v9  ;;  %v2563_v11 = vpop.permute.xlu1 %2562 }
 0x356   :  { %2744 = vst.msk [vmem:[#allocation3 + $0x78] sm:$0xff] %vm2732_vm1, %v2563_v11 }
 0x357   :  { %2867 = vperm.xlu0 %7834, %v2861_v10   ;;  %2666 = vrot.lane.b32.xlu1 %v9987_v25, %s8529_s2 }
 0x358   :  { %v2589_v12 = vpop.permute.xlu0 %2588 }
 0x359   :  { %2757 = vst.msk [vmem:[#allocation3 + $0xe0] sm:$0xff] %vm2732_vm1, %v2589_v12  ;;  %v2591_v14 = vpop.permute.xlu1 %2590 }
 0x35a   :  { %2758 = vst.msk [vmem:[#allocation3 + $0xe8] sm:$0xff] %vm2732_vm1, %v2591_v14 }
 0x35b   :  { %2882 = vperm.xlu0 %7834, %v2864_v13   ;;  %2872 = vperm.xlu1 %7835, %v2862_v2   ;;  %v10139_v2 = vld [vmem:[#allocation3 + $0x8] sm:$0xff] }
 0x35c   :  { %v2545_v15 = vpop.permute.xlu0 %2544 }
 0x35d   :  { %2735 = vst.msk [vmem:[#allocation3 + $0x30] sm:$0xff] %vm2732_vm1, %v2545_v15  ;;  %v2547_v5 = vpop.permute.xlu1 %2546  ;;  %v10143_v15 = vld [vmem:[#allocation3 + $0x18] sm:$0xff] }
 0x35e   :  { %2736 = vst.msk [vmem:[#allocation3 + $0x38] sm:$0xff] %vm2732_vm1, %v2547_v5 }
 0x35f   :  { %2961 = vperm.xlu0 %7834, %v7633_v57   ;;  %2877 = vperm.xlu1 %7835, %v2863_v16   ;;  %v10145_v57 = vld [vmem:[#allocation3] sm:$0xff] }
 0x363   :  { %2971 = vperm.xlu0 %7834, %v7635_v7   ;;  %2956 = vperm.xlu1 %7835, %v7632_v59  }
 0x365   :  { %v2573_v18 = vpop.permute.xlu0 %2572 }
 0x366   :  { %2749 = vst.msk [vmem:[#allocation3 + $0xa0] sm:$0xff] %vm2732_vm1, %v2573_v18  ;;  %v10160_v18 = vld [vmem:[#allocation3 + $0x68] sm:$0xff] }
 0x367   :  { %2966 = vperm.xlu1 %7835, %v7634_v17  }
 0x369   :  { %v2569_v20 = vpop.permute.xlu0 %2568  ;;  %v2575_v21 = vpop.permute.xlu1 %2574 }
 0x36a   :  { %2747 = vst.msk [vmem:[#allocation3 + $0x90] sm:$0xff] %vm2732_vm1, %v2569_v20  ;;  %2750 = vst.msk [vmem:[#allocation3 + $0xa8] sm:$0xff] %vm2732_vm1, %v2575_v21  ;;  %v10162_v20 = vld [vmem:[#allocation3 + $0x10] sm:$0xff] }
 0x36d   :  { %v2597_v22 = vpop.permute.xlu0 %2596  ;;  %v2571_v23 = vpop.permute.xlu1 %2570 }
 0x36e   :  { %2761 = vst.msk [vmem:[#allocation3 + $0x100] sm:$0xff] %vm2732_vm1, %v2597_v22  ;;  %2748 = vst.msk [vmem:[#allocation3 + $0x98] sm:$0xff] %vm2732_vm1, %v2571_v23  ;;  %v10170_v23 = vld [vmem:[#allocation3 + $0x28] sm:$0xff] }
 0x371   :  { %v2553_v26 = vpop.permute.xlu0 %2552  ;;  %v2599_v27 = vpop.permute.xlu1 %2598 }
 0x372   :  { %2739 = vst.msk [vmem:[#allocation3 + $0x50] sm:$0xff] %vm2732_vm1, %v2553_v26  ;;  %2762 = vst.msk [vmem:[#allocation3 + $0x108] sm:$0xff] %vm2732_vm1, %v2599_v27  ;;  %v10172_v26 = vld [vmem:[#allocation3 + $0x60] sm:$0xff] }
 0x375   :  { %v2581_v24 = vpop.permute.xlu0 %2580  ;;  %v2555_v28 = vpop.permute.xlu1 %2554 }
 0x376   :  { %2753 = vst.msk [vmem:[#allocation3 + $0xc0] sm:$0xff] %vm2732_vm1, %v2581_v24  ;;  %2740 = vst.msk [vmem:[#allocation3 + $0x58] sm:$0xff] %vm2732_vm1, %v2555_v28  ;;  %v10180_v28 = vld [vmem:[#allocation3 + $0x88] sm:$0xff] }
 0x379   :  { %v2593_v29 = vpop.permute.xlu0 %2592  ;;  %v2583_v31 = vpop.permute.xlu1 %2582 }
 0x37a   :  { %2759 = vst.msk [vmem:[#allocation3 + $0xf0] sm:$0xff] %vm2732_vm1, %v2593_v29  ;;  %2754 = vst.msk [vmem:[#allocation3 + $0xc8] sm:$0xff] %vm2732_vm1, %v2583_v31  ;;  %v10182_v29 = vld [vmem:[#allocation3 + $0x20] sm:$0xff] }
 0x37d   :  { %v2621_v32 = vpop.permute.xlu0 %2620  ;;  %v2595_v33 = vpop.permute.xlu1 %2594 }
 0x37e   :  { %2773 = vst.msk [vmem:[#allocation3 + $0x1a0] sm:$0xff] %vm2732_vm1, %v2621_v32  ;;  %2760 = vst.msk [vmem:[#allocation3 + $0xf8] sm:$0xff] %vm2732_vm1, %v2595_v33  ;;  %v10190_v33 = vld [vmem:[#allocation3 + $0x48] sm:$0xff] }
 0x381   :  { %v2577_v34 = vpop.permute.xlu0 %2576  ;;  %v2623_v35 = vpop.permute.xlu1 %2622 }
 0x382   :  { %2751 = vst.msk [vmem:[#allocation3 + $0xb0] sm:$0xff] %vm2732_vm1, %v2577_v34  ;;  %2774 = vst.msk [vmem:[#allocation3 + $0x1a8] sm:$0xff] %vm2732_vm1, %v2623_v35  ;;  %v10192_v34 = vld [vmem:[#allocation3 + $0x80] sm:$0xff] }
 0x385   :  { %v2605_v36 = vpop.permute.xlu0 %2604  ;;  %v2579_v37 = vpop.permute.xlu1 %2578 }
 0x386   :  { %2765 = vst.msk [vmem:[#allocation3 + $0x160] sm:$0xff] %vm2732_vm1, %v2605_v36  ;;  %2752 = vst.msk [vmem:[#allocation3 + $0xb8] sm:$0xff] %vm2732_vm1, %v2579_v37  ;;  %v10200_v37 = vld [vmem:[#allocation3 + $0x78] sm:$0xff] }
 0x389   :  { %v2601_v38 = vpop.permute.xlu0 %2600  ;;  %v2607_v39 = vpop.permute.xlu1 %2606 }
 0x38a   :  { %2763 = vst.msk [vmem:[#allocation3 + $0x110] sm:$0xff] %vm2732_vm1, %v2601_v38  ;;  %2766 = vst.msk [vmem:[#allocation3 + $0x168] sm:$0xff] %vm2732_vm1, %v2607_v39  ;;  %v10202_v38 = vld [vmem:[#allocation3 + $0x40] sm:$0xff] }
 0x38d   :  { %v2629_v40 = vpop.permute.xlu0 %2628  ;;  %v2603_v42 = vpop.permute.xlu1 %2602 }
 0x38e   :  { %2777 = vst.msk [vmem:[#allocation3 + $0x1c0] sm:$0xff] %vm2732_vm1, %v2629_v40  ;;  %2764 = vst.msk [vmem:[#allocation3 + $0x118] sm:$0xff] %vm2732_vm1, %v2603_v42  ;;  %v10210_v42 = vld [vmem:[#allocation3 + $0xe8] sm:$0xff] }
 0x391   :  { %v2585_v43 = vpop.permute.xlu0 %2584  ;;  %v2631_v44 = vpop.permute.xlu1 %2630 }
 0x392   :  { %2755 = vst.msk [vmem:[#allocation3 + $0xd0] sm:$0xff] %vm2732_vm1, %v2585_v43  ;;  %2778 = vst.msk [vmem:[#allocation3 + $0x1c8] sm:$0xff] %vm2732_vm1, %v2631_v44  ;;  %v10212_v43 = vld [vmem:[#allocation3 + $0x70] sm:$0xff] }
 0x395   :  { %v2613_v46 = vpop.permute.xlu0 %2612  ;;  %v2587_v47 = vpop.permute.xlu1 %2586 }
 0x396   :  { %2769 = vst.msk [vmem:[#allocation3 + $0x180] sm:$0xff] %vm2732_vm1, %v2613_v46  ;;  %2756 = vst.msk [vmem:[#allocation3 + $0xd8] sm:$0xff] %vm2732_vm1, %v2587_v47  ;;  %v10220_v47 = vld [vmem:[#allocation3 + $0x38] sm:$0xff] }
 0x399   :  { %v2625_v49 = vpop.permute.xlu0 %2624  ;;  %v2615_v50 = vpop.permute.xlu1 %2614 }
 0x39a   :  { %2775 = vst.msk [vmem:[#allocation3 + $0x1b0] sm:$0xff] %vm2732_vm1, %v2625_v49  ;;  %2770 = vst.msk [vmem:[#allocation3 + $0x188] sm:$0xff] %vm2732_vm1, %v2615_v50  ;;  %v10222_v49 = vld [vmem:[#allocation3 + $0xe0] sm:$0xff] }
 0x39d   :  { %v2609_v52 = vpop.permute.xlu0 %2608  ;;  %v2627_v53 = vpop.permute.xlu1 %2626 }
 0x39e   :  { %2767 = vst.msk [vmem:[#allocation3 + $0x170] sm:$0xff] %vm2732_vm1, %v2609_v52  ;;  %2776 = vst.msk [vmem:[#allocation3 + $0x1b8] sm:$0xff] %vm2732_vm1, %v2627_v53  ;;  %v10230_v53 = vld [vmem:[#allocation3 + $0xa8] sm:$0xff] }
 0x3a1   :  { %v2617_v54 = vpop.permute.xlu0 %2616  ;;  %v2611_v55 = vpop.permute.xlu1 %2610 }
 0x3a2   :  { %2771 = vst.msk [vmem:[#allocation3 + $0x190] sm:$0xff] %vm2732_vm1, %v2617_v54  ;;  %2768 = vst.msk [vmem:[#allocation3 + $0x178] sm:$0xff] %vm2732_vm1, %v2611_v55  ;;  %v10232_v54 = vld [vmem:[#allocation3 + $0x30] sm:$0xff] }
 0x3a5   :  { %v2633_v56 = vpop.permute.xlu0 %2632  ;;  %v2635_v58 = vpop.permute.xlu1 %2634 }
 0x3a6   :  { %2779 = vst.msk [vmem:[#allocation3 + $0x1d0] sm:$0xff] %vm2732_vm1, %v2633_v56  ;;  %2780 = vst.msk [vmem:[#allocation3 + $0x1d8] sm:$0xff] %vm2732_vm1, %v2635_v58  ;;  %v10240_v58 = vld [vmem:[#allocation3 + $0x98] sm:$0xff] }
 0x3a9   :  { %v2637_v25 = vpop.permute.xlu0 %2636  ;;  %v2619_v60 = vpop.permute.xlu1 %2618 }
 0x3aa   :  { %2781 = vst.msk [vmem:[#allocation3 + $0x1e0] sm:$0xff] %vm2732_vm1, %v2637_v25  ;;  %2772 = vst.msk [vmem:[#allocation3 + $0x198] sm:$0xff] %vm2732_vm1, %v2619_v60  ;;  %v10242_v25 = vld [vmem:[#allocation3 + $0xa0] sm:$0xff] }
 0x3ad   :  { %v2641_v61 = vpop.permute.xlu0 %2640  ;;  %v2639_v19 = vpop.permute.xlu1 %2638 }
 0x3ae   :  { %2783 = vst.msk [vmem:[#allocation3 + $0x1f0] sm:$0xff] %vm2732_vm1, %v2641_v61  ;;  %2782 = vst.msk [vmem:[#allocation3 + $0x1e8] sm:$0xff] %vm2732_vm1, %v2639_v19  ;;  %v10250_v19 = vld [vmem:[#allocation3 + $0x58] sm:$0xff] }
 0x3b1   :  { %v2645_v62 = vpop.permute.xlu0 %2644  ;;  %v2643_v0 = vpop.permute.xlu1 %2642 }
 0x3b2   :  { %2785 = vst.msk [vmem:[#allocation3 + $0x200] sm:$0xff] %vm2732_vm1, %v2645_v62  ;;  %2784 = vst.msk [vmem:[#allocation3 + $0x1f8] sm:$0xff] %vm2732_vm1, %v2643_v0  ;;  %v10252_v62 = vld [vmem:[#allocation3 + $0x90] sm:$0xff] }
 0x3b5   :  { %v2649_v30 = vpop.permute.xlu0 %2648  ;;  %v2647_v1 = vpop.permute.xlu1 %2646 }
 0x3b6   :  { %2787 = vst.msk [vmem:[#allocation3 + $0x210] sm:$0xff] %vm2732_vm1, %v2649_v30  ;;  %2786 = vst.msk [vmem:[#allocation3 + $0x208] sm:$0xff] %vm2732_vm1, %v2647_v1  ;;  %v10260_v1 = vld [vmem:[#allocation3 + $0xc8] sm:$0xff] }
 0x3b9   :  { %v2653_v41 = vpop.permute.xlu0 %2652  ;;  %v2651_v45 = vpop.permute.xlu1 %2650 }
 0x3ba   :  { %2789 = vst.msk [vmem:[#allocation3 + $0x220] sm:$0xff] %vm2732_vm1, %v2653_v41  ;;  %2788 = vst.msk [vmem:[#allocation3 + $0x218] sm:$0xff] %vm2732_vm1, %v2651_v45  ;;  %v10262_v41 = vld [vmem:[#allocation3 + $0x50] sm:$0xff] }
 0x3bd   :  { %v2657_v48 = vpop.permute.xlu0 %2656  ;;  %v2655_v51 = vpop.permute.xlu1 %2654 }
 0x3be   :  { %2791 = vst.msk [vmem:[#allocation3 + $0x230] sm:$0xff] %vm2732_vm1, %v2657_v48  ;;  %2790 = vst.msk [vmem:[#allocation3 + $0x228] sm:$0xff] %vm2732_vm1, %v2655_v51  ;;  %v10270_v51 = vld [vmem:[#allocation3 + $0xf8] sm:$0xff] }
 0x3c1   :  { %v2661_v63 = vpop.permute.xlu0 %2660  ;;  %v2659_v3 = vpop.permute.xlu1 %2658 }
 0x3c2   :  { %2793 = vst.msk [vmem:[#allocation3 + $0x240] sm:$0xff] %vm2732_vm1, %v2661_v63  ;;  %2792 = vst.msk [vmem:[#allocation3 + $0x238] sm:$0xff] %vm2732_vm1, %v2659_v3  ;;  %v10272_v63 = vld [vmem:[#allocation3 + $0xc0] sm:$0xff] }
 0x3c5   :  { %v2665_v4 = vpop.permute.xlu0 %2664  ;;  %v2663_v6 = vpop.permute.xlu1 %2662 }
 0x3c6   :  { %2795 = vst.msk [vmem:[#allocation3 + $0x250] sm:$0xff] %vm2732_vm1, %v2665_v4  ;;  %2794 = vst.msk [vmem:[#allocation3 + $0x248] sm:$0xff] %vm2732_vm1, %v2663_v6  ;;  %v10280_v6 = vld [vmem:[#allocation3 + $0xb8] sm:$0xff] }
 0x3c9   :  { %v2667_v8 = vpop.permute.xlu1 %2666 }
 0x3ca   :  { %2796 = vst.msk [vmem:[#allocation3 + $0x258] sm:$0xff] %vm2732_vm1, %v2667_v8  ;;  %v10282_v8 = vld [vmem:[#allocation3 + $0xf0] sm:$0xff]  ;;  %vm7402_vm1 = vcmask 523651  }
 0x3d6   :  { %v10129_v9 = vpop.permute.xlu0 %2867 }
 0x3d7   :  { %14711 = vst [vmem:[#allocation4_spill] sm:$0xff] %v10129_v9  ;;  %v10420_v9 = vld [vmem:[#allocation3 + $0x208] sm:$0xff] }
 0x3d8   :  { %14720 = vst [vmem:[#allocation13_spill] sm:$0xff] %v10420_v9 }
 0x3da   :  { %v10131_v10 = vpop.permute.xlu0 %2882  ;;  %v10133_v11 = vpop.permute.xlu1 %2872 }
 0x3db   :  { %14712 = vst [vmem:[#allocation5_spill] sm:$0xff] %v10131_v10  ;;  %14713 = vst [vmem:[#allocation6_spill] sm:$0xff] %v10133_v11  ;;  %v10410_v10 = vld [vmem:[#allocation3 + $0x1f8] sm:$0xff]  ;;  %v10412_v11 = vld [vmem:[#allocation3 + $0x1e0] sm:$0xff] }
 0x3dc   :  { %14718 = vst [vmem:[#allocation11_spill] sm:$0xff] %v10410_v10  ;;  %14719 = vst [vmem:[#allocation12_spill] sm:$0xff] %v10412_v11 }
 0x3de   :  { %v10135_v12 = vpop.permute.xlu0 %2961  ;;  %v10137_v13 = vpop.permute.xlu1 %2877 }
 0x3df   :  { %14714 = vst [vmem:[#allocation7_spill] sm:$0xff] %v10137_v13  ;;  %v2975_v14 = vmul.f32 %v10135_v12, %v10139_v2  ;;  %v2987_v21 = vmul.f32 %v10135_v12, %v10160_v18  ;;  %v2979_v27 = vmul.f32 %v10135_v12, %v10170_v23  ;;  %v2991_v31 = vmul.f32 %v10135_v12, %v10180_v28  ;;  %v10402_v13 = vld [vmem:[#allocation3 + $0x1d0] sm:$0xff] }
 0x3e0   :  { %v2983_v35 = vmul.f32 %v10135_v12, %v10190_v33  ;;  %v3003_v44 = vmul.f32 %v10135_v12, %v10210_v42  ;;  %v2995_v55 = vmul.f32 %v10135_v12, %v10230_v53  ;;  %v2999_v45 = vmul.f32 %v10135_v12, %v10260_v1  ;;  %14717 = vst [vmem:[#allocation10_spill] sm:$0xff] %v10402_v13 }
 0x3e1   :  { %3104 = vrot.lane.b32.xlu0 %v2975_v14, %s8531_s15 }
 0x3e2   :  { %v10148_v16 = vpop.permute.xlu0 %2971  ;;  %v10150_v5 = vpop.permute.xlu1 %2956 }
 0x3e3   :  { %v2977_v7 = vmul.f32 %v10148_v16, %v10143_v15  ;;  %v2974_v59 = vmul.f32 %v10150_v5, %v10145_v57  ;;  %v2986_v24 = vmul.f32 %v10150_v5, %v10172_v26  ;;  %v2978_v32 = vmul.f32 %v10150_v5, %v10182_v29 }
 0x3e4   :  { %v2990_v36 = vmul.f32 %v10150_v5, %v10192_v34  ;;  %v2989_v39 = vmul.f32 %v10148_v16, %v10200_v37  ;;  %v2982_v40 = vmul.f32 %v10150_v5, %v10202_v38  ;;  %v2981_v50 = vmul.f32 %v10148_v16, %v10220_v47 }
 0x3e5   :  { %3108 = vrot.lane.b32.xlu0 %v2977_v7, %s8531_s15  ;;  %3102 = vrot.lane.b32.xlu1 %v2974_v59, %s8531_s15  ;;  %v3002_v52 = vmul.f32 %v10150_v5, %v10222_v49  ;;  %v2993_v60 = vmul.f32 %v10148_v16, %v10240_v58  ;;  %v2994_v61 = vmul.f32 %v10150_v5, %v10242_v25  ;;  %v10290_v59 = vld [vmem:[#allocation3 + $0xd8] sm:$0xff] }
 0x3e6   :  { %v10158_v17 = vpop.permute.xlu1 %2966  ;;  %v2985_v0 = vmul.f32 %v10148_v16, %v10250_v19  ;;  %v3005_v3 = vmul.f32 %v10148_v16, %v10270_v51  ;;  %v2998_v4 = vmul.f32 %v10150_v5, %v10272_v63  ;;  %v2997_v14 = vmul.f32 %v10148_v16, %v10280_v6 }
 0x3e7   :  { %v2976_v22 = vmul.f32 %v10158_v17, %v10162_v20  ;;  %v2988_v46 = vmul.f32 %v10158_v17, %v10212_v43  ;;  %v2980_v56 = vmul.f32 %v10158_v17, %v10232_v54  ;;  %v2992_v30 = vmul.f32 %v10158_v17, %v10252_v62 }
 0x3e8   :  { %v2984_v48 = vmul.f32 %v10158_v17, %v10262_v41  ;;  %v3004_v7 = vmul.f32 %v10158_v17, %v10282_v8 }
 0x3e9   :  { %3128 = vrot.lane.b32.xlu0 %v2987_v21, %s8531_s15  ;;  %3106 = vrot.lane.b32.xlu1 %v2976_v22, %s8531_s15  ;;  %v10292_v21 = vld [vmem:[#allocation3 + $0xb0] sm:$0xff]  ;;  %v3001_v22 = vmul.f32 %v10148_v16, %v10290_v59 }
 0x3ed   :  { %3112 = vrot.lane.b32.xlu0 %v2979_v27, %s8531_s15  ;;  %3126 = vrot.lane.b32.xlu1 %v2986_v24, %s8531_s15  ;;  %v2996_v27 = vmul.f32 %v10158_v17, %v10292_v21  ;;  %v10300_v24 = vld [vmem:[#allocation3 + $0x148] sm:$0xff] }
 0x3f1   :  { %3136 = vrot.lane.b32.xlu0 %v2991_v31, %s8531_s15  ;;  %3110 = vrot.lane.b32.xlu1 %v2978_v32, %s8531_s15  ;;  %v10302_v31 = vld [vmem:[#allocation3 + $0xd0] sm:$0xff]  ;;  %v3007_v32 = vmul.f32 %v10135_v12, %v10300_v24 }
 0x3f5   :  { %3120 = vrot.lane.b32.xlu0 %v2983_v35, %s8531_s15  ;;  %3134 = vrot.lane.b32.xlu1 %v2990_v36, %s8531_s15  ;;  %v3000_v35 = vmul.f32 %v10158_v17, %v10302_v31  ;;  %v10308_v36 = vld [vmem:[#allocation3 + $0x158] sm:$0xff] }
 0x3f9   :  { %3132 = vrot.lane.b32.xlu0 %v2989_v39, %s8531_s15  ;;  %3118 = vrot.lane.b32.xlu1 %v2982_v40, %s8531_s15  ;;  %v10310_v39 = vld [vmem:[#allocation3 + $0x140] sm:$0xff]  ;;  %v3009_v40 = vmul.f32 %v10148_v16, %v10308_v36 }
 0x3fd   :  { %3160 = vrot.lane.b32.xlu0 %v3003_v44, %s8531_s15  ;;  %3130 = vrot.lane.b32.xlu1 %v2988_v46, %s8531_s15  ;;  %v3006_v44 = vmul.f32 %v10150_v5, %v10310_v39  ;;  %v10320_v46 = vld [vmem:[#allocation3 + $0x168] sm:$0xff] }
 0x401   :  { %3116 = vrot.lane.b32.xlu0 %v2981_v50, %s8531_s15  ;;  %3158 = vrot.lane.b32.xlu1 %v3002_v52, %s8531_s15  ;;  %v10322_v50 = vld [vmem:[#allocation3 + $0x150] sm:$0xff]  ;;  %v3011_v52 = vmul.f32 %v10135_v12, %v10320_v46 }
 0x405   :  { %3144 = vrot.lane.b32.xlu0 %v2995_v55, %s8531_s15  ;;  %3114 = vrot.lane.b32.xlu1 %v2980_v56, %s8531_s15  ;;  %v3008_v55 = vmul.f32 %v10158_v17, %v10322_v50  ;;  %v10330_v56 = vld [vmem:[#allocation3 + $0x178] sm:$0xff] }
 0x409   :  { %3140 = vrot.lane.b32.xlu0 %v2993_v60, %s8531_s15  ;;  %3142 = vrot.lane.b32.xlu1 %v2994_v61, %s8531_s15  ;;  %v10332_v60 = vld [vmem:[#allocation3 + $0x160] sm:$0xff]  ;;  %v3013_v61 = vmul.f32 %v10148_v16, %v10330_v56 }
 0x40d   :  { %3124 = vrot.lane.b32.xlu0 %v2985_v0, %s8531_s15  ;;  %3138 = vrot.lane.b32.xlu1 %v2992_v30, %s8531_s15  ;;  %v3010_v0 = vmul.f32 %v10150_v5, %v10332_v60  ;;  %v10340_v30 = vld [vmem:[#allocation3 + $0x188] sm:$0xff] }
 0x411   :  { %3152 = vrot.lane.b32.xlu0 %v2999_v45, %s8531_s15  ;;  %3122 = vrot.lane.b32.xlu1 %v2984_v48, %s8531_s15  ;;  %v10342_v45 = vld [vmem:[#allocation3 + $0x170] sm:$0xff]  ;;  %v3015_v48 = vmul.f32 %v10135_v12, %v10340_v30 }
 0x415   :  { %3164 = vrot.lane.b32.xlu0 %v3005_v3, %s8531_s15  ;;  %3150 = vrot.lane.b32.xlu1 %v2998_v4, %s8531_s15  ;;  %v3012_v3 = vmul.f32 %v10158_v17, %v10342_v45  ;;  %v10350_v4 = vld [vmem:[#allocation3 + $0x198] sm:$0xff] }
 0x419   :  { %3148 = vrot.lane.b32.xlu0 %v2997_v14, %s8531_s15  ;;  %3162 = vrot.lane.b32.xlu1 %v3004_v7, %s8531_s15  ;;  %v10352_v14 = vld [vmem:[#allocation3 + $0x180] sm:$0xff]  ;;  %v3017_v7 = vmul.f32 %v10148_v16, %v10350_v4 }
 0x41d   :  { %3156 = vrot.lane.b32.xlu0 %v3001_v22, %s8531_s15  ;;  %3146 = vrot.lane.b32.xlu1 %v2996_v27, %s8531_s15  ;;  %v3014_v22 = vmul.f32 %v10150_v5, %v10352_v14  ;;  %v10360_v27 = vld [vmem:[#allocation3 + $0x1a8] sm:$0xff] }
 0x421   :  { %3168 = vrot.lane.b32.xlu0 %v3007_v32, %s8531_s15  ;;  %3154 = vrot.lane.b32.xlu1 %v3000_v35, %s8531_s15  ;;  %v10362_v32 = vld [vmem:[#allocation3 + $0x190] sm:$0xff]  ;;  %v3019_v35 = vmul.f32 %v10135_v12, %v10360_v27 }
 0x425   :  { %3172 = vrot.lane.b32.xlu0 %v3009_v40, %s8531_s15  ;;  %3166 = vrot.lane.b32.xlu1 %v3006_v44, %s8531_s15  ;;  %v3016_v40 = vmul.f32 %v10158_v17, %v10362_v32  ;;  %v10370_v44 = vld [vmem:[#allocation3 + $0x1b8] sm:$0xff] }
 0x429   :  { %3176 = vrot.lane.b32.xlu0 %v3011_v52, %s8531_s15  ;;  %3170 = vrot.lane.b32.xlu1 %v3008_v55, %s8531_s15  ;;  %v10372_v52 = vld [vmem:[#allocation3 + $0x1a0] sm:$0xff]  ;;  %v3021_v55 = vmul.f32 %v10148_v16, %v10370_v44 }
 0x42d   :  { %3180 = vrot.lane.b32.xlu0 %v3013_v61, %s8531_s15  ;;  %3174 = vrot.lane.b32.xlu1 %v3010_v0, %s8531_s15  ;;  %v3018_v61 = vmul.f32 %v10150_v5, %v10372_v52  ;;  %v10380_v0 = vld [vmem:[#allocation3 + $0x1c8] sm:$0xff] }
 0x431   :  { %3184 = vrot.lane.b32.xlu0 %v3015_v48, %s8531_s15  ;;  %3178 = vrot.lane.b32.xlu1 %v3012_v3, %s8531_s15  ;;  %v10382_v48 = vld [vmem:[#allocation3 + $0x1b0] sm:$0xff]  ;;  %v3023_v3 = vmul.f32 %v10135_v12, %v10380_v0 }
 0x435   :  { %3188 = vrot.lane.b32.xlu0 %v3017_v7, %s8531_s15  ;;  %3182 = vrot.lane.b32.xlu1 %v3014_v22, %s8531_s15  ;;  %v3020_v7 = vmul.f32 %v10158_v17, %v10382_v48  ;;  %v10390_v22 = vld [vmem:[#allocation3 + $0x1d8] sm:$0xff] }
 0x439   :  { %3192 = vrot.lane.b32.xlu0 %v3019_v35, %s8531_s15  ;;  %3186 = vrot.lane.b32.xlu1 %v3016_v40, %s8531_s15  ;;  %v10392_v35 = vld [vmem:[#allocation3 + $0x1c0] sm:$0xff]  ;;  %v3025_v40 = vmul.f32 %v10148_v16, %v10390_v22 }
 0x43a   :  { %14715 = vst [vmem:[#allocation8_spill] sm:$0xff] %v10392_v35 }
 0x43d   :  { %3196 = vrot.lane.b32.xlu0 %v3021_v55, %s8531_s15  ;;  %3190 = vrot.lane.b32.xlu1 %v3018_v61, %s8531_s15  ;;  %v3022_v55 = vmul.f32 %v10150_v5, %v10392_v35  ;;  %v10400_v61 = vld [vmem:[#allocation3 + $0x1e8] sm:$0xff] }
 0x43e   :  { %14716 = vst [vmem:[#allocation9_spill] sm:$0xff] %v10400_v61 }
 0x441   :  { %3200 = vrot.lane.b32.xlu0 %v3023_v3, %s8531_s15  ;;  %3194 = vrot.lane.b32.xlu1 %v3020_v7, %s8531_s15  ;;  %v3027_v3 = vmul.f32 %v10135_v12, %v10400_v61  ;;  %v3024_v7 = vmul.f32 %v10158_v17, %v10402_v13  ;;  %v10422_v13 = vld [vmem:[#allocation3 + $0x1f0] sm:$0xff] }
 0x442   :  { %14721 = vst [vmem:[#allocation14_spill] sm:$0xff] %v10422_v13 }
 0x445   :  { %3204 = vrot.lane.b32.xlu0 %v3025_v40, %s8531_s15  ;;  %3198 = vrot.lane.b32.xlu1 %v3022_v55, %s8531_s15  ;;  %v3029_v40 = vmul.f32 %v10148_v16, %v10410_v10  ;;  %v3026_v55 = vmul.f32 %v10150_v5, %v10412_v11  ;;  %v10430_v10 = vld [vmem:[#allocation3 + $0x218] sm:$0xff]  ;;  %v10432_v11 = vld [vmem:[#allocation3 + $0x200] sm:$0xff] }
 0x446   :  { %14722 = vst [vmem:[#allocation15_spill] sm:$0xff] %v10430_v10  ;;  %14723 = vst [vmem:[#allocation16_spill] sm:$0xff] %v10432_v11  ;;  %v3030_v61 = vmul.f32 %v10150_v5, %v10432_v11 }
 0x449   :  { %3208 = vrot.lane.b32.xlu0 %v3027_v3, %s8531_s15  ;;  %3202 = vrot.lane.b32.xlu1 %v3024_v7, %s8531_s15  ;;  %v3031_v3 = vmul.f32 %v10135_v12, %v10420_v9  ;;  %v3028_v7 = vmul.f32 %v10158_v17, %v10422_v13  ;;  %v10442_v13 = vld [vmem:[#allocation3 + $0x228] sm:$0xff] }
 0x44d   :  { %3212 = vrot.lane.b32.xlu0 %v3029_v40, %s8531_s15  ;;  %3206 = vrot.lane.b32.xlu1 %v3026_v55, %s8531_s15  ;;  %v3033_v55 = vmul.f32 %v10148_v16, %v10430_v10 }
 0x451   :  { %3216 = vrot.lane.b32.xlu0 %v3031_v3, %s8531_s15  ;;  %3210 = vrot.lane.b32.xlu1 %v3028_v7, %s8531_s15  ;;  %v10444_v3 = vld [vmem:[#allocation3 + $0x210] sm:$0xff] }
 0x452   :  { %v3032_v10 = vmul.f32 %v10158_v17, %v10444_v3 }
 0x453   :  { %v10434_v40 = vpop.permute.xlu0 %3104 }
 0x454   :  { %14724 = vst [vmem:[#allocation17_spill] sm:$0xff] %v10434_v40  ;;  %v3035_v40 = vmul.f32 %v10135_v12, %v10442_v13 }
 0x455   :  { %3220 = vrot.lane.b32.xlu0 %v3033_v55, %s8531_s15  ;;  %3214 = vrot.lane.b32.xlu1 %v3030_v61, %s8531_s15  ;;  %v10456_v55 = vld [vmem:[#allocation3 + $0x238] sm:$0xff]  ;;  %v10458_v61 = vld [vmem:[#allocation3 + $0x220] sm:$0xff] }
 0x456   :  { %14727 = vst [vmem:[#allocation20_spill] sm:$0xff] %v10458_v61  ;;  %v3034_v12 = vmul.f32 %v10150_v5, %v10458_v61  ;;  %v7636_v5 = vld [vmem:[%s14610_s4 + $0x40] sm:$0xff] }
 0x457   :  { %v10446_v7 = vpop.permute.xlu0 %3108  ;;  %v10448_v9 = vpop.permute.xlu1 %3102 }
 0x458   :  { %14725 = vst [vmem:[#allocation18_spill] sm:$0xff] %v10446_v7  ;;  %14726 = vst [vmem:[#allocation19_spill] sm:$0xff] %v10448_v9  ;;  %v3037_v9 = vmul.f32 %v10148_v16, %v10456_v55 }
 0x459   :  { %3224 = vrot.lane.b32.xlu0 %v3035_v40, %s8531_s15  ;;  %3218 = vrot.lane.b32.xlu1 %v3032_v10, %s8531_s15  ;;  %v7637_v10 = vld [vmem:[%s14610_s4 + $0x48] sm:$0xff]  ;;  %v10473_v40 = vld [vmem:[#allocation3 + $0x230] sm:$0xff] }
 0x45a   :  { %14730 = vst [vmem:[#allocation23_spill] sm:$0xff] %v10473_v40  ;;  %v3036_v16 = vmul.f32 %v10158_v17, %v10473_v40  ;;  %v7638_v17 = vld [vmem:[%s14610_s4 + $0x50] sm:$0xff] }
 0x45b   :  { %v10460_v11 = vpop.permute.xlu0 %3128  ;;  %v10462_v35 = vpop.permute.xlu1 %3106 }
 0x45c   :  { %14728 = vst [vmem:[#allocation21_spill] sm:$0xff] %v10460_v11  ;;  %14729 = vst [vmem:[#allocation22_spill] sm:$0xff] %v10462_v35 }
 0x45d   :  { %3228 = vrot.lane.b32.xlu0 %v3037_v9, %s8531_s15  ;;  %3222 = vrot.lane.b32.xlu1 %v3034_v12, %s8531_s15  ;;  %v7639_v9 = vld [vmem:[%s14610_s4 + $0x58] sm:$0xff] }
 0x45f   :  { %v10475_v7 = vpop.permute.xlu0 %3112  ;;  %v10477_v11 = vpop.permute.xlu1 %3126 }
 0x460   :  { %14731 = vst [vmem:[#allocation24_spill] sm:$0xff] %v10475_v7  ;;  %14732 = vst [vmem:[#allocation25_spill] sm:$0xff] %v10477_v11 }
 0x461   :  { %3370 = vperm.xlu0 %7834, %v7637_v10   ;;  %3226 = vrot.lane.b32.xlu1 %v3036_v16, %s8531_s15 }
 0x463   :  { %v10488_v12 = vpop.permute.xlu0 %3136  ;;  %v10490_v35 = vpop.permute.xlu1 %3110 }
 0x464   :  { %14733 = vst [vmem:[#allocation26_spill] sm:$0xff] %v10488_v12  ;;  %14734 = vst [vmem:[#allocation27_spill] sm:$0xff] %v10490_v35 }
 0x465   :  { %3380 = vperm.xlu0 %7834, %v7639_v9   ;;  %3365 = vperm.xlu1 %7835, %v7636_v5  }
 0x467   :  { %v10495_v10 = vpop.permute.xlu0 %3120  ;;  %v10497_v16 = vpop.permute.xlu1 %3134 }
 0x468   :  { %14735 = vst [vmem:[#allocation28_spill] sm:$0xff] %v10495_v10  ;;  %14736 = vst [vmem:[#allocation29_spill] sm:$0xff] %v10497_v16 }
 0x469   :  { %3375 = vperm.xlu1 %7835, %v7638_v17  }
 0x46b   :  { %v10499_v11 = vpop.permute.xlu0 %3132  ;;  %v10501_v7 = vpop.permute.xlu1 %3118 }
 0x46c   :  { %14737 = vst [vmem:[#allocation30_spill] sm:$0xff] %v10499_v11  ;;  %14738 = vst [vmem:[#allocation31_spill] sm:$0xff] %v10501_v7 }
 0x46f   :  { %v10503_v40 = vpop.permute.xlu0 %3160  ;;  %v10505_v12 = vpop.permute.xlu1 %3130 }
 0x470   :  { %14739 = vst [vmem:[#allocation32_spill] sm:$0xff] %v10503_v40  ;;  %14740 = vst [vmem:[#allocation33_spill] sm:$0xff] %v10505_v12 }
 0x473   :  { %v10507_v35 = vpop.permute.xlu0 %3116  ;;  %v10509_v9 = vpop.permute.xlu1 %3158 }
 0x474   :  { %14741 = vst [vmem:[#allocation34_spill] sm:$0xff] %v10507_v35  ;;  %14742 = vst [vmem:[#allocation35_spill] sm:$0xff] %v10509_v9 }
 0x477   :  { %v10511_v5 = vpop.permute.xlu0 %3144  ;;  %v10513_v61 = vpop.permute.xlu1 %3114 }
 0x478   :  { %14743 = vst [vmem:[#allocation36_spill] sm:$0xff] %v10511_v5  ;;  %14744 = vst [vmem:[#allocation37_spill] sm:$0xff] %v10513_v61 }
 0x47b   :  { %v10515_v10 = vpop.permute.xlu0 %3140  ;;  %v10517_v16 = vpop.permute.xlu1 %3142 }
 0x47c   :  { %14745 = vst [vmem:[#allocation38_spill] sm:$0xff] %v10515_v10  ;;  %14746 = vst [vmem:[#allocation39_spill] sm:$0xff] %v10517_v16 }
 0x47f   :  { %v10519_v17 = vpop.permute.xlu0 %3124  ;;  %v10521_v11 = vpop.permute.xlu1 %3138 }
 0x480   :  { %14747 = vst [vmem:[#allocation40_spill] sm:$0xff] %v10519_v17  ;;  %14748 = vst [vmem:[#allocation41_spill] sm:$0xff] %v10521_v11 }
 0x483   :  { %v10523_v7 = vpop.permute.xlu0 %3152  ;;  %v10525_v40 = vpop.permute.xlu1 %3122 }
 0x484   :  { %14749 = vst [vmem:[#allocation42_spill] sm:$0xff] %v10523_v7  ;;  %14750 = vst [vmem:[#allocation43_spill] sm:$0xff] %v10525_v40 }
 0x487   :  { %v10527_v12 = vpop.permute.xlu0 %3164  ;;  %v10529_v35 = vpop.permute.xlu1 %3150 }
 0x488   :  { %14751 = vst [vmem:[#allocation44_spill] sm:$0xff] %v10527_v12  ;;  %14752 = vst [vmem:[#allocation45_spill] sm:$0xff] %v10529_v35 }
 0x48b   :  { %v10531_v9 = vpop.permute.xlu0 %3148  ;;  %v10533_v5 = vpop.permute.xlu1 %3162 }
 0x48c   :  { %14753 = vst [vmem:[#allocation46_spill] sm:$0xff] %v10531_v9  ;;  %14754 = vst [vmem:[#allocation47_spill] sm:$0xff] %v10533_v5 }
 0x48f   :  { %v10535_v61 = vpop.permute.xlu0 %3156  ;;  %v10537_v10 = vpop.permute.xlu1 %3146 }
 0x490   :  { %14755 = vst [vmem:[#allocation48_spill] sm:$0xff] %v10535_v61  ;;  %14756 = vst [vmem:[#allocation49_spill] sm:$0xff] %v10537_v10 }
 0x493   :  { %v10539_v16 = vpop.permute.xlu0 %3168  ;;  %v10541_v17 = vpop.permute.xlu1 %3154 }
 0x494   :  { %14757 = vst [vmem:[#allocation50_spill] sm:$0xff] %v10539_v16  ;;  %14758 = vst [vmem:[#allocation51_spill] sm:$0xff] %v10541_v17 }
 0x497   :  { %v10543_v11 = vpop.permute.xlu0 %3172  ;;  %v10545_v7 = vpop.permute.xlu1 %3166 }
 0x498   :  { %14759 = vst [vmem:[#allocation52_spill] sm:$0xff] %v10543_v11  ;;  %14760 = vst [vmem:[#allocation53_spill] sm:$0xff] %v10545_v7 }
 0x49b   :  { %v10547_v40 = vpop.permute.xlu0 %3176  ;;  %v10549_v12 = vpop.permute.xlu1 %3170 }
 0x49c   :  { %14761 = vst [vmem:[#allocation54_spill] sm:$0xff] %v10547_v40  ;;  %14762 = vst [vmem:[#allocation55_spill] sm:$0xff] %v10549_v12 }
 0x49f   :  { %v10551_v35 = vpop.permute.xlu0 %3180  ;;  %v10553_v9 = vpop.permute.xlu1 %3174 }
 0x4a0   :  { %14763 = vst [vmem:[#allocation56_spill] sm:$0xff] %v10551_v35  ;;  %14764 = vst [vmem:[#allocation57_spill] sm:$0xff] %v10553_v9 }
 0x4a3   :  { %v10555_v5 = vpop.permute.xlu0 %3184  ;;  %v10557_v61 = vpop.permute.xlu1 %3178 }
 0x4a4   :  { %14765 = vst [vmem:[#allocation58_spill] sm:$0xff] %v10555_v5  ;;  %14766 = vst [vmem:[#allocation59_spill] sm:$0xff] %v10557_v61 }
 0x4a7   :  { %v10559_v10 = vpop.permute.xlu0 %3188  ;;  %v10561_v16 = vpop.permute.xlu1 %3182 }
 0x4a8   :  { %14767 = vst [vmem:[#allocation60_spill] sm:$0xff] %v10559_v10  ;;  %14768 = vst [vmem:[#allocation61_spill] sm:$0xff] %v10561_v16 }
 0x4ab   :  { %v10563_v17 = vpop.permute.xlu0 %3192  ;;  %v10565_v11 = vpop.permute.xlu1 %3186 }
 0x4ac   :  { %14769 = vst [vmem:[#allocation62_spill] sm:$0xff] %v10563_v17  ;;  %14770 = vst [vmem:[#allocation63_spill] sm:$0xff] %v10565_v11 }
 0x4af   :  { %v10567_v7 = vpop.permute.xlu0 %3196  ;;  %v10569_v40 = vpop.permute.xlu1 %3190 }
 0x4b0   :  { %14771 = vst [vmem:[#allocation64_spill] sm:$0xff] %v10567_v7  ;;  %14772 = vst [vmem:[#allocation65_spill] sm:$0xff] %v10569_v40 }
 0x4b3   :  { %v10571_v12 = vpop.permute.xlu0 %3200  ;;  %v10573_v35 = vpop.permute.xlu1 %3194 }
 0x4b4   :  { %14773 = vst [vmem:[#allocation66_spill] sm:$0xff] %v10571_v12  ;;  %14774 = vst [vmem:[#allocation67_spill] sm:$0xff] %v10573_v35 }
 0x4b7   :  { %v10575_v9 = vpop.permute.xlu1 %3198  ;;  %v10577_v5 = vpop.permute.xlu0 %3204 }
 0x4b8   :  { %14775 = vst [vmem:[#allocation68_spill] sm:$0xff] %v10575_v9  ;;  %14776 = vst [vmem:[#allocation69_spill] sm:$0xff] %v10577_v5 }
 0x4bb   :  { %v10579_v61 = vpop.permute.xlu1 %3202  ;;  %v10581_v10 = vpop.permute.xlu0 %3208 }
 0x4bc   :  { %14777 = vst [vmem:[#allocation70_spill] sm:$0xff] %v10579_v61  ;;  %14778 = vst [vmem:[#allocation71_spill] sm:$0xff] %v10581_v10 }
 0x4bf   :  { %v10583_v16 = vpop.permute.xlu1 %3206  ;;  %v10585_v17 = vpop.permute.xlu0 %3212 }
 0x4c0   :  { %14779 = vst [vmem:[#allocation72_spill] sm:$0xff] %v10583_v16  ;;  %14780 = vst [vmem:[#allocation73_spill] sm:$0xff] %v10585_v17  ;;  %v11248_v17 = vld [vmem:[#allocation3 + $0x228] sm:$0xff] }
 0x4c1   :  { %14874 = vst [vmem:[#allocation145_spill] sm:$0xff] %v11248_v17 }
 0x4c3   :  { %v10587_v11 = vpop.permute.xlu1 %3210  ;;  %v10589_v7 = vpop.permute.xlu0 %3216 }
 0x4c4   :  { %14781 = vst [vmem:[#allocation74_spill] sm:$0xff] %v10587_v11  ;;  %14782 = vst [vmem:[#allocation75_spill] sm:$0xff] %v10589_v7  ;;  %v11240_v7 = vld [vmem:[#allocation3 + $0x200] sm:$0xff] }
 0x4c5   :  { %14873 = vst [vmem:[#allocation144_spill] sm:$0xff] %v11240_v7 }
 0x4c7   :  { %v10591_v40 = vpop.permute.xlu1 %3214  ;;  %v10593_v12 = vpop.permute.xlu0 %3220 }
 0x4c8   :  { %14783 = vst [vmem:[#allocation76_spill] sm:$0xff] %v10591_v40  ;;  %14784 = vst [vmem:[#allocation77_spill] sm:$0xff] %v10593_v12 }
 0x4cb   :  { %v10595_v35 = vpop.permute.xlu1 %3218  ;;  %v10597_v9 = vpop.permute.xlu0 %3224 }
 0x4cc   :  { %14785 = vst [vmem:[#allocation78_spill] sm:$0xff] %v10595_v35  ;;  %14786 = vst [vmem:[#allocation79_spill] sm:$0xff] %v10597_v9  ;;  %v11238_v9 = vld [vmem:[#allocation3 + $0x218] sm:$0xff] }
 0x4cd   :  { %14872 = vst [vmem:[#allocation143_spill] sm:$0xff] %v11238_v9 }
 0x4cf   :  { %v10599_v5 = vpop.permute.xlu1 %3222  ;;  %v10601_v61 = vpop.permute.xlu0 %3228 }
 0x4d0   :  { %14787 = vst [vmem:[#allocation80_spill] sm:$0xff] %v10599_v5  ;;  %14788 = vst [vmem:[#allocation81_spill] sm:$0xff] %v10601_v61  ;;  %v11230_v61 = vld [vmem:[#allocation3 + $0x1f0] sm:$0xff] }
 0x4d1   :  { %14871 = vst [vmem:[#allocation142_spill] sm:$0xff] %v11230_v61 }
 0x4d3   :  { %v10603_v10 = vpop.permute.xlu1 %3226 }
 0x4d4   :  { %14789 = vst [vmem:[#allocation82_spill] sm:$0xff] %v10603_v10 }
 0x4e0   :  { %v10605_v16 = vpop.permute.xlu0 %3370 }
 0x4e1   :  { %v3384_v11 = vmul.f32 %v10605_v16, %v10139_v2  ;;  %v3388_v2 = vmul.f32 %v10605_v16, %v10170_v23  ;;  %v3392_v23 = vmul.f32 %v10605_v16, %v10190_v33  ;;  %v3396_v33 = vmul.f32 %v10605_v16, %v10160_v18 }
 0x4e2   :  { %v3400_v18 = vmul.f32 %v10605_v16, %v10180_v28  ;;  %v3404_v28 = vmul.f32 %v10605_v16, %v10230_v53  ;;  %v3408_v53 = vmul.f32 %v10605_v16, %v10260_v1  ;;  %v3412_v1 = vmul.f32 %v10605_v16, %v10210_v42 }
 0x4e3   :  { %3513 = vrot.lane.b32.xlu0 %v3384_v11, %s8532_s21  ;;  %v3416_v42 = vmul.f32 %v10605_v16, %v10300_v24  ;;  %v3420_v24 = vmul.f32 %v10605_v16, %v10320_v46  ;;  %v3424_v46 = vmul.f32 %v10605_v16, %v10340_v30  ;;  %v3428_v30 = vmul.f32 %v10605_v16, %v10360_v27 }
 0x4e4   :  { %v10610_v40 = vpop.permute.xlu0 %3380  ;;  %v10612_v12 = vpop.permute.xlu1 %3365  ;;  %v3432_v27 = vmul.f32 %v10605_v16, %v10380_v0 }
 0x4e5   :  { %v3386_v35 = vmul.f32 %v10610_v40, %v10143_v15  ;;  %v3383_v5 = vmul.f32 %v10612_v12, %v10145_v57  ;;  %v3390_v15 = vmul.f32 %v10610_v40, %v10220_v47  ;;  %v3387_v57 = vmul.f32 %v10612_v12, %v10182_v29 }
 0x4e6   :  { %v3394_v47 = vmul.f32 %v10610_v40, %v10250_v19  ;;  %v3391_v29 = vmul.f32 %v10612_v12, %v10202_v38  ;;  %v3398_v19 = vmul.f32 %v10610_v40, %v10200_v37  ;;  %v3395_v38 = vmul.f32 %v10612_v12, %v10172_v26 }
 0x4e7   :  { %3517 = vrot.lane.b32.xlu0 %v3386_v35, %s8532_s21  ;;  %3511 = vrot.lane.b32.xlu1 %v3383_v5, %s8532_s21  ;;  %v3402_v37 = vmul.f32 %v10610_v40, %v10240_v58  ;;  %v3399_v26 = vmul.f32 %v10612_v12, %v10192_v34  ;;  %v3406_v58 = vmul.f32 %v10610_v40, %v10280_v6  ;;  %v14790_v35 = vld [vmem:[#allocation8_spill] sm:$0xff]  ;;  %v14791_v5 = vld [vmem:[#allocation9_spill] sm:$0xff] }
 0x4e8   :  { %v10620_v10 = vpop.permute.xlu1 %3375  ;;  %v3403_v34 = vmul.f32 %v10612_v12, %v10242_v25  ;;  %v3410_v6 = vmul.f32 %v10610_v40, %v10290_v59  ;;  %v3407_v25 = vmul.f32 %v10612_v12, %v10272_v63  ;;  %v3414_v59 = vmul.f32 %v10610_v40, %v10270_v51 }
 0x4e9   :  { %v3385_v11 = vmul.f32 %v10620_v10, %v10162_v20  ;;  %v3389_v20 = vmul.f32 %v10620_v10, %v10232_v54  ;;  %v3393_v54 = vmul.f32 %v10620_v10, %v10262_v41  ;;  %v3397_v41 = vmul.f32 %v10620_v10, %v10212_v43 }
 0x4ea   :  { %v3401_v43 = vmul.f32 %v10620_v10, %v10252_v62  ;;  %v3405_v62 = vmul.f32 %v10620_v10, %v10292_v21  ;;  %v3409_v21 = vmul.f32 %v10620_v10, %v10302_v31  ;;  %v3411_v63 = vmul.f32 %v10612_v12, %v10222_v49 }
 0x4eb   :  { %3521 = vrot.lane.b32.xlu0 %v3388_v2, %s8532_s21  ;;  %3515 = vrot.lane.b32.xlu1 %v3385_v11, %s8532_s21  ;;  %v3413_v31 = vmul.f32 %v10620_v10, %v10282_v8  ;;  %v3418_v51 = vmul.f32 %v10610_v40, %v10308_v36  ;;  %v3415_v49 = vmul.f32 %v10612_v12, %v10310_v39  ;;  %v14792_v2 = vld [vmem:[#allocation10_spill] sm:$0xff]  ;;  %v14793_v11 = vld [vmem:[#allocation11_spill] sm:$0xff] }
 0x4ec   :  { %v3417_v8 = vmul.f32 %v10620_v10, %v10322_v50  ;;  %v3422_v36 = vmul.f32 %v10610_v40, %v10330_v56  ;;  %v3419_v39 = vmul.f32 %v10612_v12, %v10332_v60  ;;  %v3421_v50 = vmul.f32 %v10620_v10, %v10342_v45 }
 0x4ed   :  { %v3426_v56 = vmul.f32 %v10610_v40, %v10350_v4  ;;  %v3423_v60 = vmul.f32 %v10612_v12, %v10352_v14  ;;  %v3425_v45 = vmul.f32 %v10620_v10, %v10362_v32  ;;  %v3430_v4 = vmul.f32 %v10610_v40, %v10370_v44 }
 0x4ee   :  { %v3427_v14 = vmul.f32 %v10612_v12, %v10372_v52  ;;  %v3429_v32 = vmul.f32 %v10620_v10, %v10382_v48  ;;  %v3434_v44 = vmul.f32 %v10610_v40, %v10390_v22  ;;  %v3431_v52 = vmul.f32 %v10612_v12, %v14790_v35 }
 0x4ef   :  { %3525 = vrot.lane.b32.xlu0 %v3390_v15, %s8532_s21  ;;  %3519 = vrot.lane.b32.xlu1 %v3387_v57, %s8532_s21  ;;  %v3436_v0 = vmul.f32 %v10605_v16, %v14791_v5  ;;  %v3433_v48 = vmul.f32 %v10620_v10, %v14792_v2  ;;  %v3438_v22 = vmul.f32 %v10610_v40, %v14793_v11  ;;  %v14794_v15 = vld [vmem:[#allocation12_spill] sm:$0xff] }
 0x4f0   :  { %v3435_v57 = vmul.f32 %v10612_v12, %v14794_v15 }
 0x4f3   :  { %3529 = vrot.lane.b32.xlu0 %v3392_v23, %s8532_s21  ;;  %3523 = vrot.lane.b32.xlu1 %v3389_v20, %s8532_s21  ;;  %v14795_v23 = vld [vmem:[#allocation13_spill] sm:$0xff] }
 0x4f4   :  { %v3440_v20 = vmul.f32 %v10605_v16, %v14795_v23 }
 0x4f7   :  { %3533 = vrot.lane.b32.xlu0 %v3394_v47, %s8532_s21  ;;  %3527 = vrot.lane.b32.xlu1 %v3391_v29, %s8532_s21  ;;  %v14796_v47 = vld [vmem:[#allocation14_spill] sm:$0xff] }
 0x4f8   :  { %v3437_v29 = vmul.f32 %v10620_v10, %v14796_v47 }
 0x4fb   :  { %3537 = vrot.lane.b32.xlu0 %v3396_v33, %s8532_s21  ;;  %3531 = vrot.lane.b32.xlu1 %v3393_v54, %s8532_s21  ;;  %v14798_v54 = vld [vmem:[#allocation15_spill] sm:$0xff] }
 0x4ff   :  { %3541 = vrot.lane.b32.xlu0 %v3398_v19, %s8532_s21  ;;  %3535 = vrot.lane.b32.xlu1 %v3395_v38, %s8532_s21  ;;  %v3442_v19 = vmul.f32 %v10610_v40, %v14798_v54  ;;  %v14799_v38 = vld [vmem:[#allocation16_spill] sm:$0xff] }
 0x503   :  { %3545 = vrot.lane.b32.xlu0 %v3400_v18, %s8532_s21  ;;  %3539 = vrot.lane.b32.xlu1 %v3397_v41, %s8532_s21  ;;  %v3439_v18 = vmul.f32 %v10612_v12, %v14799_v38 }
 0x507   :  { %3549 = vrot.lane.b32.xlu0 %v3402_v37, %s8532_s21  ;;  %3543 = vrot.lane.b32.xlu1 %v3399_v26, %s8532_s21  ;;  %v3444_v26 = vmul.f32 %v10605_v16, %v10442_v13  ;;  %v7641_v13 = vld [vmem:[%s14610_s4 + $0x68] sm:$0xff] }
 0x50b   :  { %3553 = vrot.lane.b32.xlu0 %v3404_v28, %s8532_s21  ;;  %3547 = vrot.lane.b32.xlu1 %v3401_v43, %s8532_s21  ;;  %v3441_v28 = vmul.f32 %v10620_v10, %v10444_v3 }
 0x50f   :  { %3557 = vrot.lane.b32.xlu0 %v3406_v58, %s8532_s21  ;;  %3551 = vrot.lane.b32.xlu1 %v3403_v34, %s8532_s21  ;;  %v3446_v34 = vmul.f32 %v10610_v40, %v10456_v55  ;;  %v7643_v55 = vld [vmem:[%s14610_s4 + $0x78] sm:$0xff]  ;;  %v7640_v40 = vld [vmem:[%s14610_s4 + $0x60] sm:$0xff] }
 0x513   :  { %3561 = vrot.lane.b32.xlu0 %v3408_v53, %s8532_s21  ;;  %3555 = vrot.lane.b32.xlu1 %v3405_v62, %s8532_s21  ;;  %v14804_v53 = vld [vmem:[#allocation20_spill] sm:$0xff] }
 0x514   :  { %v3443_v62 = vmul.f32 %v10612_v12, %v14804_v53 }
 0x517   :  { %3565 = vrot.lane.b32.xlu0 %v3410_v6, %s8532_s21  ;;  %3559 = vrot.lane.b32.xlu1 %v3407_v25, %s8532_s21  ;;  %v14807_v6 = vld [vmem:[#allocation23_spill] sm:$0xff] }
 0x518   :  { %v3445_v25 = vmul.f32 %v10620_v10, %v14807_v6  ;;  %v7645_v10 = vld [vmem:[%s14610_s4 + $0x88] sm:$0xff] }
 0x51b   :  { %3569 = vrot.lane.b32.xlu0 %v3412_v1, %s8532_s21  ;;  %3563 = vrot.lane.b32.xlu1 %v3409_v21, %s8532_s21  ;;  %v7642_v21 = vld [vmem:[%s14610_s4 + $0x70] sm:$0xff] }
 0x51f   :  { %3573 = vrot.lane.b32.xlu0 %v3414_v59, %s8532_s21  ;;  %3567 = vrot.lane.b32.xlu1 %v3411_v63, %s8532_s21 }
 0x523   :  { %3577 = vrot.lane.b32.xlu0 %v3416_v42, %s8532_s21  ;;  %3571 = vrot.lane.b32.xlu1 %v3413_v31, %s8532_s21  ;;  %v7647_v42 = vld [vmem:[%s14610_s4 + $0x98] sm:$0xff]  ;;  %v7644_v31 = vld [vmem:[%s14610_s4 + $0x80] sm:$0xff] }
 0x527   :  { %3581 = vrot.lane.b32.xlu0 %v3418_v51, %s8532_s21  ;;  %3575 = vrot.lane.b32.xlu1 %v3415_v49, %s8532_s21 }
 0x52b   :  { %3585 = vrot.lane.b32.xlu0 %v3420_v24, %s8532_s21  ;;  %3579 = vrot.lane.b32.xlu1 %v3417_v8, %s8532_s21  ;;  %v7646_v24 = vld [vmem:[%s14610_s4 + $0x90] sm:$0xff] }
 0x52f   :  { %3589 = vrot.lane.b32.xlu0 %v3422_v36, %s8532_s21  ;;  %3583 = vrot.lane.b32.xlu1 %v3419_v39, %s8532_s21 }
 0x533   :  { %3593 = vrot.lane.b32.xlu0 %v3424_v46, %s8532_s21  ;;  %3587 = vrot.lane.b32.xlu1 %v3421_v50, %s8532_s21 }
 0x537   :  { %3597 = vrot.lane.b32.xlu0 %v3426_v56, %s8532_s21  ;;  %3591 = vrot.lane.b32.xlu1 %v3423_v60, %s8532_s21 }
 0x53b   :  { %3601 = vrot.lane.b32.xlu0 %v3428_v30, %s8532_s21  ;;  %3595 = vrot.lane.b32.xlu1 %v3425_v45, %s8532_s21 }
 0x53f   :  { %3605 = vrot.lane.b32.xlu0 %v3430_v4, %s8532_s21  ;;  %3599 = vrot.lane.b32.xlu1 %v3427_v14, %s8532_s21 }
 0x543   :  { %3609 = vrot.lane.b32.xlu0 %v3432_v27, %s8532_s21  ;;  %3603 = vrot.lane.b32.xlu1 %v3429_v32, %s8532_s21 }
 0x547   :  { %3613 = vrot.lane.b32.xlu0 %v3434_v44, %s8532_s21  ;;  %3607 = vrot.lane.b32.xlu1 %v3431_v52, %s8532_s21 }
 0x54b   :  { %3617 = vrot.lane.b32.xlu0 %v3436_v0, %s8532_s21  ;;  %3611 = vrot.lane.b32.xlu1 %v3433_v48, %s8532_s21 }
 0x54f   :  { %3621 = vrot.lane.b32.xlu0 %v3438_v22, %s8532_s21  ;;  %3615 = vrot.lane.b32.xlu1 %v3435_v57, %s8532_s21 }
 0x553   :  { %3625 = vrot.lane.b32.xlu0 %v3440_v20, %s8532_s21  ;;  %3619 = vrot.lane.b32.xlu1 %v3437_v29, %s8532_s21 }
 0x555   :  { %v10784_v33 = vpop.permute.xlu0 %3513 }
 0x556   :  { %14797 = vst [vmem:[#allocation8_spill] sm:$0xff] %v10784_v33  ;;  %v11228_v33 = vld [vmem:[#allocation3 + $0x208] sm:$0xff] }
 0x557   :  { %3629 = vrot.lane.b32.xlu0 %v3442_v19, %s8532_s21  ;;  %3623 = vrot.lane.b32.xlu1 %v3439_v18, %s8532_s21  ;;  %14870 = vst [vmem:[#allocation141_spill] sm:$0xff] %v11228_v33 }
 0x559   :  { %v10792_v41 = vpop.permute.xlu0 %3517  ;;  %v10794_v37 = vpop.permute.xlu1 %3511 }
 0x55a   :  { %14800 = vst [vmem:[#allocation9_spill] sm:$0xff] %v10792_v41  ;;  %14801 = vst [vmem:[#allocation10_spill] sm:$0xff] %v10794_v37  ;;  %v11218_v37 = vld [vmem:[#allocation3 + $0x1f8] sm:$0xff]  ;;  %v11220_v41 = vld [vmem:[#allocation3 + $0x1e0] sm:$0xff] }
 0x55b   :  { %3633 = vrot.lane.b32.xlu0 %v3444_v26, %s8532_s21  ;;  %3627 = vrot.lane.b32.xlu1 %v3441_v28, %s8532_s21  ;;  %14869 = vst [vmem:[#allocation140_spill] sm:$0xff] %v11220_v41 }
 0x55d   :  { %v10802_v43 = vpop.permute.xlu0 %3521  ;;  %v10804_v58 = vpop.permute.xlu1 %3515 }
 0x55e   :  { %14802 = vst [vmem:[#allocation11_spill] sm:$0xff] %v10802_v43  ;;  %14803 = vst [vmem:[#allocation12_spill] sm:$0xff] %v10804_v58  ;;  %v11208_v58 = vld [vmem:[#allocation3 + $0x1e8] sm:$0xff]  ;;  %v11210_v43 = vld [vmem:[#allocation3 + $0x1d0] sm:$0xff] }
 0x55f   :  { %3637 = vrot.lane.b32.xlu0 %v3446_v34, %s8532_s21  ;;  %3631 = vrot.lane.b32.xlu1 %v3443_v62, %s8532_s21 }
 0x561   :  { %v10815_v3 = vpop.permute.xlu0 %3525  ;;  %v10817_v16 = vpop.permute.xlu1 %3519 }
 0x562   :  { %14805 = vst [vmem:[#allocation13_spill] sm:$0xff] %v10815_v3  ;;  %14806 = vst [vmem:[#allocation14_spill] sm:$0xff] %v10817_v16  ;;  %v11198_v16 = vld [vmem:[#allocation3 + $0x1d8] sm:$0xff]  ;;  %v11200_v3 = vld [vmem:[#allocation3 + $0x1c0] sm:$0xff] }
 0x563   :  { %3843 = vperm.xlu0 %7834, %v7641_v13   ;;  %3635 = vrot.lane.b32.xlu1 %v3445_v25, %s8532_s21 }
 0x565   :  { %v10828_v12 = vpop.permute.xlu0 %3529  ;;  %v10830_v1 = vpop.permute.xlu1 %3523 }
 0x566   :  { %14808 = vst [vmem:[#allocation15_spill] sm:$0xff] %v10828_v12  ;;  %14809 = vst [vmem:[#allocation16_spill] sm:$0xff] %v10830_v1  ;;  %v11188_v1 = vld [vmem:[#allocation3 + $0x1c8] sm:$0xff]  ;;  %v11190_v12 = vld [vmem:[#allocation3 + $0x1b0] sm:$0xff] }
 0x567   :  { %3853 = vperm.xlu0 %7834, %v7643_v55   ;;  %3838 = vperm.xlu1 %7835, %v7640_v40  }
 0x569   :  { %v10838_v59 = vpop.permute.xlu0 %3533  ;;  %v10840_v63 = vpop.permute.xlu1 %3527 }
 0x56a   :  { %14810 = vst [vmem:[#allocation20_spill] sm:$0xff] %v10838_v59  ;;  %14811 = vst [vmem:[#allocation23_spill] sm:$0xff] %v10840_v63  ;;  %v11178_v63 = vld [vmem:[#allocation3 + $0x1b8] sm:$0xff]  ;;  %v11180_v59 = vld [vmem:[#allocation3 + $0x1a0] sm:$0xff] }
 0x56b   :  { %3996 = vperm.xlu0 %7834, %v7645_v10   ;;  %3848 = vperm.xlu1 %7835, %v7642_v21  }
 0x56d   :  { %v10848_v51 = vpop.permute.xlu0 %3537  ;;  %v10850_v49 = vpop.permute.xlu1 %3531 }
 0x56e   :  { %14812 = vst [vmem:[#allocation83_spill] sm:$0xff] %v10848_v51  ;;  %14813 = vst [vmem:[#allocation84_spill] sm:$0xff] %v10850_v49  ;;  %v11168_v49 = vld [vmem:[#allocation3 + $0x1a8] sm:$0xff]  ;;  %v11170_v51 = vld [vmem:[#allocation3 + $0x190] sm:$0xff] }
 0x56f   :  { %4006 = vperm.xlu0 %7834, %v7647_v42   ;;  %3991 = vperm.xlu1 %7835, %v7644_v31  }
 0x571   :  { %v10855_v8 = vpop.permute.xlu0 %3541  ;;  %v10857_v36 = vpop.permute.xlu1 %3535 }
 0x572   :  { %14814 = vst [vmem:[#allocation85_spill] sm:$0xff] %v10855_v8  ;;  %14815 = vst [vmem:[#allocation86_spill] sm:$0xff] %v10857_v36  ;;  %v11158_v36 = vld [vmem:[#allocation3 + $0x198] sm:$0xff]  ;;  %v11160_v8 = vld [vmem:[#allocation3 + $0x180] sm:$0xff] }
 0x573   :  { %4001 = vperm.xlu1 %7835, %v7646_v24  }
 0x575   :  { %v10859_v39 = vpop.permute.xlu0 %3545  ;;  %v10861_v46 = vpop.permute.xlu1 %3539 }
 0x576   :  { %14816 = vst [vmem:[#allocation87_spill] sm:$0xff] %v10859_v39  ;;  %14817 = vst [vmem:[#allocation88_spill] sm:$0xff] %v10861_v46  ;;  %v11148_v46 = vld [vmem:[#allocation3 + $0x188] sm:$0xff]  ;;  %v11150_v39 = vld [vmem:[#allocation3 + $0x170] sm:$0xff] }
 0x579   :  { %v10863_v50 = vpop.permute.xlu0 %3549  ;;  %v10865_v56 = vpop.permute.xlu1 %3543 }
 0x57a   :  { %14818 = vst [vmem:[#allocation89_spill] sm:$0xff] %v10863_v50  ;;  %14819 = vst [vmem:[#allocation90_spill] sm:$0xff] %v10865_v56  ;;  %v11138_v56 = vld [vmem:[#allocation3 + $0x178] sm:$0xff]  ;;  %v11140_v50 = vld [vmem:[#allocation3 + $0x160] sm:$0xff] }
 0x57d   :  { %v10867_v60 = vpop.permute.xlu0 %3553  ;;  %v10869_v30 = vpop.permute.xlu1 %3547 }
 0x57e   :  { %14820 = vst [vmem:[#allocation91_spill] sm:$0xff] %v10867_v60  ;;  %14821 = vst [vmem:[#allocation92_spill] sm:$0xff] %v10869_v30  ;;  %v11128_v30 = vld [vmem:[#allocation3 + $0x168] sm:$0xff]  ;;  %v11130_v60 = vld [vmem:[#allocation3 + $0x110] sm:$0xff] }
 0x581   :  { %v10871_v45 = vpop.permute.xlu0 %3557  ;;  %v10873_v4 = vpop.permute.xlu1 %3551 }
 0x582   :  { %14822 = vst [vmem:[#allocation93_spill] sm:$0xff] %v10871_v45  ;;  %14823 = vst [vmem:[#allocation94_spill] sm:$0xff] %v10873_v4  ;;  %v11118_v4 = vld [vmem:[#allocation3 + $0x118] sm:$0xff]  ;;  %v11120_v45 = vld [vmem:[#allocation3 + $0x100] sm:$0xff] }
 0x585   :  { %v10875_v14 = vpop.permute.xlu0 %3561  ;;  %v10877_v27 = vpop.permute.xlu1 %3555 }
 0x586   :  { %14824 = vst [vmem:[#allocation95_spill] sm:$0xff] %v10875_v14  ;;  %14825 = vst [vmem:[#allocation96_spill] sm:$0xff] %v10877_v27  ;;  %v11108_v27 = vld [vmem:[#allocation3 + $0x108] sm:$0xff]  ;;  %v11110_v14 = vld [vmem:[#allocation3 + $0xf0] sm:$0xff] }
 0x589   :  { %v10879_v32 = vpop.permute.xlu0 %3565  ;;  %v10881_v44 = vpop.permute.xlu1 %3559 }
 0x58a   :  { %14826 = vst [vmem:[#allocation97_spill] sm:$0xff] %v10879_v32  ;;  %14827 = vst [vmem:[#allocation98_spill] sm:$0xff] %v10881_v44  ;;  %v11098_v44 = vld [vmem:[#allocation3 + $0xf8] sm:$0xff]  ;;  %v11100_v32 = vld [vmem:[#allocation3 + $0xe0] sm:$0xff] }
 0x58d   :  { %v10883_v35 = vpop.permute.xlu0 %3569  ;;  %v10885_v52 = vpop.permute.xlu1 %3563 }
 0x58e   :  { %14828 = vst [vmem:[#allocation99_spill] sm:$0xff] %v10883_v35  ;;  %14829 = vst [vmem:[#allocation100_spill] sm:$0xff] %v10885_v52  ;;  %v11088_v52 = vld [vmem:[#allocation3 + $0xe8] sm:$0xff]  ;;  %v11090_v35 = vld [vmem:[#allocation3 + $0xd0] sm:$0xff] }
 0x591   :  { %v10887_v5 = vpop.permute.xlu0 %3573  ;;  %v10889_v0 = vpop.permute.xlu1 %3567 }
 0x592   :  { %14830 = vst [vmem:[#allocation101_spill] sm:$0xff] %v10887_v5  ;;  %14831 = vst [vmem:[#allocation102_spill] sm:$0xff] %v10889_v0  ;;  %v11078_v0 = vld [vmem:[#allocation3 + $0xd8] sm:$0xff]  ;;  %v11080_v5 = vld [vmem:[#allocation3 + $0xc0] sm:$0xff] }
 0x595   :  { %v10891_v2 = vpop.permute.xlu0 %3577  ;;  %v10893_v48 = vpop.permute.xlu1 %3571 }
 0x596   :  { %14832 = vst [vmem:[#allocation103_spill] sm:$0xff] %v10891_v2  ;;  %14833 = vst [vmem:[#allocation104_spill] sm:$0xff] %v10893_v48  ;;  %v11068_v48 = vld [vmem:[#allocation3 + $0xc8] sm:$0xff]  ;;  %v11070_v2 = vld [vmem:[#allocation3 + $0xb0] sm:$0xff] }
 0x599   :  { %v10895_v11 = vpop.permute.xlu0 %3581  ;;  %v10897_v22 = vpop.permute.xlu1 %3575 }
 0x59a   :  { %14834 = vst [vmem:[#allocation105_spill] sm:$0xff] %v10895_v11  ;;  %14835 = vst [vmem:[#allocation106_spill] sm:$0xff] %v10897_v22  ;;  %v11058_v22 = vld [vmem:[#allocation3 + $0xb8] sm:$0xff]  ;;  %v11060_v11 = vld [vmem:[#allocation3 + $0xa0] sm:$0xff] }
 0x59d   :  { %v10899_v15 = vpop.permute.xlu0 %3585  ;;  %v10901_v57 = vpop.permute.xlu1 %3579 }
 0x59e   :  { %14836 = vst [vmem:[#allocation107_spill] sm:$0xff] %v10899_v15  ;;  %14837 = vst [vmem:[#allocation108_spill] sm:$0xff] %v10901_v57  ;;  %v11048_v57 = vld [vmem:[#allocation3 + $0xa8] sm:$0xff]  ;;  %v11050_v15 = vld [vmem:[#allocation3 + $0x90] sm:$0xff] }
 0x5a1   :  { %v10903_v23 = vpop.permute.xlu0 %3589  ;;  %v10905_v20 = vpop.permute.xlu1 %3583 }
 0x5a2   :  { %14838 = vst [vmem:[#allocation109_spill] sm:$0xff] %v10903_v23  ;;  %14839 = vst [vmem:[#allocation110_spill] sm:$0xff] %v10905_v20  ;;  %v11038_v20 = vld [vmem:[#allocation3 + $0x98] sm:$0xff]  ;;  %v11040_v23 = vld [vmem:[#allocation3 + $0x80] sm:$0xff] }
 0x5a5   :  { %v10907_v47 = vpop.permute.xlu0 %3593  ;;  %v10909_v29 = vpop.permute.xlu1 %3587 }
 0x5a6   :  { %14840 = vst [vmem:[#allocation111_spill] sm:$0xff] %v10907_v47  ;;  %14841 = vst [vmem:[#allocation112_spill] sm:$0xff] %v10909_v29  ;;  %v11028_v29 = vld [vmem:[#allocation3 + $0x88] sm:$0xff]  ;;  %v11030_v47 = vld [vmem:[#allocation3 + $0x70] sm:$0xff] }
 0x5a9   :  { %v10911_v54 = vpop.permute.xlu0 %3597  ;;  %v10913_v19 = vpop.permute.xlu1 %3591 }
 0x5aa   :  { %14842 = vst [vmem:[#allocation113_spill] sm:$0xff] %v10911_v54  ;;  %14843 = vst [vmem:[#allocation114_spill] sm:$0xff] %v10913_v19  ;;  %v11018_v19 = vld [vmem:[#allocation3 + $0x78] sm:$0xff]  ;;  %v11020_v54 = vld [vmem:[#allocation3 + $0x60] sm:$0xff] }
 0x5ad   :  { %v10915_v38 = vpop.permute.xlu0 %3601  ;;  %v10917_v18 = vpop.permute.xlu1 %3595 }
 0x5ae   :  { %14844 = vst [vmem:[#allocation115_spill] sm:$0xff] %v10915_v38  ;;  %14845 = vst [vmem:[#allocation116_spill] sm:$0xff] %v10917_v18  ;;  %v11008_v18 = vld [vmem:[#allocation3 + $0x68] sm:$0xff]  ;;  %v11010_v38 = vld [vmem:[#allocation3 + $0x50] sm:$0xff] }
 0x5b1   :  { %v10919_v26 = vpop.permute.xlu0 %3605  ;;  %v10921_v28 = vpop.permute.xlu1 %3599 }
 0x5b2   :  { %14846 = vst [vmem:[#allocation117_spill] sm:$0xff] %v10919_v26  ;;  %14847 = vst [vmem:[#allocation118_spill] sm:$0xff] %v10921_v28  ;;  %v10998_v28 = vld [vmem:[#allocation3 + $0x58] sm:$0xff] }
 0x5b5   :  { %v10923_v34 = vpop.permute.xlu0 %3609  ;;  %v10925_v53 = vpop.permute.xlu1 %3603 }
 0x5b6   :  { %14848 = vst [vmem:[#allocation119_spill] sm:$0xff] %v10923_v34  ;;  %14849 = vst [vmem:[#allocation120_spill] sm:$0xff] %v10925_v53 }
 0x5b9   :  { %v10927_v62 = vpop.permute.xlu1 %3607  ;;  %v10929_v13 = vpop.permute.xlu0 %3613 }
 0x5ba   :  { %14850 = vst [vmem:[#allocation121_spill] sm:$0xff] %v10927_v62  ;;  %14851 = vst [vmem:[#allocation122_spill] sm:$0xff] %v10929_v13 }
 0x5bd   :  { %v10931_v6 = vpop.permute.xlu1 %3611  ;;  %v10933_v25 = vpop.permute.xlu0 %3617 }
 0x5be   :  { %14852 = vst [vmem:[#allocation123_spill] sm:$0xff] %v10931_v6  ;;  %14853 = vst [vmem:[#allocation124_spill] sm:$0xff] %v10933_v25 }
 0x5c1   :  { %v10935_v55 = vpop.permute.xlu1 %3615  ;;  %v10937_v40 = vpop.permute.xlu0 %3621 }
 0x5c2   :  { %14854 = vst [vmem:[#allocation125_spill] sm:$0xff] %v10935_v55  ;;  %14855 = vst [vmem:[#allocation126_spill] sm:$0xff] %v10937_v40 }
 0x5c5   :  { %v10939_v10 = vpop.permute.xlu1 %3619  ;;  %v10941_v21 = vpop.permute.xlu0 %3625 }
 0x5c6   :  { %14856 = vst [vmem:[#allocation127_spill] sm:$0xff] %v10939_v10  ;;  %14857 = vst [vmem:[#allocation128_spill] sm:$0xff] %v10941_v21 }
 0x5c9   :  { %v10943_v42 = vpop.permute.xlu1 %3623  ;;  %v10945_v31 = vpop.permute.xlu0 %3629 }
 0x5ca   :  { %14858 = vst [vmem:[#allocation129_spill] sm:$0xff] %v10943_v42  ;;  %14859 = vst [vmem:[#allocation130_spill] sm:$0xff] %v10945_v31  ;;  %v10967_v31 = vld [vmem:[#allocation3 + $0x28] sm:$0xff] }
 0x5cd   :  { %v10947_v24 = vpop.permute.xlu1 %3627  ;;  %v10949_v62 = vpop.permute.xlu0 %3633 }
 0x5ce   :  { %14860 = vst [vmem:[#allocation131_spill] sm:$0xff] %v10947_v24  ;;  %14861 = vst [vmem:[#allocation132_spill] sm:$0xff] %v10949_v62 }
 0x5d1   :  { %v10951_v13 = vpop.permute.xlu1 %3631  ;;  %v10953_v6 = vpop.permute.xlu0 %3637 }
 0x5d2   :  { %14862 = vst [vmem:[#allocation133_spill] sm:$0xff] %v10951_v13  ;;  %14863 = vst [vmem:[#allocation134_spill] sm:$0xff] %v10953_v6  ;;  %v10976_v6 = vld [vmem:[#allocation3 + $0x38] sm:$0xff] }
 0x5d5   :  { %v10955_v25 = vpop.permute.xlu1 %3635 }
 0x5d6   :  { %14864 = vst [vmem:[#allocation135_spill] sm:$0xff] %v10955_v25 }
 0x5e2   :  { %v10957_v55 = vpop.permute.xlu0 %3843 }
 0x5e3   :  { %14865 = vst [vmem:[#allocation136_spill] sm:$0xff] %v10957_v55  ;;  %v10990_v55 = vld [vmem:[#allocation3 + $0x30] sm:$0xff] }
 0x5e6   :  { %v10959_v40 = vpop.permute.xlu0 %3853  ;;  %v10961_v10 = vpop.permute.xlu1 %3838 }
 0x5e7   :  { %14866 = vst [vmem:[#allocation137_spill] sm:$0xff] %v10959_v40  ;;  %14867 = vst [vmem:[#allocation138_spill] sm:$0xff] %v10961_v10  ;;  %v10978_v40 = vld [vmem:[#allocation3 + $0x20] sm:$0xff] }
 0x5ea   :  { %v10963_v21 = vpop.permute.xlu0 %3996  ;;  %v10965_v42 = vpop.permute.xlu1 %3848 }
 0x5eb   :  { %14868 = vst [vmem:[#allocation139_spill] sm:$0xff] %v10965_v42  ;;  %v4010_v24 = vmul.f32 %v10963_v21, %v10967_v31 }
 0x5ed   :  { %4139 = vrot.lane.b32.xlu0 %v4010_v24, %s8531_s15  ;;  %v10988_v24 = vld [vmem:[#allocation3 + $0x48] sm:$0xff] }
 0x5ee   :  { %v10972_v13 = vpop.permute.xlu0 %4006  ;;  %v10974_v25 = vpop.permute.xlu1 %3991  ;;  %v4014_v53 = vmul.f32 %v10963_v21, %v10988_v24 }
 0x5ef   :  { %v4012_v10 = vmul.f32 %v10972_v13, %v10976_v6  ;;  %v4009_v42 = vmul.f32 %v10974_v25, %v10978_v40 }
 0x5f1   :  { %4143 = vrot.lane.b32.xlu0 %v4012_v10, %s8531_s15  ;;  %4137 = vrot.lane.b32.xlu1 %v4009_v42, %s8531_s15  ;;  %v11000_v10 = vld [vmem:[#allocation3 + $0x40] sm:$0xff]  ;;  %v4016_v42 = vmul.f32 %v10972_v13, %v10998_v28 }
 0x5f2   :  { %v10986_v62 = vpop.permute.xlu1 %4001  ;;  %v4013_v26 = vmul.f32 %v10974_v25, %v11000_v10 }
 0x5f3   :  { %v4011_v34 = vmul.f32 %v10986_v62, %v10990_v55 }
 0x5f5   :  { %4147 = vrot.lane.b32.xlu0 %v4014_v53, %s8531_s15  ;;  %4141 = vrot.lane.b32.xlu1 %v4011_v34, %s8531_s15  ;;  %v4018_v34 = vmul.f32 %v10963_v21, %v11008_v18  ;;  %v4015_v53 = vmul.f32 %v10986_v62, %v11010_v38 }
 0x5f9   :  { %4151 = vrot.lane.b32.xlu0 %v4016_v42, %s8531_s15  ;;  %4145 = vrot.lane.b32.xlu1 %v4013_v26, %s8531_s15  ;;  %v4020_v26 = vmul.f32 %v10972_v13, %v11018_v19  ;;  %v4017_v42 = vmul.f32 %v10974_v25, %v11020_v54 }
 0x5fd   :  { %4155 = vrot.lane.b32.xlu0 %v4018_v34, %s8531_s15  ;;  %4149 = vrot.lane.b32.xlu1 %v4015_v53, %s8531_s15  ;;  %v4022_v34 = vmul.f32 %v10963_v21, %v11028_v29  ;;  %v4019_v53 = vmul.f32 %v10986_v62, %v11030_v47 }
 0x601   :  { %4159 = vrot.lane.b32.xlu0 %v4020_v26, %s8531_s15  ;;  %4153 = vrot.lane.b32.xlu1 %v4017_v42, %s8531_s15  ;;  %v4024_v26 = vmul.f32 %v10972_v13, %v11038_v20  ;;  %v4021_v42 = vmul.f32 %v10974_v25, %v11040_v23 }
 0x605   :  { %4163 = vrot.lane.b32.xlu0 %v4022_v34, %s8531_s15  ;;  %4157 = vrot.lane.b32.xlu1 %v4019_v53, %s8531_s15  ;;  %v4026_v34 = vmul.f32 %v10963_v21, %v11048_v57  ;;  %v4023_v53 = vmul.f32 %v10986_v62, %v11050_v15 }
 0x609   :  { %4167 = vrot.lane.b32.xlu0 %v4024_v26, %s8531_s15  ;;  %4161 = vrot.lane.b32.xlu1 %v4021_v42, %s8531_s15  ;;  %v4028_v26 = vmul.f32 %v10972_v13, %v11058_v22  ;;  %v4025_v42 = vmul.f32 %v10974_v25, %v11060_v11 }
 0x60d   :  { %4171 = vrot.lane.b32.xlu0 %v4026_v34, %s8531_s15  ;;  %4165 = vrot.lane.b32.xlu1 %v4023_v53, %s8531_s15  ;;  %v4030_v34 = vmul.f32 %v10963_v21, %v11068_v48  ;;  %v4027_v53 = vmul.f32 %v10986_v62, %v11070_v2 }
 0x611   :  { %4175 = vrot.lane.b32.xlu0 %v4028_v26, %s8531_s15  ;;  %4169 = vrot.lane.b32.xlu1 %v4025_v42, %s8531_s15  ;;  %v4032_v26 = vmul.f32 %v10972_v13, %v11078_v0  ;;  %v4029_v42 = vmul.f32 %v10974_v25, %v11080_v5 }
 0x615   :  { %4179 = vrot.lane.b32.xlu0 %v4030_v34, %s8531_s15  ;;  %4173 = vrot.lane.b32.xlu1 %v4027_v53, %s8531_s15  ;;  %v4034_v34 = vmul.f32 %v10963_v21, %v11088_v52  ;;  %v4031_v53 = vmul.f32 %v10986_v62, %v11090_v35 }
 0x619   :  { %4183 = vrot.lane.b32.xlu0 %v4032_v26, %s8531_s15  ;;  %4177 = vrot.lane.b32.xlu1 %v4029_v42, %s8531_s15  ;;  %v4036_v26 = vmul.f32 %v10972_v13, %v11098_v44  ;;  %v4033_v42 = vmul.f32 %v10974_v25, %v11100_v32 }
 0x61d   :  { %4187 = vrot.lane.b32.xlu0 %v4034_v34, %s8531_s15  ;;  %4181 = vrot.lane.b32.xlu1 %v4031_v53, %s8531_s15  ;;  %v4038_v34 = vmul.f32 %v10963_v21, %v11108_v27  ;;  %v4035_v53 = vmul.f32 %v10986_v62, %v11110_v14 }
 0x621   :  { %4191 = vrot.lane.b32.xlu0 %v4036_v26, %s8531_s15  ;;  %4185 = vrot.lane.b32.xlu1 %v4033_v42, %s8531_s15  ;;  %v4040_v26 = vmul.f32 %v10972_v13, %v11118_v4  ;;  %v4037_v42 = vmul.f32 %v10974_v25, %v11120_v45 }
 0x625   :  { %4195 = vrot.lane.b32.xlu0 %v4038_v34, %s8531_s15  ;;  %4189 = vrot.lane.b32.xlu1 %v4035_v53, %s8531_s15  ;;  %v4042_v34 = vmul.f32 %v10963_v21, %v11128_v30  ;;  %v4039_v53 = vmul.f32 %v10986_v62, %v11130_v60 }
 0x629   :  { %4199 = vrot.lane.b32.xlu0 %v4040_v26, %s8531_s15  ;;  %4193 = vrot.lane.b32.xlu1 %v4037_v42, %s8531_s15  ;;  %v4044_v26 = vmul.f32 %v10972_v13, %v11138_v56  ;;  %v4041_v42 = vmul.f32 %v10974_v25, %v11140_v50 }
 0x62d   :  { %4203 = vrot.lane.b32.xlu0 %v4042_v34, %s8531_s15  ;;  %4197 = vrot.lane.b32.xlu1 %v4039_v53, %s8531_s15  ;;  %v4046_v34 = vmul.f32 %v10963_v21, %v11148_v46  ;;  %v4043_v53 = vmul.f32 %v10986_v62, %v11150_v39 }
 0x631   :  { %4207 = vrot.lane.b32.xlu0 %v4044_v26, %s8531_s15  ;;  %4201 = vrot.lane.b32.xlu1 %v4041_v42, %s8531_s15  ;;  %v4048_v26 = vmul.f32 %v10972_v13, %v11158_v36  ;;  %v4045_v42 = vmul.f32 %v10974_v25, %v11160_v8 }
 0x635   :  { %4211 = vrot.lane.b32.xlu0 %v4046_v34, %s8531_s15  ;;  %4205 = vrot.lane.b32.xlu1 %v4043_v53, %s8531_s15  ;;  %v4050_v34 = vmul.f32 %v10963_v21, %v11168_v49  ;;  %v4047_v53 = vmul.f32 %v10986_v62, %v11170_v51 }
 0x639   :  { %4215 = vrot.lane.b32.xlu0 %v4048_v26, %s8531_s15  ;;  %4209 = vrot.lane.b32.xlu1 %v4045_v42, %s8531_s15  ;;  %v4052_v26 = vmul.f32 %v10972_v13, %v11178_v63  ;;  %v4049_v42 = vmul.f32 %v10974_v25, %v11180_v59 }
 0x63d   :  { %4219 = vrot.lane.b32.xlu0 %v4050_v34, %s8531_s15  ;;  %4213 = vrot.lane.b32.xlu1 %v4047_v53, %s8531_s15  ;;  %v4054_v34 = vmul.f32 %v10963_v21, %v11188_v1  ;;  %v4051_v53 = vmul.f32 %v10986_v62, %v11190_v12 }
 0x641   :  { %4223 = vrot.lane.b32.xlu0 %v4052_v26, %s8531_s15  ;;  %4217 = vrot.lane.b32.xlu1 %v4049_v42, %s8531_s15  ;;  %v4056_v26 = vmul.f32 %v10972_v13, %v11198_v16  ;;  %v4053_v42 = vmul.f32 %v10974_v25, %v11200_v3 }
 0x645   :  { %4227 = vrot.lane.b32.xlu0 %v4054_v34, %s8531_s15  ;;  %4221 = vrot.lane.b32.xlu1 %v4051_v53, %s8531_s15  ;;  %v4058_v34 = vmul.f32 %v10963_v21, %v11208_v58  ;;  %v4055_v53 = vmul.f32 %v10986_v62, %v11210_v43 }
 0x649   :  { %4231 = vrot.lane.b32.xlu0 %v4056_v26, %s8531_s15  ;;  %4225 = vrot.lane.b32.xlu1 %v4053_v42, %s8531_s15  ;;  %v4060_v26 = vmul.f32 %v10972_v13, %v11218_v37  ;;  %v4057_v42 = vmul.f32 %v10974_v25, %v11220_v41 }
 0x64d   :  { %4235 = vrot.lane.b32.xlu0 %v4058_v34, %s8531_s15  ;;  %4229 = vrot.lane.b32.xlu1 %v4055_v53, %s8531_s15  ;;  %v4062_v34 = vmul.f32 %v10963_v21, %v11228_v33  ;;  %v4059_v53 = vmul.f32 %v10986_v62, %v11230_v61  ;;  %v11250_v61 = vld [vmem:[#allocation3 + $0x210] sm:$0xff] }
 0x64e   :  { %14875 = vst [vmem:[#allocation146_spill] sm:$0xff] %v11250_v61 }
 0x651   :  { %4239 = vrot.lane.b32.xlu0 %v4060_v26, %s8531_s15  ;;  %4233 = vrot.lane.b32.xlu1 %v4057_v42, %s8531_s15  ;;  %v4064_v26 = vmul.f32 %v10972_v13, %v11238_v9  ;;  %v4061_v42 = vmul.f32 %v10974_v25, %v11240_v7  ;;  %v11258_v9 = vld [vmem:[#allocation3 + $0x238] sm:$0xff]  ;;  %v11260_v7 = vld [vmem:[#allocation3 + $0x220] sm:$0xff] }
 0x652   :  { %14876 = vst [vmem:[#allocation147_spill] sm:$0xff] %v11258_v9  ;;  %14877 = vst [vmem:[#allocation148_spill] sm:$0xff] %v11260_v7  ;;  %v4065_v33 = vmul.f32 %v10974_v25, %v11260_v7 }
 0x655   :  { %4243 = vrot.lane.b32.xlu0 %v4062_v34, %s8531_s15  ;;  %4237 = vrot.lane.b32.xlu1 %v4059_v53, %s8531_s15  ;;  %v4066_v34 = vmul.f32 %v10963_v21, %v11248_v17  ;;  %v4063_v53 = vmul.f32 %v10986_v62, %v11250_v61  ;;  %v11270_v61 = vld [vmem:[#allocation3 + $0x248] sm:$0xff] }
 0x659   :  { %4247 = vrot.lane.b32.xlu0 %v4064_v26, %s8531_s15  ;;  %4241 = vrot.lane.b32.xlu1 %v4061_v42, %s8531_s15  ;;  %v4068_v42 = vmul.f32 %v10972_v13, %v11258_v9 }
 0x65d   :  { %4251 = vrot.lane.b32.xlu0 %v4066_v34, %s8531_s15  ;;  %4245 = vrot.lane.b32.xlu1 %v4063_v53, %s8531_s15  ;;  %v11272_v34 = vld [vmem:[#allocation3 + $0x230] sm:$0xff] }
 0x65e   :  { %v4067_v9 = vmul.f32 %v10986_v62, %v11272_v34 }
 0x65f   :  { %v11262_v26 = vpop.permute.xlu0 %4139 }
 0x660   :  { %14878 = vst [vmem:[#allocation149_spill] sm:$0xff] %v11262_v26  ;;  %v4070_v26 = vmul.f32 %v10963_v21, %v11270_v61 }
 0x661   :  { %4255 = vrot.lane.b32.xlu0 %v4068_v42, %s8531_s15  ;;  %4249 = vrot.lane.b32.xlu1 %v4065_v33, %s8531_s15  ;;  %v11284_v42 = vld [vmem:[#allocation3 + $0x258] sm:$0xff]  ;;  %v11286_v33 = vld [vmem:[#allocation3 + $0x240] sm:$0xff] }
 0x662   :  { %14881 = vst [vmem:[#allocation152_spill] sm:$0xff] %v11286_v33  ;;  %v4069_v21 = vmul.f32 %v10974_v25, %v11286_v33  ;;  %v7651_v25 = vld [vmem:[%s14610_s4 + $0xb8] sm:$0xff] }
 0x663   :  { %v11274_v53 = vpop.permute.xlu0 %4143  ;;  %v11276_v17 = vpop.permute.xlu1 %4137 }
 0x664   :  { %14879 = vst [vmem:[#allocation150_spill] sm:$0xff] %v11274_v53  ;;  %14880 = vst [vmem:[#allocation151_spill] sm:$0xff] %v11276_v17  ;;  %v4072_v53 = vmul.f32 %v10972_v13, %v11284_v42 }
 0x665   :  { %4259 = vrot.lane.b32.xlu0 %v4070_v26, %s8531_s15  ;;  %4253 = vrot.lane.b32.xlu1 %v4067_v9, %s8531_s15  ;;  %v7649_v9 = vld [vmem:[%s14610_s4 + $0xa8] sm:$0xff]  ;;  %v11301_v26 = vld [vmem:[#allocation3 + $0x250] sm:$0xff] }
 0x666   :  { %14884 = vst [vmem:[#allocation155_spill] sm:$0xff] %v11301_v26  ;;  %v4071_v13 = vmul.f32 %v10986_v62, %v11301_v26  ;;  %v7650_v62 = vld [vmem:[%s14610_s4 + $0xb0] sm:$0xff] }
 0x667   :  { %v11288_v7 = vpop.permute.xlu0 %4147  ;;  %v11290_v41 = vpop.permute.xlu1 %4141 }
 0x668   :  { %14882 = vst [vmem:[#allocation153_spill] sm:$0xff] %v11288_v7  ;;  %14883 = vst [vmem:[#allocation154_spill] sm:$0xff] %v11290_v41 }
 0x669   :  { %4263 = vrot.lane.b32.xlu0 %v4072_v53, %s8531_s15  ;;  %4257 = vrot.lane.b32.xlu1 %v4069_v21, %s8531_s15  ;;  %v7648_v53 = vld [vmem:[%s14610_s4 + $0xa0] sm:$0xff] }
 0x66b   :  { %v11303_v17 = vpop.permute.xlu0 %4151  ;;  %v11305_v7 = vpop.permute.xlu1 %4145 }
 0x66c   :  { %14885 = vst [vmem:[#allocation156_spill] sm:$0xff] %v11303_v17  ;;  %14886 = vst [vmem:[#allocation157_spill] sm:$0xff] %v11305_v7 }
 0x66d   :  { %4405 = vperm.xlu0 %7834, %v7649_v9   ;;  %4261 = vrot.lane.b32.xlu1 %v4071_v13, %s8531_s15 }
 0x66f   :  { %v11316_v21 = vpop.permute.xlu0 %4155  ;;  %v11318_v41 = vpop.permute.xlu1 %4149 }
 0x670   :  { %14887 = vst [vmem:[#allocation158_spill] sm:$0xff] %v11316_v21  ;;  %14888 = vst [vmem:[#allocation159_spill] sm:$0xff] %v11318_v41 }
 0x671   :  { %4415 = vperm.xlu0 %7834, %v7651_v25   ;;  %4400 = vperm.xlu1 %7835, %v7648_v53  }
 0x673   :  { %v11323_v9 = vpop.permute.xlu0 %4159  ;;  %v11325_v13 = vpop.permute.xlu1 %4153 }
 0x674   :  { %14889 = vst [vmem:[#allocation160_spill] sm:$0xff] %v11323_v9  ;;  %14890 = vst [vmem:[#allocation161_spill] sm:$0xff] %v11325_v13 }
 0x675   :  { %4410 = vperm.xlu1 %7835, %v7650_v62  }
 0x677   :  { %v11327_v17 = vpop.permute.xlu0 %4163  ;;  %v11329_v7 = vpop.permute.xlu1 %4157 }
 0x678   :  { %14891 = vst [vmem:[#allocation162_spill] sm:$0xff] %v11327_v17  ;;  %14892 = vst [vmem:[#allocation163_spill] sm:$0xff] %v11329_v7 }
 0x67b   :  { %v11331_v26 = vpop.permute.xlu0 %4167  ;;  %v11333_v21 = vpop.permute.xlu1 %4161 }
 0x67c   :  { %14893 = vst [vmem:[#allocation164_spill] sm:$0xff] %v11331_v26  ;;  %14894 = vst [vmem:[#allocation165_spill] sm:$0xff] %v11333_v21 }
 0x67f   :  { %v11335_v41 = vpop.permute.xlu0 %4171  ;;  %v11337_v25 = vpop.permute.xlu1 %4165 }
 0x680   :  { %14895 = vst [vmem:[#allocation166_spill] sm:$0xff] %v11335_v41  ;;  %14896 = vst [vmem:[#allocation167_spill] sm:$0xff] %v11337_v25 }
 0x683   :  { %v11339_v53 = vpop.permute.xlu0 %4175  ;;  %v11341_v33 = vpop.permute.xlu1 %4169 }
 0x684   :  { %14897 = vst [vmem:[#allocation168_spill] sm:$0xff] %v11339_v53  ;;  %14898 = vst [vmem:[#allocation169_spill] sm:$0xff] %v11341_v33 }
 0x687   :  { %v11343_v9 = vpop.permute.xlu0 %4179  ;;  %v11345_v13 = vpop.permute.xlu1 %4173 }
 0x688   :  { %14899 = vst [vmem:[#allocation170_spill] sm:$0xff] %v11343_v9  ;;  %14900 = vst [vmem:[#allocation171_spill] sm:$0xff] %v11345_v13 }
 0x68b   :  { %v11347_v62 = vpop.permute.xlu0 %4183  ;;  %v11349_v17 = vpop.permute.xlu1 %4177 }
 0x68c   :  { %14901 = vst [vmem:[#allocation172_spill] sm:$0xff] %v11347_v62  ;;  %14902 = vst [vmem:[#allocation173_spill] sm:$0xff] %v11349_v17 }
 0x68f   :  { %v11351_v7 = vpop.permute.xlu0 %4187  ;;  %v11353_v26 = vpop.permute.xlu1 %4181 }
 0x690   :  { %14903 = vst [vmem:[#allocation174_spill] sm:$0xff] %v11351_v7  ;;  %14904 = vst [vmem:[#allocation175_spill] sm:$0xff] %v11353_v26 }
 0x693   :  { %v11355_v21 = vpop.permute.xlu0 %4191  ;;  %v11357_v41 = vpop.permute.xlu1 %4185 }
 0x694   :  { %14905 = vst [vmem:[#allocation176_spill] sm:$0xff] %v11355_v21  ;;  %14906 = vst [vmem:[#allocation177_spill] sm:$0xff] %v11357_v41 }
 0x697   :  { %v11359_v25 = vpop.permute.xlu0 %4195  ;;  %v11361_v53 = vpop.permute.xlu1 %4189 }
 0x698   :  { %14907 = vst [vmem:[#allocation178_spill] sm:$0xff] %v11359_v25  ;;  %14908 = vst [vmem:[#allocation179_spill] sm:$0xff] %v11361_v53 }
 0x69b   :  { %v11363_v33 = vpop.permute.xlu0 %4199  ;;  %v11365_v9 = vpop.permute.xlu1 %4193 }
 0x69c   :  { %14909 = vst [vmem:[#allocation180_spill] sm:$0xff] %v11363_v33  ;;  %14910 = vst [vmem:[#allocation181_spill] sm:$0xff] %v11365_v9 }
 0x69f   :  { %v11367_v13 = vpop.permute.xlu0 %4203  ;;  %v11369_v62 = vpop.permute.xlu1 %4197 }
 0x6a0   :  { %14911 = vst [vmem:[#allocation182_spill] sm:$0xff] %v11367_v13  ;;  %14912 = vst [vmem:[#allocation183_spill] sm:$0xff] %v11369_v62 }
 0x6a3   :  { %v11371_v17 = vpop.permute.xlu0 %4207  ;;  %v11373_v7 = vpop.permute.xlu1 %4201 }
 0x6a4   :  { %14913 = vst [vmem:[#allocation184_spill] sm:$0xff] %v11371_v17  ;;  %14914 = vst [vmem:[#allocation185_spill] sm:$0xff] %v11373_v7 }
 0x6a7   :  { %v11375_v26 = vpop.permute.xlu0 %4211  ;;  %v11377_v21 = vpop.permute.xlu1 %4205 }
 0x6a8   :  { %14915 = vst [vmem:[#allocation186_spill] sm:$0xff] %v11375_v26  ;;  %14916 = vst [vmem:[#allocation187_spill] sm:$0xff] %v11377_v21 }
 0x6ab   :  { %v11379_v41 = vpop.permute.xlu0 %4215  ;;  %v11381_v25 = vpop.permute.xlu1 %4209 }
 0x6ac   :  { %14917 = vst [vmem:[#allocation188_spill] sm:$0xff] %v11379_v41  ;;  %14918 = vst [vmem:[#allocation189_spill] sm:$0xff] %v11381_v25 }
 0x6af   :  { %v11383_v53 = vpop.permute.xlu0 %4219  ;;  %v11385_v33 = vpop.permute.xlu1 %4213 }
 0x6b0   :  { %14919 = vst [vmem:[#allocation190_spill] sm:$0xff] %v11383_v53  ;;  %14920 = vst [vmem:[#allocation191_spill] sm:$0xff] %v11385_v33 }
 0x6b3   :  { %v11387_v9 = vpop.permute.xlu0 %4223  ;;  %v11389_v13 = vpop.permute.xlu1 %4217 }
 0x6b4   :  { %14921 = vst [vmem:[#allocation192_spill] sm:$0xff] %v11387_v9  ;;  %14922 = vst [vmem:[#allocation193_spill] sm:$0xff] %v11389_v13 }
 0x6b7   :  { %v11391_v62 = vpop.permute.xlu0 %4227  ;;  %v11393_v17 = vpop.permute.xlu1 %4221 }
 0x6b8   :  { %14923 = vst [vmem:[#allocation194_spill] sm:$0xff] %v11391_v62  ;;  %14924 = vst [vmem:[#allocation195_spill] sm:$0xff] %v11393_v17 }
 0x6bb   :  { %v11395_v7 = vpop.permute.xlu0 %4231  ;;  %v11397_v26 = vpop.permute.xlu1 %4225 }
 0x6bc   :  { %14925 = vst [vmem:[#allocation196_spill] sm:$0xff] %v11395_v7  ;;  %14926 = vst [vmem:[#allocation197_spill] sm:$0xff] %v11397_v26 }
 0x6bf   :  { %v11399_v21 = vpop.permute.xlu0 %4235  ;;  %v11401_v41 = vpop.permute.xlu1 %4229 }
 0x6c0   :  { %14927 = vst [vmem:[#allocation198_spill] sm:$0xff] %v11399_v21  ;;  %14928 = vst [vmem:[#allocation199_spill] sm:$0xff] %v11401_v41 }
 0x6c3   :  { %v11403_v25 = vpop.permute.xlu1 %4233  ;;  %v11405_v53 = vpop.permute.xlu0 %4239 }
 0x6c4   :  { %14929 = vst [vmem:[#allocation200_spill] sm:$0xff] %v11403_v25  ;;  %14930 = vst [vmem:[#allocation201_spill] sm:$0xff] %v11405_v53 }
 0x6c7   :  { %v11407_v33 = vpop.permute.xlu1 %4237  ;;  %v11409_v9 = vpop.permute.xlu0 %4243 }
 0x6c8   :  { %14931 = vst [vmem:[#allocation202_spill] sm:$0xff] %v11407_v33  ;;  %14932 = vst [vmem:[#allocation203_spill] sm:$0xff] %v11409_v9 }
 0x6cb   :  { %v11411_v13 = vpop.permute.xlu1 %4241  ;;  %v11413_v62 = vpop.permute.xlu0 %4247 }
 0x6cc   :  { %14933 = vst [vmem:[#allocation204_spill] sm:$0xff] %v11411_v13  ;;  %14934 = vst [vmem:[#allocation205_spill] sm:$0xff] %v11413_v62 }
 0x6cf   :  { %v11415_v17 = vpop.permute.xlu1 %4245  ;;  %v11417_v7 = vpop.permute.xlu0 %4251 }
 0x6d0   :  { %14935 = vst [vmem:[#allocation206_spill] sm:$0xff] %v11415_v17  ;;  %14936 = vst [vmem:[#allocation207_spill] sm:$0xff] %v11417_v7 }
 0x6d3   :  { %v11419_v26 = vpop.permute.xlu1 %4249  ;;  %v11421_v21 = vpop.permute.xlu0 %4255 }
 0x6d4   :  { %14937 = vst [vmem:[#allocation208_spill] sm:$0xff] %v11419_v26  ;;  %14938 = vst [vmem:[#allocation209_spill] sm:$0xff] %v11421_v21  ;;  %v11828_v26 = vld [vmem:[#allocation3 + $0x58] sm:$0xff] }
 0x6d7   :  { %v11423_v41 = vpop.permute.xlu1 %4253  ;;  %v11425_v25 = vpop.permute.xlu0 %4259 }
 0x6d8   :  { %14939 = vst [vmem:[#allocation210_spill] sm:$0xff] %v11423_v41  ;;  %14940 = vst [vmem:[#allocation211_spill] sm:$0xff] %v11425_v25 }
 0x6db   :  { %v11427_v53 = vpop.permute.xlu1 %4257  ;;  %v11429_v33 = vpop.permute.xlu0 %4263 }
 0x6dc   :  { %14941 = vst [vmem:[#allocation212_spill] sm:$0xff] %v11427_v53  ;;  %14942 = vst [vmem:[#allocation213_spill] sm:$0xff] %v11429_v33 }
 0x6df   :  { %v11431_v9 = vpop.permute.xlu1 %4261 }
 0x6e0   :  { %14943 = vst [vmem:[#allocation214_spill] sm:$0xff] %v11431_v9 }
 0x6ec   :  { %v11433_v13 = vpop.permute.xlu0 %4405 }
 0x6ed   :  { %v4419_v62 = vmul.f32 %v11433_v13, %v10967_v31  ;;  %v4423_v31 = vmul.f32 %v11433_v13, %v10988_v24 }
 0x6ef   :  { %4548 = vrot.lane.b32.xlu0 %v4419_v62, %s8532_s21 }
 0x6f0   :  { %v11438_v17 = vpop.permute.xlu0 %4415  ;;  %v11440_v21 = vpop.permute.xlu1 %4400 }
 0x6f1   :  { %v4421_v41 = vmul.f32 %v11438_v17, %v10976_v6  ;;  %v4418_v25 = vmul.f32 %v11440_v21, %v10978_v40  ;;  %v4425_v6 = vmul.f32 %v11438_v17, %v10998_v28  ;;  %v4427_v40 = vmul.f32 %v11433_v13, %v11008_v18 }
 0x6f2   :  { %v4429_v28 = vmul.f32 %v11438_v17, %v11018_v19  ;;  %v4426_v24 = vmul.f32 %v11440_v21, %v11020_v54  ;;  %v4431_v18 = vmul.f32 %v11433_v13, %v11028_v29  ;;  %v4433_v19 = vmul.f32 %v11438_v17, %v11038_v20 }
 0x6f3   :  { %4552 = vrot.lane.b32.xlu0 %v4421_v41, %s8532_s21  ;;  %4546 = vrot.lane.b32.xlu1 %v4418_v25, %s8532_s21  ;;  %v4422_v41 = vmul.f32 %v11440_v21, %v11000_v10  ;;  %v4430_v54 = vmul.f32 %v11440_v21, %v11040_v23  ;;  %v4435_v29 = vmul.f32 %v11433_v13, %v11048_v57  ;;  %v14944_v10 = vld [vmem:[#allocation140_spill] sm:$0xff]  ;;  %v14945_v25 = vld [vmem:[#allocation141_spill] sm:$0xff] }
 0x6f4   :  { %v11448_v33 = vpop.permute.xlu1 %4410  ;;  %v4437_v20 = vmul.f32 %v11438_v17, %v11058_v22  ;;  %v4434_v23 = vmul.f32 %v11440_v21, %v11060_v11  ;;  %v4439_v57 = vmul.f32 %v11433_v13, %v11068_v48  ;;  %v4441_v22 = vmul.f32 %v11438_v17, %v11078_v0 }
 0x6f5   :  { %v4420_v62 = vmul.f32 %v11448_v33, %v10990_v55  ;;  %v4424_v55 = vmul.f32 %v11448_v33, %v11010_v38  ;;  %v4428_v38 = vmul.f32 %v11448_v33, %v11030_v47  ;;  %v4432_v47 = vmul.f32 %v11448_v33, %v11050_v15 }
 0x6f6   :  { %v4436_v15 = vmul.f32 %v11448_v33, %v11070_v2  ;;  %v4438_v11 = vmul.f32 %v11440_v21, %v11080_v5  ;;  %v4443_v48 = vmul.f32 %v11433_v13, %v11088_v52  ;;  %v4440_v2 = vmul.f32 %v11448_v33, %v11090_v35 }
 0x6f7   :  { %4556 = vrot.lane.b32.xlu0 %v4423_v31, %s8532_s21  ;;  %4550 = vrot.lane.b32.xlu1 %v4420_v62, %s8532_s21  ;;  %v4445_v0 = vmul.f32 %v11438_v17, %v11098_v44  ;;  %v4442_v5 = vmul.f32 %v11440_v21, %v11100_v32  ;;  %v4447_v52 = vmul.f32 %v11433_v13, %v11108_v27  ;;  %v14946_v31 = vld [vmem:[#allocation142_spill] sm:$0xff]  ;;  %v14947_v62 = vld [vmem:[#allocation143_spill] sm:$0xff] }
 0x6f8   :  { %v4444_v35 = vmul.f32 %v11448_v33, %v11110_v14  ;;  %v4449_v44 = vmul.f32 %v11438_v17, %v11118_v4  ;;  %v4446_v32 = vmul.f32 %v11440_v21, %v11120_v45  ;;  %v4451_v27 = vmul.f32 %v11433_v13, %v11128_v30 }
 0x6f9   :  { %v4448_v14 = vmul.f32 %v11448_v33, %v11130_v60  ;;  %v4453_v4 = vmul.f32 %v11438_v17, %v11138_v56  ;;  %v4450_v45 = vmul.f32 %v11440_v21, %v11140_v50  ;;  %v4455_v30 = vmul.f32 %v11433_v13, %v11148_v46 }
 0x6fa   :  { %v4452_v60 = vmul.f32 %v11448_v33, %v11150_v39  ;;  %v4457_v56 = vmul.f32 %v11438_v17, %v11158_v36  ;;  %v4454_v50 = vmul.f32 %v11440_v21, %v11160_v8  ;;  %v4459_v46 = vmul.f32 %v11433_v13, %v11168_v49 }
 0x6fb   :  { %4560 = vrot.lane.b32.xlu0 %v4425_v6, %s8532_s21  ;;  %4554 = vrot.lane.b32.xlu1 %v4422_v41, %s8532_s21  ;;  %v4456_v39 = vmul.f32 %v11448_v33, %v11170_v51  ;;  %v4461_v36 = vmul.f32 %v11438_v17, %v11178_v63  ;;  %v4458_v8 = vmul.f32 %v11440_v21, %v11180_v59  ;;  %v14948_v6 = vld [vmem:[#allocation144_spill] sm:$0xff] }
 0x6fc   :  { %v4463_v49 = vmul.f32 %v11433_v13, %v11188_v1  ;;  %v4460_v51 = vmul.f32 %v11448_v33, %v11190_v12  ;;  %v4465_v63 = vmul.f32 %v11438_v17, %v11198_v16  ;;  %v4462_v59 = vmul.f32 %v11440_v21, %v11200_v3 }
 0x6fd   :  { %v4467_v1 = vmul.f32 %v11433_v13, %v11208_v58  ;;  %v4464_v12 = vmul.f32 %v11448_v33, %v11210_v43  ;;  %v4469_v16 = vmul.f32 %v11438_v17, %v11218_v37  ;;  %v4466_v3 = vmul.f32 %v11440_v21, %v14944_v10 }
 0x6fe   :  { %v4471_v58 = vmul.f32 %v11433_v13, %v14945_v25  ;;  %v4468_v43 = vmul.f32 %v11448_v33, %v14946_v31  ;;  %v4473_v37 = vmul.f32 %v11438_v17, %v14947_v62  ;;  %v4470_v41 = vmul.f32 %v11440_v21, %v14948_v6 }
 0x6ff   :  { %4564 = vrot.lane.b32.xlu0 %v4427_v40, %s8532_s21  ;;  %4558 = vrot.lane.b32.xlu1 %v4424_v55, %s8532_s21  ;;  %v14949_v40 = vld [vmem:[#allocation145_spill] sm:$0xff] }
 0x700   :  { %v4475_v55 = vmul.f32 %v11433_v13, %v14949_v40 }
 0x703   :  { %4568 = vrot.lane.b32.xlu0 %v4429_v28, %s8532_s21  ;;  %4562 = vrot.lane.b32.xlu1 %v4426_v24, %s8532_s21  ;;  %v14950_v28 = vld [vmem:[#allocation146_spill] sm:$0xff] }
 0x704   :  { %v4472_v24 = vmul.f32 %v11448_v33, %v14950_v28 }
 0x707   :  { %4572 = vrot.lane.b32.xlu0 %v4431_v18, %s8532_s21  ;;  %4566 = vrot.lane.b32.xlu1 %v4428_v38, %s8532_s21  ;;  %v14952_v38 = vld [vmem:[#allocation147_spill] sm:$0xff] }
 0x70b   :  { %4576 = vrot.lane.b32.xlu0 %v4433_v19, %s8532_s21  ;;  %4570 = vrot.lane.b32.xlu1 %v4430_v54, %s8532_s21  ;;  %v4477_v19 = vmul.f32 %v11438_v17, %v14952_v38  ;;  %v14953_v54 = vld [vmem:[#allocation148_spill] sm:$0xff] }
 0x70f   :  { %4580 = vrot.lane.b32.xlu0 %v4435_v29, %s8532_s21  ;;  %4574 = vrot.lane.b32.xlu1 %v4432_v47, %s8532_s21  ;;  %v4474_v29 = vmul.f32 %v11440_v21, %v14953_v54 }
 0x713   :  { %4584 = vrot.lane.b32.xlu0 %v4437_v20, %s8532_s21  ;;  %4578 = vrot.lane.b32.xlu1 %v4434_v23, %s8532_s21  ;;  %v4479_v23 = vmul.f32 %v11433_v13, %v11270_v61  ;;  %v7653_v61 = vld [vmem:[%s14610_s4 + $0xc8] sm:$0xff] }
 0x717   :  { %4588 = vrot.lane.b32.xlu0 %v4439_v57, %s8532_s21  ;;  %4582 = vrot.lane.b32.xlu1 %v4436_v15, %s8532_s21  ;;  %v4476_v57 = vmul.f32 %v11448_v33, %v11272_v34 }
 0x71b   :  { %4592 = vrot.lane.b32.xlu0 %v4441_v22, %s8532_s21  ;;  %4586 = vrot.lane.b32.xlu1 %v4438_v11, %s8532_s21  ;;  %v4481_v11 = vmul.f32 %v11438_v17, %v11284_v42  ;;  %v7656_v17 = vld [vmem:[%s14610_s4 + $0xe0] sm:$0xff] }
 0x71c   :  { %v7652_v42 = vld [vmem:[%s14610_s4 + $0xc0] sm:$0xff] }
 0x71f   :  { %4596 = vrot.lane.b32.xlu0 %v4443_v48, %s8532_s21  ;;  %4590 = vrot.lane.b32.xlu1 %v4440_v2, %s8532_s21  ;;  %v14958_v48 = vld [vmem:[#allocation152_spill] sm:$0xff] }
 0x720   :  { %v4478_v2 = vmul.f32 %v11440_v21, %v14958_v48 }
 0x723   :  { %4600 = vrot.lane.b32.xlu0 %v4445_v0, %s8532_s21  ;;  %4594 = vrot.lane.b32.xlu1 %v4442_v5, %s8532_s21  ;;  %v14961_v0 = vld [vmem:[#allocation155_spill] sm:$0xff] }
 0x724   :  { %v4480_v5 = vmul.f32 %v11448_v33, %v14961_v0  ;;  %v7660_v33 = vld [vmem:[%s14610_s4 + $0x100] sm:$0xff] }
 0x727   :  { %4604 = vrot.lane.b32.xlu0 %v4447_v52, %s8532_s21  ;;  %4598 = vrot.lane.b32.xlu1 %v4444_v35, %s8532_s21  ;;  %v7654_v35 = vld [vmem:[%s14610_s4 + $0xd0] sm:$0xff] }
 0x72b   :  { %4608 = vrot.lane.b32.xlu0 %v4449_v44, %s8532_s21  ;;  %4602 = vrot.lane.b32.xlu1 %v4446_v32, %s8532_s21 }
 0x72f   :  { %4612 = vrot.lane.b32.xlu0 %v4451_v27, %s8532_s21  ;;  %4606 = vrot.lane.b32.xlu1 %v4448_v14, %s8532_s21  ;;  %v7661_v27 = vld [vmem:[%s14610_s4 + $0x108] sm:$0xff] }
 0x730   :  { %v7657_v14 = vld [vmem:[%s14610_s4 + $0xe8] sm:$0xff] }
 0x733   :  { %4616 = vrot.lane.b32.xlu0 %v4453_v4, %s8532_s21  ;;  %4610 = vrot.lane.b32.xlu1 %v4450_v45, %s8532_s21 }
 0x737   :  { %4620 = vrot.lane.b32.xlu0 %v4455_v30, %s8532_s21  ;;  %4614 = vrot.lane.b32.xlu1 %v4452_v60, %s8532_s21  ;;  %v7662_v30 = vld [vmem:[%s14610_s4 + $0x110] sm:$0xff] }
 0x738   :  { %v7658_v60 = vld [vmem:[%s14610_s4 + $0xf0] sm:$0xff] }
 0x73b   :  { %4624 = vrot.lane.b32.xlu0 %v4457_v56, %s8532_s21  ;;  %4618 = vrot.lane.b32.xlu1 %v4454_v50, %s8532_s21 }
 0x73f   :  { %4628 = vrot.lane.b32.xlu0 %v4459_v46, %s8532_s21  ;;  %4622 = vrot.lane.b32.xlu1 %v4456_v39, %s8532_s21  ;;  %v7655_v46 = vld [vmem:[%s14610_s4 + $0xd8] sm:$0xff] }
 0x740   :  { %v7659_v39 = vld [vmem:[%s14610_s4 + $0xf8] sm:$0xff] }
 0x743   :  { %4632 = vrot.lane.b32.xlu0 %v4461_v36, %s8532_s21  ;;  %4626 = vrot.lane.b32.xlu1 %v4458_v8, %s8532_s21 }
 0x747   :  { %4636 = vrot.lane.b32.xlu0 %v4463_v49, %s8532_s21  ;;  %4630 = vrot.lane.b32.xlu1 %v4460_v51, %s8532_s21  ;;  %v7663_v49 = vld [vmem:[%s14610_s4 + $0x118] sm:$0xff]  ;;  %s8535_s4 = smov 48  }
 0x74b   :  { %4640 = vrot.lane.b32.xlu0 %v4465_v63, %s8532_s21  ;;  %4634 = vrot.lane.b32.xlu1 %v4462_v59, %s8532_s21 }
 0x74f   :  { %4644 = vrot.lane.b32.xlu0 %v4467_v1, %s8532_s21  ;;  %4638 = vrot.lane.b32.xlu1 %v4464_v12, %s8532_s21 }
 0x753   :  { %4648 = vrot.lane.b32.xlu0 %v4469_v16, %s8532_s21  ;;  %4642 = vrot.lane.b32.xlu1 %v4466_v3, %s8532_s21 }
 0x757   :  { %4652 = vrot.lane.b32.xlu0 %v4471_v58, %s8532_s21  ;;  %4646 = vrot.lane.b32.xlu1 %v4468_v43, %s8532_s21 }
 0x75b   :  { %4656 = vrot.lane.b32.xlu0 %v4473_v37, %s8532_s21  ;;  %4650 = vrot.lane.b32.xlu1 %v4470_v41, %s8532_s21 }
 0x75f   :  { %4660 = vrot.lane.b32.xlu0 %v4475_v55, %s8532_s21  ;;  %4654 = vrot.lane.b32.xlu1 %v4472_v24, %s8532_s21 }
 0x761   :  { %v11612_v18 = vpop.permute.xlu0 %4548 }
 0x762   :  { %14951 = vst [vmem:[#allocation140_spill] sm:$0xff] %v11612_v18  ;;  %v8366_v18 = vld [vmem:[#allocation3 + $0xf8] sm:$0xff] }
 0x763   :  { %4664 = vrot.lane.b32.xlu0 %v4477_v19, %s8532_s21  ;;  %4658 = vrot.lane.b32.xlu1 %v4474_v29, %s8532_s21 }
 0x765   :  { %v11620_v47 = vpop.permute.xlu0 %4552  ;;  %v11622_v20 = vpop.permute.xlu1 %4546 }
 0x766   :  { %14954 = vst [vmem:[#allocation141_spill] sm:$0xff] %v11620_v47  ;;  %14955 = vst [vmem:[#allocation142_spill] sm:$0xff] %v11622_v20  ;;  %v8355_v47 = vld [vmem:[#allocation3 + $0x28] sm:$0xff] }
 0x767   :  { %4668 = vrot.lane.b32.xlu0 %v4479_v23, %s8532_s21  ;;  %4662 = vrot.lane.b32.xlu1 %v4476_v57, %s8532_s21  ;;  %v8375_v20 = vld [vmem:[#allocation3 + $0x148] sm:$0xff] }
 0x769   :  { %v11630_v15 = vpop.permute.xlu0 %4556  ;;  %v11632_v22 = vpop.permute.xlu1 %4550 }
 0x76a   :  { %14956 = vst [vmem:[#allocation143_spill] sm:$0xff] %v11630_v15  ;;  %14957 = vst [vmem:[#allocation144_spill] sm:$0xff] %v11632_v22  ;;  %v8362_v22 = vld [vmem:[#allocation3 + $0x98] sm:$0xff] }
 0x76b   :  { %4672 = vrot.lane.b32.xlu0 %v4481_v11, %s8532_s21  ;;  %4666 = vrot.lane.b32.xlu1 %v4478_v2, %s8532_s21  ;;  %v15044_v15 = vld [vmem:[#allocation7_spill] sm:$0xff] }
 0x76d   :  { %v11643_v34 = vpop.permute.xlu0 %4560  ;;  %v11645_v13 = vpop.permute.xlu1 %4554 }
 0x76e   :  { %14959 = vst [vmem:[#allocation145_spill] sm:$0xff] %v11643_v34  ;;  %14960 = vst [vmem:[#allocation146_spill] sm:$0xff] %v11645_v13  ;;  %v8354_v34 = vld [vmem:[#allocation3 + $0x68] sm:$0xff]  ;;  %v8373_v13 = vld [vmem:[#allocation3 + $0xf0] sm:$0xff] }
 0x76f   :  { %4879 = vperm.xlu0 %7834, %v7653_v61   ;;  %4670 = vrot.lane.b32.xlu1 %v4480_v5, %s8532_s21 }
 0x771   :  { %v11656_v21 = vpop.permute.xlu0 %4564  ;;  %v11658_v52 = vpop.permute.xlu1 %4558 }
 0x772   :  { %14962 = vst [vmem:[#allocation147_spill] sm:$0xff] %v11656_v21  ;;  %14963 = vst [vmem:[#allocation148_spill] sm:$0xff] %v11658_v52  ;;  %v8360_v52 = vld [vmem:[#allocation3 + $0x38] sm:$0xff]  ;;  %v8365_v21 = vld [vmem:[#allocation3 + $0x10] sm:$0xff] }
 0x773   :  { %5027 = vperm.xlu0 %7834, %v7656_v17   ;;  %4874 = vperm.xlu1 %7835, %v7652_v42  }
 0x775   :  { %v11666_v44 = vpop.permute.xlu0 %4568  ;;  %v11668_v32 = vpop.permute.xlu1 %4562 }
 0x776   :  { %14964 = vst [vmem:[#allocation152_spill] sm:$0xff] %v11666_v44  ;;  %14965 = vst [vmem:[#allocation155_spill] sm:$0xff] %v11668_v32 }
 0x777   :  { %5436 = vperm.xlu0 %7834, %v7660_v33   ;;  %4884 = vperm.xlu1 %7835, %v7654_v35  }
 0x779   :  { %v11676_v4 = vpop.permute.xlu0 %4572  ;;  %v11678_v45 = vpop.permute.xlu1 %4566 }
 0x77a   :  { %14966 = vst [vmem:[#allocation215_spill] sm:$0xff] %v11676_v4  ;;  %14967 = vst [vmem:[#allocation216_spill] sm:$0xff] %v11678_v45  ;;  %v8358_v45 = vld [vmem:[#allocation3 + $0x78] sm:$0xff]  ;;  %v12065_v4 = vld [vmem:[#allocation3 + $0x108] sm:$0xff] }
 0x77b   :  { %5441 = vperm.xlu0 %7834, %v7661_v27   ;;  %5032 = vperm.xlu1 %7835, %v7657_v14  }
 0x77d   :  { %v11686_v56 = vpop.permute.xlu0 %4576  ;;  %v11688_v50 = vpop.permute.xlu1 %4570 }
 0x77e   :  { %14968 = vst [vmem:[#allocation217_spill] sm:$0xff] %v11686_v56  ;;  %14969 = vst [vmem:[#allocation218_spill] sm:$0xff] %v11688_v50  ;;  %v15043_v56 = vld [vmem:[#allocation5_spill] sm:$0xff] }
 0x77f   :  { %5446 = vperm.xlu0 %7834, %v7662_v30   ;;  %5037 = vperm.xlu1 %7835, %v7658_v60  }
 0x781   :  { %v11696_v36 = vpop.permute.xlu0 %4580  ;;  %v11698_v8 = vpop.permute.xlu1 %4574 }
 0x782   :  { %14970 = vst [vmem:[#allocation219_spill] sm:$0xff] %v11696_v36  ;;  %14971 = vst [vmem:[#allocation220_spill] sm:$0xff] %v11698_v8  ;;  %v12019_v36 = vld [vmem:[#allocation3 + $0xe8] sm:$0xff] }
 0x783   :  { %4889 = vperm.xlu0 %7834, %v7655_v46   ;;  %5042 = vperm.xlu1 %7835, %v7659_v39  }
 0x785   :  { %v11703_v51 = vpop.permute.xlu0 %4584  ;;  %v11705_v63 = vpop.permute.xlu1 %4578 }
 0x786   :  { %14972 = vst [vmem:[#allocation221_spill] sm:$0xff] %v11703_v51  ;;  %14973 = vst [vmem:[#allocation222_spill] sm:$0xff] %v11705_v63  ;;  %v8341_v51 = vld [vmem:[#allocation3 + $0xe0] sm:$0xff] }
 0x787   :  { %5451 = vperm.xlu1 %7835, %v7663_v49  }
 0x789   :  { %v11707_v59 = vpop.permute.xlu0 %4588  ;;  %v11709_v1 = vpop.permute.xlu1 %4582 }
 0x78a   :  { %14974 = vst [vmem:[#allocation223_spill] sm:$0xff] %v11707_v59  ;;  %14975 = vst [vmem:[#allocation224_spill] sm:$0xff] %v11709_v1  ;;  %v8345_v1 = vld [vmem:[#allocation3 + $0x160] sm:$0xff] }
 0x78b   :  { %v8349_v59 = vld [vmem:[#allocation3 + $0x1e0] sm:$0xff] }
 0x78d   :  { %v11711_v12 = vpop.permute.xlu0 %4592  ;;  %v11713_v16 = vpop.permute.xlu1 %4586 }
 0x78e   :  { %14976 = vst [vmem:[#allocation225_spill] sm:$0xff] %v11711_v12  ;;  %14977 = vst [vmem:[#allocation226_spill] sm:$0xff] %v11713_v16  ;;  %v15042_v16 = vld [vmem:[#allocation6_spill] sm:$0xff] }
 0x791   :  { %v11715_v10 = vpop.permute.xlu0 %4596  ;;  %v11717_v3 = vpop.permute.xlu1 %4590 }
 0x792   :  { %14978 = vst [vmem:[#allocation227_spill] sm:$0xff] %v11715_v10  ;;  %14979 = vst [vmem:[#allocation228_spill] sm:$0xff] %v11717_v3  ;;  %v8344_v3 = vld [vmem:[#allocation3 + $0x140] sm:$0xff] }
 0x793   :  { %v8348_v10 = vld [vmem:[#allocation3 + $0x1c0] sm:$0xff] }
 0x795   :  { %v11719_v25 = vpop.permute.xlu0 %4600  ;;  %v11721_v58 = vpop.permute.xlu1 %4594 }
 0x796   :  { %14980 = vst [vmem:[#allocation229_spill] sm:$0xff] %v11719_v25  ;;  %14981 = vst [vmem:[#allocation230_spill] sm:$0xff] %v11721_v58  ;;  %v8352_v58 = vld [vmem:[#allocation3 + $0x8] sm:$0xff] }
 0x797   :  { %v12031_v63 = vmul.f32 %v8352_v58, %v15042_v16 }
 0x799   :  { %v11723_v31 = vpop.permute.xlu0 %4604  ;;  %v11725_v43 = vpop.permute.xlu1 %4598 }
 0x79a   :  { %14982 = vst [vmem:[#allocation231_spill] sm:$0xff] %v11723_v31  ;;  %14983 = vst [vmem:[#allocation232_spill] sm:$0xff] %v11725_v43  ;;  %v8347_v31 = vld [vmem:[#allocation3 + $0x1a0] sm:$0xff] }
 0x79d   :  { %v11727_v62 = vpop.permute.xlu0 %4608  ;;  %v11729_v37 = vpop.permute.xlu1 %4602 }
 0x79e   :  { %14984 = vst [vmem:[#allocation233_spill] sm:$0xff] %v11727_v62  ;;  %14985 = vst [vmem:[#allocation234_spill] sm:$0xff] %v11729_v37 }
 0x7a1   :  { %v11731_v6 = vpop.permute.xlu0 %4612  ;;  %v11733_v41 = vpop.permute.xlu1 %4606 }
 0x7a2   :  { %14986 = vst [vmem:[#allocation235_spill] sm:$0xff] %v11731_v6  ;;  %14987 = vst [vmem:[#allocation236_spill] sm:$0xff] %v11733_v41  ;;  %v8342_v41 = vld [vmem:[#allocation3 + $0xa0] sm:$0xff] }
 0x7a5   :  { %v11735_v40 = vpop.permute.xlu0 %4616  ;;  %v11737_v55 = vpop.permute.xlu1 %4610 }
 0x7a6   :  { %14988 = vst [vmem:[#allocation237_spill] sm:$0xff] %v11735_v40  ;;  %14989 = vst [vmem:[#allocation238_spill] sm:$0xff] %v11737_v55  ;;  %v11848_v40 = vld [vmem:[#allocation3 + $0x78] sm:$0xff]  ;;  %v8337_v55 = vld [vmem:[#allocation3 + $0x60] sm:$0xff] }
 0x7a9   :  { %v11739_v28 = vpop.permute.xlu0 %4620  ;;  %v11741_v24 = vpop.permute.xlu1 %4614 }
 0x7aa   :  { %14990 = vst [vmem:[#allocation239_spill] sm:$0xff] %v11739_v28  ;;  %14991 = vst [vmem:[#allocation240_spill] sm:$0xff] %v11741_v24  ;;  %v11862_v24 = vld [vmem:[#allocation3 + $0x98] sm:$0xff] }
 0x7ad   :  { %v11743_v38 = vpop.permute.xlu0 %4624  ;;  %v11745_v19 = vpop.permute.xlu1 %4618 }
 0x7ae   :  { %14992 = vst [vmem:[#allocation241_spill] sm:$0xff] %v11743_v38  ;;  %14993 = vst [vmem:[#allocation242_spill] sm:$0xff] %v11745_v19  ;;  %v11846_v38 = vld [vmem:[#allocation3 + $0x80] sm:$0xff] }
 0x7af   :  { %15029 = vst [vmem:[#allocation278_spill] sm:$0xff] %v11846_v38 }
 0x7b1   :  { %v11747_v54 = vpop.permute.xlu0 %4628  ;;  %v11749_v29 = vpop.permute.xlu1 %4622 }
 0x7b2   :  { %14994 = vst [vmem:[#allocation243_spill] sm:$0xff] %v11747_v54  ;;  %14995 = vst [vmem:[#allocation244_spill] sm:$0xff] %v11749_v29  ;;  %v11860_v29 = vld [vmem:[#allocation3 + $0xa0] sm:$0xff] }
 0x7b3   :  { %15030 = vst [vmem:[#allocation279_spill] sm:$0xff] %v11860_v29 }
 0x7b5   :  { %v11751_v23 = vpop.permute.xlu0 %4632  ;;  %v11753_v57 = vpop.permute.xlu1 %4626 }
 0x7b6   :  { %14996 = vst [vmem:[#allocation245_spill] sm:$0xff] %v11751_v23  ;;  %14997 = vst [vmem:[#allocation246_spill] sm:$0xff] %v11753_v57 }
 0x7b9   :  { %v11755_v11 = vpop.permute.xlu0 %4636  ;;  %v11757_v48 = vpop.permute.xlu1 %4630 }
 0x7ba   :  { %14998 = vst [vmem:[#allocation247_spill] sm:$0xff] %v11755_v11  ;;  %14999 = vst [vmem:[#allocation248_spill] sm:$0xff] %v11757_v48  ;;  %v4812_v48 = vld [vmem:[#allocation3 + $0x88] sm:$0xff] }
 0x7bd   :  { %v11759_v2 = vpop.permute.xlu0 %4640  ;;  %v11761_v61 = vpop.permute.xlu1 %4634 }
 0x7be   :  { %15000 = vst [vmem:[#allocation249_spill] sm:$0xff] %v11759_v2  ;;  %15001 = vst [vmem:[#allocation250_spill] sm:$0xff] %v11761_v61  ;;  %v11838_v2 = vld [vmem:[#allocation3 + $0x68] sm:$0xff] }
 0x7bf   :  { %15028 = vst [vmem:[#allocation277_spill] sm:$0xff] %v11838_v2 }
 0x7c1   :  { %v11763_v0 = vpop.permute.xlu0 %4644  ;;  %v11765_v5 = vpop.permute.xlu1 %4638 }
 0x7c2   :  { %15002 = vst [vmem:[#allocation251_spill] sm:$0xff] %v11763_v0  ;;  %15003 = vst [vmem:[#allocation252_spill] sm:$0xff] %v11765_v5  ;;  %v4813_v5 = vld [vmem:[#allocation3 + $0x90] sm:$0xff] }
 0x7c5   :  { %v11767_v17 = vpop.permute.xlu1 %4642  ;;  %v11769_v42 = vpop.permute.xlu0 %4648 }
 0x7c6   :  { %15004 = vst [vmem:[#allocation253_spill] sm:$0xff] %v11767_v17  ;;  %15005 = vst [vmem:[#allocation254_spill] sm:$0xff] %v11769_v42  ;;  %v11836_v17 = vld [vmem:[#allocation3 + $0x70] sm:$0xff] }
 0x7c9   :  { %v11771_v33 = vpop.permute.xlu1 %4646  ;;  %v11773_v35 = vpop.permute.xlu0 %4652 }
 0x7ca   :  { %15006 = vst [vmem:[#allocation255_spill] sm:$0xff] %v11771_v33  ;;  %15007 = vst [vmem:[#allocation256_spill] sm:$0xff] %v11773_v35 }
 0x7cd   :  { %v11775_v27 = vpop.permute.xlu1 %4650  ;;  %v11777_v14 = vpop.permute.xlu0 %4656 }
 0x7ce   :  { %15008 = vst [vmem:[#allocation257_spill] sm:$0xff] %v11775_v27  ;;  %15009 = vst [vmem:[#allocation258_spill] sm:$0xff] %v11777_v14 }
 0x7d1   :  { %v11779_v30 = vpop.permute.xlu1 %4654  ;;  %v11781_v60 = vpop.permute.xlu0 %4660 }
 0x7d2   :  { %15010 = vst [vmem:[#allocation259_spill] sm:$0xff] %v11779_v30  ;;  %15011 = vst [vmem:[#allocation260_spill] sm:$0xff] %v11781_v60  ;;  %v11803_v60 = vld [vmem:[#allocation3 + $0x40] sm:$0xff] }
 0x7d3   :  { %15022 = vst [vmem:[#allocation271_spill] sm:$0xff] %v11803_v60 }
 0x7d5   :  { %v11783_v46 = vpop.permute.xlu1 %4658  ;;  %v11785_v39 = vpop.permute.xlu0 %4664 }
 0x7d6   :  { %15012 = vst [vmem:[#allocation261_spill] sm:$0xff] %v11783_v46  ;;  %15013 = vst [vmem:[#allocation262_spill] sm:$0xff] %v11785_v39  ;;  %v11826_v46 = vld [vmem:[#allocation3 + $0x60] sm:$0xff] }
 0x7d7   :  { %15027 = vst [vmem:[#allocation276_spill] sm:$0xff] %v11826_v46 }
 0x7d9   :  { %v11787_v49 = vpop.permute.xlu1 %4662  ;;  %v11789_v9 = vpop.permute.xlu0 %4668 }
 0x7da   :  { %15014 = vst [vmem:[#allocation263_spill] sm:$0xff] %v11787_v49  ;;  %15015 = vst [vmem:[#allocation264_spill] sm:$0xff] %v11789_v9 }
 0x7dd   :  { %v11791_v42 = vpop.permute.xlu1 %4666  ;;  %v11793_v33 = vpop.permute.xlu0 %4672 }
 0x7de   :  { %15016 = vst [vmem:[#allocation265_spill] sm:$0xff] %v11791_v42  ;;  %15017 = vst [vmem:[#allocation266_spill] sm:$0xff] %v11793_v33  ;;  %v11812_v33 = vld [vmem:[#allocation3 + $0x48] sm:$0xff]  ;;  %v11819_v42 = vld [vmem:[#allocation3 + $0x50] sm:$0xff] }
 0x7e1   :  { %v11795_v7 = vpop.permute.xlu1 %4670 }
 0x7e2   :  { %15018 = vst [vmem:[#allocation267_spill] sm:$0xff] %v11795_v7 }
 0x7ee   :  { %v11797_v35 = vpop.permute.xlu0 %4879 }
 0x7ef   :  { %15019 = vst [vmem:[#allocation268_spill] sm:$0xff] %v11797_v35 }
 0x7f2   :  { %v11799_v14 = vpop.permute.xlu0 %5027  ;;  %v11801_v30 = vpop.permute.xlu1 %4874 }
 0x7f3   :  { %15020 = vst [vmem:[#allocation269_spill] sm:$0xff] %v11799_v14  ;;  %15021 = vst [vmem:[#allocation270_spill] sm:$0xff] %v11801_v30  ;;  %v5045_v39 = vmul.f32 %v11799_v14, %v11803_v60  ;;  %v5049_v27 = vmul.f32 %v11799_v14, %v11826_v46  ;;  %v5057_v11 = vmul.f32 %v11799_v14, %v11860_v29  ;;  %v12112_v30 = vld [vmem:[#allocation3 + $0x128] sm:$0xff] }
 0x7f4   :  { %15045 = vst [vmem:[#allocation6_spill] sm:$0xff] %v12112_v30 }
 0x7f5   :  { %5173 = vrot.lane.b32.xlu1 %v5045_v39, %s8531_s15 }
 0x7f6   :  { %v11808_v49 = vpop.permute.xlu1 %4884  ;;  %v11882_v54 = vpop.permute.xlu0 %5436 }
 0x7f7   :  { %15023 = vst [vmem:[#allocation272_spill] sm:$0xff] %v11808_v49  ;;  %15031 = vst [vmem:[#allocation280_spill] sm:$0xff] %v11882_v54  ;;  %v5458_v6 = vmul.f32 %v11882_v54, %v11826_v46  ;;  %v8361_v49 = vld [vmem:[#allocation3 + $0xa8] sm:$0xff]  ;;  %v8374_v46 = vld [vmem:[#allocation3 + $0xb0] sm:$0xff] }
 0x7fa   :  { %v11810_v9 = vpop.permute.xlu1 %5032 }
 0x7fb   :  { %15024 = vst [vmem:[#allocation273_spill] sm:$0xff] %v11810_v9  ;;  %v5046_v7 = vmul.f32 %v11810_v9, %v11812_v33  ;;  %v5050_v23 = vmul.f32 %v11810_v9, %v11838_v2 }
 0x7fd   :  { %5175 = vrot.lane.b32.xlu0 %v5046_v7, %s8531_s15 }
 0x7fe   :  { %v11817_v0 = vpop.permute.xlu1 %5037 }
 0x7ff   :  { %15025 = vst [vmem:[#allocation274_spill] sm:$0xff] %v11817_v0  ;;  %v5047_v53 = vmul.f32 %v11817_v0, %v11819_v42 }
 0x801   :  { %5177 = vrot.lane.b32.xlu1 %v5047_v53, %s8531_s15  ;;  %v5051_v53 = vmul.f32 %v11817_v0, %v11836_v17 }
 0x802   :  { %v11824_v39 = vpop.permute.xlu1 %5042 }
 0x803   :  { %15026 = vst [vmem:[#allocation275_spill] sm:$0xff] %v11824_v39  ;;  %v5048_v7 = vmul.f32 %v11824_v39, %v11828_v26 }
 0x805   :  { %5181 = vrot.lane.b32.xlu1 %v5049_v27, %s8531_s15  ;;  %5179 = vrot.lane.b32.xlu0 %v5048_v7, %s8531_s15  ;;  %v5053_v27 = vmul.f32 %v11799_v14, %v11846_v38  ;;  %v5052_v7 = vmul.f32 %v11824_v39, %v11848_v40 }
 0x806   :  { %v11942_v19 = vpop.permute.xlu1 %5451 }
 0x807   :  { %15035 = vst [vmem:[#allocation284_spill] sm:$0xff] %v11942_v19 }
 0x809   :  { %5185 = vrot.lane.b32.xlu1 %v5051_v53, %s8531_s15  ;;  %5183 = vrot.lane.b32.xlu0 %v5050_v23, %s8531_s15  ;;  %v5055_v53 = vmul.f32 %v11817_v0, %v4813_v5  ;;  %v5054_v23 = vmul.f32 %v11810_v9, %v4812_v48 }
 0x80d   :  { %5189 = vrot.lane.b32.xlu1 %v5053_v27, %s8531_s15  ;;  %5187 = vrot.lane.b32.xlu0 %v5052_v7, %s8531_s15  ;;  %v5056_v27 = vmul.f32 %v11824_v39, %v11862_v24  ;;  %v5839_v7 = vld [vmem:[%s14611_s5 + $0x8] sm:$0xff] }
 0x811   :  { %5193 = vrot.lane.b32.xlu1 %v5055_v53, %s8531_s15  ;;  %5191 = vrot.lane.b32.xlu0 %v5054_v23, %s8531_s15  ;;  %v5838_v53 = vld [vmem:[%s14611_s5] sm:$0xff]  ;;  %v5840_v23 = vld [vmem:[%s14611_s5 + $0x10] sm:$0xff] }
 0x815   :  { %5197 = vrot.lane.b32.xlu1 %v5057_v11, %s8531_s15  ;;  %5195 = vrot.lane.b32.xlu0 %v5056_v27, %s8531_s15  ;;  %v5926_v11 = vld [vmem:[%s14612_s6] sm:$0xff]  ;;  %v5927_v27 = vld [vmem:[%s14612_s6 + $0x8] sm:$0xff] }
 0x819   :  { %5849 = vperm.xlu1 %7835, %v5839_v7   ;;  %5844 = vperm.xlu0 %7834, %v5838_v53   ;;  %v5454_v7 = vmul.f32 %v11882_v54, %v11803_v60  ;;  %v11890_v53 = vld [vmem:[#allocation3 + $0xa8] sm:$0xff] }
 0x81a   :  { %15032 = vst [vmem:[#allocation281_spill] sm:$0xff] %v11890_v53  ;;  %v5058_v28 = vmul.f32 %v11810_v9, %v11890_v53 }
 0x81d   :  { %5854 = vperm.xlu1 %7835, %v5840_v23   ;;  %5932 = vperm.xlu0 %7834, %v5926_v11   ;;  %v5466_v23 = vmul.f32 %v11882_v54, %v11860_v29  ;;  %v5462_v11 = vmul.f32 %v11882_v54, %v11846_v38  ;;  %v8370_v29 = vld [vmem:[#allocation3 + $0x30] sm:$0xff] }
 0x81e   :  { %v8371_v38 = vld [vmem:[#allocation3 + $0x90] sm:$0xff] }
 0x821   :  { %5582 = vrot.lane.b32.xlu1 %v5454_v7, %s8532_s21  ;;  %5937 = vperm.xlu0 %7834, %v5927_v27   ;;  %v5928_v27 = vld [vmem:[%s14612_s6 + $0x10] sm:$0xff]  ;;  %v11910_v7 = vpop.permute.xlu0 %5441 }
 0x822   :  { %15033 = vst [vmem:[#allocation282_spill] sm:$0xff] %v11910_v7  ;;  %v5463_v61 = vmul.f32 %v11910_v7, %v4812_v48 }
 0x825   :  { %5199 = vrot.lane.b32.xlu1 %v5058_v28, %s8531_s15  ;;  %5590 = vrot.lane.b32.xlu0 %v5458_v6, %s8532_s21  ;;  %v5841_v28 = vld [vmem:[%s14611_s5 + $0x18] sm:$0xff]  ;;  %v5459_v6 = vmul.f32 %v11910_v7, %v11838_v2  ;;  %v12081_v2 = vmul.f32 %v8366_v18, %v15043_v56  ;;  %v12096_v18 = vmul.f32 %v8371_v38, %v15044_v15 }
 0x826   :  { %v12110_v38 = vmul.f32 %v8375_v20, %v15042_v16 }
 0x829   :  { %5606 = vrot.lane.b32.xlu1 %v5466_v23, %s8532_s21  ;;  %5598 = vrot.lane.b32.xlu0 %v5462_v11, %s8532_s21  ;;  %v5455_v23 = vmul.f32 %v11910_v7, %v11812_v33  ;;  %v4817_v11 = vld [vmem:[#allocation3 + $0xb0] sm:$0xff]  ;;  %v5467_v33 = vmul.f32 %v11910_v7, %v11890_v53 }
 0x82a   :  { %v5059_v57 = vmul.f32 %v11817_v0, %v4817_v11 }
 0x82d   :  { %5942 = vperm.xlu1 %7835, %v5928_v27   ;;  %5859 = vperm.xlu0 %7834, %v5841_v28   ;;  %v5929_v27 = vld [vmem:[%s14612_s6 + $0x18] sm:$0xff]  ;;  %v11927_v28 = vpop.permute.xlu0 %5446 }
 0x82e   :  { %15034 = vst [vmem:[#allocation283_spill] sm:$0xff] %v11927_v28  ;;  %v5460_v48 = vmul.f32 %v11927_v28, %v11836_v17  ;;  %v5468_v17 = vmul.f32 %v11927_v28, %v4817_v11  ;;  %v5461_v11 = vmul.f32 %v11942_v19, %v11848_v40  ;;  %v8336_v40 = vld [vmem:[#allocation3] sm:$0xff] }
 0x831   :  { %5592 = vrot.lane.b32.xlu1 %v5459_v6, %s8532_s21  ;;  %5584 = vrot.lane.b32.xlu0 %v5455_v23, %s8532_s21  ;;  %v5464_v6 = vmul.f32 %v11927_v28, %v4813_v5 }
 0x835   :  { %5600 = vrot.lane.b32.xlu1 %v5463_v61, %s8532_s21  ;;  %5201 = vrot.lane.b32.xlu0 %v5059_v57, %s8531_s15  ;;  %v5456_v61 = vmul.f32 %v11927_v28, %v11819_v42  ;;  %v4818_v57 = vld [vmem:[#allocation3 + $0xb8] sm:$0xff]  ;;  %v11946_v42 = vld [vmem:[#allocation3 + $0xe0] sm:$0xff] }
 0x836   :  { %v5060_v23 = vmul.f32 %v11824_v39, %v4818_v57  ;;  %v5065_v5 = vmul.f32 %v11799_v14, %v11946_v42  ;;  %v8387_v39 = vld [vmem:[#allocation3 + $0x1c8] sm:$0xff] }
 0x839   :  { %5947 = vperm.xlu1 %7835, %v5929_v27   ;;  %5608 = vrot.lane.b32.xlu0 %v5467_v33, %s8532_s21  ;;  %v4819_v27 = vld [vmem:[#allocation3 + $0xc0] sm:$0xff] }
 0x83a   :  { %v5061_v33 = vmul.f32 %v11799_v14, %v4819_v27 }
 0x83d   :  { %5594 = vrot.lane.b32.xlu1 %v5460_v48, %s8532_s21  ;;  %5586 = vrot.lane.b32.xlu0 %v5456_v61, %s8532_s21  ;;  %v5457_v48 = vmul.f32 %v11942_v19, %v11828_v26  ;;  %v11954_v61 = vld [vmem:[#allocation3 + $0x100] sm:$0xff] }
 0x841   :  { %5602 = vrot.lane.b32.xlu1 %v5464_v6, %s8532_s21  ;;  %5203 = vrot.lane.b32.xlu0 %v5060_v23, %s8531_s15  ;;  %v5069_v6 = vmul.f32 %v11799_v14, %v11954_v61  ;;  %v11960_v23 = vld [vmem:[#allocation3 + $0x120] sm:$0xff] }
 0x842   :  { %v5073_v26 = vmul.f32 %v11799_v14, %v11960_v23  ;;  %v8379_v14 = vld [vmem:[#allocation3 + $0x150] sm:$0xff] }
 0x845   :  { %5205 = vrot.lane.b32.xlu1 %v5061_v33, %s8531_s15  ;;  %5610 = vrot.lane.b32.xlu0 %v5468_v17, %s8532_s21  ;;  %v5465_v33 = vmul.f32 %v11942_v19, %v11862_v24  ;;  %v15036_v17 = vld [vmem:[#allocation4_spill] sm:$0xff]  ;;  %v5469_v24 = vmul.f32 %v11942_v19, %v4818_v57  ;;  %v8378_v19 = vld [vmem:[#allocation3 + $0x168] sm:$0xff] }
 0x846   :  { %v8343_v57 = vld [vmem:[#allocation3 + $0xc0] sm:$0xff]  ;;  %v12125_v20 = vmul.f32 %v8378_v19, %v15042_v16 }
 0x847   :  { %v11997_v43 = vmul.f32 %v8343_v57, %v15036_v17  ;;  %v12011_v57 = vmul.f32 %v8347_v31, %v15036_v17  ;;  %v5066_v31 = vmul.f32 %v11810_v9, %v12019_v36 }
 0x849   :  { %5213 = vrot.lane.b32.xlu0 %v5065_v5, %s8531_s15  ;;  %5588 = vrot.lane.b32.xlu1 %v5457_v48, %s8532_s21  ;;  %v11971_v5 = vmul.f32 %v8336_v40, %v15036_v17  ;;  %v11973_v48 = vld [vmem:[#allocation3 + $0xc8] sm:$0xff]  ;;  %v8340_v40 = vld [vmem:[#allocation3 + $0x40] sm:$0xff]  ;;  %15037 = vst [vmem:[#allocation4_spill] sm:$0xff] %v12011_v57  ;;  %v8386_v57 = vld [vmem:[#allocation3 + $0x1b8] sm:$0xff] }
 0x84a   :  { %v11988_v12 = vmul.f32 %v8340_v40, %v15036_v17  ;;  %v12003_v40 = vmul.f32 %v8345_v1, %v15036_v17  ;;  %v12017_v1 = vmul.f32 %v8349_v59, %v15036_v17  ;;  %v8353_v59 = vld [vmem:[#allocation3 + $0x18] sm:$0xff] }
 0x84b   :  { %v12034_v44 = vmul.f32 %v8353_v59, %v15043_v56  ;;  %v12049_v59 = vmul.f32 %v8358_v45, %v15043_v56  ;;  %v12063_v45 = vmul.f32 %v8362_v22, %v15043_v56  ;;  %v12078_v22 = vmul.f32 %v8365_v21, %v15044_v15 }
 0x84c   :  { %15039 = vst [vmem:[#allocation286_spill] sm:$0xff] %v12017_v1  ;;  %v12093_v21 = vmul.f32 %v8370_v29, %v15044_v15  ;;  %v12107_v29 = vmul.f32 %v8374_v46, %v15044_v15  ;;  %v5478_v46 = vmul.f32 %v11882_v54, %v11954_v61  ;;  %v8383_v61 = vld [vmem:[#allocation3 + $0x198] sm:$0xff] }
 0x84d   :  { %5596 = vrot.lane.b32.xlu0 %v5461_v11, %s8532_s21  ;;  %5221 = vrot.lane.b32.xlu1 %v5069_v6, %s8531_s15  ;;  %v11976_v11 = vmul.f32 %v8337_v55, %v15036_v17  ;;  %v8338_v6 = vld [vmem:[#allocation3 + $0x20] sm:$0xff]  ;;  %v11991_v55 = vmul.f32 %v8341_v51, %v15036_v17  ;;  %v12140_v19 = vmul.f32 %v8383_v61, %v15043_v56 }
 0x84e   :  { %v11979_v62 = vmul.f32 %v8338_v6, %v15036_v17  ;;  %v11994_v6 = vmul.f32 %v8342_v41, %v15036_v17  ;;  %v8346_v51 = vld [vmem:[#allocation3 + $0x180] sm:$0xff]  ;;  %v12154_v61 = vmul.f32 %v8387_v39, %v15042_v16 }
 0x84f   :  { %v12008_v41 = vmul.f32 %v8346_v51, %v15036_v17  ;;  %v8351_v51 = vld [vmem:[#allocation3 + $0x220] sm:$0xff] }
 0x850   :  { %v12025_v37 = vmul.f32 %v8351_v51, %v15036_v17  ;;  %v8356_v51 = vld [vmem:[#allocation3 + $0x88] sm:$0xff]  ;;  %15049 = vst [vmem:[#allocation290_spill] sm:$0xff] %v12154_v61  ;;  %v8391_v61 = vld [vmem:[#allocation3 + $0x1d0] sm:$0xff] }
 0x851   :  { %5229 = vrot.lane.b32.xlu0 %v5073_v26, %s8531_s15  ;;  %5604 = vrot.lane.b32.xlu1 %v5465_v33, %s8532_s21  ;;  %v5062_v26 = vmul.f32 %v11810_v9, %v11973_v48  ;;  %v8339_v33 = vld [vmem:[#allocation3 + $0x80] sm:$0xff]  ;;  %v12043_v8 = vmul.f32 %v8356_v51, %v15042_v16  ;;  %v12057_v51 = vmul.f32 %v8360_v52, %v15043_v56 }
 0x852   :  { %v11985_v25 = vmul.f32 %v8339_v33, %v15036_v17  ;;  %v12000_v33 = vmul.f32 %v8344_v3, %v15036_v17  ;;  %v12014_v3 = vmul.f32 %v8348_v10, %v15036_v17  ;;  %15041 = vst [vmem:[#allocation288_spill] sm:$0xff] %v12025_v37  ;;  %v5470_v10 = vmul.f32 %v11882_v54, %v4819_v27  ;;  %v8357_v27 = vld [vmem:[#allocation3 + $0x48] sm:$0xff] }
 0x853   :  { %v12046_v58 = vmul.f32 %v8357_v27, %v15042_v16  ;;  %v12060_v27 = vmul.f32 %v8361_v49, %v15042_v16  ;;  %v5474_v52 = vmul.f32 %v11882_v54, %v11946_v42  ;;  %v5070_v49 = vmul.f32 %v11810_v9, %v12065_v4  ;;  %v8369_v42 = vld [vmem:[#allocation3 + $0x70] sm:$0xff] }
 0x854   :  { %15038 = vst [vmem:[#allocation285_spill] sm:$0xff] %v12014_v3  ;;  %v12090_v32 = vmul.f32 %v8369_v42, %v15044_v15  ;;  %v12104_v42 = vmul.f32 %v8373_v13, %v15044_v15  ;;  %v5074_v13 = vmul.f32 %v11810_v9, %v12112_v30  ;;  %v12128_v37 = vmul.f32 %v8379_v14, %v15044_v15  ;;  %v8382_v9 = vld [vmem:[#allocation3 + $0x170] sm:$0xff]  ;;  %v8384_v3 = vld [vmem:[#allocation3 + $0x1a8] sm:$0xff] }
 0x855   :  { %5612 = vrot.lane.b32.xlu0 %v5469_v24, %s8532_s21  ;;  %5207 = vrot.lane.b32.xlu1 %v5062_v26, %s8531_s15  ;;  %v8350_v24 = vld [vmem:[#allocation3 + $0x200] sm:$0xff]  ;;  %v12137_v1 = vmul.f32 %v8382_v9, %v15044_v15  ;;  %v12143_v14 = vmul.f32 %v8384_v3, %v15042_v16  ;;  %v12151_v9 = vmul.f32 %v8386_v57, %v15043_v56  ;;  %v8388_v30 = vld [vmem:[#allocation3 + $0x1b0] sm:$0xff] }
 0x856   :  { %v12022_v26 = vmul.f32 %v8350_v24, %v15036_v17  ;;  %v12037_v24 = vmul.f32 %v8354_v34, %v15042_v16  ;;  %v12040_v17 = vmul.f32 %v8355_v47, %v15042_v16  ;;  %v8359_v34 = vld [vmem:[#allocation3 + $0xe8] sm:$0xff]  ;;  %v12157_v3 = vmul.f32 %v8388_v30, %v15044_v15 }
 0x857   :  { %v12054_v47 = vmul.f32 %v8359_v34, %v15042_v16  ;;  %v8364_v34 = vld [vmem:[#allocation3 + $0xc8] sm:$0xff]  ;;  %15046 = vst [vmem:[#allocation5_spill] sm:$0xff] %v12143_v14  ;;  %15048 = vst [vmem:[#allocation289_spill] sm:$0xff] %v12151_v9  ;;  %v12159_v14 = vld [vmem:[#allocation3 + $0xd0] sm:$0xff]  ;;  %v5482_v57 = vmul.f32 %v11882_v54, %v11960_v23  ;;  %v12172_v30 = vmul.f32 %v8391_v61, %v15044_v15 }
 0x858   :  { %15040 = vst [vmem:[#allocation287_spill] sm:$0xff] %v12022_v26  ;;  %v12071_v53 = vmul.f32 %v8364_v34, %v15042_v16  ;;  %v8368_v34 = vld [vmem:[#allocation3 + $0xd8] sm:$0xff]  ;;  %15050 = vst [vmem:[#allocation291_spill] sm:$0xff] %v12157_v3  ;;  %v5063_v39 = vmul.f32 %v11817_v0, %v12159_v14 }
 0x859   :  { %5215 = vrot.lane.b32.xlu0 %v5066_v31, %s8531_s15  ;;  %5614 = vrot.lane.b32.xlu1 %v5470_v10, %s8532_s21  ;;  %v8363_v31 = vld [vmem:[#allocation3 + $0x58] sm:$0xff]  ;;  %v12087_v50 = vmul.f32 %v8368_v34, %v15043_v56  ;;  %15051 = vst [vmem:[#allocation292_spill] sm:$0xff] %v12159_v14  ;;  %15054 = vst [vmem:[#allocation295_spill] sm:$0xff] %v12172_v30  ;;  %v8396_v14 = vld [vmem:[#allocation3 + $0x228] sm:$0xff] }
 0x85a   :  { %v12068_v10 = vmul.f32 %v8363_v31, %v15043_v56  ;;  %v8367_v31 = vld [vmem:[#allocation3 + $0xb8] sm:$0xff]  ;;  %v12187_v61 = vmul.f32 %v8396_v14, %v15042_v16  ;;  %v8397_v30 = vld [vmem:[#allocation3 + $0x210] sm:$0xff] }
 0x85b   :  { %v12084_v35 = vmul.f32 %v8367_v31, %v15043_v56  ;;  %v8372_v31 = vld [vmem:[#allocation3 + $0x50] sm:$0xff]  ;;  %v8392_v3 = vld [vmem:[#allocation3 + $0x1f8] sm:$0xff] }
 0x85c   :  { %v12101_v34 = vmul.f32 %v8372_v31, %v15044_v15  ;;  %v8377_v31 = vld [vmem:[#allocation3 + $0x158] sm:$0xff]  ;;  %v12175_v9 = vmul.f32 %v8392_v3, %v15043_v56  ;;  %v12190_v3 = vmul.f32 %v8397_v30, %v15044_v15  ;;  %v8399_v14 = vld [vmem:[#allocation3 + $0x230] sm:$0xff] }
 0x85d   :  { %5622 = vrot.lane.b32.xlu0 %v5474_v52, %s8532_s21  ;;  %5223 = vrot.lane.b32.xlu1 %v5070_v49, %s8531_s15  ;;  %v8376_v52 = vld [vmem:[#allocation3 + $0xd0] sm:$0xff]  ;;  %v12118_v60 = vmul.f32 %v8377_v31, %v15043_v56  ;;  %v8381_v31 = vld [vmem:[#allocation3 + $0x188] sm:$0xff]  ;;  %v8395_v23 = vld [vmem:[#allocation3 + $0x218] sm:$0xff]  ;;  %v12206_v30 = vmul.f32 %v8399_v14, %v15044_v15 }
 0x85e   :  { %v12115_v49 = vmul.f32 %v8376_v52, %v15044_v15  ;;  %v8380_v52 = vld [vmem:[#allocation3 + $0x178] sm:$0xff]  ;;  %v12134_v28 = vmul.f32 %v8381_v31, %v15042_v16  ;;  %v12184_v54 = vmul.f32 %v8395_v23, %v15043_v56  ;;  %15057 = vst [vmem:[#allocation298_spill] sm:$0xff] %v12190_v3  ;;  %v12208_v3 = vld [vmem:[#allocation3 + $0xf0] sm:$0xff] }
 0x85f   :  { %v12131_v26 = vmul.f32 %v8380_v52, %v15043_v56  ;;  %v8385_v52 = vld [vmem:[#allocation3 + $0x190] sm:$0xff] }
 0x860   :  { %v12148_v31 = vmul.f32 %v8385_v52, %v15044_v15  ;;  %v8390_v52 = vld [vmem:[#allocation3 + $0x1e8] sm:$0xff]  ;;  %15056 = vst [vmem:[#allocation297_spill] sm:$0xff] %v12184_v54  ;;  %v8398_v54 = vld [vmem:[#allocation3 + $0x238] sm:$0xff] }
 0x861   :  { %5231 = vrot.lane.b32.xlu0 %v5074_v13, %s8531_s15  ;;  %5630 = vrot.lane.b32.xlu1 %v5478_v46, %s8532_s21  ;;  %v8389_v13 = vld [vmem:[#allocation3 + $0x1d8] sm:$0xff] }
 0x862   :  { %15047 = vst [vmem:[#allocation7_spill] sm:$0xff] %v12148_v31  ;;  %v12162_v46 = vmul.f32 %v8389_v13, %v15043_v56  ;;  %v12165_v31 = vmul.f32 %v8390_v52, %v15042_v16  ;;  %v8393_v13 = vld [vmem:[#allocation3 + $0x208] sm:$0xff]  ;;  %v8394_v52 = vld [vmem:[#allocation3 + $0x1f0] sm:$0xff] }
 0x864   :  { %15052 = vst [vmem:[#allocation293_spill] sm:$0xff] %v12162_v46  ;;  %15053 = vst [vmem:[#allocation294_spill] sm:$0xff] %v12165_v31  ;;  %v12178_v46 = vmul.f32 %v8393_v13, %v15042_v16  ;;  %v12181_v31 = vmul.f32 %v8394_v52, %v15044_v15  ;;  %v15058_v13 = vld [vmem:[#allocation17_spill] sm:$0xff]  ;;  %v12203_v16 = vmul.f32 %v8398_v54, %v15043_v56  ;;  %v15064_v54 = vld [vmem:[#allocation22_spill] sm:$0xff] }
 0x865   :  { %5638 = vrot.lane.b32.xlu0 %v5482_v57, %s8532_s21  ;;  %5209 = vrot.lane.b32.xlu1 %v5063_v39, %s8531_s15  ;;  %v12196_v52 = vadd.f32 %v15058_v13, %v12031_v63  ;;  %15060 = vst [vmem:[#allocation17_spill] sm:$0xff] %v12208_v3  ;;  %v15061_v57 = vld [vmem:[#allocation19_spill] sm:$0xff]  ;;  %v15062_v63 = vld [vmem:[#allocation21_spill] sm:$0xff]  ;;  %v5471_v56 = vmul.f32 %v11910_v7, %v11973_v48  ;;  %v15069_v48 = vld [vmem:[#allocation28_spill] sm:$0xff] }
 0x866   :  { %15055 = vst [vmem:[#allocation296_spill] sm:$0xff] %v12181_v31  ;;  %v15059_v31 = vld [vmem:[#allocation18_spill] sm:$0xff]  ;;  %v12212_v39 = vadd.f32 %v15061_v57, %v11971_v5  ;;  %v12216_v13 = vadd.f32 %v15062_v63, %v12037_v24  ;;  %v12224_v15 = vadd.f32 %v15064_v54, %v12078_v22  ;;  %v15066_v5 = vld [vmem:[#allocation25_spill] sm:$0xff]  ;;  %v12244_v22 = vadd.f32 %v15069_v48, %v12046_v58 }
 0x867   :  { %v12200_v23 = vadd.f32 %v15059_v31, %v12034_v44  ;;  %v5067_v44 = vmul.f32 %v11817_v0, %v12208_v3  ;;  %v15065_v31 = vld [vmem:[#allocation24_spill] sm:$0xff]  ;;  %v12232_v57 = vadd.f32 %v15066_v5, %v11976_v11  ;;  %v15067_v24 = vld [vmem:[#allocation26_spill] sm:$0xff]  ;;  %v15070_v54 = vld [vmem:[#allocation29_spill] sm:$0xff] }
 0x868   :  { %15063 = vst [vmem:[#allocation18_spill] sm:$0xff] %v12216_v13  ;;  %v12228_v14 = vadd.f32 %v15065_v31, %v12040_v17  ;;  %v12236_v63 = vadd.f32 %v15067_v24, %v12043_v8  ;;  %v15068_v13 = vld [vmem:[#allocation27_spill] sm:$0xff]  ;;  %v12248_v17 = vadd.f32 %v15070_v54, %v11985_v25  ;;  %v15071_v11 = vld [vmem:[#allocation30_spill] sm:$0xff]  ;;  %v15074_v5 = vld [vmem:[#allocation33_spill] sm:$0xff] }
 0x869   :  { %v12240_v3 = vadd.f32 %v15068_v13, %v11979_v62  ;;  %5217 = vrot.lane.b32.xlu0 %v5067_v44, %s8531_s15  ;;  %5616 = vrot.lane.b32.xlu1 %v5471_v56, %s8532_s21  ;;  %v12254_v8 = vadd.f32 %v15071_v11, %v12049_v59  ;;  %v15072_v31 = vld [vmem:[#allocation31_spill] sm:$0xff]  ;;  %v15073_v13 = vld [vmem:[#allocation32_spill] sm:$0xff]  ;;  %v12266_v25 = vadd.f32 %v15074_v5, %v12090_v32  ;;  %v12268_v24 = vld [vmem:[#allocation3 + $0x110] sm:$0xff] }
 0x86a   :  { %v12258_v62 = vadd.f32 %v15072_v31, %v11988_v12  ;;  %v12262_v58 = vadd.f32 %v15073_v13, %v12054_v47  ;;  %v15075_v44 = vld [vmem:[#allocation34_spill] sm:$0xff]  ;;  %v15076_v59 = vld [vmem:[#allocation35_spill] sm:$0xff]  ;;  %v5475_v12 = vmul.f32 %v11910_v7, %v12019_v36  ;;  %v5071_v47 = vmul.f32 %v11817_v0, %v12268_v24  ;;  %v15077_v54 = vld [vmem:[#allocation36_spill] sm:$0xff] }
 0x86b   :  { %v12272_v56 = vadd.f32 %v15075_v44, %v12057_v51  ;;  %v12276_v48 = vadd.f32 %v15076_v59, %v11991_v55  ;;  %v12284_v32 = vadd.f32 %v15077_v54, %v12060_v27  ;;  %v15078_v11 = vld [vmem:[#allocation37_spill] sm:$0xff]  ;;  %v15079_v51 = vld [vmem:[#allocation38_spill] sm:$0xff]  ;;  %v15080_v55 = vld [vmem:[#allocation39_spill] sm:$0xff] }
 0x86c   :  { %v12288_v31 = vadd.f32 %v15078_v11, %v12093_v21  ;;  %v12292_v13 = vadd.f32 %v15079_v51, %v12063_v45  ;;  %v12296_v5 = vadd.f32 %v15080_v55, %v11994_v6  ;;  %v15081_v36 = vld [vmem:[#allocation40_spill] sm:$0xff]  ;;  %v15082_v59 = vld [vmem:[#allocation41_spill] sm:$0xff]  ;;  %v15083_v54 = vld [vmem:[#allocation42_spill] sm:$0xff] }
 0x86d   :  { %v12300_v44 = vadd.f32 %v15081_v36, %v12068_v10  ;;  %v12304_v27 = vadd.f32 %v15082_v59, %v12096_v18  ;;  %v12308_v21 = vadd.f32 %v15083_v54, %v12071_v53  ;;  %5624 = vrot.lane.b32.xlu0 %v5475_v12, %s8532_s21  ;;  %5225 = vrot.lane.b32.xlu1 %v5071_v47, %s8531_s15  ;;  %v15084_v45 = vld [vmem:[#allocation43_spill] sm:$0xff]  ;;  %v15085_v11 = vld [vmem:[#allocation44_spill] sm:$0xff]  ;;  %v15086_v51 = vld [vmem:[#allocation45_spill] sm:$0xff] }
 0x86e   :  { %v12314_v6 = vadd.f32 %v15084_v45, %v12101_v34  ;;  %v12318_v10 = vadd.f32 %v15085_v11, %v12081_v2  ;;  %v12322_v18 = vadd.f32 %v15086_v51, %v11997_v43  ;;  %v15087_v55 = vld [vmem:[#allocation46_spill] sm:$0xff]  ;;  %v15088_v12 = vld [vmem:[#allocation47_spill] sm:$0xff]  ;;  %v15089_v34 = vld [vmem:[#allocation48_spill] sm:$0xff]  ;;  %v5479_v43 = vmul.f32 %v11910_v7, %v12065_v4 }
 0x86f   :  { %v12326_v53 = vadd.f32 %v15087_v55, %v12084_v35  ;;  %v12328_v36 = vld [vmem:[#allocation3 + $0x130] sm:$0xff]  ;;  %v12332_v47 = vadd.f32 %v15088_v12, %v12104_v42  ;;  %v12336_v59 = vadd.f32 %v15089_v34, %v12087_v50  ;;  %v15090_v54 = vld [vmem:[#allocation49_spill] sm:$0xff]  ;;  %v15092_v42 = vld [vmem:[#allocation51_spill] sm:$0xff] }
 0x870   :  { %v5075_v2 = vmul.f32 %v11817_v0, %v12328_v36  ;;  %v12344_v35 = vadd.f32 %v15090_v54, %v12107_v29  ;;  %v15091_v45 = vld [vmem:[#allocation50_spill] sm:$0xff]  ;;  %v12352_v51 = vadd.f32 %v15092_v42, %v12115_v49  ;;  %v15093_v50 = vld [vmem:[#allocation52_spill] sm:$0xff]  ;;  %v15094_v12 = vld [vmem:[#allocation53_spill] sm:$0xff] }
 0x871   :  { %v12348_v11 = vadd.f32 %v15091_v45, %v12110_v38  ;;  %v12356_v55 = vadd.f32 %v15093_v50, %v12118_v60  ;;  %v12360_v34 = vadd.f32 %v15094_v12, %v12000_v33  ;;  %v15095_v4 = vld [vmem:[#allocation54_spill] sm:$0xff]  ;;  %v15096_v54 = vld [vmem:[#allocation55_spill] sm:$0xff]  ;;  %5632 = vrot.lane.b32.xlu1 %v5479_v43, %s8532_s21  ;;  %v15097_v49 = vld [vmem:[#allocation56_spill] sm:$0xff]  ;;  %v12388_v12 = vpop.permute.xlu1 %5173 }
 0x872   :  { %v12364_v29 = vadd.f32 %v15095_v4, %v12125_v20  ;;  %v12368_v38 = vadd.f32 %v15096_v54, %v12128_v37  ;;  %5233 = vrot.lane.b32.xlu0 %v5075_v2, %s8531_s15  ;;  %v12374_v60 = vadd.f32 %v15097_v49, %v12131_v26  ;;  %v15098_v45 = vld [vmem:[#allocation57_spill] sm:$0xff]  ;;  %v15099_v42 = vld [vmem:[#allocation58_spill] sm:$0xff]  ;;  %v15101_v50 = vld [vmem:[#allocation59_spill] sm:$0xff]  ;;  %15103 = vst [vmem:[#allocation22_spill] sm:$0xff] %v12388_v12 }
 0x873   :  { %v12378_v33 = vadd.f32 %v15098_v45, %v12003_v40  ;;  %v12382_v20 = vadd.f32 %v15099_v42, %v12134_v28  ;;  %v12386_v37 = vadd.f32 %v15101_v50, %v12137_v1  ;;  %v12390_v2 = vld [vmem:[#allocation3 + $0xd8] sm:$0xff]  ;;  %v15105_v43 = vld [vmem:[#allocation60_spill] sm:$0xff]  ;;  %v15107_v4 = vld [vmem:[#allocation61_spill] sm:$0xff] }
 0x874   :  { %15104 = vst [vmem:[#allocation24_spill] sm:$0xff] %v12390_v2  ;;  %v12394_v26 = vadd.f32 %v15105_v43, %v12140_v19  ;;  %v12398_v40 = vadd.f32 %v15107_v4, %v12008_v41  ;;  %v15109_v54 = vld [vmem:[#allocation6_spill] sm:$0xff]  ;;  %v15110_v49 = vld [vmem:[#allocation275_spill] sm:$0xff]  ;;  %v15111_v1 = vld [vmem:[#allocation5_spill] sm:$0xff] }
 0x875   :  { %15100 = vst [vmem:[#allocation19_spill] sm:$0xff] %v12382_v20  ;;  %15102 = vst [vmem:[#allocation21_spill] sm:$0xff] %v12386_v37  ;;  %v5483_v28 = vmul.f32 %v11910_v7, %v15109_v54  ;;  %v5064_v45 = vmul.f32 %v15110_v49, %v12390_v2  ;;  %v15112_v42 = vld [vmem:[#allocation62_spill] sm:$0xff]  ;;  %v15114_v0 = vld [vmem:[#allocation7_spill] sm:$0xff]  ;;  %v12420_v54 = vpop.permute.xlu0 %4889 }
 0x876   :  { %15106 = vst [vmem:[#allocation25_spill] sm:$0xff] %v12394_v26  ;;  %15108 = vst [vmem:[#allocation26_spill] sm:$0xff] %v12398_v40  ;;  %v12406_v50 = vadd.f32 %v15112_v42, %v15111_v1  ;;  %v15115_v12 = vld [vmem:[#allocation63_spill] sm:$0xff]  ;;  %v15117_v19 = vld [vmem:[#allocation289_spill] sm:$0xff] }
 0x877   :  { %v12410_v37 = vadd.f32 %v15115_v12, %v15114_v0  ;;  %v15118_v43 = vld [vmem:[#allocation64_spill] sm:$0xff]  ;;  %v15120_v4 = vld [vmem:[#allocation65_spill] sm:$0xff]  ;;  %15121 = vst [vmem:[#allocation29_spill] sm:$0xff] %v12420_v54  ;;  %v15122_v7 = vld [vmem:[#allocation290_spill] sm:$0xff]  ;;  %5640 = vrot.lane.b32.xlu0 %v5483_v28, %s8532_s21  ;;  %5211 = vrot.lane.b32.xlu1 %v5064_v45, %s8531_s15 }
 0x878   :  { %15113 = vst [vmem:[#allocation27_spill] sm:$0xff] %v12406_v50  ;;  %v12414_v26 = vadd.f32 %v15118_v43, %v15117_v19  ;;  %v15119_v41 = vld [vmem:[#allocation4_spill] sm:$0xff]  ;;  %v15123_v2 = vld [vmem:[#allocation66_spill] sm:$0xff]  ;;  %v15125_v1 = vld [vmem:[#allocation291_spill] sm:$0xff] }
 0x879   :  { %15116 = vst [vmem:[#allocation28_spill] sm:$0xff] %v12410_v37  ;;  %v12418_v40 = vadd.f32 %v15120_v4, %v15119_v41  ;;  %v12424_v20 = vadd.f32 %v15123_v2, %v15122_v7  ;;  %v15126_v42 = vld [vmem:[#allocation67_spill] sm:$0xff]  ;;  %v15128_v0 = vld [vmem:[#allocation293_spill] sm:$0xff]  ;;  %v15132_v43 = vld [vmem:[#allocation68_spill] sm:$0xff] }
 0x87a   :  { %v12428_v50 = vadd.f32 %v15126_v42, %v15125_v1  ;;  %v15129_v12 = vld [vmem:[#allocation69_spill] sm:$0xff]  ;;  %v15134_v4 = vld [vmem:[#allocation294_spill] sm:$0xff]  ;;  %v15135_v54 = vld [vmem:[#allocation71_spill] sm:$0xff] }
 0x87b   :  { %15124 = vst [vmem:[#allocation30_spill] sm:$0xff] %v12424_v20  ;;  %v12432_v37 = vadd.f32 %v15129_v12, %v15128_v0  ;;  %v15131_v19 = vld [vmem:[#allocation285_spill] sm:$0xff]  ;;  %v12442_v7 = vadd.f32 %v15135_v54, %v15134_v4  ;;  %v15137_v2 = vld [vmem:[#allocation295_spill] sm:$0xff]  ;;  %v15138_v20 = vld [vmem:[#allocation70_spill] sm:$0xff]  ;;  %v12452_v12 = vpop.permute.xlu1 %5177 }
 0x87c   :  { %15127 = vst [vmem:[#allocation31_spill] sm:$0xff] %v12428_v50  ;;  %v12438_v41 = vadd.f32 %v15132_v43, %v15131_v19  ;;  %v12446_v1 = vadd.f32 %v15138_v20, %v15137_v2  ;;  %v15140_v42 = vld [vmem:[#allocation73_spill] sm:$0xff]  ;;  %15142 = vst [vmem:[#allocation37_spill] sm:$0xff] %v12452_v12  ;;  %v12454_v28 = vld [vmem:[#allocation3 + $0xf8] sm:$0xff] }
 0x87d   :  { %15130 = vst [vmem:[#allocation32_spill] sm:$0xff] %v12432_v37  ;;  %15136 = vst [vmem:[#allocation34_spill] sm:$0xff] %v12442_v7  ;;  %v12450_v0 = vadd.f32 %v15140_v42, %v12175_v9  ;;  %v15144_v45 = vld [vmem:[#allocation286_spill] sm:$0xff]  ;;  %v15145_v37 = vld [vmem:[#allocation72_spill] sm:$0xff]  ;;  %v5068_v20 = vmul.f32 %v15110_v49, %v12454_v28 }
 0x87e   :  { %15133 = vst [vmem:[#allocation33_spill] sm:$0xff] %v12438_v41  ;;  %15139 = vst [vmem:[#allocation35_spill] sm:$0xff] %v12446_v1  ;;  %v12458_v19 = vadd.f32 %v15145_v37, %v15144_v45  ;;  %v15147_v43 = vld [vmem:[#allocation75_spill] sm:$0xff]  ;;  %v15149_v4 = vld [vmem:[#allocation292_spill] sm:$0xff] }
 0x87f   :  { %15141 = vst [vmem:[#allocation36_spill] sm:$0xff] %v12450_v0  ;;  %15143 = vst [vmem:[#allocation38_spill] sm:$0xff] %v12454_v28  ;;  %v12462_v54 = vadd.f32 %v15147_v43, %v12178_v46  ;;  %v15150_v2 = vld [vmem:[#allocation283_spill] sm:$0xff]  ;;  %v15151_v9 = vld [vmem:[#allocation296_spill] sm:$0xff]  ;;  %v12484_v28 = vpop.permute.xlu0 %5175  ;;  %5219 = vrot.lane.b32.xlu0 %v5068_v20, %s8531_s15 }
 0x880   :  { %15146 = vst [vmem:[#allocation39_spill] sm:$0xff] %v12458_v19  ;;  %v5472_v1 = vmul.f32 %v15150_v2, %v15149_v4  ;;  %v15152_v42 = vld [vmem:[#allocation74_spill] sm:$0xff]  ;;  %v15153_v12 = vld [vmem:[#allocation297_spill] sm:$0xff]  ;;  %v15156_v37 = vld [vmem:[#allocation287_spill] sm:$0xff] }
 0x881   :  { %15148 = vst [vmem:[#allocation40_spill] sm:$0xff] %v12462_v54  ;;  %v12470_v0 = vadd.f32 %v15152_v42, %v15151_v9  ;;  %v15154_v7 = vld [vmem:[#allocation77_spill] sm:$0xff]  ;;  %v15157_v45 = vld [vmem:[#allocation76_spill] sm:$0xff]  ;;  %v15158_v46 = vld [vmem:[#allocation79_spill] sm:$0xff] }
 0x882   :  { %v12474_v41 = vadd.f32 %v15154_v7, %v15153_v12  ;;  %v12478_v19 = vadd.f32 %v15157_v45, %v15156_v37  ;;  %v12482_v43 = vadd.f32 %v15158_v46, %v12187_v61  ;;  %v15159_v54 = vld [vmem:[#allocation298_spill] sm:$0xff]  ;;  %v15161_v9 = vld [vmem:[#allocation81_spill] sm:$0xff]  ;;  %v15163_v7 = vld [vmem:[#allocation288_spill] sm:$0xff]  ;;  %5618 = vrot.lane.b32.xlu1 %v5472_v1, %s8532_s21 }
 0x883   :  { %v15160_v4 = vld [vmem:[#allocation78_spill] sm:$0xff]  ;;  %v12492_v42 = vadd.f32 %v15161_v9, %v12203_v16  ;;  %v15164_v12 = vld [vmem:[#allocation80_spill] sm:$0xff]  ;;  %v15169_v46 = vld [vmem:[#allocation9_spill] sm:$0xff] }
 0x884   :  { %15155 = vst [vmem:[#allocation41_spill] sm:$0xff] %v12474_v41  ;;  %v12488_v50 = vadd.f32 %v15160_v4, %v15159_v54  ;;  %v12496_v41 = vadd.f32 %v15164_v12, %v15163_v7  ;;  %v15166_v61 = vld [vmem:[#allocation82_spill] sm:$0xff]  ;;  %v15168_v45 = vld [vmem:[#allocation8_spill] sm:$0xff]  ;;  %v12510_v16 = vadd.f32 %v15169_v46, %v12200_v23  ;;  %v12516_v7 = vld [vmem:[#allocation3 + $0x118] sm:$0xff] }
 0x885   :  { %15162 = vst [vmem:[#allocation42_spill] sm:$0xff] %v12492_v42  ;;  %v12502_v37 = vadd.f32 %v15166_v61, %v12206_v30  ;;  %v12506_v54 = vadd.f32 %v15168_v45, %v12196_v52  ;;  %v15170_v4 = vld [vmem:[#allocation10_spill] sm:$0xff]  ;;  %v15171_v1 = vld [vmem:[#allocation11_spill] sm:$0xff]  ;;  %v15172_v30 = vld [vmem:[#allocation12_spill] sm:$0xff]  ;;  %v5072_v23 = vmul.f32 %v15110_v49, %v12516_v7 }
 0x886   :  { %15165 = vst [vmem:[#allocation43_spill] sm:$0xff] %v12496_v41  ;;  %v12514_v9 = vadd.f32 %v15170_v4, %v12212_v39  ;;  %v12520_v20 = vadd.f32 %v15171_v1, %v12228_v14  ;;  %v12524_v12 = vadd.f32 %v15172_v30, %v12224_v15  ;;  %v15173_v52 = vld [vmem:[#allocation17_spill] sm:$0xff]  ;;  %v15175_v46 = vld [vmem:[#allocation14_spill] sm:$0xff]  ;;  %v15176_v14 = vld [vmem:[#allocation15_spill] sm:$0xff] }
 0x887   :  { %15167 = vst [vmem:[#allocation44_spill] sm:$0xff] %v12502_v37  ;;  %v5476_v61 = vmul.f32 %v15150_v2, %v15173_v52  ;;  %v15174_v45 = vld [vmem:[#allocation13_spill] sm:$0xff]  ;;  %v12536_v4 = vadd.f32 %v15175_v46, %v12240_v3  ;;  %v12540_v1 = vadd.f32 %v15176_v14, %v12244_v22  ;;  %v15177_v15 = vld [vmem:[#allocation16_spill] sm:$0xff]  ;;  %v12546_v52 = vpop.permute.xlu0 %5179  ;;  %v12548_v37 = vpop.permute.xlu1 %5181  ;;  %v12550_v41 = vld [vmem:[#allocation3 + $0x138] sm:$0xff]  ;;  %5227 = vrot.lane.b32.xlu1 %v5072_v23, %s8531_s15 }
 0x888   :  { %v12532_v39 = vadd.f32 %v15174_v45, %v12272_v56  ;;  %v12544_v30 = vadd.f32 %v15177_v15, %v12288_v31  ;;  %15178 = vst [vmem:[#allocation45_spill] sm:$0xff] %v12546_v52  ;;  %v15179_v56 = vld [vmem:[#allocation20_spill] sm:$0xff]  ;;  %v15180_v3 = vld [vmem:[#allocation23_spill] sm:$0xff]  ;;  %v15181_v22 = vld [vmem:[#allocation18_spill] sm:$0xff] }
 0x889   :  { %v12554_v45 = vadd.f32 %v15179_v56, %v12300_v44  ;;  %v12558_v46 = vadd.f32 %v15180_v3, %v12258_v62  ;;  %v15182_v14 = vld [vmem:[#allocation83_spill] sm:$0xff]  ;;  %5626 = vrot.lane.b32.xlu0 %v5476_v61, %s8532_s21  ;;  %v15183_v31 = vld [vmem:[#allocation84_spill] sm:$0xff]  ;;  %v15184_v52 = vld [vmem:[#allocation85_spill] sm:$0xff] }
 0x88a   :  { %v12562_v42 = vadd.f32 %v15182_v14, %v15181_v22  ;;  %v12568_v15 = vadd.f32 %v15183_v31, %v12314_v6  ;;  %v12572_v44 = vadd.f32 %v15184_v52, %v12254_v8  ;;  %v15185_v56 = vld [vmem:[#allocation86_spill] sm:$0xff]  ;;  %v15186_v3 = vld [vmem:[#allocation87_spill] sm:$0xff]  ;;  %v15187_v61 = vld [vmem:[#allocation88_spill] sm:$0xff]  ;;  %v5076_v8 = vmul.f32 %v15110_v49, %v12550_v41 }
 0x88b   :  { %v12576_v62 = vadd.f32 %v15185_v56, %v12232_v57  ;;  %v12580_v22 = vadd.f32 %v15186_v3, %v12236_v63  ;;  %v12584_v14 = vadd.f32 %v15187_v61, %v12266_v25  ;;  %v15188_v23 = vld [vmem:[#allocation89_spill] sm:$0xff]  ;;  %v5480_v52 = vmul.f32 %v15150_v2, %v12268_v24  ;;  %v15189_v57 = vld [vmem:[#allocation90_spill] sm:$0xff]  ;;  %v15190_v63 = vld [vmem:[#allocation91_spill] sm:$0xff] }
 0x88c   :  { %v12588_v6 = vadd.f32 %v15188_v23, %v12292_v13  ;;  %v12596_v31 = vadd.f32 %v15189_v57, %v12248_v17  ;;  %v12600_v56 = vadd.f32 %v15190_v63, %v12284_v32  ;;  %v15191_v25 = vld [vmem:[#allocation92_spill] sm:$0xff]  ;;  %v15192_v13 = vld [vmem:[#allocation93_spill] sm:$0xff]  ;;  %v15193_v23 = vld [vmem:[#allocation94_spill] sm:$0xff] }
 0x88d   :  { %v12604_v3 = vadd.f32 %v15191_v25, %v12304_v27  ;;  %v12608_v61 = vadd.f32 %v15192_v13, %v12326_v53  ;;  %v12612_v49 = vadd.f32 %v15193_v23, %v12296_v5  ;;  %v15194_v24 = vld [vmem:[#allocation95_spill] sm:$0xff]  ;;  %v15195_v57 = vld [vmem:[#allocation96_spill] sm:$0xff]  ;;  %5235 = vrot.lane.b32.xlu0 %v5076_v8, %s8531_s15  ;;  %5634 = vrot.lane.b32.xlu1 %v5480_v52, %s8532_s21  ;;  %v15196_v27 = vld [vmem:[#allocation97_spill] sm:$0xff]  ;;  %v12640_v23 = vpop.permute.xlu0 %5183  ;;  %v12642_v8 = vpop.permute.xlu1 %5185 }
 0x88e   :  { %v12616_v17 = vadd.f32 %v15194_v24, %v12308_v21  ;;  %v12620_v32 = vadd.f32 %v15195_v57, %v12344_v35  ;;  %v12626_v53 = vadd.f32 %v15196_v27, %v12336_v59  ;;  %v15198_v63 = vld [vmem:[#allocation98_spill] sm:$0xff]  ;;  %v15199_v25 = vld [vmem:[#allocation99_spill] sm:$0xff]  ;;  %v15200_v13 = vld [vmem:[#allocation100_spill] sm:$0xff] }
 0x88f   :  { %v12630_v5 = vadd.f32 %v15198_v63, %v12322_v18  ;;  %v12634_v21 = vadd.f32 %v15199_v25, %v12262_v58  ;;  %v12638_v35 = vadd.f32 %v15200_v13, %v12352_v51  ;;  %v12644_v52 = vld [vmem:[#allocation3 + $0x180] sm:$0xff]  ;;  %v15202_v59 = vld [vmem:[#allocation101_spill] sm:$0xff]  ;;  %v15204_v18 = vld [vmem:[#allocation102_spill] sm:$0xff]  ;;  %v5484_v58 = vmul.f32 %v15150_v2, %v12328_v36 }
 0x890   :  { %15197 = vst [vmem:[#allocation46_spill] sm:$0xff] %v12626_v53  ;;  %v12648_v24 = vadd.f32 %v15202_v59, %v12318_v10  ;;  %v12652_v57 = vadd.f32 %v15204_v18, %v12276_v48  ;;  %v15205_v51 = vld [vmem:[#allocation269_spill] sm:$0xff]  ;;  %v15206_v63 = vld [vmem:[#allocation103_spill] sm:$0xff]  ;;  %v15208_v13 = vld [vmem:[#allocation104_spill] sm:$0xff] }
 0x891   :  { %15201 = vst [vmem:[#allocation47_spill] sm:$0xff] %v12638_v35  ;;  %v5077_v27 = vmul.f32 %v15205_v51, %v12644_v52  ;;  %v12660_v25 = vadd.f32 %v15206_v63, %v12348_v11  ;;  %v12664_v53 = vadd.f32 %v15208_v13, %v12332_v47  ;;  %v15210_v10 = vld [vmem:[#allocation105_spill] sm:$0xff]  ;;  %v15212_v48 = vld [vmem:[#allocation106_spill] sm:$0xff]  ;;  %v15214_v36 = vld [vmem:[#allocation107_spill] sm:$0xff]  ;;  %5642 = vrot.lane.b32.xlu0 %v5484_v58, %s8532_s21 }
 0x892   :  { %15203 = vst [vmem:[#allocation48_spill] sm:$0xff] %v12648_v24  ;;  %v12668_v59 = vadd.f32 %v15210_v10, %v12356_v55  ;;  %v12672_v18 = vadd.f32 %v15212_v48, %v12360_v34  ;;  %v12676_v24 = vadd.f32 %v15214_v36, %v12364_v29  ;;  %v15216_v35 = vld [vmem:[#allocation108_spill] sm:$0xff]  ;;  %v15218_v63 = vld [vmem:[#allocation109_spill] sm:$0xff]  ;;  %v15220_v55 = vld [vmem:[#allocation110_spill] sm:$0xff] }
 0x893   :  { %15207 = vst [vmem:[#allocation49_spill] sm:$0xff] %v12660_v25  ;;  %15209 = vst [vmem:[#allocation50_spill] sm:$0xff] %v12664_v53  ;;  %v12680_v11 = vadd.f32 %v15216_v35, %v12368_v38  ;;  %v12684_v47 = vadd.f32 %v15218_v63, %v12374_v60  ;;  %5237 = vrot.lane.b32.xlu1 %v5077_v27, %s8531_s15  ;;  %v12690_v34 = vadd.f32 %v15220_v55, %v12378_v33  ;;  %v15222_v13 = vld [vmem:[#allocation19_spill] sm:$0xff]  ;;  %v15225_v48 = vld [vmem:[#allocation21_spill] sm:$0xff]  ;;  %v12736_v25 = vpop.permute.xlu1 %5189 }
 0x894   :  { %15211 = vst [vmem:[#allocation51_spill] sm:$0xff] %v12668_v59  ;;  %15213 = vst [vmem:[#allocation52_spill] sm:$0xff] %v12672_v18  ;;  %v15223_v10 = vld [vmem:[#allocation111_spill] sm:$0xff]  ;;  %v15226_v36 = vld [vmem:[#allocation112_spill] sm:$0xff] }
 0x895   :  { %15215 = vst [vmem:[#allocation53_spill] sm:$0xff] %v12676_v24  ;;  %15217 = vst [vmem:[#allocation54_spill] sm:$0xff] %v12680_v11  ;;  %v12694_v29 = vadd.f32 %v15223_v10, %v15222_v13  ;;  %v12698_v38 = vadd.f32 %v15226_v36, %v15225_v48  ;;  %v15228_v35 = vld [vmem:[#allocation25_spill] sm:$0xff]  ;;  %v12704_v63 = vld [vmem:[#allocation3 + $0x1a0] sm:$0xff]  ;;  %v12734_v24 = vpop.permute.xlu0 %5187 }
 0x896   :  { %15219 = vst [vmem:[#allocation55_spill] sm:$0xff] %v12684_v47  ;;  %15221 = vst [vmem:[#allocation56_spill] sm:$0xff] %v12690_v34  ;;  %v15229_v59 = vld [vmem:[#allocation113_spill] sm:$0xff]  ;;  %v15231_v58 = vld [vmem:[#allocation26_spill] sm:$0xff]  ;;  %v5081_v13 = vmul.f32 %v15205_v51, %v12704_v63 }
 0x897   :  { %15224 = vst [vmem:[#allocation57_spill] sm:$0xff] %v12694_v29  ;;  %15227 = vst [vmem:[#allocation58_spill] sm:$0xff] %v12698_v38  ;;  %v12702_v60 = vadd.f32 %v15229_v59, %v15228_v35  ;;  %v15232_v27 = vld [vmem:[#allocation114_spill] sm:$0xff]  ;;  %v15234_v33 = vld [vmem:[#allocation27_spill] sm:$0xff] }
 0x898   :  { %v12708_v47 = vadd.f32 %v15232_v27, %v15231_v58  ;;  %v15235_v55 = vld [vmem:[#allocation115_spill] sm:$0xff]  ;;  %v15237_v10 = vld [vmem:[#allocation24_spill] sm:$0xff]  ;;  %v15242_v35 = vld [vmem:[#allocation117_spill] sm:$0xff]  ;;  %15249 = vst [vmem:[#allocation63_spill] sm:$0xff] %v12734_v24  ;;  %5245 = vrot.lane.b32.xlu0 %v5081_v13, %s8531_s15 }
 0x899   :  { %15230 = vst [vmem:[#allocation59_spill] sm:$0xff] %v12702_v60  ;;  %v12712_v11 = vadd.f32 %v15235_v55, %v15234_v33  ;;  %v15238_v48 = vld [vmem:[#allocation284_spill] sm:$0xff]  ;;  %v12724_v60 = vadd.f32 %v15242_v35, %v12414_v26  ;;  %v15244_v58 = vld [vmem:[#allocation118_spill] sm:$0xff]  ;;  %v15247_v55 = vld [vmem:[#allocation119_spill] sm:$0xff] }
 0x89a   :  { %15233 = vst [vmem:[#allocation60_spill] sm:$0xff] %v12708_v47  ;;  %v5473_v36 = vmul.f32 %v15238_v48, %v15237_v10  ;;  %v15239_v38 = vld [vmem:[#allocation28_spill] sm:$0xff]  ;;  %v12728_v27 = vadd.f32 %v15244_v58, %v12418_v40  ;;  %v15246_v33 = vld [vmem:[#allocation30_spill] sm:$0xff]  ;;  %v15250_v10 = vld [vmem:[#allocation31_spill] sm:$0xff] }
 0x89b   :  { %15236 = vst [vmem:[#allocation61_spill] sm:$0xff] %v12712_v11  ;;  %v15240_v29 = vld [vmem:[#allocation116_spill] sm:$0xff]  ;;  %15243 = vst [vmem:[#allocation5_spill] sm:$0xff] %v12724_v60  ;;  %v12732_v11 = vadd.f32 %v15247_v55, %v15246_v33  ;;  %v15256_v35 = vld [vmem:[#allocation33_spill] sm:$0xff] }
 0x89c   :  { %v12720_v59 = vadd.f32 %v15240_v29, %v15239_v38  ;;  %15245 = vst [vmem:[#allocation62_spill] sm:$0xff] %v12728_v27  ;;  %v15251_v47 = vld [vmem:[#allocation120_spill] sm:$0xff]  ;;  %v15257_v60 = vld [vmem:[#allocation121_spill] sm:$0xff]  ;;  %5620 = vrot.lane.b32.xlu1 %v5473_v36, %s8532_s21  ;;  %v15259_v58 = vld [vmem:[#allocation34_spill] sm:$0xff] }
 0x89d   :  { %15248 = vst [vmem:[#allocation7_spill] sm:$0xff] %v12732_v11  ;;  %v12740_v29 = vadd.f32 %v15251_v47, %v15250_v10  ;;  %v15253_v38 = vld [vmem:[#allocation32_spill] sm:$0xff]  ;;  %v12748_v40 = vadd.f32 %v15257_v60, %v15256_v35  ;;  %v15262_v11 = vld [vmem:[#allocation35_spill] sm:$0xff]  ;;  %v15275_v34 = vld [vmem:[#allocation38_spill] sm:$0xff] }
 0x89e   :  { %15241 = vst [vmem:[#allocation6_spill] sm:$0xff] %v12720_v59  ;;  %v15254_v59 = vld [vmem:[#allocation122_spill] sm:$0xff]  ;;  %v15260_v33 = vld [vmem:[#allocation124_spill] sm:$0xff]  ;;  %v15263_v27 = vld [vmem:[#allocation123_spill] sm:$0xff] }
 0x89f   :  { %15252 = vst [vmem:[#allocation289_spill] sm:$0xff] %v12740_v29  ;;  %v12744_v26 = vadd.f32 %v15254_v59, %v15253_v38  ;;  %15258 = vst [vmem:[#allocation4_spill] sm:$0xff] %v12748_v40  ;;  %v12754_v55 = vadd.f32 %v15260_v33, %v15259_v58  ;;  %v12758_v47 = vadd.f32 %v15263_v27, %v15262_v11  ;;  %v15265_v10 = vld [vmem:[#allocation36_spill] sm:$0xff]  ;;  %v15266_v29 = vld [vmem:[#allocation126_spill] sm:$0xff] }
 0x8a0   :  { %v12762_v59 = vadd.f32 %v15266_v29, %v15265_v10  ;;  %v15268_v38 = vld [vmem:[#allocation39_spill] sm:$0xff]  ;;  %v12768_v35 = vld [vmem:[#allocation3 + $0x1c0] sm:$0xff]  ;;  %v8400_v58 = vld [vmem:[#allocation3 + $0x28] sm:$0xff]  ;;  %v5477_v11 = vmul.f32 %v15238_v48, %v15275_v34 }
 0x8a1   :  { %15255 = vst [vmem:[#allocation64_spill] sm:$0xff] %v12744_v26  ;;  %15261 = vst [vmem:[#allocation65_spill] sm:$0xff] %v12754_v55  ;;  %v15269_v26 = vld [vmem:[#allocation125_spill] sm:$0xff]  ;;  %v15271_v13 = vld [vmem:[#allocation40_spill] sm:$0xff]  ;;  %v5085_v27 = vmul.f32 %v15205_v51, %v12768_v35 }
 0x8a2   :  { %15264 = vst [vmem:[#allocation290_spill] sm:$0xff] %v12758_v47  ;;  %15267 = vst [vmem:[#allocation66_spill] sm:$0xff] %v12762_v59  ;;  %v12766_v60 = vadd.f32 %v15269_v26, %v15268_v38  ;;  %v15272_v36 = vld [vmem:[#allocation128_spill] sm:$0xff]  ;;  %v15276_v29 = vld [vmem:[#allocation127_spill] sm:$0xff]  ;;  %5628 = vrot.lane.b32.xlu0 %v5477_v11, %s8532_s21 }
 0x8a3   :  { %v12772_v40 = vadd.f32 %v15272_v36, %v15271_v13  ;;  %v15274_v33 = vld [vmem:[#allocation136_spill] sm:$0xff]  ;;  %v12781_v10 = vadd.f32 %v15276_v29, %v12470_v0  ;;  %v15278_v26 = vld [vmem:[#allocation41_spill] sm:$0xff]  ;;  %v15279_v38 = vld [vmem:[#allocation130_spill] sm:$0xff]  ;;  %5253 = vrot.lane.b32.xlu1 %v5085_v27, %s8531_s15 }
 0x8a4   :  { %15270 = vst [vmem:[#allocation291_spill] sm:$0xff] %v12766_v60  ;;  %v3857_v55 = vmul.f32 %v8400_v58, %v15274_v33  ;;  %v12785_v59 = vadd.f32 %v15279_v38, %v15278_v26  ;;  %v8401_v47 = vld [vmem:[#allocation3 + $0x48] sm:$0xff]  ;;  %v15283_v60 = vld [vmem:[#allocation132_spill] sm:$0xff] }
 0x8a5   :  { %15273 = vst [vmem:[#allocation67_spill] sm:$0xff] %v12772_v40  ;;  %15277 = vst [vmem:[#allocation293_spill] sm:$0xff] %v12781_v10  ;;  %v3861_v13 = vmul.f32 %v8401_v47, %v15274_v33  ;;  %v8402_v36 = vld [vmem:[#allocation3 + $0x68] sm:$0xff]  ;;  %v12795_v18 = vadd.f32 %v15283_v60, %v12482_v43  ;;  %v15285_v47 = vld [vmem:[#allocation131_spill] sm:$0xff]  ;;  %v12807_v60 = vpop.permute.xlu0 %5191 }
 0x8a6   :  { %15280 = vst [vmem:[#allocation69_spill] sm:$0xff] %v12785_v59  ;;  %v3865_v58 = vmul.f32 %v8402_v36, %v15274_v33  ;;  %v15281_v40 = vld [vmem:[#allocation129_spill] sm:$0xff]  ;;  %v12802_v26 = vadd.f32 %v15285_v47, %v12488_v50  ;;  %v12811_v11 = vld [vmem:[#allocation3 + $0x1e0] sm:$0xff]  ;;  %v12814_v27 = vadd.f32 %v3857_v55, %v12506_v54  ;;  %v8410_v55 = vld [vmem:[#allocation3 + $0x58] sm:$0xff] }
 0x8a7   :  { %v12791_v34 = vadd.f32 %v15281_v40, %v12478_v19  ;;  %15284 = vst [vmem:[#allocation68_spill] sm:$0xff] %v12795_v18  ;;  %v8403_v0 = vld [vmem:[#allocation3 + $0x88] sm:$0xff]  ;;  %v8409_v10 = vld [vmem:[#allocation3 + $0x20] sm:$0xff]  ;;  %v12824_v24 = vadd.f32 %v3861_v13, %v12520_v20 }
 0x8a8   :  { %v3869_v29 = vmul.f32 %v8403_v0, %v15274_v33  ;;  %15286 = vst [vmem:[#allocation294_spill] sm:$0xff] %v12802_v26  ;;  %v8404_v38 = vld [vmem:[#allocation3 + $0xa8] sm:$0xff]  ;;  %v12809_v0 = vpop.permute.xlu1 %5193  ;;  %v8408_v26 = vld [vmem:[#allocation3 + $0x38] sm:$0xff]  ;;  %v12827_v54 = vadd.f32 %v3865_v58, %v12540_v1 }
 0x8a9   :  { %15282 = vst [vmem:[#allocation285_spill] sm:$0xff] %v12791_v34  ;;  %v3873_v36 = vmul.f32 %v8404_v38, %v15274_v33  ;;  %v8405_v19 = vld [vmem:[#allocation3 + $0xc8] sm:$0xff]  ;;  %v5089_v38 = vmul.f32 %v15205_v51, %v12811_v11  ;;  %v15288_v34 = vld [vmem:[#allocation138_spill] sm:$0xff] }
 0x8aa   :  { %v3877_v40 = vmul.f32 %v8405_v19, %v15274_v33  ;;  %v8406_v59 = vld [vmem:[#allocation3 + $0xe8] sm:$0xff]  ;;  %v5481_v19 = vmul.f32 %v15238_v48, %v12516_v7  ;;  %v3856_v53 = vmul.f32 %v8409_v10, %v15288_v34  ;;  %v12832_v7 = vadd.f32 %v3869_v29, %v12562_v42  ;;  %v8412_v10 = vld [vmem:[#allocation3 + $0x78] sm:$0xff]  ;;  %v8413_v42 = vld [vmem:[#allocation3 + $0x60] sm:$0xff] }
 0x8ab   :  { %v3881_v43 = vmul.f32 %v8406_v59, %v15274_v33  ;;  %v8407_v50 = vld [vmem:[#allocation3 + $0x108] sm:$0xff]  ;;  %5261 = vrot.lane.b32.xlu0 %v5089_v38, %s8531_s15  ;;  %v12838_v13 = vadd.f32 %v3873_v36, %v12580_v22  ;;  %v3864_v29 = vmul.f32 %v8413_v42, %v15288_v34  ;;  %v5485_v38 = vmul.f32 %v15238_v48, %v12550_v41  ;;  %v15295_v41 = vld [vmem:[#allocation139_spill] sm:$0xff] }
 0x8ac   :  { %v3885_v47 = vmul.f32 %v8407_v50, %v15274_v33  ;;  %v15287_v59 = vld [vmem:[#allocation137_spill] sm:$0xff]  ;;  %v8411_v33 = vld [vmem:[#allocation3 + $0x40] sm:$0xff]  ;;  %5636 = vrot.lane.b32.xlu1 %v5481_v19, %s8532_s21  ;;  %v12841_v1 = vadd.f32 %v3877_v40, %v12600_v56  ;;  %v8414_v40 = vld [vmem:[#allocation3 + $0x98] sm:$0xff] }
 0x8ad   :  { %v3859_v18 = vmul.f32 %v8408_v26, %v15287_v59  ;;  %v3863_v50 = vmul.f32 %v8410_v55, %v15287_v59  ;;  %v3860_v51 = vmul.f32 %v8411_v33, %v15288_v34  ;;  %v3867_v20 = vmul.f32 %v8412_v10, %v15287_v59  ;;  %15289 = vst [vmem:[#allocation71_spill] sm:$0xff] %v12838_v13  ;;  %v12846_v33 = vld [vmem:[#allocation3 + $0x188] sm:$0xff]  ;;  %v8415_v19 = vld [vmem:[#allocation3 + $0x80] sm:$0xff]  ;;  %v12862_v10 = vpop.permute.xlu0 %5195  ;;  %v15297_v13 = vld [vmem:[#allocation151_spill] sm:$0xff] }
 0x8ae   :  { %15290 = vst [vmem:[#allocation295_spill] sm:$0xff] %v12841_v1  ;;  %v12844_v58 = vadd.f32 %v3881_v43, %v12616_v17  ;;  %v12850_v26 = vadd.f32 %v3885_v47, %v12634_v21  ;;  %v15293_v22 = vld [vmem:[#allocation273_spill] sm:$0xff]  ;;  %v3920_v17 = vadd.f32 %v3856_v53, %v12514_v9  ;;  %v3871_v43 = vmul.f32 %v8414_v40, %v15287_v59  ;;  %v12864_v21 = vpop.permute.xlu1 %5197  ;;  %v8416_v47 = vld [vmem:[#allocation3 + $0x30] sm:$0xff] }
 0x8af   :  { %v5078_v36 = vmul.f32 %v15293_v22, %v12846_v33  ;;  %v12857_v56 = vadd.f32 %v3859_v18, %v12510_v16  ;;  %v3868_v55 = vmul.f32 %v8415_v19, %v15288_v34  ;;  %15294 = vst [vmem:[#allocation286_spill] sm:$0xff] %v12862_v10  ;;  %v3858_v42 = vmul.f32 %v8416_v47, %v15295_v41  ;;  %v8417_v9 = vld [vmem:[#allocation3 + $0x50] sm:$0xff] }
 0x8b0   :  { %15291 = vst [vmem:[#allocation70_spill] sm:$0xff] %v12844_v58  ;;  %15292 = vst [vmem:[#allocation73_spill] sm:$0xff] %v12850_v26  ;;  %v12868_v26 = vadd.f32 %v3863_v50, %v12532_v39  ;;  %v3924_v16 = vadd.f32 %v3860_v51, %v12536_v4  ;;  %5644 = vrot.lane.b32.xlu0 %v5485_v38, %s8532_s21  ;;  %v3862_v53 = vmul.f32 %v8417_v9, %v15295_v41  ;;  %v8418_v40 = vld [vmem:[#allocation3 + $0x70] sm:$0xff]  ;;  %v12879_v39 = vld [vmem:[#allocation3 + $0x1a8] sm:$0xff] }
 0x8b1   :  { %5239 = vrot.lane.b32.xlu1 %v5078_v36, %s8531_s15  ;;  %v12875_v18 = vadd.f32 %v3867_v20, %v12554_v45  ;;  %v3866_v19 = vmul.f32 %v8418_v40, %v15295_v41  ;;  %v8419_v58 = vld [vmem:[#allocation3 + $0x90] sm:$0xff]  ;;  %v3928_v4 = vadd.f32 %v3864_v29, %v12558_v46  ;;  %v8420_v51 = vld [vmem:[#allocation3 + $0xb8] sm:$0xff]  ;;  %v5082_v38 = vmul.f32 %v15293_v22, %v12879_v39  ;;  %v15296_v36 = vld [vmem:[#allocation280_spill] sm:$0xff]  ;;  %v12893_v29 = vpop.permute.xlu0 %5844 }
 0x8b2   :  { %v3870_v47 = vmul.f32 %v8419_v58, %v15295_v41  ;;  %v3875_v50 = vmul.f32 %v8420_v51, %v15287_v59  ;;  %v5486_v45 = vmul.f32 %v15296_v36, %v12644_v52  ;;  %v12888_v20 = vadd.f32 %v3871_v43, %v12572_v44  ;;  %v8421_v40 = vld [vmem:[#allocation3 + $0xa0] sm:$0xff]  ;;  %v8422_v1 = vld [vmem:[#allocation3 + $0xb0] sm:$0xff]  ;;  %v12895_v51 = vpop.permute.xlu1 %5849  ;;  %v15298_v52 = vld [vmem:[#allocation271_spill] sm:$0xff] }
 0x8b3   :  { %v3932_v9 = vadd.f32 %v3868_v55, %v12576_v62  ;;  %v3872_v58 = vmul.f32 %v8421_v40, %v15288_v34  ;;  %v3874_v46 = vmul.f32 %v8422_v1, %v15295_v41  ;;  %v4329_v10 = vadd.f32 %v15297_v13, %v3920_v17  ;;  %v15299_v44 = vld [vmem:[#allocation270_spill] sm:$0xff]  ;;  %v8423_v13 = vld [vmem:[#allocation3 + $0xd8] sm:$0xff]  ;;  %v12915_v17 = vld [vmem:[#allocation3 + $0x1c8] sm:$0xff] }
 0x8b4   :  { %v12899_v48 = vadd.f32 %v3858_v42, %v12524_v12  ;;  %v4892_v43 = vmul.f32 %v15299_v44, %v15298_v52  ;;  %5247 = vrot.lane.b32.xlu0 %v5082_v38, %s8531_s15  ;;  %v12906_v62 = vadd.f32 %v3862_v53, %v12544_v30  ;;  %v12909_v1 = vadd.f32 %v3866_v19, %v12568_v15  ;;  %v15301_v38 = vld [vmem:[#allocation142_spill] sm:$0xff]  ;;  %v8424_v19 = vld [vmem:[#allocation3 + $0xc0] sm:$0xff] }
 0x8b5   :  { %5646 = vrot.lane.b32.xlu1 %v5486_v45, %s8532_s21  ;;  %v12912_v55 = vadd.f32 %v3870_v47, %v12584_v14  ;;  %v3879_v12 = vmul.f32 %v8423_v13, %v15287_v59  ;;  %v12918_v42 = vadd.f32 %v3875_v50, %v12588_v6  ;;  %v4738_v40 = vadd.f32 %v15301_v38, %v4329_v10  ;;  %v8425_v45 = vld [vmem:[#allocation3 + $0xd0] sm:$0xff]  ;;  %v12933_v50 = vpop.permute.xlu0 %5932  ;;  %v15305_v38 = vld [vmem:[#allocation276_spill] sm:$0xff] }
 0x8b6   :  { %v5490_v30 = vmul.f32 %v15296_v36, %v12704_v63  ;;  %v5086_v15 = vmul.f32 %v15293_v22, %v12915_v17  ;;  %v12926_v53 = vadd.f32 %v3872_v58, %v12596_v31  ;;  %v12929_v14 = vadd.f32 %v3874_v46, %v12604_v3  ;;  %15303 = vst [vmem:[#allocation292_spill] sm:$0xff] %v12933_v50  ;;  %v12935_v10 = vpop.permute.xlu1 %5854  ;;  %v15304_v63 = vld [vmem:[#allocation157_spill] sm:$0xff]  ;;  %v8426_v58 = vld [vmem:[#allocation3 + $0xf8] sm:$0xff] }
 0x8b7   :  { %15300 = vst [vmem:[#allocation72_spill] sm:$0xff] %v12918_v42  ;;  %v3876_v47 = vmul.f32 %v8424_v19, %v15288_v34  ;;  %v3878_v6 = vmul.f32 %v8425_v45, %v15295_v41  ;;  %v4333_v52 = vadd.f32 %v15304_v63, %v3924_v16  ;;  %v4956_v13 = vadd.f32 %v4892_v43, %v4738_v40  ;;  %v8427_v19 = vld [vmem:[#allocation3 + $0xe0] sm:$0xff]  ;;  %v8428_v42 = vld [vmem:[#allocation3 + $0xf0] sm:$0xff]  ;;  %v12952_v43 = vld [vmem:[#allocation3 + $0x1e8] sm:$0xff] }
 0x8b8   :  { %15302 = vst [vmem:[#allocation75_spill] sm:$0xff] %v12929_v14  ;;  %v4896_v31 = vmul.f32 %v15299_v44, %v15305_v38  ;;  %5654 = vrot.lane.b32.xlu0 %v5490_v30, %s8532_s21  ;;  %v12943_v3 = vadd.f32 %v3879_v12, %v12608_v61  ;;  %v12946_v46 = vmul.f32 %v8426_v58, %v15287_v59  ;;  %v15309_v40 = vld [vmem:[#allocation146_spill] sm:$0xff]  ;;  %v15311_v38 = vld [vmem:[#allocation161_spill] sm:$0xff] }
 0x8b9   :  { %5255 = vrot.lane.b32.xlu1 %v5086_v15, %s8531_s15  ;;  %v3880_v45 = vmul.f32 %v8427_v19, %v15288_v34  ;;  %v12950_v16 = vmul.f32 %v8428_v42, %v15295_v41  ;;  %v4742_v30 = vadd.f32 %v15309_v40, %v4333_v52  ;;  %v15310_v63 = vld [vmem:[#allocation22_spill] sm:$0xff]  ;;  %v5090_v61 = vmul.f32 %v15293_v22, %v12952_v43  ;;  %v15314_v40 = vld [vmem:[#allocation279_spill] sm:$0xff] }
 0x8ba   :  { %15306 = vst [vmem:[#allocation296_spill] sm:$0xff] %v12943_v3  ;;  %15307 = vst [vmem:[#allocation74_spill] sm:$0xff] %v12946_v46  ;;  %v5365_v15 = vadd.f32 %v15310_v63, %v4956_v13  ;;  %v5494_v12 = vmul.f32 %v15296_v36, %v12768_v35  ;;  %v4337_v58 = vadd.f32 %v15311_v38, %v3928_v4  ;;  %v15312_v3 = vld [vmem:[#allocation165_spill] sm:$0xff]  ;;  %v15313_v42 = vld [vmem:[#allocation278_spill] sm:$0xff]  ;;  %v5583_v52 = vpop.permute.xlu1 %5582 }
 0x8bb   :  { %15308 = vst [vmem:[#allocation297_spill] sm:$0xff] %v12950_v16  ;;  %v4341_v19 = vadd.f32 %v15312_v3, %v3932_v9  ;;  %v12963_v46 = vadd.f32 %v3876_v47, %v12612_v49  ;;  %v4900_v14 = vmul.f32 %v15299_v44, %v15313_v42  ;;  %v12967_v16 = vpop.permute.xlu0 %5937  ;;  %v4960_v13 = vadd.f32 %v4896_v31, %v4742_v30  ;;  %v8429_v35 = vld [vmem:[#allocation3 + $0x118] sm:$0xff]  ;;  %v8430_v49 = vld [vmem:[#allocation3 + $0x100] sm:$0xff]  ;;  %v15317_v38 = vld [vmem:[#allocation218_spill] sm:$0xff] }
 0x8bc   :  { %v4904_v63 = vmul.f32 %v15299_v44, %v15314_v40  ;;  %v5774_v22 = vadd.f32 %v5583_v52, %v5365_v15  ;;  %5263 = vrot.lane.b32.xlu0 %v5090_v61, %s8531_s15  ;;  %v12974_v4 = vmul.f32 %v8429_v35, %v15287_v59  ;;  %v3884_v9 = vmul.f32 %v8430_v49, %v15288_v34  ;;  %v15316_v47 = vld [vmem:[#allocation155_spill] sm:$0xff]  ;;  %v12979_v31 = vld [vmem:[#allocation3 + $0x190] sm:$0xff] }
 0x8bd   :  { %5662 = vrot.lane.b32.xlu1 %v5494_v12, %s8532_s21  ;;  %v4746_v3 = vadd.f32 %v15316_v47, %v4337_v58  ;;  %v4750_v42 = vadd.f32 %v15317_v38, %v4341_v19  ;;  %v5369_v30 = vadd.f32 %v12548_v37, %v4960_v13  ;;  %v5498_v61 = vmul.f32 %v15296_v36, %v12811_v11  ;;  %v15318_v12 = vld [vmem:[#allocation274_spill] sm:$0xff] }
 0x8be   :  { %15315 = vst [vmem:[#allocation77_spill] sm:$0xff] %v12974_v4  ;;  %v5862_v15 = vmul.f32 %v12893_v29, %v5774_v22  ;;  %v5079_v52 = vmul.f32 %v15318_v12, %v12979_v31  ;;  %v12988_v40 = vadd.f32 %v3878_v6, %v12620_v32  ;;  %v12991_v35 = vadd.f32 %v3880_v45, %v12630_v5  ;;  %v8431_v58 = vld [vmem:[#allocation3 + $0x110] sm:$0xff]  ;;  %v12996_v13 = vpop.permute.xlu1 %5199  ;;  %v15319_v5 = vld [vmem:[#allocation149_spill] sm:$0xff] }
 0x8bf   :  { %v12994_v19 = vmul.f32 %v8431_v58, %v15295_v41  ;;  %v4964_v49 = vadd.f32 %v4900_v14, %v4746_v3  ;;  %v5591_v37 = vpop.permute.xlu0 %5590  ;;  %v4968_v22 = vadd.f32 %v4904_v63, %v4750_v42  ;;  %v13003_v32 = vld [vmem:[#allocation3 + $0x1b0] sm:$0xff]  ;;  %v4330_v6 = vadd.f32 %v15319_v5, %v12814_v27  ;;  %v15323_v58 = vld [vmem:[#allocation268_spill] sm:$0xff]  ;;  %v15324_v5 = vld [vmem:[#allocation277_spill] sm:$0xff] }
 0x8c0   :  { %v12999_v11 = vadd.f32 %v12933_v50, %v5862_v15  ;;  %v5778_v47 = vadd.f32 %v5591_v37, %v5369_v30  ;;  %5670 = vrot.lane.b32.xlu0 %v5498_v61, %s8532_s21  ;;  %v13008_v45 = vadd.f32 %v3884_v9, %v12652_v57  ;;  %v5083_v14 = vmul.f32 %v15318_v12, %v13003_v32  ;;  %v15320_v63 = vld [vmem:[#allocation282_spill] sm:$0xff]  ;;  %v15322_v57 = vld [vmem:[#allocation153_spill] sm:$0xff] }
 0x8c1   :  { %5241 = vrot.lane.b32.xlu1 %v5079_v52, %s8531_s15  ;;  %v5487_v3 = vmul.f32 %v15320_v63, %v12846_v33  ;;  %v5373_v38 = vadd.f32 %v12736_v25, %v4964_v49  ;;  %v5377_v42 = vadd.f32 %v12864_v21, %v4968_v22  ;;  %v15321_v61 = vld [vmem:[#allocation150_spill] sm:$0xff]  ;;  %v4334_v9 = vadd.f32 %v15322_v57, %v12824_v24  ;;  %v8432_v52 = vld [vmem:[#allocation3 + $0x48] sm:$0xff] }
 0x8c2   :  { %v7664_v30 = vmul.f32 -1.442695, %v12999_v11  ;;  %v5866_v15 = vmul.f32 %v12893_v29, %v5778_v47  ;;  %v13020_v27 = vadd.f32 %v15321_v61, %v12857_v56  ;;  %v4893_v37 = vmul.f32 %v8432_v52, %v15323_v58  ;;  %v5607_v49 = vpop.permute.xlu1 %5606  ;;  %v15325_v24 = vld [vmem:[#allocation154_spill] sm:$0xff]  ;;  %v15326_v61 = vld [vmem:[#allocation140_spill] sm:$0xff]  ;;  %v15327_v52 = vld [vmem:[#allocation143_spill] sm:$0xff] }
 0x8c3   :  { %v4897_v33 = vmul.f32 %v15323_v58, %v15324_v5  ;;  %v5599_v25 = vpop.permute.xlu0 %5598  ;;  %v5786_v47 = vadd.f32 %v5607_v49, %v5377_v42  ;;  %v4331_v56 = vadd.f32 %v15325_v24, %v12899_v48  ;;  %v4739_v57 = vadd.f32 %v15326_v61, %v4330_v6  ;;  %v15328_v48 = vld [vmem:[#allocation156_spill] sm:$0xff]  ;;  %v15329_v6 = vld [vmem:[#allocation158_spill] sm:$0xff] }
 0x8c4   :  { %8016 = vpow2.f32 %v7664_v30  ;;  %v13028_v21 = vadd.f32 %v12933_v50, %v5866_v15  ;;  %v5782_v22 = vadd.f32 %v5599_v25, %v5373_v38  ;;  %5249 = vrot.lane.b32.xlu0 %v5083_v14, %s8531_s15  ;;  %v4743_v59 = vadd.f32 %v15327_v52, %v4334_v9  ;;  %v13038_v30 = vld [vmem:[#allocation3 + $0x1d0] sm:$0xff] }
 0x8c5   :  { %5648 = vrot.lane.b32.xlu1 %v5487_v3, %s8532_s21  ;;  %v5491_v5 = vmul.f32 %v15320_v63, %v12879_v39  ;;  %v5874_v14 = vmul.f32 %v12893_v29, %v5786_v47  ;;  %v5087_v3 = vmul.f32 %v15318_v12, %v13038_v30  ;;  %v13047_v42 = vadd.f32 %v15328_v48, %v12868_v26  ;;  %v8433_v39 = vld [vmem:[#allocation3 + $0x88] sm:$0xff]  ;;  %v15331_v26 = vld [vmem:[#allocation159_spill] sm:$0xff] }
 0x8c6   :  { %v7668_v15 = vmul.f32 -1.442695, %v13028_v21  ;;  %v5870_v38 = vmul.f32 %v12893_v29, %v5782_v22  ;;  %v4338_v9 = vadd.f32 %v15329_v6, %v12827_v54  ;;  %v4957_v25 = vadd.f32 %v4893_v37, %v4739_v57  ;;  %v13054_v61 = vpop.permute.xlu1 %5942  ;;  %v13064_v54 = vld [vmem:[#allocation3 + $0x1f0] sm:$0xff]  ;;  %v15332_v57 = vld [vmem:[#allocation147_spill] sm:$0xff] }
 0x8c7   :  { %v4901_v49 = vmul.f32 %v8433_v39, %v15323_v58  ;;  %v13052_v24 = vpop.permute.xlu0 %5859  ;;  %v4961_v22 = vadd.f32 %v4897_v33, %v4743_v59  ;;  %v13060_v52 = vadd.f32 %v12933_v50, %v5874_v14  ;;  %v4335_v37 = vadd.f32 %v15331_v26, %v12906_v62  ;;  %v15334_v62 = vld [vmem:[#allocation162_spill] sm:$0xff]  ;;  %v15335_v39 = vld [vmem:[#allocation163_spill] sm:$0xff] }
 0x8c8   :  { %15330 = vst [vmem:[#allocation287_spill] sm:$0xff] %v13052_v24  ;;  %8018 = vpow2.f32 %v7668_v15  ;;  %v13057_v47 = vadd.f32 %v12933_v50, %v5870_v38  ;;  %5656 = vrot.lane.b32.xlu0 %v5491_v5, %s8532_s21  ;;  %v4747_v48 = vadd.f32 %v15332_v57, %v4338_v9  ;;  %v5091_v59 = vmul.f32 %v15318_v12, %v13064_v54  ;;  %v15336_v57 = vld [vmem:[#allocation281_spill] sm:$0xff] }
 0x8c9   :  { %5257 = vrot.lane.b32.xlu1 %v5087_v3, %s8531_s15  ;;  %v5495_v33 = vmul.f32 %v15320_v63, %v12915_v17  ;;  %v5366_v15 = vadd.f32 %v12484_v28, %v4957_v25  ;;  %v5370_v38 = vadd.f32 %v12640_v23, %v4961_v22  ;;  %v7676_v14 = vmul.f32 -1.442695, %v13060_v52  ;;  %v15333_v3 = vld [vmem:[#allocation160_spill] sm:$0xff] }
 0x8ca   :  { %v7672_v5 = vmul.f32 -1.442695, %v13057_v47  ;;  %v13079_v6 = vadd.f32 %v15333_v3, %v12875_v18  ;;  %v4342_v9 = vadd.f32 %v15334_v62, %v12832_v7  ;;  %v4339_v26 = vadd.f32 %v15335_v39, %v12909_v1  ;;  %v5593_v25 = vpop.permute.xlu1 %5592  ;;  %v15337_v18 = vld [vmem:[#allocation164_spill] sm:$0xff]  ;;  %v15338_v7 = vld [vmem:[#allocation167_spill] sm:$0xff] }
 0x8cb   :  { %v4905_v17 = vmul.f32 %v15323_v58, %v15336_v57  ;;  %v5585_v28 = vpop.permute.xlu0 %5584  ;;  %v4965_v23 = vadd.f32 %v4901_v49, %v4747_v48  ;;  %v5779_v41 = vadd.f32 %v5593_v25, %v5370_v38  ;;  %v13091_v3 = vadd.f32 %v15337_v18, %v12888_v20  ;;  %v15339_v62 = vld [vmem:[#allocation215_spill] sm:$0xff]  ;;  %v15340_v20 = vld [vmem:[#allocation144_spill] sm:$0xff] }
 0x8cc   :  { %8020 = vpow2.f32 %v7672_v5  ;;  %v5775_v22 = vadd.f32 %v5585_v28, %v5366_v15  ;;  %5265 = vrot.lane.b32.xlu0 %v5091_v59, %s8531_s15  ;;  %v4343_v1 = vadd.f32 %v15338_v7, %v12912_v55  ;;  %v4751_v39 = vadd.f32 %v15339_v62, %v4342_v9  ;;  %v15344_v62 = vld [vmem:[#allocation216_spill] sm:$0xff] }
 0x8cd   :  { %5664 = vrot.lane.b32.xlu1 %v5495_v33, %s8532_s21  ;;  %8022 = vpow2.f32 %v7676_v14  ;;  %v5374_v49 = vadd.f32 %v12807_v60, %v4965_v23  ;;  %v5867_v15 = vmul.f32 %v12895_v51, %v5779_v41  ;;  %v5499_v59 = vmul.f32 %v15320_v63, %v12952_v43  ;;  %v13101_v33 = vld [vmem:[#allocation3 + $0x198] sm:$0xff]  ;;  %v8434_v60 = vld [vmem:[#allocation3 + $0x50] sm:$0xff]  ;;  %v15342_v23 = vld [vmem:[#allocation272_spill] sm:$0xff] }
 0x8ce   :  { %v8017_v57 = vpop.eup %8016  ;;  %v5863_v48 = vmul.f32 %v12895_v51, %v5775_v22  ;;  %v4740_v38 = vadd.f32 %v15340_v20, %v4331_v56  ;;  %v4969_v28 = vadd.f32 %v4905_v17, %v4751_v39  ;;  %v5601_v9 = vpop.permute.xlu1 %5600  ;;  %v15341_v14 = vld [vmem:[#allocation275_spill] sm:$0xff]  ;;  %v4894_v22 = vmul.f32 %v8434_v60, %v15342_v23  ;;  %v15343_v17 = vld [vmem:[#allocation148_spill] sm:$0xff] }
 0x8cf   :  { %v6206_v5 = vadd.f32 1.0, %v8017_v57  ;;  %v13104_v55 = vpop.permute.xlu0 %5201  ;;  %v5080_v25 = vmul.f32 %v15341_v14, %v13101_v33  ;;  %v13113_v43 = vadd.f32 %v12967_v16, %v5867_v15  ;;  %v5783_v18 = vadd.f32 %v5601_v9, %v5374_v49  ;;  %v13116_v56 = vld [vmem:[#allocation3 + $0x1b8] sm:$0xff]  ;;  %v8435_v57 = vld [vmem:[#allocation3 + $0x70] sm:$0xff] }
 0x8d0   :  { %v13110_v41 = vadd.f32 %v12967_v16, %v5863_v48  ;;  %5672 = vrot.lane.b32.xlu0 %v5499_v59, %s8532_s21  ;;  %v4744_v7 = vadd.f32 %v15343_v17, %v4335_v37  ;;  %v4748_v39 = vadd.f32 %v15344_v62, %v4339_v26  ;;  %v4898_v20 = vmul.f32 %v8435_v57, %v15342_v23  ;;  %v15345_v37 = vld [vmem:[#allocation220_spill] sm:$0xff] }
 0x8d1   :  { %5243 = vrot.lane.b32.xlu1 %v5080_v25, %s8531_s15  ;;  %v5084_v48 = vmul.f32 %v15341_v14, %v13116_v56  ;;  %v5378_v15 = vadd.f32 %v12996_v13, %v4969_v28  ;;  %v7669_v59 = vmul.f32 -1.442695, %v13113_v43  ;;  %v5871_v9 = vmul.f32 %v12895_v51, %v5783_v18  ;;  %v8436_v18 = vld [vmem:[#allocation3 + $0x90] sm:$0xff] }
 0x8d2   :  { %v8019_v60 = vpop.eup %8018  ;;  %v7665_v49 = vmul.f32 -1.442695, %v13110_v41  ;;  %v4752_v17 = vadd.f32 %v15345_v37, %v4343_v1  ;;  %8024 = vrcp.f32 %v6206_v5  ;;  %v13129_v57 = vpop.permute.xlu1 %5947  ;;  %v5488_v25 = vmul.f32 %v15150_v2, %v12979_v31  ;;  %v15347_v31 = vld [vmem:[#allocation37_spill] sm:$0xff] }
 0x8d3   :  { %v6210_v26 = vadd.f32 1.0, %v8019_v60  ;;  %v5609_v62 = vpop.permute.xlu0 %5608  ;;  %15346 = vst [vmem:[#allocation76_spill] sm:$0xff] %v13129_v57  ;;  %v4958_v4 = vadd.f32 %v4894_v22, %v4740_v38  ;;  %v13134_v13 = vadd.f32 %v12967_v16, %v5871_v9  ;;  %v4962_v34 = vadd.f32 %v4898_v20, %v4744_v7  ;;  %v8437_v9 = vld [vmem:[#allocation3 + $0xb0] sm:$0xff] }
 0x8d4   :  { %8026 = vpow2.f32 %v7665_v49  ;;  %v5787_v28 = vadd.f32 %v5609_v62, %v5378_v15  ;;  %5251 = vrot.lane.b32.xlu0 %v5084_v48, %s8531_s15  ;;  %v4902_v1 = vmul.f32 %v8436_v18, %v15342_v23  ;;  %v5492_v5 = vmul.f32 %v15150_v2, %v13003_v32  ;;  %v13144_v49 = vld [vmem:[#allocation3 + $0x1d8] sm:$0xff]  ;;  %v15348_v18 = vld [vmem:[#allocation29_spill] sm:$0xff] }
 0x8d5   :  { %8028 = vrcp.f32 %v6210_v26  ;;  %5650 = vrot.lane.b32.xlu1 %v5488_v25, %s8532_s21  ;;  %v5367_v38 = vadd.f32 %v15347_v31, %v4958_v4  ;;  %v7673_v22 = vmul.f32 -1.442695, %v13134_v13  ;;  %v5371_v20 = vadd.f32 %v12642_v8, %v4962_v34  ;;  %v13156_v31 = vld [vmem:[#allocation3 + $0x1f8] sm:$0xff] }
 0x8d6   :  { %v8021_v60 = vpop.eup %8020  ;;  %8030 = vpow2.f32 %v7669_v59  ;;  %v5875_v15 = vmul.f32 %v12895_v51, %v5787_v28  ;;  %v4906_v37 = vmul.f32 %v8437_v9, %v15342_v23  ;;  %v5595_v62 = vpop.permute.xlu1 %5594  ;;  %v5088_v32 = vmul.f32 %v15341_v14, %v13144_v49  ;;  %v8438_v28 = vld [vmem:[#allocation3 + $0x58] sm:$0xff] }
 0x8d7   :  { %v8023_v7 = vpop.eup %8022  ;;  %v6214_v48 = vadd.f32 1.0, %v8021_v60  ;;  %v5587_v26 = vpop.permute.xlu0 %5586  ;;  %8032 = vpow2.f32 %v7673_v22  ;;  %v4895_v8 = vmul.f32 %v8438_v28, %v15348_v18  ;;  %v4966_v34 = vadd.f32 %v4902_v1, %v4748_v39  ;;  %v8439_v28 = vld [vmem:[#allocation3 + $0x78] sm:$0xff] }
 0x8d8   :  { %v6218_v4 = vadd.f32 1.0, %v8023_v7  ;;  %v13151_v59 = vadd.f32 %v12967_v16, %v5875_v15  ;;  %v5776_v25 = vadd.f32 %v5587_v26, %v5367_v38  ;;  %5658 = vrot.lane.b32.xlu0 %v5492_v5, %s8532_s21  ;;  %v5780_v60 = vadd.f32 %v5595_v62, %v5371_v20  ;;  %v15349_v5 = vld [vmem:[#allocation169_spill] sm:$0xff] }
 0x8d9   :  { %8034 = vrcp.f32 %v6214_v48  ;;  %5259 = vrot.lane.b32.xlu1 %v5088_v32, %s8531_s15  ;;  %v5092_v38 = vmul.f32 %v15341_v14, %v13156_v31  ;;  %v13164_v15 = vadd.f32 %v15349_v5, %v12926_v53  ;;  %v5375_v39 = vadd.f32 %v12809_v0, %v4966_v34  ;;  %v15350_v26 = vld [vmem:[#allocation141_spill] sm:$0xff] }
 0x8da   :  { %8036 = vrcp.f32 %v6218_v4  ;;  %v7677_v7 = vmul.f32 -1.442695, %v13151_v59  ;;  %v5864_v22 = vmul.f32 %v12935_v10, %v5776_v25  ;;  %v5868_v1 = vmul.f32 %v12935_v10, %v5780_v60  ;;  %v5603_v48 = vpop.permute.xlu1 %5602  ;;  %v15351_v0 = vld [vmem:[#allocation145_spill] sm:$0xff] }
 0x8db   :  { %v13168_v20 = vpop.permute.xlu0 %5203  ;;  %v5496_v9 = vmul.f32 %v15150_v2, %v13038_v30  ;;  %v4741_v62 = vadd.f32 %v15350_v26, %v13020_v27  ;;  %v4970_v32 = vadd.f32 %v4906_v37, %v4752_v17  ;;  %v4745_v25 = vadd.f32 %v15351_v0, %v13047_v42  ;;  %v13204_v0 = vld [vmem:[#allocation3 + $0x220] sm:$0xff] }
 0x8dc   :  { %8038 = vpow2.f32 %v7677_v7  ;;  %v13175_v4 = vadd.f32 %v13054_v61, %v5864_v22  ;;  %5267 = vrot.lane.b32.xlu0 %v5092_v38, %s8531_s15  ;;  %v8025_v53 = vpop.eup %8024  ;;  %v4899_v34 = vmul.f32 %v8439_v28, %v15348_v18  ;;  %v13182_v60 = vadd.f32 %v13054_v61, %v5868_v1  ;;  %v13189_v38 = vld [vmem:[#allocation3 + $0x200] sm:$0xff] }
 0x8dd   :  { %v5784_v30 = vadd.f32 %v5603_v48, %v5375_v39  ;;  %5666 = vrot.lane.b32.xlu1 %v5496_v9, %s8532_s21  ;;  %v4959_v17 = vadd.f32 %v4895_v8, %v4741_v62  ;;  %v5379_v37 = vadd.f32 %v13104_v55, %v4970_v32  ;;  %v5500_v22 = vmul.f32 %v15150_v2, %v13064_v54  ;;  %v15352_v8 = vld [vmem:[#allocation269_spill] sm:$0xff] }
 0x8de   :  { %v8027_v27 = vpop.eup %8026  ;;  %v7666_v7 = vmul.f32 -1.442695, %v13175_v4  ;;  %v7670_v26 = vmul.f32 -1.442695, %v13182_v60  ;;  %v13193_v48 = vpop.permute.xlu1 %5205  ;;  %v5093_v9 = vmul.f32 %v15352_v8, %v13189_v38  ;;  %v13198_v62 = vmul.f32 %v8025_v53, %v12999_v11 }
 0x8df   :  { %v8029_v42 = vpop.eup %8028  ;;  %v6207_v5 = vadd.f32 1.0, %v8027_v27  ;;  %v5872_v1 = vmul.f32 %v12935_v10, %v5784_v30  ;;  %v5611_v39 = vpop.permute.xlu0 %5610  ;;  %v5097_v11 = vmul.f32 %v15352_v8, %v13204_v0  ;;  %v15355_v27 = vld [vmem:[#allocation45_spill] sm:$0xff]  ;;  %v4963_v14 = vadd.f32 %v4899_v34, %v4745_v25  ;;  %v15359_v25 = vld [vmem:[#allocation63_spill] sm:$0xff] }
 0x8e0   :  { %v8031_v55 = vpop.eup %8030  ;;  %15353 = vst [vmem:[#allocation79_spill] sm:$0xff] %v13198_v62  ;;  %v13201_v54 = vmul.f32 %v8029_v42, %v13028_v21  ;;  %8040 = vpow2.f32 %v7666_v7  ;;  %v5788_v32 = vadd.f32 %v5611_v39, %v5379_v37  ;;  %5674 = vrot.lane.b32.xlu0 %v5500_v22, %s8532_s21  ;;  %v5368_v21 = vadd.f32 %v15355_v27, %v4959_v17  ;;  %v8440_v27 = vld [vmem:[#allocation3 + $0x98] sm:$0xff] }
 0x8e1   :  { %8042 = vrcp.f32 %v6207_v5  ;;  %v6211_v28 = vadd.f32 1.0, %v8031_v55  ;;  %v13207_v30 = vadd.f32 %v13054_v61, %v5872_v1  ;;  %5269 = vrot.lane.b32.xlu1 %v5093_v9, %s8531_s15  ;;  %v8033_v53 = vpop.eup %8032  ;;  %v15356_v9 = vld [vmem:[#allocation284_spill] sm:$0xff]  ;;  %v4903_v37 = vmul.f32 %v8440_v27, %v15348_v18  ;;  %v15361_v27 = vld [vmem:[#allocation217_spill] sm:$0xff] }
 0x8e2   :  { %15354 = vst [vmem:[#allocation298_spill] sm:$0xff] %v13201_v54  ;;  %8044 = vpow2.f32 %v7670_v26  ;;  %v5876_v7 = vmul.f32 %v12935_v10, %v5788_v32  ;;  %v6215_v42 = vadd.f32 1.0, %v8033_v53  ;;  %v5589_v39 = vpop.permute.xlu1 %5588  ;;  %v5489_v55 = vmul.f32 %v15356_v9, %v13101_v33 }
 0x8e3   :  { %v8035_v22 = vpop.eup %8034  ;;  %8046 = vrcp.f32 %v6211_v28  ;;  %v7674_v5 = vmul.f32 -1.442695, %v13207_v30  ;;  %v13217_v1 = vpop.permute.xlu0 %5213  ;;  %v5777_v32 = vadd.f32 %v5589_v39, %v5368_v21  ;;  %v15358_v28 = vld [vmem:[#allocation152_spill] sm:$0xff]  ;;  %v5372_v34 = vadd.f32 %v15359_v25, %v4963_v14  ;;  %v8441_v14 = vld [vmem:[#allocation3 + $0xb8] sm:$0xff] }
 0x8e4   :  { %v8037_v2 = vpop.eup %8036  ;;  %v13222_v17 = vmul.f32 %v8035_v22, %v13057_v47  ;;  %v13225_v26 = vadd.f32 %v13054_v61, %v5876_v7  ;;  %5277 = vrot.lane.b32.xlu0 %v5097_v11, %s8531_s15  ;;  %v4749_v53 = vadd.f32 %v15358_v28, %v13079_v6  ;;  %v5493_v47 = vmul.f32 %v15356_v9, %v13116_v56  ;;  %v13240_v6 = vld [vmem:[#allocation3 + $0x240] sm:$0xff] }
 0x8e5   :  { %v13232_v62 = vmul.f32 %v8037_v2, %v13060_v52  ;;  %5652 = vrot.lane.b32.xlu1 %v5489_v55, %s8532_s21  ;;  %8048 = vpow2.f32 %v7674_v5  ;;  %v5865_v21 = vmul.f32 %v13052_v24, %v5777_v32  ;;  %v5101_v56 = vmul.f32 %v15352_v8, %v13240_v6  ;;  %v13248_v39 = vld [vmem:[#allocation3 + $0x260] sm:$0xff] }
 0x8e6   :  { %15357 = vst [vmem:[#allocation78_spill] sm:$0xff] %v13222_v17  ;;  %v8039_v33 = vpop.eup %8038  ;;  %v7678_v11 = vmul.f32 -1.442695, %v13225_v26  ;;  %8050 = vrcp.f32 %v6215_v42  ;;  %v13244_v22 = vpop.permute.xlu1 %5221  ;;  %v4907_v5 = vmul.f32 %v8441_v14, %v15348_v18  ;;  %v15360_v42 = vld [vmem:[#allocation173_spill] sm:$0xff]  ;;  %v4967_v25 = vadd.f32 %v4903_v37, %v4749_v53  ;;  %v15362_v14 = vld [vmem:[#allocation222_spill] sm:$0xff] }
 0x8e7   :  { %v6219_v2 = vadd.f32 1.0, %v8039_v33  ;;  %v5597_v52 = vpop.permute.xlu0 %5596  ;;  %v13252_v55 = vadd.f32 %v13129_v57, %v5865_v21  ;;  %v4349_v28 = vadd.f32 %v15360_v42, %v12963_v46  ;;  %v4753_v33 = vadd.f32 %v15361_v27, %v13091_v3  ;;  %v15363_v46 = vld [vmem:[#allocation286_spill] sm:$0xff]  ;;  %v8442_v3 = vld [vmem:[#allocation3 + $0xc0] sm:$0xff]  ;;  %v13307_v17 = vld [vmem:[#allocation3 + $0x228] sm:$0xff] }
 0x8e8   :  { %8052 = vpow2.f32 %v7678_v11  ;;  %v5781_v32 = vadd.f32 %v5597_v52, %v5372_v34  ;;  %5660 = vrot.lane.b32.xlu0 %v5493_v47, %s8532_s21  ;;  %v4754_v11 = vadd.f32 %v15362_v14, %v13164_v15  ;;  %v5105_v47 = vmul.f32 %v15352_v8, %v13248_v39  ;;  %v8443_v14 = vld [vmem:[#allocation3 + $0xe0] sm:$0xff] }
 0x8e9   :  { %8054 = vrcp.f32 %v6219_v2  ;;  %5285 = vrot.lane.b32.xlu1 %v5101_v56, %s8531_s15  ;;  %v7667_v21 = vmul.f32 -1.442695, %v13252_v55  ;;  %v5376_v42 = vadd.f32 %v15363_v46, %v4967_v25  ;;  %v4908_v37 = vmul.f32 %v8442_v3, %v15299_v44 }
 0x8ea   :  { %v8041_v7 = vpop.eup %8040  ;;  %v5869_v34 = vmul.f32 %v13052_v24, %v5781_v32  ;;  %v5605_v2 = vpop.permute.xlu1 %5604  ;;  %v5497_v15 = vmul.f32 %v15356_v9, %v13144_v49  ;;  %v4971_v32 = vadd.f32 %v4907_v5, %v4753_v33  ;;  %v4912_v46 = vmul.f32 %v8443_v14, %v15299_v44 }
 0x8eb   :  { %v8043_v52 = vpop.eup %8042  ;;  %v6208_v54 = vadd.f32 1.0, %v8041_v7  ;;  %v13268_v53 = vpop.permute.xlu0 %5229  ;;  %8056 = vpow2.f32 %v7667_v21  ;;  %v5785_v3 = vadd.f32 %v5605_v2, %v5376_v42  ;;  %v5501_v33 = vmul.f32 %v15356_v9, %v13156_v31  ;;  %v13288_v21 = vld [vmem:[#allocation3 + $0x208] sm:$0xff] }
 0x8ec   :  { %v8045_v56 = vpop.eup %8044  ;;  %v13273_v27 = vmul.f32 %v8043_v52, %v13110_v41  ;;  %v13276_v8 = vadd.f32 %v13129_v57, %v5869_v34  ;;  %5293 = vrot.lane.b32.xlu0 %v5105_v47, %s8531_s15  ;;  %v5380_v41 = vadd.f32 %v13168_v20, %v4971_v32  ;;  %v15374_v20 = vld [vmem:[#allocation234_spill] sm:$0xff] }
 0x8ed   :  { %v8047_v7 = vpop.eup %8046  ;;  %8058 = vrcp.f32 %v6208_v54  ;;  %v6212_v25 = vadd.f32 1.0, %v8045_v56  ;;  %5668 = vrot.lane.b32.xlu1 %v5497_v15, %s8532_s21  ;;  %v15366_v54 = vld [vmem:[#allocation226_spill] sm:$0xff]  ;;  %v5873_v47 = vmul.f32 %v13052_v24, %v5785_v3  ;;  %v4972_v56 = vadd.f32 %v4908_v37, %v4754_v11 }
 0x8ee   :  { %15364 = vst [vmem:[#allocation81_spill] sm:$0xff] %v13273_v27  ;;  %v13282_v49 = vmul.f32 %v8047_v7, %v13113_v43  ;;  %v7671_v5 = vmul.f32 -1.442695, %v13276_v8  ;;  %v4758_v34 = vadd.f32 %v15366_v54, %v4349_v28  ;;  %v13292_v42 = vpop.permute.xlu1 %5207  ;;  %v15367_v43 = vld [vmem:[#allocation273_spill] sm:$0xff] }
 0x8ef   :  { %8060 = vrcp.f32 %v6212_v25  ;;  %v5613_v52 = vpop.permute.xlu0 %5612  ;;  %v5094_v2 = vmul.f32 %v15367_v43, %v13288_v21  ;;  %v8049_v15 = vpop.eup %8048  ;;  %v15368_v28 = vld [vmem:[#allocation177_spill] sm:$0xff]  ;;  %v13304_v54 = vadd.f32 %v13129_v57, %v5873_v47  ;;  %v5381_v37 = vadd.f32 %v13193_v48, %v4972_v56 }
 0x8f0   :  { %15365 = vst [vmem:[#allocation288_spill] sm:$0xff] %v13282_v49  ;;  %8062 = vpow2.f32 %v7671_v5  ;;  %v5789_v31 = vadd.f32 %v5613_v52, %v5380_v41  ;;  %5676 = vrot.lane.b32.xlu0 %v5501_v33, %s8532_s21  ;;  %v8051_v32 = vpop.eup %8050  ;;  %v4353_v7 = vadd.f32 %v15368_v28, %v12991_v35  ;;  %v15369_v25 = vld [vmem:[#allocation181_spill] sm:$0xff]  ;;  %v6216_v3 = vadd.f32 1.0, %v8049_v15 }
 0x8f1   :  { %v4357_v14 = vadd.f32 %v15369_v25, %v13008_v45  ;;  %5271 = vrot.lane.b32.xlu1 %v5094_v2, %s8531_s15  ;;  %v4976_v41 = vadd.f32 %v4912_v46, %v4758_v34  ;;  %v5098_v35 = vmul.f32 %v15367_v43, %v13307_v17  ;;  %v7675_v52 = vmul.f32 -1.442695, %v13304_v54 }
 0x8f2   :  { %v8053_v11 = vpop.eup %8052  ;;  %v5877_v5 = vmul.f32 %v13052_v24, %v5789_v31  ;;  %8064 = vrcp.f32 %v6216_v3  ;;  %v5615_v15 = vpop.permute.xlu1 %5614  ;;  %v5502_v2 = vmul.f32 %v15296_v36, %v13189_v38  ;;  %v13319_v28 = vmul.f32 %v8051_v32, %v13134_v13  ;;  %v8444_v31 = vld [vmem:[#allocation3 + $0x100] sm:$0xff] }
 0x8f3   :  { %v8055_v33 = vpop.eup %8054  ;;  %v6220_v45 = vadd.f32 1.0, %v8053_v11  ;;  %v13314_v47 = vpop.permute.xlu0 %5215  ;;  %v5790_v34 = vadd.f32 %v5615_v15, %v5381_v37  ;;  %v5385_v56 = vadd.f32 %v13217_v1, %v4976_v41  ;;  %v4916_v25 = vmul.f32 %v8444_v31, %v15299_v44  ;;  %v13337_v11 = vld [vmem:[#allocation3 + $0x248] sm:$0xff]  ;;  %v15370_v37 = vld [vmem:[#allocation230_spill] sm:$0xff] }
 0x8f4   :  { %v13322_v48 = vmul.f32 %v8055_v33, %v13151_v59  ;;  %v13325_v46 = vadd.f32 %v13129_v57, %v5877_v5  ;;  %5279 = vrot.lane.b32.xlu0 %v5098_v35, %s8531_s15  ;;  %v5506_v13 = vmul.f32 %v15296_v36, %v13204_v0  ;;  %v4762_v41 = vadd.f32 %v15370_v37, %v4353_v7  ;;  %v8445_v35 = vld [vmem:[#allocation3 + $0x120] sm:$0xff]  ;;  %v13352_v7 = vld [vmem:[#allocation3 + $0x268] sm:$0xff]  ;;  %v15373_v37 = vld [vmem:[#allocation166_spill] sm:$0xff] }
 0x8f5   :  { %8066 = vrcp.f32 %v6220_v45  ;;  %5678 = vrot.lane.b32.xlu1 %v5502_v2, %s8532_s21  ;;  %v8057_v38 = vpop.eup %8056  ;;  %v5878_v3 = vmul.f32 %v12893_v29, %v5790_v34  ;;  %v4920_v33 = vmul.f32 %v8445_v35, %v15299_v44  ;;  %v5102_v15 = vmul.f32 %v15367_v43, %v13337_v11 }
 0x8f6   :  { %8068 = vpow2.f32 %v7675_v52  ;;  %v7679_v32 = vmul.f32 -1.442695, %v13325_v46  ;;  %v6209_v5 = vadd.f32 1.0, %v8057_v38  ;;  %v13341_v0 = vpop.permute.xlu1 %5223  ;;  %v15372_v38 = vld [vmem:[#allocation71_spill] sm:$0xff]  ;;  %v4766_v59 = vadd.f32 %v15374_v20, %v4357_v14 }
 0x8f7   :  { %v8059_v1 = vpop.eup %8058  ;;  %v5623_v45 = vpop.permute.xlu0 %5622  ;;  %v13349_v2 = vadd.f32 %v12933_v50, %v5878_v3  ;;  %v4346_v35 = vadd.f32 %v15373_v37, %v15372_v38  ;;  %v4980_v27 = vadd.f32 %v4916_v25, %v4762_v41  ;;  %v8446_v38 = vld [vmem:[#allocation3 + $0xc8] sm:$0xff] }
 0x8f8   :  { %v13346_v52 = vmul.f32 %v8059_v1, %v13175_v4  ;;  %8070 = vpow2.f32 %v7679_v32  ;;  %v5794_v34 = vadd.f32 %v5623_v45, %v5385_v56  ;;  %5686 = vrot.lane.b32.xlu0 %v5506_v13, %s8532_s21  ;;  %v5106_v4 = vmul.f32 %v15367_v43, %v13352_v7 }
 0x8f9   :  { %v8061_v31 = vpop.eup %8060  ;;  %5287 = vrot.lane.b32.xlu1 %v5102_v15, %s8531_s15  ;;  %8072 = vrcp.f32 %v6209_v5  ;;  %v7680_v56 = vmul.f32 -1.442695, %v13349_v2  ;;  %v5389_v45 = vadd.f32 %v13244_v22, %v4980_v27  ;;  %v4909_v20 = vmul.f32 %v8446_v38, %v15323_v58  ;;  %v15376_v27 = vld [vmem:[#allocation295_spill] sm:$0xff]  ;;  %v15377_v15 = vld [vmem:[#allocation170_spill] sm:$0xff] }
 0x8fa   :  { %15371 = vst [vmem:[#allocation80_spill] sm:$0xff] %v13346_v52  ;;  %v8063_v32 = vpop.eup %8062  ;;  %v13361_v3 = vmul.f32 %v8061_v31, %v13182_v60  ;;  %v5882_v13 = vmul.f32 %v12893_v29, %v5794_v34  ;;  %v5631_v25 = vpop.permute.xlu1 %5630  ;;  %v5510_v43 = vmul.f32 %v15296_v36, %v13240_v6  ;;  %v4984_v41 = vadd.f32 %v4920_v33, %v4766_v59  ;;  %v15378_v31 = vld [vmem:[#allocation219_spill] sm:$0xff]  ;;  %v15379_v6 = vld [vmem:[#allocation70_spill] sm:$0xff] }
 0x8fb   :  { %v6213_v1 = vadd.f32 1.0, %v8063_v32  ;;  %v13367_v14 = vpop.permute.xlu0 %5231  ;;  %8074 = vpow2.f32 %v7680_v56  ;;  %v4350_v34 = vadd.f32 %v15377_v15, %v15376_v27  ;;  %v4755_v37 = vadd.f32 %v15378_v31, %v4346_v35  ;;  %v15380_v38 = vld [vmem:[#allocation174_spill] sm:$0xff]  ;;  %v8447_v15 = vld [vmem:[#allocation3 + $0xe8] sm:$0xff] }
 0x8fc   :  { %15375 = vst [vmem:[#allocation82_spill] sm:$0xff] %v13361_v3  ;;  %v13374_v5 = vadd.f32 %v12933_v50, %v5882_v13  ;;  %5295 = vrot.lane.b32.xlu0 %v5106_v4, %s8531_s15  ;;  %v8065_v22 = vpop.eup %8064  ;;  %v5798_v32 = vadd.f32 %v5631_v25, %v5389_v45  ;;  %v4354_v60 = vadd.f32 %v15380_v38, %v15379_v6  ;;  %v13387_v56 = vld [vmem:[#allocation3 + $0x210] sm:$0xff] }
 0x8fd   :  { %8076 = vrcp.f32 %v6213_v1  ;;  %5694 = vrot.lane.b32.xlu1 %v5510_v43, %s8532_s21  ;;  %v5393_v59 = vadd.f32 %v13268_v53, %v4984_v41  ;;  %v5514_v4 = vmul.f32 %v15296_v36, %v13248_v39  ;;  %v4973_v27 = vadd.f32 %v4909_v20, %v4755_v37  ;;  %v15381_v20 = vld [vmem:[#allocation223_spill] sm:$0xff] }
 0x8fe   :  { %v7684_v33 = vmul.f32 -1.442695, %v13374_v5  ;;  %v4913_v35 = vmul.f32 %v8447_v15, %v15323_v58  ;;  %v5886_v1 = vmul.f32 %v12893_v29, %v5798_v32  ;;  %v13391_v25 = vpop.permute.xlu1 %5209  ;;  %v5095_v53 = vmul.f32 %v15318_v12, %v13387_v56  ;;  %v8448_v32 = vld [vmem:[#allocation3 + $0x108] sm:$0xff] }
 0x8ff   :  { %v8067_v13 = vpop.eup %8066  ;;  %v5639_v45 = vpop.permute.xlu0 %5638  ;;  %v13396_v41 = vmul.f32 %v8065_v22, %v13207_v30  ;;  %v4759_v31 = vadd.f32 %v15381_v20, %v4350_v34  ;;  %v4917_v6 = vmul.f32 %v8448_v32, %v15323_v58  ;;  %v13408_v30 = vld [vmem:[#allocation3 + $0x230] sm:$0xff] }
 0x900   :  { %v8069_v43 = vpop.eup %8068  ;;  %v13399_v36 = vmul.f32 %v8067_v13, %v13225_v26  ;;  %8078 = vpow2.f32 %v7684_v33  ;;  %v5802_v39 = vadd.f32 %v5639_v45, %v5393_v59  ;;  %5702 = vrot.lane.b32.xlu0 %v5514_v4, %s8532_s21  ;;  %v13405_v38 = vadd.f32 %v12933_v50, %v5886_v1  ;;  %v15383_v20 = vld [vmem:[#allocation178_spill] sm:$0xff]  ;;  %v8449_v26 = vld [vmem:[#allocation3 + $0x128] sm:$0xff] }
 0x901   :  { %v6217_v37 = vadd.f32 1.0, %v8069_v43  ;;  %5273 = vrot.lane.b32.xlu1 %v5095_v53, %s8531_s15  ;;  %v5382_v59 = vadd.f32 %v13292_v42, %v4973_v27  ;;  %v5099_v34 = vmul.f32 %v15318_v12, %v13408_v30  ;;  %v5503_v45 = vmul.f32 %v15320_v63, %v13288_v21  ;;  %v15382_v43 = vld [vmem:[#allocation73_spill] sm:$0xff] }
 0x902   :  { %v8071_v22 = vpop.eup %8070  ;;  %v5890_v33 = vmul.f32 %v12893_v29, %v5802_v39  ;;  %v7688_v13 = vmul.f32 -1.442695, %v13405_v38  ;;  %v5617_v1 = vpop.permute.xlu1 %5616  ;;  %v4358_v32 = vadd.f32 %v15383_v20, %v15382_v43  ;;  %v4977_v42 = vadd.f32 %v4913_v35, %v4759_v31  ;;  %v15389_v20 = vld [vmem:[#allocation50_spill] sm:$0xff] }
 0x903   :  { %8080 = vrcp.f32 %v6217_v37  ;;  %v6221_v4 = vadd.f32 1.0, %v8071_v22  ;;  %v13417_v15 = vpop.permute.xlu0 %5217  ;;  %v8073_v53 = vpop.eup %8072  ;;  %v5791_v39 = vadd.f32 %v5617_v1, %v5382_v59  ;;  %v15384_v37 = vld [vmem:[#allocation227_spill] sm:$0xff]  ;;  %v4921_v52 = vmul.f32 %v8449_v26, %v15323_v58 }
 0x904   :  { %v13424_v27 = vadd.f32 %v12933_v50, %v5890_v33  ;;  %5281 = vrot.lane.b32.xlu0 %v5099_v34, %s8531_s15  ;;  %v4763_v22 = vadd.f32 %v15384_v37, %v4354_v60  ;;  %v5507_v21 = vmul.f32 %v15320_v63, %v13307_v17  ;;  %v5386_v35 = vadd.f32 %v13314_v47, %v4977_v42  ;;  %v13435_v33 = vld [vmem:[#allocation3 + $0x250] sm:$0xff] }
 0x905   :  { %8082 = vrcp.f32 %v6221_v4  ;;  %5680 = vrot.lane.b32.xlu1 %v5503_v45, %s8532_s21  ;;  %v8075_v3 = vpop.eup %8074  ;;  %v5879_v59 = vmul.f32 %v12895_v51, %v5791_v39  ;;  %v13438_v34 = vmul.f32 %v8073_v53, %v13252_v55  ;;  %v5103_v17 = vmul.f32 %v15318_v12, %v13435_v33  ;;  %v13451_v55 = vld [vmem:[#allocation3 + $0x270] sm:$0xff]  ;;  %v15390_v39 = vld [vmem:[#allocation231_spill] sm:$0xff] }
 0x906   :  { %8084 = vpow2.f32 %v7688_v13  ;;  %v7692_v31 = vmul.f32 -1.442695, %v13424_v27  ;;  %v6222_v26 = vadd.f32 1.0, %v8075_v3  ;;  %v4981_v4 = vadd.f32 %v4917_v6, %v4763_v22  ;;  %v13440_v45 = vpop.permute.xlu1 %5225  ;;  %v15387_v3 = vld [vmem:[#allocation47_spill] sm:$0xff]  ;;  %v15388_v6 = vld [vmem:[#allocation297_spill] sm:$0xff] }
 0x907   :  { %v8077_v60 = vpop.eup %8076  ;;  %15385 = vst [vmem:[#allocation8_spill] sm:$0xff] %v13438_v34  ;;  %v5625_v1 = vpop.permute.xlu0 %5624  ;;  %v13448_v13 = vadd.f32 %v12967_v16, %v5879_v59  ;;  %v3946_v53 = vadd.f32 %v15388_v6, %v15387_v3  ;;  %v13457_v42 = vadd.f32 %v12994_v19, %v15389_v20  ;;  %v4767_v37 = vadd.f32 %v15390_v39, %v4358_v32  ;;  %v15392_v19 = vld [vmem:[#allocation171_spill] sm:$0xff] }
 0x908   :  { %v13445_v47 = vmul.f32 %v8077_v60, %v13276_v8  ;;  %8086 = vpow2.f32 %v7692_v31  ;;  %v5795_v43 = vadd.f32 %v5625_v1, %v5386_v35  ;;  %5688 = vrot.lane.b32.xlu0 %v5507_v21, %s8532_s21  ;;  %v5107_v8 = vmul.f32 %v15318_v12, %v13451_v55  ;;  %v15391_v60 = vld [vmem:[#allocation75_spill] sm:$0xff] }
 0x909   :  { %5289 = vrot.lane.b32.xlu1 %v5103_v17, %s8531_s15  ;;  %v5390_v35 = vadd.f32 %v13341_v0, %v4981_v4  ;;  %v7681_v31 = vmul.f32 -1.442695, %v13448_v13  ;;  %v4347_v1 = vadd.f32 %v15392_v19, %v15391_v60  ;;  %8088 = vrcp.f32 %v6222_v26  ;;  %v15394_v26 = vld [vmem:[#allocation179_spill] sm:$0xff]  ;;  %v8450_v60 = vld [vmem:[#allocation3 + $0xd0] sm:$0xff] }
 0x90a   :  { %15386 = vst [vmem:[#allocation9_spill] sm:$0xff] %v13445_v47  ;;  %v8079_v22 = vpop.eup %8078  ;;  %v5883_v59 = vmul.f32 %v12895_v51, %v5795_v43  ;;  %v5633_v17 = vpop.permute.xlu1 %5632  ;;  %v5511_v12 = vmul.f32 %v15320_v63, %v13337_v11  ;;  %v4985_v6 = vadd.f32 %v4921_v52, %v4767_v37  ;;  %v15393_v43 = vld [vmem:[#allocation175_spill] sm:$0xff]  ;;  %v4910_v19 = vmul.f32 %v8450_v60, %v15342_v23 }
 0x90b   :  { %v6226_v32 = vadd.f32 1.0, %v8079_v22  ;;  %v13470_v3 = vpop.permute.xlu0 %5233  ;;  %8090 = vpow2.f32 %v7681_v31  ;;  %v5799_v0 = vadd.f32 %v5633_v17, %v5390_v35  ;;  %v4351_v39 = vadd.f32 %v15393_v43, %v12988_v40  ;;  %v13488_v35 = vld [vmem:[#allocation3 + $0x218] sm:$0xff]  ;;  %v15395_v31 = vld [vmem:[#allocation224_spill] sm:$0xff] }
 0x90c   :  { %v13475_v20 = vadd.f32 %v12967_v16, %v5883_v59  ;;  %5297 = vrot.lane.b32.xlu0 %v5107_v8, %s8531_s15  ;;  %v4355_v22 = vadd.f32 %v15394_v26, %v3946_v53  ;;  %v5394_v11 = vadd.f32 %v13367_v14, %v4985_v6  ;;  %v5515_v8 = vmul.f32 %v15320_v63, %v13352_v7  ;;  %v15397_v6 = vld [vmem:[#allocation275_spill] sm:$0xff] }
 0x90d   :  { %v8081_v4 = vpop.eup %8080  ;;  %8092 = vrcp.f32 %v6226_v32  ;;  %5696 = vrot.lane.b32.xlu1 %v5511_v12, %s8532_s21  ;;  %v5887_v37 = vmul.f32 %v12895_v51, %v5799_v0  ;;  %v4756_v53 = vadd.f32 %v15395_v31, %v4347_v1  ;;  %v8451_v32 = vld [vmem:[#allocation3 + $0xf0] sm:$0xff]  ;;  %v5096_v0 = vmul.f32 %v15397_v6, %v13488_v35  ;;  %v13509_v21 = vld [vmem:[#allocation3 + $0x238] sm:$0xff] }
 0x90e   :  { %v7685_v52 = vmul.f32 -1.442695, %v13475_v20  ;;  %v13492_v59 = vmul.f32 %v8081_v4, %v13304_v54  ;;  %v4914_v17 = vmul.f32 %v8451_v32, %v15342_v23  ;;  %v13495_v14 = vpop.permute.xlu1 %5211  ;;  %v15399_v54 = vld [vmem:[#allocation228_spill] sm:$0xff]  ;;  %v8452_v31 = vld [vmem:[#allocation3 + $0x110] sm:$0xff] }
 0x90f   :  { %v8083_v40 = vpop.eup %8082  ;;  %v5641_v12 = vpop.permute.xlu0 %5640  ;;  %v13503_v7 = vadd.f32 %v12967_v16, %v5887_v37  ;;  %v4760_v4 = vadd.f32 %v15399_v54, %v4351_v39  ;;  %v4974_v60 = vadd.f32 %v4910_v19, %v4756_v53  ;;  %v4918_v32 = vmul.f32 %v8452_v31, %v15342_v23 }
 0x910   :  { %15396 = vst [vmem:[#allocation10_spill] sm:$0xff] %v13492_v59  ;;  %v8085_v43 = vpop.eup %8084  ;;  %v13500_v63 = vmul.f32 %v8083_v40, %v13325_v46  ;;  %8094 = vpow2.f32 %v7685_v52  ;;  %v5803_v1 = vadd.f32 %v5641_v12, %v5394_v11  ;;  %5704 = vrot.lane.b32.xlu0 %v5515_v8, %s8532_s21  ;;  %v5100_v39 = vmul.f32 %v15397_v6, %v13509_v21  ;;  %v15400_v12 = vld [vmem:[#allocation283_spill] sm:$0xff]  ;;  %v15408_v59 = vld [vmem:[#allocation236_spill] sm:$0xff] }
 0x911   :  { %v6230_v26 = vadd.f32 1.0, %v8085_v43  ;;  %5275 = vrot.lane.b32.xlu1 %v5096_v0, %s8531_s15  ;;  %v7689_v37 = vmul.f32 -1.442695, %v13503_v7  ;;  %v5383_v8 = vadd.f32 %v13391_v25, %v4974_v60  ;;  %v5504_v0 = vmul.f32 %v15400_v12, %v13387_v56  ;;  %v15401_v43 = vld [vmem:[#allocation232_spill] sm:$0xff]  ;;  %v15404_v25 = vld [vmem:[#allocation183_spill] sm:$0xff] }
 0x912   :  { %15398 = vst [vmem:[#allocation11_spill] sm:$0xff] %v13500_v63  ;;  %v8087_v46 = vpop.eup %8086  ;;  %v5891_v11 = vmul.f32 %v12895_v51, %v5803_v1  ;;  %v5619_v53 = vpop.permute.xlu1 %5618  ;;  %v4764_v54 = vadd.f32 %v15401_v43, %v4355_v22  ;;  %v4978_v31 = vadd.f32 %v4914_v17, %v4760_v4  ;;  %v4359_v60 = vadd.f32 %v15404_v25, %v13457_v42  ;;  %v8454_v25 = vld [vmem:[#allocation3 + $0x160] sm:$0xff] }
 0x913   :  { %8096 = vrcp.f32 %v6230_v26  ;;  %v6234_v19 = vadd.f32 1.0, %v8087_v46  ;;  %v13518_v40 = vpop.permute.xlu0 %5219  ;;  %v8089_v1 = vpop.eup %8088  ;;  %v15402_v26 = vld [vmem:[#allocation46_spill] sm:$0xff]  ;;  %v5792_v47 = vadd.f32 %v5619_v53, %v5383_v8 }
 0x914   :  { %8098 = vpow2.f32 %v7689_v37  ;;  %v13524_v52 = vadd.f32 %v12967_v16, %v5891_v11  ;;  %5283 = vrot.lane.b32.xlu0 %v5100_v39, %s8531_s15  ;;  %v15403_v46 = vld [vmem:[#allocation74_spill] sm:$0xff]  ;;  %v5387_v22 = vadd.f32 %v13417_v15, %v4978_v31  ;;  %v4982_v17 = vadd.f32 %v4918_v32, %v4764_v54  ;;  %v13538_v11 = vld [vmem:[#allocation3 + $0x258] sm:$0xff]  ;;  %v15405_v31 = vld [vmem:[#allocation72_spill] sm:$0xff] }
 0x915   :  { %v13529_v34 = vadd.f32 %v15403_v46, %v15402_v26  ;;  %8100 = vrcp.f32 %v6234_v19  ;;  %5682 = vrot.lane.b32.xlu1 %v5504_v0, %s8532_s21  ;;  %v8091_v56 = vpop.eup %8090  ;;  %v5508_v37 = vmul.f32 %v15400_v12, %v13408_v30  ;;  %v8453_v26 = vld [vmem:[#allocation3 + $0x130] sm:$0xff]  ;;  %v5880_v19 = vmul.f32 %v12935_v10, %v5792_v47  ;;  %v13546_v32 = vld [vmem:[#allocation3 + $0x278] sm:$0xff]  ;;  %v15406_v47 = vld [vmem:[#allocation168_spill] sm:$0xff] }
 0x916   :  { %v7693_v4 = vmul.f32 -1.442695, %v13524_v52  ;;  %v6223_v43 = vadd.f32 1.0, %v8091_v56  ;;  %v4922_v42 = vmul.f32 %v8453_v26, %v15342_v23  ;;  %v13542_v53 = vpop.permute.xlu1 %5227  ;;  %v5104_v15 = vmul.f32 %v15397_v6, %v13538_v11  ;;  %v15407_v56 = vld [vmem:[#allocation138_spill] sm:$0xff] }
 0x917   :  { %v8093_v39 = vpop.eup %8092  ;;  %v5627_v8 = vpop.permute.xlu0 %5626  ;;  %v13549_v0 = vmul.f32 %v8089_v1, %v13349_v2  ;;  %v4348_v46 = vadd.f32 %v15406_v47, %v15405_v31  ;;  %v13558_v26 = vmul.f32 %v8454_v25, %v15407_v56  ;;  %v4768_v63 = vadd.f32 %v15408_v59, %v4359_v60  ;;  %v15411_v31 = vld [vmem:[#allocation221_spill] sm:$0xff]  ;;  %v8455_v25 = vld [vmem:[#allocation3 + $0xd8] sm:$0xff] }
 0x918   :  { %v13552_v30 = vmul.f32 %v8093_v39, %v13374_v5  ;;  %8102 = vpow2.f32 %v7693_v4  ;;  %v5796_v54 = vadd.f32 %v5627_v8, %v5387_v22  ;;  %5690 = vrot.lane.b32.xlu0 %v5508_v37, %s8532_s21  ;;  %v13562_v49 = vadd.f32 %v13054_v61, %v5880_v19  ;;  %v15409_v8 = vld [vmem:[#allocation296_spill] sm:$0xff] }
 0x919   :  { %5291 = vrot.lane.b32.xlu1 %v5104_v15, %s8531_s15  ;;  %v5391_v5 = vadd.f32 %v13440_v45, %v4982_v17  ;;  %v5108_v22 = vmul.f32 %v15397_v6, %v13546_v32  ;;  %8104 = vrcp.f32 %v6223_v43  ;;  %v5512_v19 = vmul.f32 %v15400_v12, %v13435_v33  ;;  %v15410_v45 = vld [vmem:[#allocation172_spill] sm:$0xff] }
 0x91a   :  { %v8095_v2 = vpop.eup %8094  ;;  %v5884_v1 = vmul.f32 %v12935_v10, %v5796_v54  ;;  %v7682_v59 = vmul.f32 -1.442695, %v13562_v49  ;;  %v5635_v39 = vpop.permute.xlu1 %5634  ;;  %v4352_v17 = vadd.f32 %v15410_v45, %v15409_v8  ;;  %v4986_v15 = vadd.f32 %v4922_v42, %v4768_v63 }
 0x91b   :  { %v6227_v37 = vadd.f32 1.0, %v8095_v2  ;;  %v13572_v60 = vpop.permute.xlu0 %5235  ;;  %v5800_v6 = vadd.f32 %v5635_v39, %v5391_v5  ;;  %v4757_v47 = vadd.f32 %v15411_v31, %v4348_v46  ;;  %v4911_v2 = vmul.f32 %v8455_v25, %v15348_v18 }
 0x91c   :  { %v13579_v54 = vadd.f32 %v13054_v61, %v5884_v1  ;;  %5299 = vrot.lane.b32.xlu0 %v5108_v22, %s8531_s15  ;;  %v5516_v33 = vmul.f32 %v15400_v12, %v13451_v55  ;;  %v5395_v63 = vadd.f32 %v13470_v3, %v4986_v15  ;;  %v5505_v55 = vmul.f32 %v15356_v9, %v13488_v35 }
 0x91d   :  { %v8097_v43 = vpop.eup %8096  ;;  %8106 = vrcp.f32 %v6227_v37  ;;  %5698 = vrot.lane.b32.xlu1 %v5512_v19, %s8532_s21  ;;  %v5888_v5 = vmul.f32 %v12935_v10, %v5800_v6  ;;  %v8456_v37 = vld [vmem:[#allocation3 + $0xf8] sm:$0xff]  ;;  %v15413_v6 = vld [vmem:[#allocation225_spill] sm:$0xff]  ;;  %v4975_v31 = vadd.f32 %v4911_v2, %v4757_v47  ;;  %v5509_v35 = vmul.f32 %v15356_v9, %v13509_v21 }
 0x91e   :  { %v8099_v8 = vpop.eup %8098  ;;  %8108 = vpow2.f32 %v7682_v59  ;;  %v7686_v42 = vmul.f32 -1.442695, %v13579_v54  ;;  %v13591_v46 = vmul.f32 %v8097_v43, %v13405_v38  ;;  %v4915_v39 = vmul.f32 %v8456_v37, %v15348_v18  ;;  %v13594_v45 = vpop.permute.xlu1 %5237  ;;  %v15412_v38 = vld [vmem:[#allocation176_spill] sm:$0xff] }
 0x91f   :  { %v8101_v1 = vpop.eup %8100  ;;  %v6231_v22 = vadd.f32 1.0, %v8099_v8  ;;  %v5643_v19 = vpop.permute.xlu0 %5642  ;;  %v13602_v12 = vadd.f32 %v13054_v61, %v5888_v5  ;;  %v4356_v15 = vadd.f32 %v15412_v38, %v13529_v34  ;;  %v4761_v43 = vadd.f32 %v15413_v6, %v4352_v17  ;;  %v15414_v5 = vld [vmem:[#allocation48_spill] sm:$0xff]  ;;  %v15416_v38 = vld [vmem:[#allocation229_spill] sm:$0xff] }
 0x920   :  { %v13599_v3 = vmul.f32 %v8101_v1, %v13424_v27  ;;  %8110 = vpow2.f32 %v7686_v42  ;;  %v5804_v59 = vadd.f32 %v5643_v19, %v5395_v63  ;;  %5706 = vrot.lane.b32.xlu0 %v5516_v33, %s8532_s21  ;;  %v5384_v34 = vadd.f32 %v13495_v14, %v4975_v31  ;;  %v8457_v42 = vld [vmem:[#allocation3 + $0x118] sm:$0xff]  ;;  %v15415_v1 = vld [vmem:[#allocation77_spill] sm:$0xff] }
 0x921   :  { %5684 = vrot.lane.b32.xlu1 %v5505_v55, %s8532_s21  ;;  %8112 = vrcp.f32 %v6231_v22  ;;  %v7690_v25 = vmul.f32 -1.442695, %v13602_v12  ;;  %v4919_v17 = vmul.f32 %v8457_v42, %v15348_v18  ;;  %v5513_v21 = vmul.f32 %v15356_v9, %v13538_v11  ;;  %v8458_v55 = vld [vmem:[#allocation3 + $0x180] sm:$0xff] }
 0x922   :  { %v8103_v27 = vpop.eup %8102  ;;  %v5892_v8 = vmul.f32 %v12935_v10, %v5804_v59  ;;  %v5621_v2 = vpop.permute.xlu1 %5620  ;;  %v3951_v22 = vadd.f32 %v15415_v1, %v15414_v5  ;;  %v4979_v37 = vadd.f32 %v4915_v39, %v4761_v43  ;;  %v3892_v59 = vmul.f32 %v8458_v55, %v15407_v56  ;;  %v15417_v11 = vld [vmem:[#allocation52_spill] sm:$0xff]  ;;  %v8459_v1 = vld [vmem:[#allocation3 + $0x138] sm:$0xff] }
 0x923   :  { %v6235_v63 = vadd.f32 1.0, %v8103_v27  ;;  %v13617_v47 = vpop.permute.xlu0 %5245  ;;  %8114 = vpow2.f32 %v7690_v25  ;;  %v8105_v14 = vpop.eup %8104  ;;  %v4765_v6 = vadd.f32 %v15416_v38, %v4356_v15  ;;  %v5793_v31 = vadd.f32 %v5621_v2, %v5384_v34 }
 0x924   :  { %v13624_v19 = vadd.f32 %v13054_v61, %v5892_v8  ;;  %5692 = vrot.lane.b32.xlu0 %v5509_v35, %s8532_s21  ;;  %v3952_v27 = vadd.f32 %v13558_v26, %v15417_v11  ;;  %v5388_v39 = vadd.f32 %v13518_v40, %v4979_v37  ;;  %v5517_v35 = vmul.f32 %v15356_v9, %v13546_v32  ;;  %v15418_v8 = vld [vmem:[#allocation180_spill] sm:$0xff]  ;;  %v15419_v32 = vld [vmem:[#allocation185_spill] sm:$0xff] }
 0x925   :  { %8116 = vrcp.f32 %v6235_v63  ;;  %5700 = vrot.lane.b32.xlu1 %v5513_v21, %s8532_s21  ;;  %v4360_v42 = vadd.f32 %v15418_v8, %v3951_v22  ;;  %v4983_v5 = vadd.f32 %v4919_v17, %v4765_v6  ;;  %v4923_v15 = vmul.f32 %v8459_v1, %v15348_v18  ;;  %v15420_v22 = vld [vmem:[#allocation56_spill] sm:$0xff]  ;;  %v15422_v1 = vld [vmem:[#allocation42_spill] sm:$0xff] }
 0x926   :  { %v7694_v43 = vmul.f32 -1.442695, %v13624_v19  ;;  %v5881_v63 = vmul.f32 %v13052_v24, %v5793_v31  ;;  %v13639_v2 = vpop.permute.xlu1 %5253  ;;  %v13642_v40 = vmul.f32 %v8105_v14, %v13448_v13  ;;  %v4361_v17 = vadd.f32 %v15419_v32, %v3952_v27  ;;  %v15421_v31 = vld [vmem:[#allocation233_spill] sm:$0xff]  ;;  %v8461_v32 = vld [vmem:[#allocation3 + $0x1a0] sm:$0xff] }
 0x927   :  { %v8107_v25 = vpop.eup %8106  ;;  %v5629_v34 = vpop.permute.xlu0 %5628  ;;  %v3956_v37 = vadd.f32 %v3892_v59, %v15420_v22  ;;  %v4769_v11 = vadd.f32 %v15421_v31, %v4360_v42  ;;  %v5392_v13 = vadd.f32 %v13542_v53, %v4983_v5  ;;  %v15423_v42 = vld [vmem:[#allocation134_spill] sm:$0xff]  ;;  %v3896_v22 = vmul.f32 %v8461_v32, %v15407_v56  ;;  %v15435_v14 = vld [vmem:[#allocation193_spill] sm:$0xff] }
 0x928   :  { %v8109_v26 = vpop.eup %8108  ;;  %v13645_v21 = vmul.f32 %v8107_v25, %v13475_v20  ;;  %8118 = vpow2.f32 %v7694_v43  ;;  %v5797_v9 = vadd.f32 %v5629_v34, %v5388_v39  ;;  %5708 = vrot.lane.b32.xlu0 %v5517_v35, %s8532_s21  ;;  %v13651_v38 = vadd.f32 %v13129_v57, %v5881_v63  ;;  %v8460_v43 = vld [vmem:[#allocation3 + $0x180] sm:$0xff] }
 0x929   :  { %v6224_v55 = vadd.f32 1.0, %v8109_v26  ;;  %v4924_v27 = vmul.f32 %v8460_v43, %v15299_v44  ;;  %v13664_v63 = vadd.f32 %v15423_v42, %v15422_v1  ;;  %v4987_v53 = vadd.f32 %v4923_v15, %v4769_v11  ;;  %v15425_v26 = vld [vmem:[#allocation189_spill] sm:$0xff] }
 0x92a   :  { %v8111_v6 = vpop.eup %8110  ;;  %v5885_v20 = vmul.f32 %v13052_v24, %v5797_v9  ;;  %v7683_v59 = vmul.f32 -1.442695, %v13651_v38  ;;  %v5637_v25 = vpop.permute.xlu1 %5636  ;;  %v4365_v9 = vadd.f32 %v15425_v26, %v3956_v37 }
 0x92b   :  { %8120 = vrcp.f32 %v6224_v55  ;;  %v6228_v39 = vadd.f32 1.0, %v8111_v6  ;;  %v13660_v35 = vpop.permute.xlu0 %5261  ;;  %v8113_v8 = vpop.eup %8112  ;;  %15424 = vst [vmem:[#allocation12_spill] sm:$0xff] %v13664_v63  ;;  %v5801_v34 = vadd.f32 %v5637_v25, %v5392_v13  ;;  %v15426_v55 = vld [vmem:[#allocation238_spill] sm:$0xff]  ;;  %v5396_v43 = vadd.f32 %v13572_v60, %v4987_v53  ;;  %v8462_v25 = vld [vmem:[#allocation3 + $0x1a0] sm:$0xff]  ;;  %v15429_v53 = vld [vmem:[#allocation43_spill] sm:$0xff] }
 0x92c   :  { %v13667_v5 = vadd.f32 %v13129_v57, %v5885_v20  ;;  %v4770_v6 = vadd.f32 %v15426_v55, %v4361_v17  ;;  %v13676_v20 = vmul.f32 %v8113_v8, %v13503_v7  ;;  %v4928_v42 = vmul.f32 %v8462_v25, %v15299_v44  ;;  %v8463_v8 = vld [vmem:[#allocation3 + $0x168] sm:$0xff]  ;;  %v8464_v55 = vld [vmem:[#allocation3 + $0x1c0] sm:$0xff] }
 0x92d   :  { %8122 = vrcp.f32 %v6228_v39  ;;  %v8115_v31 = vpop.eup %8114  ;;  %v5889_v15 = vmul.f32 %v13052_v24, %v5801_v34  ;;  %v15430_v34 = vld [vmem:[#allocation133_spill] sm:$0xff] }
 0x92e   :  { %8124 = vpow2.f32 %v7683_v59  ;;  %v7687_v1 = vmul.f32 -1.442695, %v13667_v5  ;;  %15427 = vst [vmem:[#allocation17_spill] sm:$0xff] %v13676_v20  ;;  %v6232_v13 = vadd.f32 1.0, %v8115_v31  ;;  %v4988_v37 = vadd.f32 %v4924_v27, %v4770_v6  ;;  %v13679_v17 = vpop.permute.xlu1 %5239  ;;  %v15432_v27 = vld [vmem:[#allocation136_spill] sm:$0xff]  ;;  %v15433_v31 = vld [vmem:[#allocation242_spill] sm:$0xff] }
 0x92f   :  { %v8117_v11 = vpop.eup %8116  ;;  %v5645_v26 = vpop.permute.xlu0 %5644  ;;  %v13685_v60 = vadd.f32 %v13129_v57, %v5889_v15  ;;  %v13689_v7 = vadd.f32 %v15430_v34, %v15429_v53  ;;  %v3889_v32 = vmul.f32 %v8463_v8, %v15432_v27  ;;  %v3900_v6 = vmul.f32 %v8464_v55, %v15407_v56  ;;  %v15434_v53 = vld [vmem:[#allocation60_spill] sm:$0xff] }
 0x930   :  { %v13682_v39 = vmul.f32 %v8117_v11, %v13524_v52  ;;  %8126 = vpow2.f32 %v7687_v1  ;;  %v5805_v59 = vadd.f32 %v5645_v26, %v5396_v43  ;;  %v4774_v25 = vadd.f32 %v15433_v31, %v4365_v9  ;;  %v8465_v11 = vld [vmem:[#allocation3 + $0x188] sm:$0xff]  ;;  %v15436_v43 = vld [vmem:[#allocation62_spill] sm:$0xff] }
 0x931   :  { %15431 = vst [vmem:[#allocation14_spill] sm:$0xff] %v13689_v7  ;;  %v5397_v52 = vadd.f32 %v13594_v45, %v4988_v37  ;;  %v7691_v1 = vmul.f32 -1.442695, %v13685_v60  ;;  %v3893_v26 = vmul.f32 %v8465_v11, %v15432_v27  ;;  %v3960_v34 = vadd.f32 %v3896_v22, %v15434_v53  ;;  %v8466_v11 = vld [vmem:[#allocation3 + $0x1c0] sm:$0xff] }
 0x932   :  { %15428 = vst [vmem:[#allocation13_spill] sm:$0xff] %v13682_v39  ;;  %v8119_v33 = vpop.eup %8118  ;;  %v5893_v15 = vmul.f32 %v13052_v24, %v5805_v59  ;;  %8128 = vrcp.f32 %v6232_v13  ;;  %v5647_v9 = vpop.permute.xlu1 %5646  ;;  %v4992_v31 = vadd.f32 %v4928_v42, %v4774_v25  ;;  %v3964_v63 = vadd.f32 %v3900_v6, %v15436_v43  ;;  %v15437_v13 = vld [vmem:[#allocation49_spill] sm:$0xff]  ;;  %v8467_v6 = vld [vmem:[#allocation3 + $0x1e0] sm:$0xff]  ;;  %v15451_v39 = vld [vmem:[#allocation239_spill] sm:$0xff] }
 0x933   :  { %v6236_v8 = vadd.f32 1.0, %v8119_v33  ;;  %v13701_v55 = vpop.permute.xlu0 %5247  ;;  %8130 = vpow2.f32 %v7691_v1  ;;  %v5806_v37 = vadd.f32 %v5647_v9, %v5397_v52  ;;  %v4369_v4 = vadd.f32 %v15435_v14, %v3960_v34  ;;  %v15439_v9 = vld [vmem:[#allocation246_spill] sm:$0xff]  ;;  %v8471_v24 = vld [vmem:[#allocation3 + $0x1c8] sm:$0xff] }
 0x934   :  { %v13704_v45 = vadd.f32 %v13129_v57, %v5893_v15  ;;  %v4932_v22 = vmul.f32 %v8466_v11, %v15299_v44  ;;  %v3953_v33 = vadd.f32 %v3889_v32, %v15437_v13  ;;  %v5401_v53 = vadd.f32 %v13617_v47, %v4992_v31  ;;  %v15438_v15 = vld [vmem:[#allocation197_spill] sm:$0xff]  ;;  %v8468_v11 = vld [vmem:[#allocation3 + $0x170] sm:$0xff] }
 0x935   :  { %v8121_v59 = vpop.eup %8120  ;;  %8132 = vrcp.f32 %v6236_v8  ;;  %v5894_v25 = vmul.f32 %v12893_v29, %v5806_v37  ;;  %v4373_v52 = vadd.f32 %v15438_v15, %v3964_v63  ;;  %v4778_v7 = vadd.f32 %v15439_v9, %v4369_v4  ;;  %v15440_v37 = vld [vmem:[#allocation182_spill] sm:$0xff] }
 0x936   :  { %v7695_v42 = vmul.f32 -1.442695, %v13704_v45  ;;  %v13716_v14 = vmul.f32 %v8121_v59, %v13562_v49  ;;  %v4936_v43 = vmul.f32 %v8467_v6, %v15299_v44  ;;  %v13719_v8 = vpop.permute.xlu1 %5255  ;;  %v4362_v4 = vadd.f32 %v15440_v37, %v3953_v33  ;;  %v15441_v49 = vld [vmem:[#allocation139_spill] sm:$0xff]  ;;  %v15442_v6 = vld [vmem:[#allocation250_spill] sm:$0xff]  ;;  %v8469_v33 = vld [vmem:[#allocation3 + $0x188] sm:$0xff] }
 0x937   :  { %v8123_v1 = vpop.eup %8122  ;;  %v5655_v34 = vpop.permute.xlu0 %5654  ;;  %v13725_v31 = vadd.f32 %v12933_v50, %v5894_v25  ;;  %v3890_v59 = vmul.f32 %v8468_v11, %v15441_v49  ;;  %v4996_v15 = vadd.f32 %v4932_v22, %v4778_v7  ;;  %v4782_v44 = vadd.f32 %v15442_v6, %v4373_v52  ;;  %v15443_v22 = vld [vmem:[#allocation53_spill] sm:$0xff] }
 0x938   :  { %v8125_v32 = vpop.eup %8124  ;;  %v13722_v47 = vmul.f32 %v8123_v1, %v13579_v54  ;;  %8134 = vpow2.f32 %v7695_v42  ;;  %v5810_v63 = vadd.f32 %v5655_v34, %v5401_v53  ;;  %v4925_v1 = vmul.f32 %v8469_v33, %v15323_v58  ;;  %v8470_v11 = vld [vmem:[#allocation3 + $0x1a8] sm:$0xff]  ;;  %v15445_v33 = vld [vmem:[#allocation186_spill] sm:$0xff] }
 0x939   :  { %v6225_v13 = vadd.f32 1.0, %v8125_v32  ;;  %v7696_v57 = vmul.f32 -1.442695, %v13725_v31  ;;  %v5405_v53 = vadd.f32 %v13639_v2, %v4996_v15  ;;  %v3957_v32 = vadd.f32 %v3893_v26, %v15443_v22  ;;  %v8472_v22 = vld [vmem:[#allocation3 + $0x1a8] sm:$0xff] }
 0x93a   :  { %v8127_v9 = vpop.eup %8126  ;;  %v5898_v54 = vmul.f32 %v12893_v29, %v5810_v63  ;;  %v5663_v7 = vpop.permute.xlu1 %5662  ;;  %v5000_v52 = vadd.f32 %v4936_v43, %v4782_v44  ;;  %v3901_v20 = vmul.f32 %v8471_v24, %v15432_v27 }
 0x93b   :  { %8136 = vrcp.f32 %v6225_v13  ;;  %v6229_v25 = vadd.f32 1.0, %v8127_v9  ;;  %v13736_v34 = vpop.permute.xlu0 %5263  ;;  %v3897_v13 = vmul.f32 %v8470_v11, %v15432_v27  ;;  %v15444_v9 = vld [vmem:[#allocation235_spill] sm:$0xff]  ;;  %v5814_v2 = vadd.f32 %v5663_v7, %v5405_v53 }
 0x93c   :  { %8138 = vpow2.f32 %v7696_v57  ;;  %v13740_v37 = vadd.f32 %v12933_v50, %v5898_v54  ;;  %v8129_v63 = vpop.eup %8128  ;;  %v4771_v6 = vadd.f32 %v15444_v9, %v4362_v4  ;;  %v4366_v42 = vadd.f32 %v15445_v33, %v3957_v32  ;;  %v15446_v32 = vld [vmem:[#allocation44_spill] sm:$0xff] }
 0x93d   :  { %8140 = vrcp.f32 %v6229_v25  ;;  %v8131_v15 = vpop.eup %8130  ;;  %v5409_v44 = vadd.f32 %v13660_v35, %v5000_v52  ;;  %v4929_v11 = vmul.f32 %v8472_v22, %v15323_v58  ;;  %v5902_v4 = vmul.f32 %v12893_v29, %v5814_v2  ;;  %v15447_v52 = vld [vmem:[#allocation135_spill] sm:$0xff] }
 0x93e   :  { %v7700_v57 = vmul.f32 -1.442695, %v13740_v37  ;;  %v6233_v43 = vadd.f32 1.0, %v8131_v15  ;;  %v4989_v54 = vadd.f32 %v4925_v1, %v4771_v6  ;;  %v13750_v53 = vpop.permute.xlu1 %5241  ;;  %v13753_v7 = vmul.f32 %v8129_v63, %v13602_v12  ;;  %v15449_v1 = vld [vmem:[#allocation54_spill] sm:$0xff]  ;;  %v15450_v15 = vld [vmem:[#allocation57_spill] sm:$0xff] }
 0x93f   :  { %v8133_v26 = vpop.eup %8132  ;;  %v5671_v25 = vpop.permute.xlu0 %5670  ;;  %v13760_v9 = vadd.f32 %v15447_v52, %v15446_v32  ;;  %v3954_v6 = vadd.f32 %v3890_v59, %v15449_v1  ;;  %v3961_v33 = vadd.f32 %v3897_v13, %v15450_v15  ;;  %v13765_v2 = vadd.f32 %v12933_v50, %v5902_v4  ;;  %v8473_v32 = vld [vmem:[#allocation3 + $0x190] sm:$0xff] }
 0x940   :  { %v13756_v24 = vmul.f32 %v8133_v26, %v13624_v19  ;;  %8142 = vpow2.f32 %v7700_v57  ;;  %v5818_v35 = vadd.f32 %v5671_v25, %v5409_v44  ;;  %v4775_v12 = vadd.f32 %v15451_v39, %v4366_v42  ;;  %v15452_v57 = vld [vmem:[#allocation61_spill] sm:$0xff]  ;;  %v15454_v15 = vld [vmem:[#allocation194_spill] sm:$0xff] }
 0x941   :  { %15448 = vst [vmem:[#allocation15_spill] sm:$0xff] %v13760_v9  ;;  %v5398_v63 = vadd.f32 %v13679_v17, %v4989_v54  ;;  %v3965_v26 = vadd.f32 %v3901_v20, %v15452_v57  ;;  %8144 = vrcp.f32 %v6233_v43  ;;  %v7704_v59 = vmul.f32 -1.442695, %v13765_v2  ;;  %v8474_v43 = vld [vmem:[#allocation3 + $0x1c8] sm:$0xff] }
 0x942   :  { %v8135_v22 = vpop.eup %8134  ;;  %v5906_v19 = vmul.f32 %v12893_v29, %v5818_v35  ;;  %v5649_v4 = vpop.permute.xlu1 %5648  ;;  %v3894_v52 = vmul.f32 %v8473_v32, %v15441_v49  ;;  %v4993_v39 = vadd.f32 %v4929_v11, %v4775_v12  ;;  %v15453_v35 = vld [vmem:[#allocation190_spill] sm:$0xff] }
 0x943   :  { %v6237_v25 = vadd.f32 1.0, %v8135_v22  ;;  %v13774_v13 = vpop.permute.xlu0 %5249  ;;  %v5807_v42 = vadd.f32 %v5649_v4, %v5398_v63  ;;  %v4370_v1 = vadd.f32 %v15453_v35, %v3961_v33  ;;  %v4374_v20 = vadd.f32 %v15454_v15, %v3965_v26  ;;  %v15455_v12 = vld [vmem:[#allocation78_spill] sm:$0xff]  ;;  %v15457_v33 = vld [vmem:[#allocation243_spill] sm:$0xff]  ;;  %v8475_v35 = vld [vmem:[#allocation3 + $0x1e8] sm:$0xff] }
 0x944   :  { %v13778_v17 = vadd.f32 %v12933_v50, %v5906_v19  ;;  %v4933_v22 = vmul.f32 %v8474_v43, %v15323_v58  ;;  %v5402_v44 = vadd.f32 %v13701_v55, %v4993_v39  ;;  %v15456_v63 = vpack.i.bf16 %v13232_v62, %v15455_v12  ;;  %v8476_v43 = vld [vmem:[#allocation3 + $0x1b0] sm:$0xff] }
 0x945   :  { %v8137_v54 = vpop.eup %8136  ;;  %8146 = vrcp.f32 %v6237_v25  ;;  %v5895_v11 = vmul.f32 %v12895_v51, %v5807_v42  ;;  %v4779_v4 = vadd.f32 %v15457_v33, %v4370_v1  ;;  %v4937_v15 = vmul.f32 %v8475_v35, %v15323_v58 }
 0x946   :  { %v8139_v57 = vpop.eup %8138  ;;  %8148 = vpow2.f32 %v7704_v59  ;;  %v7708_v32 = vmul.f32 -1.442695, %v13778_v17  ;;  %7850 = vxpose.xlu0.b32.start [1/4] (short) (narrow) %v15456_v63, 8  ;;  %v13791_v26 = vmul.f32 %v8137_v54, %v13651_v38  ;;  %v13794_v59 = vpop.permute.xlu1 %5257  ;;  %v3898_v1 = vmul.f32 %v8476_v43, %v15441_v49  ;;  %v8477_v38 = vld [vmem:[#allocation3 + $0x1d0] sm:$0xff] }
 0x947   :  { %v8141_v19 = vpop.eup %8140  ;;  %v6238_v25 = vadd.f32 1.0, %v8139_v57  ;;  %v5657_v55 = vpop.permute.xlu0 %5656  ;;  %v13800_v62 = vadd.f32 %v12967_v16, %v5895_v11  ;;  %v3902_v54 = vmul.f32 %v8477_v38, %v15441_v49  ;;  %v15458_v57 = vld [vmem:[#allocation247_spill] sm:$0xff]  ;;  %v4997_v63 = vadd.f32 %v4933_v22, %v4779_v4 }
 0x948   :  { %v13797_v39 = vmul.f32 %v8141_v19, %v13667_v5  ;;  %8150 = vpow2.f32 %v7708_v32  ;;  %v5811_v42 = vadd.f32 %v5657_v55, %v5402_v44  ;;  %v4783_v12 = vadd.f32 %v15458_v57, %v4374_v20  ;;  %v15460_v11 = vld [vmem:[#allocation187_spill] sm:$0xff]  ;;  %v8478_v20 = vld [vmem:[#allocation3 + $0x190] sm:$0xff] }
 0x949   :  { %8152 = vrcp.f32 %v6238_v25  ;;  %v7697_v35 = vmul.f32 -1.442695, %v13800_v62  ;;  %v15459_v32 = vpack.i.bf16 %v13322_v48, %v13319_v28  ;;  %v4363_v19 = vadd.f32 %v15460_v11, %v3954_v6  ;;  %v8479_v38 = vld [vmem:[#allocation3 + $0x178] sm:$0xff]  ;;  %v15462_v6 = vld [vmem:[#allocation58_spill] sm:$0xff]  ;;  %v15463_v11 = vld [vmem:[#allocation240_spill] sm:$0xff] }
 0x94a   :  { %v8143_v33 = vpop.eup %8142  ;;  %v5899_v5 = vmul.f32 %v12895_v51, %v5811_v42  ;;  %v5406_v43 = vadd.f32 %v13719_v8, %v4997_v63  ;;  %v4926_v22 = vmul.f32 %v8478_v20, %v15342_v23  ;;  %v5665_v25 = vpop.permute.xlu1 %5664  ;;  %v15461_v42 = vld [vmem:[#allocation137_spill] sm:$0xff]  ;;  %v5001_v28 = vadd.f32 %v4937_v15, %v4783_v12  ;;  %v7950_v20 = vld [vmem:[%s14613_s7] sm:$0xff]   ;;  %v15464_v44 = vld [vmem:[#allocation6_spill] sm:$0xff] }
 0x94b   :  { %7852 = vxpose.xlu0.b32.cont [2/4] (short) (narrow) %v15459_v32, 8  ;;  %v6242_v55 = vadd.f32 1.0, %v8143_v33  ;;  %v13815_v4 = vpop.permute.xlu0 %5265  ;;  %v13818_v57 = vmul.f32 %v8479_v38, %v15461_v42  ;;  %8154 = vpow2.f32 %v7697_v35  ;;  %v8145_v32 = vpop.eup %8144  ;;  %v3958_v33 = vadd.f32 %v3894_v52, %v15462_v6  ;;  %v15465_v38 = vld [vmem:[#allocation289_spill] sm:$0xff]  ;;  %v15466_v35 = vld [vmem:[#allocation298_spill] sm:$0xff]  ;;  %7796 = vmatprep.subr.bf16.mxu1 %v7950_v20 }
 0x94c   :  { %v13821_v48 = vadd.f32 %v12967_v16, %v5899_v5  ;;  %v4772_v8 = vadd.f32 %v15463_v11, %v4363_v19  ;;  %v5815_v63 = vadd.f32 %v5665_v25, %v5406_v43  ;;  %v3962_v9 = vadd.f32 %v3898_v1, %v15464_v44  ;;  %v15467_v5 = vld [vmem:[#allocation79_spill] sm:$0xff]  ;;  %v8480_v6 = vld [vmem:[#allocation3 + $0x1b0] sm:$0xff]  ;;  %7797 = vmatpush3.bf16.msra.mxu1 %v7950_v20 }
 0x94d   :  { %8156 = vrcp.f32 %v6242_v55  ;;  %v3966_v58 = vadd.f32 %v3902_v54, %v15465_v38  ;;  %v5410_v15 = vadd.f32 %v13736_v34, %v5001_v28  ;;  %v15468_v50 = vpack.i.bf16 %v15466_v35, %v15467_v5  ;;  %v15470_v55 = vld [vmem:[#allocation191_spill] sm:$0xff]  ;;  %v15477_v20 = vld [vmem:[#allocation10_spill] sm:$0xff] }
 0x94e   :  { %v7701_v12 = vmul.f32 -1.442695, %v13821_v48  ;;  %v15469_v52 = vpack.i.bf16 %v13399_v36, %v13396_v41  ;;  %v4367_v43 = vadd.f32 %v15470_v55, %v3958_v33  ;;  %v4990_v25 = vadd.f32 %v4926_v22, %v4772_v8  ;;  %v13841_v44 = vpop.permute.xlu1 %5243  ;;  %v15471_v33 = vld [vmem:[#allocation195_spill] sm:$0xff]  ;;  %v15472_v8 = vld [vmem:[#allocation244_spill] sm:$0xff] }
 0x94f   :  { %7837 = vxpose.xlu1.b32.start [1/4] (short) (narrow) %v15468_v50, 8  ;;  %v8147_v19 = vpop.eup %8146  ;;  %v4930_v1 = vmul.f32 %v8480_v6, %v15342_v23  ;;  %v5903_v54 = vmul.f32 %v12895_v51, %v5815_v63  ;;  %v5673_v34 = vpop.permute.xlu0 %5672  ;;  %v7951_v50 = vld [vmem:[%s14613_s7 + $0x8] sm:$0xff]   ;;  %v13847_v41 = vmul.f32 %v8145_v32, %v13685_v60  ;;  %v4371_v11 = vadd.f32 %v15471_v33, %v3962_v9  ;;  %v15473_v32 = vld [vmem:[#allocation288_spill] sm:$0xff] }
 0x950   :  { %7854 = vxpose.xlu0.b32.cont [3/4] (short) (narrow) %v15469_v52, 8  ;;  %v8149_v28 = vpop.eup %8148  ;;  %v13850_v36 = vmul.f32 %v8147_v19, %v13704_v45  ;;  %8158 = vpow2.f32 %v7701_v12  ;;  %v5819_v22 = vadd.f32 %v5673_v34, %v5410_v15  ;;  %v4776_v63 = vadd.f32 %v15472_v8, %v4367_v43  ;;  %7798 = vmatprep.subr.bf16.mxu1 %v7951_v50  ;;  %v15474_v45 = vld [vmem:[#allocation81_spill] sm:$0xff]  ;;  %v15476_v15 = vld [vmem:[#allocation11_spill] sm:$0xff]  ;;  %v8481_v43 = vld [vmem:[#allocation3 + $0x1d0] sm:$0xff] }
 0x951   :  { %v6246_v38 = vadd.f32 1.0, %v8149_v28  ;;  %v13855_v35 = vadd.f32 %v12967_v16, %v5903_v54  ;;  %v5399_v52 = vadd.f32 %v13750_v53, %v4990_v25  ;;  %v15475_v19 = vpack.i.bf16 %v15473_v32, %v15474_v45  ;;  %v8482_v28 = vld [vmem:[#allocation3 + $0x198] sm:$0xff]  ;;  %7799 = vmatpush3.bf16.msra.mxu1 %v7951_v50 }
 0x952   :  { %v8151_v5 = vpop.eup %8150  ;;  %v5907_v60 = vmul.f32 %v12895_v51, %v5819_v22  ;;  %v15478_v12 = vpack.i.bf16 %v15476_v15, %v15477_v20  ;;  %v7881_v9 = vpack.i.bf16 %v13850_v36, %v13847_v41  ;;  %v4934_v6 = vmul.f32 %v8481_v43, %v15342_v23  ;;  %v5651_v54 = vpop.permute.xlu1 %5650  ;;  %v15479_v45 = vld [vmem:[#allocation199_spill] sm:$0xff]  ;;  %v15480_v15 = vld [vmem:[#allocation248_spill] sm:$0xff] }
 0x953   :  { %7839 = vxpose.xlu1.b32.cont [2/4] (short) (narrow) %v15475_v19, 8  ;;  %8160 = vrcp.f32 %v6246_v38  ;;  %v6250_v55 = vadd.f32 1.0, %v8151_v5  ;;  %v7705_v53 = vmul.f32 -1.442695, %v13855_v35  ;;  %v13869_v25 = vpop.permute.xlu0 %5251  ;;  %v8153_v34 = vpop.eup %8152  ;;  %v3895_v22 = vmul.f32 %v8482_v28, %v15461_v42  ;;  %v8483_v38 = vld [vmem:[#allocation3 + $0x1b8] sm:$0xff]  ;;  %v15516_v36 = vld [vmem:[#allocation200_spill] sm:$0xff] }
 0x954   :  { %7856 = vxpose.xlu0.b32.end [4/4] (short) (narrow) %v15478_v12, 8  ;;  %v4994_v33 = vadd.f32 %v4930_v1, %v4776_v63  ;;  %v13873_v8 = vadd.f32 %v12967_v16, %v5907_v60  ;;  %v5808_v32 = vadd.f32 %v5651_v54, %v5399_v52  ;;  %v3899_v5 = vmul.f32 %v8483_v38, %v15461_v42  ;;  %v15481_v63 = vld [vmem:[#allocation82_spill] sm:$0xff]  ;;  %v15482_v60 = vld [vmem:[#allocation80_spill] sm:$0xff] }
 0x955   :  { %v4375_v19 = vadd.f32 %v15479_v45, %v3966_v58  ;;  %v4780_v20 = vadd.f32 %v15480_v15, %v4371_v11  ;;  %8162 = vrcp.f32 %v6250_v55  ;;  %v8155_v12 = vpop.eup %8154  ;;  %v15483_v52 = vpack.i.bf16 %v15481_v63, %v15482_v60 }
 0x956   :  { %v5403_v43 = vadd.f32 %v13774_v13, %v4994_v33  ;;  %8164 = vpow2.f32 %v7705_v53  ;;  %v7709_v28 = vmul.f32 -1.442695, %v13873_v8  ;;  %v5896_v1 = vmul.f32 %v12935_v10, %v5808_v32  ;;  %v8484_v13 = vld [vmem:[#allocation3 + $0x1f0] sm:$0xff]  ;;  %v13891_v38 = vpop.permute.xlu1 %5259 }
 0x957   :  { %7841 = vxpose.xlu1.b32.cont [3/4] (short) (narrow) %v15483_v52, 8  ;;  %v15484_v50 = vpack.i.bf16 %v13552_v30, %v13549_v0  ;;  %v8157_v58 = vpop.eup %8156  ;;  %v13888_v11 = vmul.f32 %v8153_v34, %v13725_v31  ;;  %v6239_v55 = vadd.f32 1.0, %v8155_v12  ;;  %v4998_v54 = vadd.f32 %v4934_v6, %v4780_v20  ;;  %v5659_v33 = vpop.permute.xlu0 %5658  ;;  %v15485_v30 = vld [vmem:[#allocation51_spill] sm:$0xff]  ;;  %v15488_v12 = vld [vmem:[#allocation252_spill] sm:$0xff] }
 0x958   :  { %v4938_v53 = vmul.f32 %v8484_v13, %v15342_v23  ;;  %v13894_v32 = vmul.f32 %v8157_v58, %v13740_v37  ;;  %8166 = vpow2.f32 %v7709_v28  ;;  %v13897_v45 = vadd.f32 %v13054_v61, %v5896_v1  ;;  %v15486_v34 = vld [vmem:[#allocation55_spill] sm:$0xff]  ;;  %v15490_v1 = vld [vmem:[#allocation8_spill] sm:$0xff] }
 0x959   :  { %7863 = vxpose.xlu0.b32.start [1/4] (short) (narrow) %v15484_v50, 8  ;;  %v5812_v0 = vadd.f32 %v5659_v33, %v5403_v43  ;;  %v3955_v31 = vadd.f32 %v13818_v57, %v15485_v30  ;;  %v3959_v15 = vadd.f32 %v3895_v22, %v15486_v34  ;;  %v15487_v6 = vld [vmem:[#allocation59_spill] sm:$0xff]  ;;  %v4784_v63 = vadd.f32 %v15488_v12, %v4375_v19  ;;  %v15489_v50 = vld [vmem:[#allocation9_spill] sm:$0xff]  ;;  %v15493_v34 = vld [vmem:[#allocation184_spill] sm:$0xff] }
 0x95a   :  { %v3963_v20 = vadd.f32 %v3899_v5, %v15487_v6  ;;  %v8159_v60 = vpop.eup %8158  ;;  %v5407_v52 = vadd.f32 %v13794_v59, %v4998_v54  ;;  %v7698_v37 = vmul.f32 -1.442695, %v13897_v45  ;;  %v15491_v58 = vpack.i.bf16 %v15489_v50, %v15490_v1  ;;  %v8485_v5 = vld [vmem:[#allocation3 + $0x1d8] sm:$0xff]  ;;  %v8486_v43 = vld [vmem:[#allocation3 + $0x1e8] sm:$0xff]  ;;  %v5667_v33 = vpop.permute.xlu1 %5666 }
 0x95b   :  { %v5900_v28 = vmul.f32 %v12935_v10, %v5812_v0  ;;  %v15492_v57 = vpack.i.bf16 %v13645_v21, %v13642_v40  ;;  %v7888_v22 = vpack.i.bf16 %v13894_v32, %v13888_v11  ;;  %v3903_v19 = vmul.f32 %v8485_v5, %v15461_v42  ;;  %v13917_v13 = vpop.permute.xlu0 %5267  ;;  %v8487_v12 = vld [vmem:[#allocation3 + $0x1f8] sm:$0xff]  ;;  %v15511_v32 = vld [vmem:[#allocation4_spill] sm:$0xff] }
 0x95c   :  { %7843 = vxpose.xlu1.b32.end [4/4] (short) (narrow) %v15491_v58, 8  ;;  %v3905_v59 = vmul.f32 %v8486_v43, %v15432_v27  ;;  %8168 = vrcp.f32 %v6239_v55  ;;  %v6243_v54 = vadd.f32 1.0, %v8159_v60  ;;  %v5002_v0 = vadd.f32 %v4938_v53, %v4784_v63  ;;  %v8488_v1 = vld [vmem:[#allocation3 + $0x198] sm:$0xff]  ;;  %v8489_v60 = vld [vmem:[#allocation3 + $0x1e0] sm:$0xff]  ;;  %v15497_v43 = vld [vmem:[#allocation237_spill] sm:$0xff] }
 0x95d   :  { %7865 = vxpose.xlu0.b32.cont [2/4] (short) (narrow) %v15492_v57, 8  ;;  %8170 = vpow2.f32 %v7698_v37  ;;  %v13920_v30 = vadd.f32 %v13054_v61, %v5900_v28  ;;  %v5816_v40 = vadd.f32 %v5667_v33, %v5407_v52  ;;  %v8161_v21 = vpop.eup %8160  ;;  %v4364_v6 = vadd.f32 %v15493_v34, %v3955_v31  ;;  %v15496_v57 = vld [vmem:[#allocation188_spill] sm:$0xff] }
 0x95e   :  { %v13924_v50 = vmul.f32 %v8487_v12, %v15461_v42  ;;  %8172 = vrcp.f32 %v6243_v54  ;;  %v4927_v55 = vmul.f32 %v8488_v1, %v15348_v18  ;;  %v13928_v58 = vmul.f32 %v8489_v60, %v15407_v56  ;;  %v13945_v34 = vpop.permute.xlu1 %5269  ;;  %v8491_v12 = vld [vmem:[#allocation3 + $0x208] sm:$0xff] }
 0x95f   :  { %v5411_v53 = vadd.f32 %v13815_v4, %v5002_v0  ;;  %v7702_v63 = vmul.f32 -1.442695, %v13920_v30  ;;  %v5904_v52 = vmul.f32 %v12935_v10, %v5816_v40  ;;  %v15494_v31 = vpack.i.bf16 %v13599_v3, %v13591_v46  ;;  %v8163_v28 = vpop.eup %8162  ;;  %v8490_v4 = vld [vmem:[#allocation3 + $0x1b8] sm:$0xff]  ;;  %v5675_v40 = vpop.permute.xlu0 %5674 }
 0x960   :  { %v15495_v37 = vpack.i.bf16 %v13722_v47, %v13716_v14  ;;  %v4368_v5 = vadd.f32 %v15496_v57, %v3959_v15  ;;  %v4773_v54 = vadd.f32 %v15497_v43, %v4364_v6  ;;  %v13942_v33 = vmul.f32 %v8161_v21, %v13765_v2  ;;  %v8165_v46 = vpop.eup %8164  ;;  %v15498_v15 = vld [vmem:[#allocation192_spill] sm:$0xff] }
 0x961   :  { %7876 = vxpose.xlu1.b32.start [1/4] (short) (narrow) %v15494_v31, 8  ;;  %v4931_v0 = vmul.f32 %v8490_v4, %v15348_v18  ;;  %v13948_v3 = vmul.f32 %v8163_v28, %v13778_v17  ;;  %8174 = vpow2.f32 %v7702_v63  ;;  %v13951_v14 = vadd.f32 %v13054_v61, %v5904_v52  ;;  %v15499_v31 = vld [vmem:[#allocation241_spill] sm:$0xff] }
 0x962   :  { %7867 = vxpose.xlu0.b32.cont [3/4] (short) (narrow) %v15495_v37, 8  ;;  %v5820_v47 = vadd.f32 %v5675_v40, %v5411_v53  ;;  %v4372_v6 = vadd.f32 %v15498_v15, %v3963_v20  ;;  %v3909_v2 = vmul.f32 %v8491_v12, %v15432_v27  ;;  %v6247_v21 = vadd.f32 1.0, %v8165_v46  ;;  %v8167_v60 = vpop.eup %8166  ;;  %v15500_v28 = vld [vmem:[#allocation13_spill] sm:$0xff]  ;;  %v5653_v40 = vpop.permute.xlu1 %5652  ;;  %v15505_v12 = vld [vmem:[#allocation7_spill] sm:$0xff] }
 0x963   :  { %v4991_v1 = vadd.f32 %v4927_v55, %v4773_v54  ;;  %v4777_v37 = vadd.f32 %v15499_v31, %v4368_v5  ;;  %v7706_v57 = vmul.f32 -1.442695, %v13951_v14  ;;  %v15501_v63 = vld [vmem:[#allocation17_spill] sm:$0xff]  ;;  %v15503_v53 = vpack.i.bf16 %v13797_v39, %v13791_v26  ;;  %v8492_v5 = vld [vmem:[#allocation3 + $0x1d8] sm:$0xff]  ;;  %v13968_v4 = vpop.permute.xlu0 %5277 }
 0x964   :  { %v5908_v17 = vmul.f32 %v12935_v10, %v5820_v47  ;;  %v15502_v43 = vpack.i.bf16 %v15500_v28, %v15501_v63  ;;  %v7901_v20 = vpack.i.bf16 %v13948_v3, %v13942_v33  ;;  %8176 = vrcp.f32 %v6247_v21  ;;  %v15504_v46 = vld [vmem:[#allocation5_spill] sm:$0xff]  ;;  %v15507_v28 = vld [vmem:[#allocation196_spill] sm:$0xff] }
 0x965   :  { %v6251_v55 = vadd.f32 1.0, %v8167_v60  ;;  %v5400_v52 = vadd.f32 %v13841_v44, %v4991_v1  ;;  %v4935_v54 = vmul.f32 %v8492_v5, %v15348_v18  ;;  %v3967_v47 = vadd.f32 %v3903_v19, %v15504_v46  ;;  %v15506_v21 = vld [vmem:[#allocation245_spill] sm:$0xff] }
 0x966   :  { %7878 = vxpose.xlu1.b32.cont [2/4] (short) (narrow) %v15502_v43, 8  ;;  %7869 = vxpose.xlu0.b32.end [4/4] (short) (narrow) %v15503_v53, 8  ;;  %v4995_v15 = vadd.f32 %v4931_v0, %v4777_v37  ;;  %8178 = vpow2.f32 %v7706_v57  ;;  %v13972_v26 = vadd.f32 %v13054_v61, %v5908_v17  ;;  %v8169_v39 = vpop.eup %8168  ;;  %v13975_v31 = vadd.f32 %v3905_v59, %v15505_v12  ;;  %v8493_v43 = vld [vmem:[#allocation3 + $0x200] sm:$0xff]  ;;  %v8494_v17 = vld [vmem:[#allocation3 + $0x1f8] sm:$0xff]  ;;  %v15520_v3 = vld [vmem:[#allocation285_spill] sm:$0xff] }
 0x967   :  { %v4781_v60 = vadd.f32 %v15506_v21, %v4372_v6  ;;  %8180 = vrcp.f32 %v6251_v55  ;;  %v5809_v44 = vadd.f32 %v5653_v40, %v5400_v52  ;;  %v8171_v1 = vpop.eup %8170  ;;  %v4376_v63 = vadd.f32 %v15507_v28, %v3967_v47  ;;  %v15509_v52 = vld [vmem:[#allocation287_spill] sm:$0xff]  ;;  %v5661_v40 = vpop.permute.xlu0 %5660  ;;  %v15510_v47 = vld [vmem:[#allocation64_spill] sm:$0xff] }
 0x968   :  { %v3908_v53 = vmul.f32 %v8493_v43, %v15407_v56  ;;  %v5404_v19 = vadd.f32 %v13869_v25, %v4995_v15  ;;  %v7710_v0 = vmul.f32 -1.442695, %v13972_v26  ;;  %v15508_v37 = vpack.i.bf16 %v13756_v24, %v13753_v7  ;;  %v8173_v59 = vpop.eup %8172  ;;  %v13990_v25 = vpop.permute.xlu1 %5285  ;;  %v15513_v12 = vld [vmem:[#allocation76_spill] sm:$0xff] }
 0x969   :  { %v6240_v6 = vadd.f32 1.0, %v8171_v1  ;;  %v4999_v57 = vadd.f32 %v4935_v54, %v4781_v60  ;;  %v4939_v55 = vmul.f32 %v8494_v17, %v15348_v18  ;;  %v5897_v5 = vmul.f32 %v15509_v52, %v5809_v44  ;;  %v15512_v54 = vld [vmem:[#allocation65_spill] sm:$0xff]  ;;  %v15515_v1 = vld [vmem:[#allocation291_spill] sm:$0xff]  ;;  %v15518_v17 = vld [vmem:[#allocation270_spill] sm:$0xff] }
 0x96a   :  { %7880 = vxpose.xlu1.b32.cont [3/4] (short) (narrow) %v15508_v37, 8  ;;  %7889 = vxpose.xlu0.b32.start [1/4] (short) (narrow) %v7888_v22, 8  ;;  %v6431_v46 = vmul.f32 %v8169_v39, %v13800_v62  ;;  %v6435_v7 = vmul.f32 %v8173_v59, %v13821_v48  ;;  %8182 = vpow2.f32 %v7710_v0  ;;  %v5813_v24 = vadd.f32 %v5661_v40, %v5404_v19  ;;  %v15514_v44 = vld [vmem:[#allocation249_spill] sm:$0xff]  ;;  %v8495_v0 = vld [vmem:[#allocation3 + $0x220] sm:$0xff] }
 0x96b   :  { %v13996_v11 = vadd.f32 %v13924_v50, %v15510_v47  ;;  %v3968_v22 = vadd.f32 %v13928_v58, %v15511_v32  ;;  %v14001_v15 = vadd.f32 %v3909_v2, %v15512_v54  ;;  %v14004_v21 = vadd.f32 %v15513_v12, %v5897_v5  ;;  %v8175_v60 = vpop.eup %8174  ;;  %v14014_v43 = vpop.permute.xlu0 %5293  ;;  %v15519_v47 = vld [vmem:[#allocation253_spill] sm:$0xff] }
 0x96c   :  { %v4785_v62 = vadd.f32 %v15514_v44, %v4376_v63  ;;  %v5408_v48 = vadd.f32 %v13891_v38, %v4999_v57  ;;  %v5901_v39 = vmul.f32 %v15509_v52, %v5813_v24  ;;  %v7890_v50 = vpack.i.bf16 %v6435_v7, %v6431_v46  ;;  %v5669_v19 = vpop.permute.xlu1 %5668  ;;  %v8496_v57 = vld [vmem:[#allocation3 + $0x200] sm:$0xff] }
 0x96d   :  { %v3972_v58 = vadd.f32 %v3908_v53, %v15515_v1  ;;  %8184 = vrcp.f32 %v6240_v6  ;;  %v6244_v2 = vadd.f32 1.0, %v8175_v60  ;;  %v7699_v28 = vmul.f32 -1.442695, %v14004_v21  ;;  %v15517_v53 = vld [vmem:[#allocation204_spill] sm:$0xff] }
 0x96e   :  { %7882 = vxpose.xlu1.b32.end [4/4] (short) (narrow) %v7881_v9, 8  ;;  %v3912_v63 = vmul.f32 %v8495_v0, %v15407_v56  ;;  %v5003_v38 = vadd.f32 %v4939_v55, %v4785_v62  ;;  %v14018_v37 = vadd.f32 %v15513_v12, %v5901_v39  ;;  %v5817_v59 = vadd.f32 %v5669_v19, %v5408_v48  ;;  %v8177_v41 = vpop.eup %8176  ;;  %v8497_v60 = vld [vmem:[#allocation3 + $0x220] sm:$0xff] }
 0x96f   :  { %7891 = vxpose.xlu0.b32.cont [2/4] (short) (narrow) %v7890_v50, 8  ;;  %v4377_v9 = vadd.f32 %v15516_v36, %v3968_v22  ;;  %v4381_v6 = vadd.f32 %v15517_v53, %v3972_v58  ;;  %8186 = vrcp.f32 %v6244_v2  ;;  %v4940_v5 = vmul.f32 %v8496_v57, %v15518_v17  ;;  %v5677_v62 = vpop.permute.xlu0 %5676  ;;  %v8498_v50 = vld [vmem:[#allocation3 + $0x240] sm:$0xff] }
 0x970   :  { %v8179_v40 = vpop.eup %8178  ;;  %v5412_v46 = vadd.f32 %v13917_v13, %v5003_v38  ;;  %8188 = vpow2.f32 %v7699_v28  ;;  %v7703_v55 = vmul.f32 -1.442695, %v14018_v37  ;;  %v5905_v7 = vmul.f32 %v15509_v52, %v5817_v59  ;;  %v14032_v13 = vpop.permute.xlu1 %5271  ;;  %v15522_v38 = vld [vmem:[#allocation208_spill] sm:$0xff] }
 0x971   :  { %v8181_v24 = vpop.eup %8180  ;;  %v4786_v32 = vadd.f32 %v15519_v47, %v4377_v9  ;;  %v6439_v22 = vmul.f32 %v8177_v41, %v13855_v35  ;;  %v6248_v54 = vadd.f32 1.0, %v8179_v40  ;;  %v4944_v44 = vmul.f32 %v8497_v60, %v15518_v17  ;;  %v15521_v35 = vld [vmem:[#allocation257_spill] sm:$0xff]  ;;  %v8499_v9 = vld [vmem:[#allocation3 + $0x240] sm:$0xff] }
 0x972   :  { %7902 = vxpose.xlu1.b32.start [1/4] (short) (narrow) %v7901_v20, 8  ;;  %v6443_v48 = vmul.f32 %v8181_v24, %v13873_v8  ;;  %8190 = vpow2.f32 %v7703_v55  ;;  %v14036_v39 = vadd.f32 %v15513_v12, %v5905_v7  ;;  %v5821_v33 = vadd.f32 %v5677_v62, %v5412_v46  ;;  %v15523_v55 = vld [vmem:[#allocation14_spill] sm:$0xff] }
 0x973   :  { %v3976_v20 = vadd.f32 %v3912_v63, %v15520_v3  ;;  %v3916_v1 = vmul.f32 %v8498_v50, %v15407_v56  ;;  %v4790_v58 = vadd.f32 %v15521_v35, %v4381_v6  ;;  %v5004_v2 = vadd.f32 %v4940_v5, %v4786_v32  ;;  %v14046_v53 = vpop.permute.xlu0 %5279  ;;  %v8500_v6 = vld [vmem:[#allocation3 + $0x1f0] sm:$0xff]  ;;  %v8501_v32 = vld [vmem:[#allocation3 + $0x218] sm:$0xff]  ;;  %v8503_v50 = vld [vmem:[#allocation3 + $0x260] sm:$0xff] }
 0x974   :  { %v8183_v28 = vpop.eup %8182  ;;  %8192 = vrcp.f32 %v6248_v54  ;;  %v7707_v19 = vmul.f32 -1.442695, %v14036_v39  ;;  %v5909_v0 = vmul.f32 %v15509_v52, %v5821_v33  ;;  %v7903_v8 = vpack.i.bf16 %v6443_v48, %v6439_v22  ;;  %v5679_v56 = vpop.permute.xlu1 %5678  ;;  %v8502_v54 = vld [vmem:[#allocation3 + $0x228] sm:$0xff]  ;;  %v15525_v33 = vld [vmem:[#allocation212_spill] sm:$0xff] }
 0x975   :  { %v4385_v59 = vadd.f32 %v15522_v38, %v3976_v20  ;;  %v6252_v41 = vadd.f32 1.0, %v8183_v28  ;;  %v5413_v36 = vadd.f32 %v13945_v34, %v5004_v2  ;;  %v4948_v63 = vmul.f32 %v8499_v9, %v15518_v17  ;;  %v15524_v34 = vld [vmem:[#allocation261_spill] sm:$0xff] }
 0x976   :  { %v14049_v57 = vmul.f32 %v8500_v6, %v15441_v49  ;;  %v5008_v5 = vadd.f32 %v4944_v44, %v4790_v58  ;;  %8194 = vpow2.f32 %v7707_v19  ;;  %v14052_v40 = vadd.f32 %v15513_v12, %v5909_v0  ;;  %7904 = vxpose.xlu1.b32.cont [2/4] (short) (narrow) %v7903_v8, 8  ;;  %v15526_v8 = vld [vmem:[#allocation198_spill] sm:$0xff] }
 0x977   :  { %v8185_v46 = vpop.eup %8184  ;;  %v3980_v7 = vadd.f32 %v3916_v1, %v15523_v55  ;;  %v4794_v24 = vadd.f32 %v15524_v34, %v4385_v59  ;;  %8196 = vrcp.f32 %v6252_v41  ;;  %v5822_v47 = vadd.f32 %v5679_v56, %v5413_v36  ;;  %v5687_v58 = vpop.permute.xlu0 %5686  ;;  %v8504_v59 = vld [vmem:[#allocation3 + $0x210] sm:$0xff]  ;;  %v15528_v56 = vld [vmem:[#allocation265_spill] sm:$0xff] }
 0x978   :  { %v14057_v22 = vmul.f32 %v8501_v32, %v15461_v42  ;;  %v14060_v60 = vmul.f32 %v8502_v54, %v15432_v27  ;;  %v5417_v44 = vadd.f32 %v13968_v4, %v5008_v5  ;;  %v7711_v62 = vmul.f32 -1.442695, %v14052_v40  ;;  %v14067_v2 = vpop.permute.xlu1 %5287  ;;  %v8505_v55 = vld [vmem:[#allocation3 + $0x208] sm:$0xff]  ;;  %v8506_v54 = vld [vmem:[#allocation3 + $0x238] sm:$0xff] }
 0x979   :  { %v8187_v48 = vpop.eup %8186  ;;  %v4389_v3 = vadd.f32 %v15525_v33, %v3980_v7  ;;  %v5012_v20 = vadd.f32 %v4948_v63, %v4794_v24  ;;  %v4952_v1 = vmul.f32 %v8503_v50, %v15518_v17  ;;  %v5910_v35 = vmul.f32 %v12893_v29, %v5822_v47  ;;  %v15527_v17 = vld [vmem:[#allocation292_spill] sm:$0xff]  ;;  %v15530_v33 = vld [vmem:[#allocation203_spill] sm:$0xff] }
 0x97a   :  { %v8189_v28 = vpop.eup %8188  ;;  %v6432_v19 = vmul.f32 %v8185_v46, %v13897_v45  ;;  %v6436_v0 = vmul.f32 %v8187_v48, %v13920_v30  ;;  %8198 = vpow2.f32 %v7711_v62  ;;  %v5826_v4 = vadd.f32 %v5687_v58, %v5417_v44  ;;  %v15529_v7 = vld [vmem:[#allocation268_spill] sm:$0xff] }
 0x97b   :  { %v4378_v38 = vadd.f32 %v15526_v8, %v13975_v31  ;;  %v3910_v41 = vmul.f32 %v8504_v59, %v15441_v49  ;;  %v6241_v36 = vadd.f32 1.0, %v8189_v28  ;;  %v14075_v9 = vadd.f32 %v15527_v17, %v5910_v35  ;;  %v14082_v24 = vpop.permute.xlu0 %5295  ;;  %v15531_v35 = vld [vmem:[#allocation251_spill] sm:$0xff] }
 0x97c   :  { %v8191_v63 = vpop.eup %8190  ;;  %v4798_v6 = vadd.f32 %v15528_v56, %v4389_v3  ;;  %v5421_v5 = vadd.f32 %v13990_v25, %v5012_v20  ;;  %v5914_v45 = vmul.f32 %v12893_v29, %v5826_v4  ;;  %v7892_v30 = vpack.i.bf16 %v6436_v0, %v6432_v19  ;;  %v5695_v47 = vpop.permute.xlu1 %5694  ;;  %v8507_v20 = vld [vmem:[#allocation3 + $0x248] sm:$0xff] }
 0x97d   :  { %8200 = vrcp.f32 %v6241_v36  ;;  %v6245_v46 = vadd.f32 1.0, %v8191_v63  ;;  %v4941_v31 = vmul.f32 %v8505_v55, %v15529_v7  ;;  %v7712_v34 = vmul.f32 -1.442695, %v14075_v9 }
 0x97e   :  { %v8193_v32 = vpop.eup %8192  ;;  %v3915_v44 = vmul.f32 %v8506_v54, %v15461_v42  ;;  %v5016_v62 = vadd.f32 %v4952_v1, %v4798_v6  ;;  %v14086_v25 = vadd.f32 %v15527_v17, %v5914_v45  ;;  %v5830_v48 = vadd.f32 %v5695_v47, %v5421_v5  ;;  %7893 = vxpose.xlu0.b32.cont [3/4] (short) (narrow) %v7892_v30, 8  ;;  %v15532_v5 = vld [vmem:[#allocation290_spill] sm:$0xff] }
 0x97f   :  { %v4382_v3 = vadd.f32 %v15530_v33, %v14001_v15  ;;  %v3917_v50 = vmul.f32 %v8507_v20, %v15432_v27  ;;  %v4787_v58 = vadd.f32 %v15531_v35, %v4378_v38  ;;  %8202 = vrcp.f32 %v6245_v46  ;;  %v8508_v15 = vld [vmem:[#allocation3 + $0x228] sm:$0xff]  ;;  %v5703_v27 = vpop.permute.xlu0 %5702  ;;  %v15533_v30 = vld [vmem:[#allocation66_spill] sm:$0xff]  ;;  %v15534_v46 = vld [vmem:[#allocation67_spill] sm:$0xff] }
 0x980   :  { %v8195_v28 = vpop.eup %8194  ;;  %v5425_v19 = vadd.f32 %v14014_v43, %v5016_v62  ;;  %8204 = vpow2.f32 %v7712_v34  ;;  %v7716_v1 = vmul.f32 -1.442695, %v14086_v25  ;;  %v5918_v0 = vmul.f32 %v12893_v29, %v5830_v48  ;;  %v14097_v56 = vpop.permute.xlu1 %5273  ;;  %v15536_v48 = vld [vmem:[#allocation293_spill] sm:$0xff] }
 0x981   :  { %v8197_v4 = vpop.eup %8196  ;;  %v6440_v8 = vmul.f32 %v8193_v32, %v13951_v14  ;;  %v6249_v59 = vadd.f32 1.0, %v8195_v28  ;;  %v5005_v36 = vadd.f32 %v4941_v31, %v4787_v58  ;;  %v4945_v63 = vmul.f32 %v8508_v15, %v15529_v7  ;;  %v15535_v31 = vld [vmem:[#allocation256_spill] sm:$0xff]  ;;  %v15538_v28 = vld [vmem:[#allocation207_spill] sm:$0xff] }
 0x982   :  { %v6444_v38 = vmul.f32 %v8197_v4, %v13972_v26  ;;  %8206 = vpow2.f32 %v7716_v1  ;;  %v14101_v43 = vadd.f32 %v15527_v17, %v5918_v0  ;;  %v5834_v6 = vadd.f32 %v5703_v27, %v5425_v19  ;;  %v8510_v4 = vld [vmem:[#allocation3 + $0x230] sm:$0xff] }
 0x983   :  { %v3970_v45 = vadd.f32 %v14049_v57, %v15532_v5  ;;  %v14107_v14 = vadd.f32 %v14057_v22, %v15533_v30  ;;  %v3977_v55 = vadd.f32 %v14060_v60, %v15534_v46  ;;  %v4791_v34 = vadd.f32 %v15535_v31, %v4382_v3  ;;  %v15537_v57 = vld [vmem:[#allocation69_spill] sm:$0xff]  ;;  %v14121_v35 = vpop.permute.xlu0 %5281 }
 0x984   :  { %v8199_v47 = vpop.eup %8198  ;;  %v5414_v26 = vadd.f32 %v14032_v13, %v5005_v36  ;;  %v7720_v32 = vmul.f32 -1.442695, %v14101_v43  ;;  %v5922_v54 = vmul.f32 %v12893_v29, %v5834_v6  ;;  %v7905_v62 = vpack.i.bf16 %v6444_v38, %v6440_v8  ;;  %v5681_v60 = vpop.permute.xlu1 %5680  ;;  %v15541_v38 = vld [vmem:[#allocation260_spill] sm:$0xff]  ;;  %v8511_v5 = vld [vmem:[#allocation3 + $0x268] sm:$0xff] }
 0x985   :  { %v14116_v33 = vadd.f32 %v3910_v41, %v15536_v48  ;;  %v14119_v20 = vadd.f32 %v3915_v44, %v15537_v57  ;;  %8208 = vrcp.f32 %v6249_v59  ;;  %v6253_v22 = vadd.f32 1.0, %v8199_v47  ;;  %v15539_v41 = vld [vmem:[#allocation68_spill] sm:$0xff]  ;;  %v8509_v44 = vld [vmem:[#allocation3 + $0x248] sm:$0xff] }
 0x986   :  { %v5009_v3 = vadd.f32 %v4945_v63, %v4791_v34  ;;  %8210 = vpow2.f32 %v7720_v32  ;;  %v14124_v13 = vadd.f32 %v15527_v17, %v5922_v54  ;;  %v5823_v58 = vadd.f32 %v5681_v60, %v5414_v26  ;;  %7906 = vxpose.xlu1.b32.cont [3/4] (short) (narrow) %v7905_v62, 8  ;;  %v15540_v63 = vld [vmem:[#allocation211_spill] sm:$0xff]  ;;  %v15542_v26 = vld [vmem:[#allocation202_spill] sm:$0xff] }
 0x987   :  { %v8201_v29 = vpop.eup %8200  ;;  %v4386_v19 = vadd.f32 %v15538_v28, %v3977_v55  ;;  %v3981_v1 = vadd.f32 %v3917_v50, %v15539_v41  ;;  %8212 = vrcp.f32 %v6253_v22  ;;  %v4949_v0 = vmul.f32 %v8509_v44, %v15529_v7  ;;  %v5689_v46 = vpop.permute.xlu0 %5688  ;;  %v8512_v54 = vld [vmem:[#allocation3 + $0x258] sm:$0xff]  ;;  %v8513_v28 = vld [vmem:[#allocation3 + $0x210] sm:$0xff] }
 0x988   :  { %v3914_v8 = vmul.f32 %v8510_v4, %v15441_v49  ;;  %v5418_v59 = vadd.f32 %v14046_v53, %v5009_v3  ;;  %v7724_v36 = vmul.f32 -1.442695, %v14124_v13  ;;  %v5911_v17 = vmul.f32 %v12895_v51, %v5823_v58  ;;  %v14137_v55 = vpop.permute.xlu1 %5289  ;;  %v8514_v41 = vld [vmem:[#allocation3 + $0x250] sm:$0xff] }
 0x989   :  { %v8203_v15 = vpop.eup %8202  ;;  %v4390_v27 = vadd.f32 %v15540_v63, %v3981_v1  ;;  %v4795_v6 = vadd.f32 %v15541_v38, %v4386_v19  ;;  %v6433_v50 = vmul.f32 %v8201_v29, %v14004_v21  ;;  %v4953_v30 = vmul.f32 %v8511_v5, %v15529_v7  ;;  %v15543_v7 = vld [vmem:[#allocation264_spill] sm:$0xff] }
 0x98a   :  { %v8205_v31 = vpop.eup %8204  ;;  %v6437_v53 = vmul.f32 %v8203_v15, %v14018_v37  ;;  %8214 = vpow2.f32 %v7724_v36  ;;  %v14141_v34 = vadd.f32 %v12967_v16, %v5911_v17  ;;  %v5827_v47 = vadd.f32 %v5689_v46, %v5418_v59  ;;  %v15544_v59 = vld [vmem:[#allocation294_spill] sm:$0xff]  ;;  %v15545_v17 = vld [vmem:[#allocation255_spill] sm:$0xff] }
 0x98b   :  { %v4379_v32 = vadd.f32 %v15542_v26, %v3970_v45  ;;  %v3919_v62 = vmul.f32 %v8512_v54, %v15461_v42  ;;  %v6254_v21 = vadd.f32 1.0, %v8205_v31  ;;  %v5013_v48 = vadd.f32 %v4949_v0, %v4795_v6  ;;  %v14150_v19 = vpop.permute.xlu0 %5297  ;;  %v15547_v6 = vld [vmem:[#allocation12_spill] sm:$0xff] }
 0x98c   :  { %v8207_v57 = vpop.eup %8206  ;;  %v4799_v22 = vadd.f32 %v15543_v7, %v4390_v27  ;;  %v7713_v60 = vmul.f32 -1.442695, %v14141_v34  ;;  %v5915_v3 = vmul.f32 %v12895_v51, %v5827_v47  ;;  %v7894_v37 = vpack.i.bf16 %v6437_v53, %v6433_v50  ;;  %v5697_v42 = vpop.permute.xlu1 %5696  ;;  %v15546_v27 = vld [vmem:[#allocation206_spill] sm:$0xff]  ;;  %v15550_v7 = vld [vmem:[#allocation259_spill] sm:$0xff] }
 0x98d   :  { %8216 = vrcp.f32 %v6254_v21  ;;  %v6258_v58 = vadd.f32 1.0, %v8207_v57  ;;  %v5422_v29 = vadd.f32 %v14067_v2, %v5013_v48  ;;  %v4942_v45 = vmul.f32 %v8513_v28, %v15342_v23  ;;  %v8515_v53 = vld [vmem:[#allocation3 + $0x230] sm:$0xff]  ;;  %v15549_v48 = vld [vmem:[#allocation15_spill] sm:$0xff] }
 0x98e   :  { %v3918_v1 = vmul.f32 %v8514_v41, %v15441_v49  ;;  %v5017_v44 = vadd.f32 %v4953_v30, %v4799_v22  ;;  %8218 = vpow2.f32 %v7713_v60  ;;  %v14154_v0 = vadd.f32 %v12967_v16, %v5915_v3  ;;  %7895 = vxpose.xlu0.b32.end [4/4] (short) (narrow) %v7894_v37, 8  ;;  %v15552_v28 = vld [vmem:[#allocation210_spill] sm:$0xff] }
 0x98f   :  { %v8209_v4 = vpop.eup %8208  ;;  %v3978_v36 = vadd.f32 %v3914_v8, %v15544_v59  ;;  %v4788_v2 = vadd.f32 %v15545_v17, %v4379_v32  ;;  %8220 = vrcp.f32 %v6258_v58  ;;  %v5831_v15 = vadd.f32 %v5697_v42, %v5422_v29  ;;  %v5705_v26 = vpop.permute.xlu0 %5704 }
 0x990   :  { %v8211_v63 = vpop.eup %8210  ;;  %v4383_v38 = vadd.f32 %v15546_v27, %v14116_v33  ;;  %v3983_v50 = vadd.f32 %v3919_v62, %v15547_v6  ;;  %v5426_v49 = vadd.f32 %v14082_v24, %v5017_v44  ;;  %v7717_v5 = vmul.f32 -1.442695, %v14154_v0  ;;  %v14165_v32 = vpop.permute.xlu1 %5275  ;;  %v15548_v24 = vld [vmem:[#allocation201_spill] sm:$0xff] }
 0x991   :  { %v8213_v30 = vpop.eup %8212  ;;  %v6262_v46 = vadd.f32 1.0, %v8211_v63  ;;  %v5006_v31 = vadd.f32 %v4942_v45, %v4788_v2  ;;  %v4946_v8 = vmul.f32 %v8515_v53, %v15342_v23  ;;  %v5919_v47 = vmul.f32 %v12895_v51, %v5831_v15  ;;  %v15553_v44 = vld [vmem:[#allocation209_spill] sm:$0xff]  ;;  %v15554_v2 = vld [vmem:[#allocation214_spill] sm:$0xff]  ;;  %v15555_v15 = vld [vmem:[#allocation263_spill] sm:$0xff] }
 0x992   :  { %v6441_v54 = vmul.f32 %v8209_v4, %v14036_v39  ;;  %v6445_v33 = vmul.f32 %v8213_v30, %v14052_v40  ;;  %8222 = vpow2.f32 %v7717_v5  ;;  %v5835_v62 = vadd.f32 %v5705_v26, %v5426_v49  ;;  %v15551_v40 = vld [vmem:[#allocation205_spill] sm:$0xff]  ;;  %v8516_v63 = vld [vmem:[#allocation3 + $0x250] sm:$0xff]  ;;  %v8518_v53 = vld [vmem:[#allocation3 + $0x218] sm:$0xff] }
 0x993   :  { %v4380_v21 = vadd.f32 %v15548_v24, %v13996_v11  ;;  %v3982_v57 = vadd.f32 %v3918_v1, %v15549_v48  ;;  %v4792_v22 = vadd.f32 %v15550_v7, %v4383_v38  ;;  %v14174_v60 = vadd.f32 %v12967_v16, %v5919_v47  ;;  %v14182_v41 = vpop.permute.xlu0 %5283  ;;  %v15557_v48 = vld [vmem:[#allocation254_spill] sm:$0xff] }
 0x994   :  { %v8215_v3 = vpop.eup %8214  ;;  %8224 = vrcp.f32 %v6262_v46  ;;  %v5415_v37 = vadd.f32 %v14097_v56, %v5006_v31  ;;  %v5923_v39 = vmul.f32 %v12895_v51, %v5835_v62  ;;  %v7907_v58 = vpack.i.bf16 %v6445_v33, %v6441_v54  ;;  %v5683_v1 = vpop.permute.xlu1 %5682  ;;  %v8517_v46 = vld [vmem:[#allocation3 + $0x270] sm:$0xff]  ;;  %v15556_v62 = vld [vmem:[#allocation213_spill] sm:$0xff] }
 0x995   :  { %v4384_v29 = vadd.f32 %v15551_v40, %v14107_v14  ;;  %v4387_v45 = vadd.f32 %v15552_v28, %v3978_v36  ;;  %v6266_v11 = vadd.f32 1.0, %v8215_v3  ;;  %v7721_v42 = vmul.f32 -1.442695, %v14174_v60 }
 0x996   :  { %v4388_v4 = vadd.f32 %v15553_v44, %v14119_v20  ;;  %v5010_v59 = vadd.f32 %v4946_v8, %v4792_v22  ;;  %v14187_v56 = vadd.f32 %v12967_v16, %v5923_v39  ;;  %v5824_v51 = vadd.f32 %v5683_v1, %v5415_v37  ;;  %7908 = vxpose.xlu1.b32.end [4/4] (short) (narrow) %v7907_v58, 8 }
 0x997   :  { %v8217_v17 = vpop.eup %8216  ;;  %v4391_v14 = vadd.f32 %v15554_v2, %v3982_v57  ;;  %v4796_v36 = vadd.f32 %v15555_v15, %v4387_v45  ;;  %8226 = vrcp.f32 %v6266_v11  ;;  %v4950_v27 = vmul.f32 %v8516_v63, %v15342_v23  ;;  %v5691_v47 = vpop.permute.xlu0 %5690  ;;  %v15558_v57 = vld [vmem:[#allocation267_spill] sm:$0xff] }
 0x998   :  { %v8219_v38 = vpop.eup %8218  ;;  %v5419_v6 = vadd.f32 %v14121_v35, %v5010_v59  ;;  %8228 = vpow2.f32 %v7721_v42  ;;  %v7725_v20 = vmul.f32 -1.442695, %v14187_v56  ;;  %v5912_v16 = vmul.f32 %v12935_v10, %v5824_v51  ;;  %v5292_v26 = vpop.permute.xlu1 %5291  ;;  %v8519_v45 = vld [vmem:[#allocation3 + $0x238] sm:$0xff] }
 0x999   :  { %v8221_v49 = vpop.eup %8220  ;;  %v6446_v5 = vmul.f32 %v8217_v17, %v14075_v9  ;;  %v6255_v30 = vadd.f32 1.0, %v8219_v38  ;;  %v4954_v31 = vmul.f32 %v8517_v46, %v15342_v23  ;;  %v4943_v8 = vmul.f32 %v8518_v53, %v15348_v18  ;;  %v8520_v51 = vld [vmem:[#allocation3 + $0x258] sm:$0xff] }
 0x99a   :  { %v6450_v54 = vmul.f32 %v8221_v49, %v14086_v25  ;;  %8230 = vpow2.f32 %v7725_v20  ;;  %v14200_v35 = vadd.f32 %v13054_v61, %v5912_v16  ;;  %v5828_v33 = vadd.f32 %v5691_v47, %v5419_v6  ;;  %v15559_v25 = vld [vmem:[#allocation258_spill] sm:$0xff]  ;;  %v8521_v17 = vld [vmem:[#allocation3 + $0x278] sm:$0xff] }
 0x99b   :  { %v4392_v24 = vadd.f32 %v15556_v62, %v3983_v50  ;;  %v4789_v9 = vadd.f32 %v15557_v48, %v4380_v21  ;;  %v4800_v7 = vadd.f32 %v15558_v57, %v4391_v14  ;;  %v5014_v22 = vadd.f32 %v4950_v27, %v4796_v36  ;;  %v5300_v11 = vpop.permute.xlu0 %5299  ;;  %v15560_v14 = vld [vmem:[#allocation262_spill] sm:$0xff] }
 0x99c   :  { %v8223_v23 = vpop.eup %8222  ;;  %8232 = vrcp.f32 %v6255_v30  ;;  %v7714_v3 = vmul.f32 -1.442695, %v14200_v35  ;;  %v5916_v37 = vmul.f32 %v12935_v10, %v5828_v33  ;;  %v7914_v39 = vpack.i.bf16 %v6450_v54, %v6446_v5  ;;  %v5699_v21 = vpop.permute.xlu1 %5698  ;;  %v15561_v6 = vld [vmem:[#allocation266_spill] sm:$0xff] }
 0x99d   :  { %v4793_v58 = vadd.f32 %v15559_v25, %v4384_v29  ;;  %v6259_v40 = vadd.f32 1.0, %v8223_v23  ;;  %v5423_v28 = vadd.f32 %v14137_v55, %v5014_v22  ;;  %v4947_v50 = vmul.f32 %v8519_v45, %v15348_v18 }
 0x99e   :  { %v8225_v42 = vpop.eup %8224  ;;  %v5018_v1 = vadd.f32 %v4954_v31, %v4800_v7  ;;  %v5007_v44 = vadd.f32 %v4943_v8, %v4789_v9  ;;  %8234 = vpow2.f32 %v7714_v3  ;;  %v14211_v59 = vadd.f32 %v13054_v61, %v5916_v37  ;;  %7915 = vxpose.xlu0.b32.start [1/4] (short) (narrow) %v7914_v39, 8 }
 0x99f   :  { %8236 = vrcp.f32 %v6259_v40  ;;  %v4951_v29 = vmul.f32 %v8520_v51, %v15348_v18  ;;  %v4955_v55 = vmul.f32 %v8521_v17, %v15348_v18  ;;  %v5832_v2 = vadd.f32 %v5699_v21, %v5423_v28  ;;  %v5707_v30 = vpop.permute.xlu0 %5706 }
 0x9a0   :  { %v4797_v15 = vadd.f32 %v15560_v14, %v4388_v4  ;;  %v5427_v36 = vadd.f32 %v14150_v19, %v5018_v1  ;;  %v5416_v63 = vadd.f32 %v14165_v32, %v5007_v44  ;;  %v7718_v27 = vmul.f32 -1.442695, %v14211_v59  ;;  %v5685_v46 = vpop.permute.xlu1 %5684 }
 0x9a1   :  { %v8227_v38 = vpop.eup %8226  ;;  %v4801_v20 = vadd.f32 %v15561_v6, %v4392_v24  ;;  %v6454_v16 = vmul.f32 %v8225_v42, %v14101_v43  ;;  %v5011_v49 = vadd.f32 %v4947_v50, %v4793_v58  ;;  %v5920_v5 = vmul.f32 %v12935_v10, %v5832_v2 }
 0x9a2   :  { %v8229_v18 = vpop.eup %8228  ;;  %v6458_v31 = vmul.f32 %v8227_v38, %v14124_v13  ;;  %8238 = vpow2.f32 %v7718_v27  ;;  %v5836_v4 = vadd.f32 %v5707_v30, %v5427_v36  ;;  %v5825_v19 = vadd.f32 %v5685_v46, %v5416_v63 }
 0x9a3   :  { %v6263_v53 = vadd.f32 1.0, %v8229_v18  ;;  %v5015_v32 = vadd.f32 %v4951_v29, %v4797_v15  ;;  %v5019_v8 = vadd.f32 %v4955_v55, %v4801_v20  ;;  %v14224_v47 = vadd.f32 %v13054_v61, %v5920_v5  ;;  %v5693_v57 = vpop.permute.xlu0 %5692 }
 0x9a4   :  { %v8231_v54 = vpop.eup %8230  ;;  %v5420_v43 = vadd.f32 %v14182_v41, %v5011_v49  ;;  %v5924_v33 = vmul.f32 %v12935_v10, %v5836_v4  ;;  %v5913_v62 = vmul.f32 %v15509_v52, %v5825_v19  ;;  %v7927_v24 = vpack.i.bf16 %v6458_v31, %v6454_v16  ;;  %v5701_v7 = vpop.permute.xlu1 %5700 }
 0x9a5   :  { %8240 = vrcp.f32 %v6263_v53  ;;  %v6267_v48 = vadd.f32 1.0, %v8231_v54  ;;  %v5424_v13 = vadd.f32 %v5292_v26, %v5015_v32  ;;  %v7722_v9 = vmul.f32 -1.442695, %v14224_v47 }
 0x9a6   :  { %v8233_v22 = vpop.eup %8232  ;;  %v14231_v23 = vadd.f32 %v13054_v61, %v5924_v33  ;;  %v14234_v3 = vadd.f32 %v15513_v12, %v5913_v62  ;;  %v5829_v41 = vadd.f32 %v5693_v57, %v5420_v43  ;;  %7928 = vxpose.xlu1.b32.start [1/4] (short) (narrow) %v7927_v24, 8  ;;  %v5428_v10 = vadd.f32 %v5300_v11, %v5019_v8 }
 0x9a7   :  { %8242 = vrcp.f32 %v6267_v48  ;;  %v5833_v37 = vadd.f32 %v5701_v7, %v5424_v13  ;;  %v6447_v61 = vmul.f32 %v8233_v22, %v14141_v34  ;;  %v5709_v50 = vpop.permute.xlu0 %5708 }
 0x9a8   :  { %v8235_v39 = vpop.eup %8234  ;;  %8244 = vpow2.f32 %v7722_v9  ;;  %v7726_v26 = vmul.f32 -1.442695, %v14231_v23  ;;  %v7715_v25 = vmul.f32 -1.442695, %v14234_v3  ;;  %v5917_v58 = vmul.f32 %v15509_v52, %v5829_v41 }
 0x9a9   :  { %v8237_v40 = vpop.eup %8236  ;;  %v6256_v28 = vadd.f32 1.0, %v8235_v39  ;;  %v5921_v45 = vmul.f32 %v15509_v52, %v5833_v37  ;;  %v5837_v42 = vadd.f32 %v5709_v50, %v5428_v10 }
 0x9aa   :  { %v6451_v21 = vmul.f32 %v8237_v40, %v14154_v0  ;;  %8246 = vpow2.f32 %v7726_v26  ;;  %v6005_v11 = vadd.f32 %v15513_v12, %v5917_v58 }
 0x9ab   :  { %v6009_v1 = vadd.f32 %v15513_v12, %v5921_v45  ;;  %8248 = vpow2.f32 %v7715_v25  ;;  %v5925_v29 = vmul.f32 %v15509_v52, %v5837_v42 }
 0x9ac   :  { %v8239_v44 = vpop.eup %8238  ;;  %v7719_v51 = vmul.f32 -1.442695, %v6005_v11  ;;  %v7916_v17 = vpack.i.bf16 %v6451_v21, %v6447_v61  ;;  %8250 = vrcp.f32 %v6256_v28 }
 0x9ad   :  { %v6260_v34 = vadd.f32 1.0, %v8239_v44  ;;  %v7723_v55 = vmul.f32 -1.442695, %v6009_v1  ;;  %v6013_v2 = vadd.f32 %v15513_v12, %v5925_v29 }
 0x9ae   :  { %8252 = vpow2.f32 %v7719_v51  ;;  %7917 = vxpose.xlu0.b32.cont [2/4] (short) (narrow) %v7916_v17, 8 }
 0x9af   :  { %v8241_v0 = vpop.eup %8240  ;;  %8254 = vrcp.f32 %v6260_v34  ;;  %v7727_v14 = vmul.f32 -1.442695, %v6013_v2 }
 0x9b0   :  { %8256 = vpow2.f32 %v7723_v55  ;;  %v6455_v63 = vmul.f32 %v8241_v0, %v14174_v60 }
 0x9b1   :  { %v8243_v15 = vpop.eup %8242  ;;  %8258 = vpow2.f32 %v7727_v14 }
 0x9b2   :  { %v8245_v36 = vpop.eup %8244  ;;  %v6459_v27 = vmul.f32 %v8243_v15, %v14187_v56 }
 0x9b3   :  { %v6264_v52 = vadd.f32 1.0, %v8245_v36 }
 0x9b4   :  { %v8247_v38 = vpop.eup %8246  ;;  %v7929_v6 = vpack.i.bf16 %v6459_v27, %v6455_v63 }
 0x9b5   :  { %8260 = vrcp.f32 %v6264_v52  ;;  %v6268_v20 = vadd.f32 1.0, %v8247_v38  ;;  %v8249_v16 = vpop.eup %8248  ;;  %v14264_v52 = vld [vmem:[%s14614_s8] ss:$0 sm:$0xff]  ;;  %s8533_s8 = smov 16  }
 0x9b6   :  { %7930 = vxpose.xlu1.b32.cont [2/4] (short) (narrow) %v7929_v6, 8  ;;  %v8251_v12 = vpop.eup %8250  ;;  %v6257_v49 = vadd.f32 1.0, %v8249_v16  ;;  %v14269_v6 = vld [vmem:[%s14615_s9] ss:$0 sm:$0xff] }
 0x9b7   :  { %8262 = vrcp.f32 %v6268_v20  ;;  %v6448_v60 = vmul.f32 %v8251_v12, %v14200_v35 }
 0x9b8   :  { %v8253_v5 = vpop.eup %8252  ;;  %8264 = vrcp.f32 %v6257_v49 }
 0x9b9   :  { %v8255_v30 = vpop.eup %8254  ;;  %v6261_v46 = vadd.f32 1.0, %v8253_v5 }
 0x9ba   :  { %v8257_v18 = vpop.eup %8256  ;;  %v6452_v56 = vmul.f32 %v8255_v30, %v14211_v59 }
 0x9bb   :  { %8266 = vrcp.f32 %v6261_v46  ;;  %v6265_v31 = vadd.f32 1.0, %v8257_v18  ;;  %v8259_v4 = vpop.eup %8258 }
 0x9bc   :  { %v7918_v19 = vpack.i.bf16 %v6452_v56, %v6448_v60  ;;  %v6269_v53 = vadd.f32 1.0, %v8259_v4 }
 0x9bd   :  { %8268 = vrcp.f32 %v6265_v31 }
 0x9be   :  { %7919 = vxpose.xlu0.b32.cont [3/4] (short) (narrow) %v7918_v19, 8  ;;  %8270 = vrcp.f32 %v6269_v53 }
 0x9bf   :  { %v8261_v32 = vpop.eup %8260 }
 0x9c0   :  { %v6456_v54 = vmul.f32 %v8261_v32, %v14224_v47 }
 0x9c1   :  { %v8263_v8 = vpop.eup %8262 }
 0x9c2   :  { %v6460_v43 = vmul.f32 %v8263_v8, %v14231_v23  ;;  %v8265_v33 = vpop.eup %8264 }
 0x9c3   :  { %v6449_v35 = vmul.f32 %v8265_v33, %v14234_v3 }
 0x9c4   :  { %v7931_v62 = vpack.i.bf16 %v6460_v43, %v6456_v54 }
 0x9c5   :  { %v8267_v24 = vpop.eup %8266 }
 0x9c6   :  { %v6453_v59 = vmul.f32 %v8267_v24, %v6005_v11  ;;  %7932 = vxpose.xlu1.b32.cont [3/4] (short) (narrow) %v7931_v62, 8 }
 0x9c7   :  { %v8269_v48 = vpop.eup %8268 }
 0x9c8   :  { %v7920_v13 = vpack.i.bf16 %v6453_v59, %v6449_v35  ;;  %v7857_v9 = vpop.trf.xlu0  ;;  %v8271_v57 = vpop.eup %8270  ;;  %v6457_v7 = vmul.f32 %v8269_v48, %v6009_v1 }
 0x9c9   :  { %v6461_v22 = vmul.f32 %v8271_v57, %v6013_v2  ;;  %v7861_v10 = vunpack.i.h.bf16 %v7857_v9  ;;  %v7858_v47 = vunpack.i.l.bf16 %v7857_v9 }
 0x9ca   :  { %7921 = vxpose.xlu0.b32.end [4/4] (short) (narrow) %v7920_v13, 8 }
 0x9cb   :  { %v7933_v41 = vpack.i.bf16 %v6461_v22, %v6457_v7  ;;  %v6975_v26 = vpack.c.bf16 %v7861_v10, %v7858_v47 }
 0x9cd   :  { %7934 = vxpose.xlu1.b32.end [4/4] (short) (narrow) %v7933_v41, 8 }
 0x9d0   :  { %v7844_v37 = vpop.trf.xlu1 }
 0x9d1   :  { %v7848_v23 = vunpack.i.h.bf16 %v7844_v37  ;;  %v7845_v39 = vunpack.i.l.bf16 %v7844_v37 }
 0x9d3   :  { %v6974_v25 = vpack.c.bf16 %v7848_v23, %v7845_v39 }
 0x9d5   :  { %7800 = vmatprep.mubr.msk.bf16.mxu1 %vm6998_vm3, %v6974_v25 }
 0x9d6   :  { %7801 = vmatmul.mubr.msk.bf16.vlgmr.msra.gmra.mrb[0].mxu1 %vm6998_vm3, %v6975_v26 }
 0x9da   :  { %v7870_v3 = vpop.trf.xlu0 }
 0x9db   :  { %v7874_v58 = vunpack.i.h.bf16 %v7870_v3  ;;  %v7871_v40 = vunpack.i.l.bf16 %v7870_v3 }
 0x9dd   :  { %v6976_v61 = vpack.c.bf16 %v7874_v58, %v7871_v40 }
 0x9df   :  { %7804 = vmatprep.mubr.msk.bf16.mxu1 %vm6998_vm3, %v6976_v61 }
 0x9e2   :  { %v7883_v28 = vpop.trf.xlu1 }
 0x9e3   :  { %v7887_v45 = vunpack.i.h.bf16 %v7883_v28  ;;  %v7884_v50 = vunpack.i.l.bf16 %v7883_v28 }
 0x9e5   :  { %v6977_v21 = vpack.c.bf16 %v7887_v45, %v7884_v50 }
 0x9e7   :  { %7805 = vmatmul.mubr.msk.bf16.gmra.mrb[4].mxu1 %vm6998_vm3, %v6977_v21 }
 0xa02   :  { %v7896_v11 = vpop.trf.xlu0 }
 0xa03   :  { %v7900_v42 = vunpack.i.h.bf16 %v7896_v11  ;;  %v7897_v1 = vunpack.i.l.bf16 %v7896_v11 }
 0xa05   :  { %v6978_v44 = vpack.c.bf16 %v7900_v42, %v7897_v1 }
 0xa07   :  { %7808 = vmatprep.mubr.msk.bf16.mxu1 %vm6998_vm3, %v6978_v44 }
 0xa0a   :  { %v7909_v51 = vpop.trf.xlu1 }
 0xa0b   :  { %v7913_v29 = vunpack.i.h.bf16 %v7909_v51  ;;  %v7910_v17 = vunpack.i.l.bf16 %v7909_v51 }
 0xa0d   :  { %v6979_v34 = vpack.c.bf16 %v7913_v29, %v7910_v17 }
 0xa0f   :  { %7809 = vmatmul.mubr.msk.bf16.gmra.mrb[8].mxu1 %vm6998_vm3, %v6979_v34 }
 0xa3e   :  { %v7922_v55 = vpop.trf.xlu0 }
 0xa3f   :  { %v7926_v2 = vunpack.i.h.bf16 %v7922_v55  ;;  %v7923_v0 = vunpack.i.l.bf16 %v7922_v55 }
 0xa41   :  { %v6980_v14 = vpack.c.bf16 %v7926_v2, %v7923_v0  ;;  %v7935_v15 = vpop.trf.xlu1 }
 0xa42   :  { %v7939_v36 = vunpack.i.h.bf16 %v7935_v15  ;;  %v7936_v63 = vunpack.i.l.bf16 %v7935_v15 }
 0xa43   :  { %7812 = vmatprep.mubr.msk.bf16.mxu1 %vm6998_vm3, %v6980_v14 }
 0xa44   :  { %v6981_v27 = vpack.c.bf16 %v7939_v36, %v7936_v63 }
 0xa46   :  { %7813 = vmatmul.mubr.msk.bf16.gmra.mrb[12].mxu1 %vm6998_vm3, %v6981_v27  ;;  %vm7432_vm3 = vcmask 654852  }
 0xaa9   :  { %v7802_v38 = vpop.f32.mrb[0].mxu1 }
 0xaaa   :  { %v7129_v20 = vmul.f32 %v7802_v38, %v14264_v52  ;;  %v7057_v16 = vpop.f32.mrb[1].mxu1 }
 0xaab   :  { %v7127_v12 = vmul.f32 %v14264_v52, %v7057_v16  ;;  %v7803_v49 = vpop.f32.mrb[2].mxu1 }
 0xaac   :  { %v7152_v5 = vadd.f32 %v14269_v6, %v7129_v20  ;;  %v7130_v30 = vmul.f32 %v7803_v49, %v14264_v52  ;;  %v7060_v46 = vpop.f32.mrb[3].mxu1 }
 0xaad   :  { %v7150_v18 = vadd.f32 %v14269_v6, %v7127_v12  ;;  %v7128_v60 = vmul.f32 %v14264_v52, %v7060_v46 }
 0xaae   :  { %v7742_v56 = vmul.f32 -1.442695, %v7152_v5  ;;  %v7153_v31 = vadd.f32 %v14269_v6, %v7130_v30 }
 0xaaf   :  { %v7740_v4 = vmul.f32 -1.442695, %v7150_v18  ;;  %v7151_v19 = vadd.f32 %v14269_v6, %v7128_v60 }
 0xab0   :  { %8272 = vpow2.f32 %v7742_v56  ;;  %v7743_v53 = vmul.f32 -1.442695, %v7153_v31 }
 0xab1   :  { %8274 = vpow2.f32 %v7740_v4  ;;  %v7741_v32 = vmul.f32 -1.442695, %v7151_v19 }
 0xab2   :  { %8276 = vpow2.f32 %v7743_v53 }
 0xab3   :  { %8278 = vpow2.f32 %v7741_v32 }
 0xaba   :  { %v7806_v8 = vpop.f32.mrb[4].mxu1  ;;  %v8273_v33 = vpop.eup %8272 }
 0xabb   :  { %v7133_v54 = vmul.f32 %v7806_v8, %v14264_v52  ;;  %v7073_v43 = vpop.f32.mrb[5].mxu1  ;;  %v8275_v35 = vpop.eup %8274  ;;  %v7216_v59 = vadd.f32 1.0, %v8273_v33 }
 0xabc   :  { %v7131_v62 = vmul.f32 %v14264_v52, %v7073_v43  ;;  %v7807_v24 = vpop.f32.mrb[6].mxu1  ;;  %v8277_v57 = vpop.eup %8276  ;;  %v7214_v7 = vadd.f32 1.0, %v8275_v35 }
 0xabd   :  { %v7156_v48 = vadd.f32 %v14269_v6, %v7133_v54  ;;  %v7134_v13 = vmul.f32 %v7807_v24, %v14264_v52  ;;  %v7076_v9 = vpop.f32.mrb[7].mxu1  ;;  %v8279_v10 = vpop.eup %8278  ;;  %8280 = vrcp.f32 %v7216_v59  ;;  %v7217_v47 = vadd.f32 1.0, %v8277_v57 }
 0xabe   :  { %v7154_v22 = vadd.f32 %v14269_v6, %v7131_v62  ;;  %v7132_v41 = vmul.f32 %v14264_v52, %v7076_v9  ;;  %8282 = vrcp.f32 %v7214_v7  ;;  %v7215_v39 = vadd.f32 1.0, %v8279_v10 }
 0xabf   :  { %v7746_v37 = vmul.f32 -1.442695, %v7156_v48  ;;  %v7157_v23 = vadd.f32 %v14269_v6, %v7134_v13  ;;  %8284 = vrcp.f32 %v7217_v47 }
 0xac0   :  { %v7744_v26 = vmul.f32 -1.442695, %v7154_v22  ;;  %v7155_v25 = vadd.f32 %v14269_v6, %v7132_v41  ;;  %8286 = vrcp.f32 %v7215_v39 }
 0xac1   :  { %v7747_v3 = vmul.f32 -1.442695, %v7157_v23  ;;  %8288 = vpow2.f32 %v7746_v37 }
 0xac2   :  { %v7745_v58 = vmul.f32 -1.442695, %v7155_v25  ;;  %8290 = vpow2.f32 %v7744_v26 }
 0xac3   :  { %8292 = vpow2.f32 %v7747_v3 }
 0xac4   :  { %8294 = vpow2.f32 %v7745_v58 }
 0xac7   :  { %v8281_v40 = vpop.eup %8280 }
 0xac8   :  { %v14287_v61 = vpop.eup %8282  ;;  %v14289_v50 = vrot.slane %v8281_v40, 6 }
 0xac9   :  { %v8285_v28 = vpop.eup %8284 }
 0xaca   :  { %v8287_v45 = vpop.eup %8286  ;;  %v14291_v11 = vrot.slane %v8285_v28, 5 }
 0xacb   :  { %v8289_v21 = vpop.eup %8288  ;;  %v14293_v42 = vrot.slane %v8287_v45, 7 }
 0xacc   :  { %v8291_v1 = vpop.eup %8290  ;;  %v7220_v44 = vadd.f32 1.0, %v8289_v21  ;;  %v7469_v41 = vsel %vm7279_vm10, %v14291_v11, %v14289_v50 }
 0xacd   :  { %v8293_v51 = vpop.eup %8292  ;;  %v7218_v29 = vadd.f32 1.0, %v8291_v1  ;;  %v7318_v17 = vsel %vm7282_vm4, %v14293_v42, %v14287_v61  ;;  %v7348_v34 = vsel %vm7285_vm5, %v14293_v42, %v14287_v61  ;;  %v7378_v55 = vsel %vm7288_vm6, %v14293_v42, %v14287_v61 }
 0xace   :  { %v8295_v2 = vpop.eup %8294  ;;  %8296 = vrcp.f32 %v7220_v44  ;;  %v7221_v0 = vadd.f32 1.0, %v8293_v51  ;;  %v7319_v14 = vsel %vm7285_vm5, %v14289_v50, %v7318_v17  ;;  %v7349_v15 = vsel %vm7288_vm6, %v14289_v50, %v7348_v34 }
 0xacf   :  { %8298 = vrcp.f32 %v7218_v29  ;;  %v7219_v36 = vadd.f32 1.0, %v8295_v2  ;;  %v7320_v63 = vsel %vm7288_vm6, %v14291_v11, %v7319_v14  ;;  %v7350_v27 = vsel %vm7291_vm7, %v14291_v11, %v7349_v15 }
 0xad0   :  { %8300 = vrcp.f32 %v7221_v0  ;;  %v7379_v38 = vsel %vm7291_vm7, %v14289_v50, %v7378_v55  ;;  %v7408_v16 = vsel %vm7291_vm7, %v14293_v42, %v14287_v61  ;;  %v7438_v46 = vsel %vm7294_vm8, %v14293_v42, %v14287_v61 }
 0xad1   :  { %8302 = vrcp.f32 %v7219_v36  ;;  %v7380_v20 = vsel %vm7294_vm8, %v14291_v11, %v7379_v38  ;;  %v7409_v12 = vsel %vm7294_vm8, %v14289_v50, %v7408_v16  ;;  %v14330_v56 = vsel %vm7297_vm9, %v14289_v50, %v7438_v46 }
 0xad2   :  { %v14323_v49 = vsel %vm7297_vm9, %v14291_v11, %v7409_v12  ;;  %v7498_v37 = vsel %vm7279_vm10, %v14289_v50, %v14293_v42  ;;  %v7280_v23 = vsel %vm7279_vm10, %v14293_v42, %v14287_v61 }
 0xad3   :  { %v7499_v25 = vsel %vm7282_vm4, %v14291_v11, %v7498_v37  ;;  %v7283_v3 = vsel %vm7282_vm4, %v14289_v50, %v7280_v23 }
 0xad4   :  { %v7286_v21 = vsel %vm7285_vm5, %v14291_v11, %v7283_v3 }
 0xad8   :  { %v8297_v5 = vpop.eup %8296 }
 0xad9   :  { %v8299_v30 = vpop.eup %8298  ;;  %v7293_v4 = vrot.slane %v8297_v5, 2 }
 0xada   :  { %v8301_v18 = vpop.eup %8300  ;;  %v7287_v60 = vrot.slane %v8299_v30, 4 }
 0xadb   :  { %v8303_v31 = vpop.eup %8302  ;;  %v7296_v19 = vrot.slane %v8301_v18, 1 }
 0xadc   :  { %v7290_v53 = vrot.slane %v8303_v31, 3  ;;  %v7321_v32 = vsel %vm7291_vm7, %v7287_v60, %v7320_v63  ;;  %v7351_v8 = vsel %vm7294_vm8, %v7287_v60, %v7350_v27  ;;  %v14335_v54 = vsel %vm7297_vm9, %v7287_v60, %v7380_v20 }
 0xadd   :  { %7332 = vrot.lane.b32.xlu1 %v7296_v19, %s8533_s8  ;;  %v14339_v43 = vsel %vm7279_vm10, %v7296_v19, %v7293_v4  ;;  %v7440_v33 = vsel %vm7279_vm10, %v7287_v60, %v14291_v11  ;;  %v7470_v47 = vsel %vm7282_vm4, %v7287_v60, %v7469_v41  ;;  %v7500_v45 = vsel %vm7285_vm5, %v7287_v60, %v7499_v25 }
 0xade   :  { %v7322_v62 = vsel %vm7294_vm8, %v7290_v53, %v7321_v32  ;;  %v14345_v24 = vsel %vm7297_vm9, %v7290_v53, %v7351_v8  ;;  %v7382_v35 = vsel %vm7279_vm10, %v7293_v4, %v7290_v53  ;;  %v7411_v59 = vsel %vm7279_vm10, %v7290_v53, %v7287_v60 }
 0xadf   :  { %v7323_v48 = vsel %vm7297_vm9, %v7293_v4, %v7322_v62  ;;  %v14351_v13 = vsel %vm7282_vm4, %v7296_v19, %v7382_v35  ;;  %v7412_v9 = vsel %vm7282_vm4, %v7293_v4, %v7411_v59  ;;  %v7441_v57 = vsel %vm7282_vm4, %v7290_v53, %v7440_v33 }
 0xae0   :  { %7330 = vrot.lane.b32.xlu0 %v7323_v48, %s8533_s8  ;;  %v14357_v7 = vsel %vm7285_vm5, %v7296_v19, %v7412_v9  ;;  %v7442_v22 = vsel %vm7285_vm5, %v7293_v4, %v7441_v57  ;;  %v7471_v26 = vsel %vm7285_vm5, %v7290_v53, %v7470_v47  ;;  %v7501_v29 = vsel %vm7288_vm6, %v7290_v53, %v7500_v45 }
 0xae1   :  { %v14364_v10 = vsel %vm7288_vm6, %v7296_v19, %v7442_v22  ;;  %v7472_v28 = vsel %vm7288_vm6, %v7293_v4, %v7471_v26  ;;  %v7289_v50 = vsel %vm7288_vm6, %v7287_v60, %v7286_v21  ;;  %v7502_v2 = vsel %vm7291_vm7, %v7293_v4, %v7501_v29 }
 0xae2   :  { %v7810_v39 = vpop.f32.mrb[8].mxu1  ;;  %v14385_v51 = vsel %vm7291_vm7, %v7296_v19, %v7472_v28  ;;  %v14395_v14 = vsel %vm7294_vm8, %v7296_v19, %v7502_v2  ;;  %v7292_v15 = vsel %vm7291_vm7, %v7290_v53, %v7289_v50 }
 0xae3   :  { %v7137_v58 = vmul.f32 %v7810_v39, %v14264_v52  ;;  %v7089_v40 = vpop.f32.mrb[9].mxu1  ;;  %v7295_v27 = vsel %vm7294_vm8, %v7293_v4, %v7292_v15 }
 0xae4   :  { %v7135_v1 = vmul.f32 %v14264_v52, %v7089_v40  ;;  %v7811_v44 = vpop.f32.mrb[10].mxu1  ;;  %v7298_v16 = vsel %vm7297_vm9, %v7296_v19, %v7295_v27 }
 0xae5   :  { %v7160_v17 = vadd.f32 %v14269_v6, %v7137_v58  ;;  %v7138_v34 = vmul.f32 %v7811_v44, %v14264_v52  ;;  %v7092_v55 = vpop.f32.mrb[11].mxu1  ;;  %7316 = vst.msk [vmem:[%s14616_s10] sm:$0xff] %vm7315_vm11, %v7298_v16 }
 0xae6   :  { %v7158_v11 = vadd.f32 %v14269_v6, %v7135_v1  ;;  %v7136_v0 = vmul.f32 %v14264_v52, %v7092_v55 }
 0xae7   :  { %v7750_v36 = vmul.f32 -1.442695, %v7160_v17  ;;  %v7161_v63 = vadd.f32 %v14269_v6, %v7138_v34 }
 0xae8   :  { %v7748_v38 = vmul.f32 -1.442695, %v7158_v11  ;;  %v7159_v20 = vadd.f32 %v14269_v6, %v7136_v0 }
 0xae9   :  { %8304 = vpow2.f32 %v7750_v36  ;;  %v7751_v12 = vmul.f32 -1.442695, %v7161_v63 }
 0xaea   :  { %8306 = vpow2.f32 %v7748_v38  ;;  %v7749_v5 = vmul.f32 -1.442695, %v7159_v20 }
 0xaeb   :  { %8308 = vpow2.f32 %v7751_v12 }
 0xaec   :  { %8310 = vpow2.f32 %v7749_v5 }
 0xaf3   :  { %v8305_v30 = vpop.eup %8304 }
 0xaf4   :  { %v8307_v46 = vpop.eup %8306  ;;  %v7224_v18 = vadd.f32 1.0, %v8305_v30 }
 0xaf5   :  { %v8309_v60 = vpop.eup %8308  ;;  %v7222_v31 = vadd.f32 1.0, %v8307_v46 }
 0xaf6   :  { %v8311_v4 = vpop.eup %8310  ;;  %8312 = vrcp.f32 %v7224_v18  ;;  %v7225_v53 = vadd.f32 1.0, %v8309_v60 }
 0xaf7   :  { %8314 = vrcp.f32 %v7222_v31  ;;  %v7223_v19 = vadd.f32 1.0, %v8311_v4 }
 0xaf8   :  { %8316 = vrcp.f32 %v7225_v53 }
 0xaf9   :  { %8318 = vrcp.f32 %v7223_v19 }
 0xb00   :  { %v8313_v32 = vpop.eup %8312 }
 0xb01   :  { %v14406_v8 = vpop.eup %8314  ;;  %v7301_v33 = vrot.slane %v8313_v32, 6 }
 0xb02   :  { %v8317_v62 = vpop.eup %8316 }
 0xb03   :  { %v8319_v35 = vpop.eup %8318  ;;  %v14408_v59 = vrot.slane %v8317_v62, 5 }
 0xb04   :  { %v7299_v48 = vrot.slane %v8319_v35, 7 }
 0xb05   :  { %v14412_v9 = vsel %vm7279_vm10, %v14408_v59, %v7301_v33 }
 0xb06   :  { %v7324_v57 = vsel %vm7282_vm4, %v7299_v48, %v14406_v8  ;;  %v7354_v22 = vsel %vm7285_vm5, %v7299_v48, %v14406_v8  ;;  %v7384_v41 = vsel %vm7288_vm6, %v7299_v48, %v14406_v8  ;;  %v7414_v47 = vsel %vm7291_vm7, %v7299_v48, %v14406_v8 }
 0xb07   :  { %v7325_v37 = vsel %vm7285_vm5, %v7301_v33, %v7324_v57  ;;  %v7355_v23 = vsel %vm7288_vm6, %v7301_v33, %v7354_v22  ;;  %v7385_v39 = vsel %vm7291_vm7, %v7301_v33, %v7384_v41  ;;  %v7415_v26 = vsel %vm7294_vm8, %v7301_v33, %v7414_v47 }
 0xb08   :  { %v7326_v25 = vsel %vm7288_vm6, %v14408_v59, %v7325_v37  ;;  %v7356_v3 = vsel %vm7291_vm7, %v14408_v59, %v7355_v23  ;;  %v7386_v58 = vsel %vm7294_vm8, %v14408_v59, %v7385_v39  ;;  %v14434_v40 = vsel %vm7297_vm9, %v14408_v59, %v7415_v26 }
 0xb09   :  { %v7444_v28 = vsel %vm7294_vm8, %v7299_v48, %v14406_v8  ;;  %v14440_v45 = vsel %vm7297_vm9, %v7299_v48, %v14406_v8  ;;  %v7504_v21 = vsel %vm7279_vm10, %v7301_v33, %v7299_v48  ;;  %v7300_v1 = vsel %vm7279_vm10, %v7299_v48, %v14406_v8 }
 0xb0a   :  { %v14446_v44 = vsel %vm7297_vm9, %v7301_v33, %v7444_v28  ;;  %v7505_v29 = vsel %vm7282_vm4, %v14408_v59, %v7504_v21  ;;  %v7302_v50 = vsel %vm7282_vm4, %v7301_v33, %v7300_v1 }
 0xb0b   :  { %v14453_v17 = vsel %vm7285_vm5, %v14408_v59, %v7302_v50 }
 0xb19   :  { %v7814_v34 = vpop.f32.mrb[12].mxu1 }
 0xb1a   :  { %v7141_v55 = vmul.f32 %v7814_v34, %v14264_v52  ;;  %v7105_v2 = vpop.f32.mrb[13].mxu1 }
 0xb1b   :  { %v7139_v11 = vmul.f32 %v14264_v52, %v7105_v2  ;;  %v7815_v0 = vpop.f32.mrb[14].mxu1 }
 0xb1c   :  { %v7164_v15 = vadd.f32 %v14269_v6, %v7141_v55  ;;  %v7142_v36 = vmul.f32 %v7815_v0, %v14264_v52  ;;  %v7108_v63 = vpop.f32.mrb[15].mxu1 }
 0xb1d   :  { %v7162_v27 = vadd.f32 %v14269_v6, %v7139_v11  ;;  %v7140_v38 = vmul.f32 %v14264_v52, %v7108_v63 }
 0xb1e   :  { %v7754_v20 = vmul.f32 -1.442695, %v7164_v15  ;;  %v7165_v16 = vadd.f32 %v14269_v6, %v7142_v36 }
 0xb1f   :  { %v7752_v12 = vmul.f32 -1.442695, %v7162_v27  ;;  %v7163_v5 = vadd.f32 %v14269_v6, %v7140_v38 }
 0xb20   :  { %8320 = vpow2.f32 %v7754_v20  ;;  %v7755_v30 = vmul.f32 -1.442695, %v7165_v16 }
 0xb21   :  { %8322 = vpow2.f32 %v7752_v12  ;;  %v7753_v46 = vmul.f32 -1.442695, %v7163_v5 }
 0xb22   :  { %8324 = vpow2.f32 %v7755_v30 }
 0xb23   :  { %8326 = vpow2.f32 %v7753_v46 }
 0xb2a   :  { %v8321_v18 = vpop.eup %8320 }
 0xb2b   :  { %v8323_v60 = vpop.eup %8322  ;;  %v7228_v31 = vadd.f32 1.0, %v8321_v18 }
 0xb2c   :  { %v8325_v4 = vpop.eup %8324  ;;  %v7226_v53 = vadd.f32 1.0, %v8323_v60 }
 0xb2d   :  { %v8327_v19 = vpop.eup %8326  ;;  %8328 = vrcp.f32 %v7228_v31  ;;  %v7229_v52 = vadd.f32 1.0, %v8325_v4 }
 0xb2e   :  { %8330 = vrcp.f32 %v7226_v53  ;;  %v7227_v32 = vadd.f32 1.0, %v8327_v19 }
 0xb2f   :  { %8332 = vrcp.f32 %v7229_v52 }
 0xb30   :  { %8334 = vrcp.f32 %v7227_v32 }
 0xb37   :  { %v8329_v33 = vpop.eup %8328 }
 0xb38   :  { %v8331_v6 = vpop.eup %8330  ;;  %v7309_v57 = vrot.slane %v8329_v33, 2 }
 0xb39   :  { %v8333_v62 = vpop.eup %8332  ;;  %v7305_v35 = vrot.slane %v8331_v6, 4 }
 0xb3a   :  { %v8335_v48 = vpop.eup %8334  ;;  %v7311_v22 = vrot.slane %v8333_v62, 1 }
 0xb3b   :  { %v7307_v41 = vrot.slane %v8335_v48, 3  ;;  %v7327_v47 = vsel %vm7291_vm7, %v7305_v35, %v7326_v25  ;;  %v7357_v37 = vsel %vm7294_vm8, %v7305_v35, %v7356_v3  ;;  %v7387_v23 = vsel %vm7297_vm9, %v7305_v35, %v7386_v58 }
 0xb3c   :  { %7336 = vrot.lane.b32.xlu0 %v7311_v22, %s8533_s8  ;;  %v7359_v39 = vsel %vm7279_vm10, %v7311_v22, %v7309_v57  ;;  %v7446_v26 = vsel %vm7279_vm10, %v7305_v35, %v14408_v59  ;;  %v7476_v28 = vsel %vm7282_vm4, %v7305_v35, %v14412_v9  ;;  %v7506_v21 = vsel %vm7285_vm5, %v7305_v35, %v7505_v29 }
 0xb3d   :  { %v7328_v1 = vsel %vm7294_vm8, %v7307_v41, %v7327_v47  ;;  %v7358_v25 = vsel %vm7297_vm9, %v7307_v41, %v7357_v37  ;;  %v7388_v3 = vsel %vm7279_vm10, %v7309_v57, %v7307_v41  ;;  %v7417_v58 = vsel %vm7279_vm10, %v7307_v41, %v7305_v35 }
 0xb3e   :  { %v7329_v50 = vsel %vm7297_vm9, %v7309_v57, %v7328_v1  ;;  %v7389_v34 = vsel %vm7282_vm4, %v7311_v22, %v7388_v3  ;;  %v7418_v55 = vsel %vm7282_vm4, %v7309_v57, %v7417_v58  ;;  %v7447_v59 = vsel %vm7282_vm4, %v7307_v41, %v7446_v26 }
 0xb3f   :  { %7334 = vrot.lane.b32.xlu1 %v7329_v50, %s8533_s8  ;;  %v7419_v9 = vsel %vm7285_vm5, %v7311_v22, %v7418_v55  ;;  %v7448_v29 = vsel %vm7285_vm5, %v7309_v57, %v7447_v59  ;;  %v7477_v2 = vsel %vm7285_vm5, %v7307_v41, %v7476_v28  ;;  %v7507_v11 = vsel %vm7288_vm6, %v7307_v41, %v7506_v21 }
 0xb40   :  { %7362 = vrot.lane.b32.xlu0 %v14339_v43, %s8534_s24  ;;  %v7449_v0 = vsel %vm7288_vm6, %v7311_v22, %v7448_v29  ;;  %v7478_v15 = vsel %vm7288_vm6, %v7309_v57, %v7477_v2  ;;  %v7508_v36 = vsel %vm7291_vm7, %v7309_v57, %v7507_v11  ;;  %v7306_v63 = vsel %vm7288_vm6, %v7305_v35, %v14453_v17 }
 0xb41   :  { %v7479_v27 = vsel %vm7291_vm7, %v7311_v22, %v7478_v15  ;;  %v7509_v38 = vsel %vm7294_vm8, %v7311_v22, %v7508_v36  ;;  %v7308_v20 = vsel %vm7291_vm7, %v7307_v41, %v7306_v63  ;;  %vm7464_vm4 = vcmask 782976  }
 0xb42   :  { %v7310_v16 = vsel %vm7294_vm8, %v7309_v57, %v7308_v20  ;;  %vm7462_vm5 = vcmask 786053   ;;  %vm7494_vm6 = vcmask 915200   ;;  %vm7492_vm7 = vcmask 917254  }
 0xb43   :  { %7360 = vrot.lane.b32.xlu1 %v14345_v24, %s8534_s24  ;;  %v7312_v43 = vsel %vm7297_vm9, %v7311_v22, %v7310_v16  ;;  %vm7524_vm8 = vcmask 1047424  }
 0xb44   :  { %7366 = vrot.lane.b32.xlu0 %v7359_v39, %s8534_s24  ;;  %7317 = vst.msk [vmem:[%s14616_s10 + $0x8] sm:$0xff] %vm7315_vm11, %v7312_v43 }
 0xb47   :  { %7364 = vrot.lane.b32.xlu1 %v7358_v25, %s8534_s24 }
 0xb48   :  { %7392 = vrot.lane.b32.xlu0 %v14351_v13, %s8535_s4 }
 0xb4b   :  { %7390 = vrot.lane.b32.xlu1 %v14335_v54, %s8535_s4  ;;  %v7468_v54 = vsel %vm7297_vm9, %v14293_v42, %v14287_v61  ;;  %vm7522_vm9 = vcmask 1048455  }
 0xb4c   :  { %7396 = vrot.lane.b32.xlu0 %v7389_v34, %s8535_s4 }
 0xb4f   :  { %v7333_v17 = vpop.permute.xlu1 %7332  ;;  %7394 = vrot.lane.b32.xlu1 %v7387_v23, %s8535_s4 }
 0xb50   :  { %7345 = vst.msk [vmem:[%s14616_s10 + $0x7] sm:$0x1] %vm7344_vm12, %v7333_v17  ;;  %7422 = vrot.lane.b32.xlu0 %v14357_v7, %s8536_s16 }
 0xb52   :  { %v7331_v24 = vpop.permute.xlu0 %7330 }
 0xb53   :  { %7343 = vst.msk [vmem:[%s14616_s10 - $0x1] sm:$0xfe] %vm7342_vm13, %v7331_v24  ;;  %7420 = vrot.lane.b32.xlu1 %v14323_v49, %s8536_s16 }
 0xb54   :  { %7426 = vrot.lane.b32.xlu0 %v7419_v9, %s8536_s16 }
 0xb57   :  { %7424 = vrot.lane.b32.xlu1 %v14434_v40, %s8536_s16 }
 0xb58   :  { %7452 = vrot.lane.b32.xlu0 %v14364_v10, %s8537_s11 }
 0xb5b   :  { %7450 = vrot.lane.b32.xlu1 %v14330_v56, %s8537_s11 }
 0xb5c   :  { %7456 = vrot.lane.b32.xlu0 %v7449_v0, %s8537_s11 }
 0xb5f   :  { %7454 = vrot.lane.b32.xlu1 %v14446_v44, %s8537_s11 }
 0xb60   :  { %7482 = vrot.lane.b32.xlu0 %v14385_v51, %s8538_s12 }
 0xb63   :  { %7480 = vrot.lane.b32.xlu1 %v7468_v54, %s8538_s12 }
 0xb64   :  { %7486 = vrot.lane.b32.xlu0 %v7479_v27, %s8538_s12 }
 0xb67   :  { %7484 = vrot.lane.b32.xlu1 %v14440_v45, %s8538_s12 }
 0xb68   :  { %7512 = vrot.lane.b32.xlu0 %v14395_v14, %s8539_s1 }
 0xb6b   :  { %7510 = vrot.lane.b32.xlu1 %v14287_v61, %s8539_s1 }
 0xb6c   :  { %7516 = vrot.lane.b32.xlu0 %v7509_v38, %s8539_s1 }
 0xb6f   :  { %7514 = vrot.lane.b32.xlu1 %v14406_v8, %s8539_s1 }
 0xbae   :  { %v7337_v49 = vpop.permute.xlu0 %7336 }
 0xbaf   :  { %7347 = vst.msk [vmem:[%s14616_s10 + $0xf] sm:$0x1] %vm7344_vm12, %v7337_v49 }
 0xbb1   :  { %v7335_v42 = vpop.permute.xlu1 %7334 }
 0xbb2   :  { %7346 = vst.msk [vmem:[%s14616_s10 + $0x7] sm:$0xfe] %vm7342_vm13, %v7335_v42  ;;  %v7363_v56 = vpop.permute.xlu0 %7362 }
 0xbb3   :  { %7375 = vst.msk [vmem:[%s14616_s10 + $0x6] sm:$0x3] %vm7374_vm14, %v7363_v56 }
 0xbb5   :  { %v7361_v61 = vpop.permute.xlu1 %7360 }
 0xbb6   :  { %7373 = vst.msk [vmem:[%s14616_s10 - $0x2] sm:$0xfc] %vm7372_vm15, %v7361_v61  ;;  %v7367_v13 = vpop.permute.xlu0 %7366 }
 0xbb7   :  { %7377 = vst.msk [vmem:[%s14616_s10 + $0xe] sm:$0x3] %vm7374_vm14, %v7367_v13 }
 0xbb9   :  { %v7365_v7 = vpop.permute.xlu1 %7364 }
 0xbba   :  { %7376 = vst.msk [vmem:[%s14616_s10 + $0x6] sm:$0xfc] %vm7372_vm15, %v7365_v7  ;;  %v7393_v10 = vpop.permute.xlu0 %7392 }
 0xbbb   :  { %7405 = vst.msk [vmem:[%s14616_s10 + $0x5] sm:$0x7] %vm7404_vm0, %v7393_v10 }
 0xbbd   :  { %v7391_v51 = vpop.permute.xlu1 %7390 }
 0xbbe   :  { %7403 = vst.msk [vmem:[%s14616_s10 - $0x3] sm:$0xf8] %vm7402_vm1, %v7391_v51  ;;  %v7397_v14 = vpop.permute.xlu0 %7396 }
 0xbbf   :  { %7407 = vst.msk [vmem:[%s14616_s10 + $0xd] sm:$0x7] %vm7404_vm0, %v7397_v14 }
 0xbc1   :  { %v7395_v8 = vpop.permute.xlu1 %7394 }
 0xbc2   :  { %7406 = vst.msk [vmem:[%s14616_s10 + $0x5] sm:$0xf8] %vm7402_vm1, %v7395_v8  ;;  %v7423_v40 = vpop.permute.xlu0 %7422 }
 0xbc3   :  { %7435 = vst.msk [vmem:[%s14616_s10 + $0x4] sm:$0xf] %vm7434_vm2, %v7423_v40 }
 0xbc5   :  { %v7421_v45 = vpop.permute.xlu1 %7420 }
 0xbc6   :  { %7433 = vst.msk [vmem:[%s14616_s10 - $0x4] sm:$0xf0] %vm7432_vm3, %v7421_v45  ;;  %v7427_v44 = vpop.permute.xlu0 %7426 }
 0xbc7   :  { %7437 = vst.msk [vmem:[%s14616_s10 + $0xc] sm:$0xf] %vm7434_vm2, %v7427_v44 }
 0xbc9   :  { %v7425_v12 = vpop.permute.xlu1 %7424 }
 0xbca   :  { %7436 = vst.msk [vmem:[%s14616_s10 + $0x4] sm:$0xf0] %vm7432_vm3, %v7425_v12  ;;  %v7453_v5 = vpop.permute.xlu0 %7452 }
 0xbcb   :  { %7465 = vst.msk [vmem:[%s14616_s10 + $0x3] sm:$0x1f] %vm7464_vm4, %v7453_v5 }
 0xbcd   :  { %v7451_v30 = vpop.permute.xlu1 %7450 }
 0xbce   :  { %7463 = vst.msk [vmem:[%s14616_s10 - $0x5] sm:$0xe0] %vm7462_vm5, %v7451_v30  ;;  %v7457_v46 = vpop.permute.xlu0 %7456 }
 0xbcf   :  { %7467 = vst.msk [vmem:[%s14616_s10 + $0xb] sm:$0x1f] %vm7464_vm4, %v7457_v46 }
 0xbd1   :  { %v7455_v18 = vpop.permute.xlu1 %7454 }
 0xbd2   :  { %7466 = vst.msk [vmem:[%s14616_s10 + $0x3] sm:$0xe0] %vm7462_vm5, %v7455_v18  ;;  %v7483_v60 = vpop.permute.xlu0 %7482 }
 0xbd3   :  { %7495 = vst.msk [vmem:[%s14616_s10 + $0x2] sm:$0x3f] %vm7494_vm6, %v7483_v60 }
 0xbd5   :  { %v7481_v31 = vpop.permute.xlu1 %7480 }
 0xbd6   :  { %7493 = vst.msk [vmem:[%s14616_s10 - $0x6] sm:$0xc0] %vm7492_vm7, %v7481_v31  ;;  %v7487_v4 = vpop.permute.xlu0 %7486 }
 0xbd7   :  { %7497 = vst.msk [vmem:[%s14616_s10 + $0xa] sm:$0x3f] %vm7494_vm6, %v7487_v4 }
 0xbd9   :  { %v7485_v53 = vpop.permute.xlu1 %7484 }
 0xbda   :  { %7496 = vst.msk [vmem:[%s14616_s10 + $0x2] sm:$0xc0] %vm7492_vm7, %v7485_v53  ;;  %v7513_v19 = vpop.permute.xlu0 %7512 }
 0xbdb   :  { %7525 = vst.msk [vmem:[%s14616_s10 + $0x1] sm:$0x7f] %vm7524_vm8, %v7513_v19 }
 0xbdd   :  { %v7511_v52 = vpop.permute.xlu1 %7510 }
 0xbde   :  { %7523 = vst.msk [vmem:[%s14616_s10 - $0x7] sm:$0x80] %vm7522_vm9, %v7511_v52  ;;  %v7517_v32 = vpop.permute.xlu0 %7516 }
 0xbdf   :  { %7527 = vst.msk [vmem:[%s14616_s10 + $0x9] sm:$0x7f] %vm7524_vm8, %v7517_v32 }
 0xbe1   :  { %v7515_v33 = vpop.permute.xlu1 %7514 }
 0xbe2   :  { %7526 = vst.msk [vmem:[%s14616_s10 + $0x1] sm:$0x80] %vm7522_vm9, %v7515_v33 }

</bundles_post_ra>
